<compile_context>
chip_gen: v7x
topology: tpu7x:2x2x1
jax: 0.10.0
libtpu: 0.0.40
codegen_flags: <defaults>
</compile_context>

<pallas_src>
import jax
import jax.numpy as jnp
import numpy as np
from jax import lax
from jax.experimental import pallas as pl
from jax.experimental.pallas import tpu as pltpu

EPS = 1e-5          # InstanceNorm3d default eps
NEG_SLOPE = 0.1     # LeakyReLU negative_slope


def _round_up(x, m):
    return (x + m - 1) // m * m


def _largest_divisor_leq(n, cap):
    for r in range(max(1, min(n, cap)), 0, -1):
        if n % r == 0:
            return r
    return 1


def _make_conv_stats_kernel(Cin, Cout, S, W, CHUNK, NC, Dblk):
    """Pass 1: 3x3x3 conv for Dblk depth planes + per-plane per-channel sum/sumsq."""
    K = 3 * Cin
    unroll_chunks = NC <= 8   # static unroll for small plane counts (test path)

    def kernel(b0_ref, b1_ref, w_ref, m_ref, y_ref, s_ref, xs_ref):
        # Stack the Dblk+2 padded depth planes needed by this step, plane-major,
        # so every in-plane tap of every output plane is a single contiguous
        # (3*Cin, CHUNK) slice (9 K=12 matmuls instead of 27 K=4 matmuls).
        for p in range(Dblk):
            xs_ref[p * Cin:(p + 1) * Cin, :] = b0_ref[0, p, :, :]
        for p in range(2):
            xs_ref[(Dblk + p) * Cin:(Dblk + p + 1) * Cin, :] = b1_ref[0, p, :, :]

        w_all = w_ref[...]                      # (9, Cout, 3*Cin) bf16, resident
        valid = m_ref[0:1, :]                   # (1, CHUNK) f32 stats mask
        if W == S:
            # No stored zero column between rows: kill the row-wrapping edge taps.
            ml = m_ref[1:2, :].astype(jnp.bfloat16)
            mr = m_ref[2:3, :].astype(jnp.bfloat16)
        else:
            ml = mr = None

        def do_chunk(b, r0, base, ssum, ssq):
            acc = jnp.zeros((Cout, CHUNK), jnp.float32)     # lives in vregs
            for t in range(9):                              # 9 in-plane taps, static
                kh, kw = t // 3, t % 3
                xt = xs_ref[r0:r0 + K, pl.ds(base + kh * S + kw, CHUNK)]
                if W == S:
                    if kw == 0:
                        xt = xt * ml
                    elif kw == 2:
                        xt = xt * mr
                acc = acc + jnp.dot(w_all[t], xt,
                                    preferred_element_type=jnp.float32)
            accm = acc if W == S else acc * valid
            # stats from the f32 accumulator, y stored as bf16
            y_ref[0, b, :, pl.ds(base, CHUNK)] = acc.astype(jnp.bfloat16)
            return (ssum + jnp.sum(accm, axis=1, keepdims=True),
                    ssq + jnp.sum(accm * acc, axis=1, keepdims=True))

        for b in range(Dblk):                   # output depth planes this step
            r0 = b * Cin
            zero = jnp.zeros((Cout, 1), jnp.float32)
            if unroll_chunks:
                ssum, ssq = zero, zero
                for j in range(NC):
                    ssum, ssq = do_chunk(b, r0, j * CHUNK, ssum, ssq)
            else:
                def body(j, carry):
                    base = pl.multiple_of(j * CHUNK, 128)
                    return do_chunk(b, r0, base, carry[0], carry[1])
                ssum, ssq = lax.fori_loop(0, NC, body, (zero, zero))
            s_ref[0, b, :, 0:1] = ssum
            s_ref[0, b, :, 1:2] = ssq

    return kernel


def _make_norm_act_kernel(W, Dblk2, neg_slope):
    """Pass 2: per-(n,c) FMA (scale/shift already folded) + LeakyReLU, NCDHW out."""

    def kernel(y_ref, a_ref, b_ref, o_ref):
        a = a_ref[0]                            # (Cout, 1, 1) f32
        s = b_ref[0]
        for p in range(Dblk2):
            z = y_ref[0, p].astype(jnp.float32) * a + s     # (Cout, H, S)
            z = jnp.where(z >= 0, z, neg_slope * z)
            o_ref[0, :, p, :, :] = z[:, :, :W].astype(o_ref.dtype)

    return kernel


@jax.jit
def conv_block_forward(x, weight, gamma, beta):
    """x: (N, Cin, D, H, W) float32 (torch NCDHW); weight: (Cout, Cin, 3, 3, 3).
    Returns (N, Cout, D, H, W)."""
    N, Cin, D, H, W = x.shape
    Cout = weight.shape[0]

    S = _round_up(W, 128)                  # lane-dense row stride
    P2 = _round_up((H + 2) * S + 2, 128)   # flattened padded plane (guard + H+2 rows)
    Dblk = 4 if D >= 4 else 2              # output depth planes per pass-1 grid step
    D2 = _round_up(D, Dblk)
    Dq = D2 + Dblk                         # padded depth planes stored (covers b1 block)
    R = _largest_divisor_leq(H, max(1, 1024 // S))
    CHUNK = R * S                          # accumulator tile (lanes), multiple of S
    NC = H // R                            # chunks per plane
    Dblk2 = _largest_divisor_leq(D, 4)     # depth planes per pass-2 grid step

    # ---- host prep: one fused pad/transpose pass over the small (Cin) input ----
    xb = x.astype(jnp.bfloat16)
    xb = jnp.pad(xb, ((0, 0), (0, 0), (0, 0), (0, 0), (0, S - W)))       # width -> S
    xb = jnp.transpose(xb, (0, 2, 1, 3, 4)).reshape(N, D, Cin, H * S)    # plane-major
    xp = jnp.pad(xb, ((0, 0), (1, Dq - 1 - D), (0, 0),
                      (1 + S, P2 - (1 + S) - H * S)))                    # (N,Dq,Cin,P2)

    # weights: (Cout,Cin,kd,kh,kw) -> (9 in-plane taps, Cout, 3*Cin), depth taps
    # folded into the contraction dim (matches the plane-stacked scratch).
    wt = jnp.transpose(weight, (3, 4, 2, 1, 0)).reshape(9, 3 * Cin, Cout)
    w_stk = jnp.transpose(wt, (0, 2, 1)).astype(jnp.bfloat16)            # (9,Cout,3Cin)

    # resident lane masks: row 0 = stats validity (col < W),
    # rows 1/2 = edge-tap masks (only applied when W == S, i.e. no stored pad col).
    col = jnp.arange(CHUNK, dtype=jnp.int32) % S
    masks = jnp.stack([(col < W).astype(jnp.float32),
                       (col != 0).astype(jnp.float32),
                       (col != S - 1).astype(jnp.float32)], axis=0)      # (3, CHUNK)

    # ---- pass 1: conv + per-plane per-channel sum / sumsq ----
    conv_kernel = _make_conv_stats_kernel(Cin, Cout, S, W, CHUNK, NC, Dblk)
    y, s = pl.pallas_call(
        conv_kernel,
        out_shape=(
            jax.ShapeDtypeStruct((N, D2, Cout, H * S), jnp.bfloat16),
            jax.ShapeDtypeStruct((N, D2, Cout, 2), jnp.float32),
        ),
        grid_spec=pltpu.PrefetchScalarGridSpec(
            num_scalar_prefetch=0,
            grid=(N, D2 // Dblk),
            in_specs=[
                pl.BlockSpec((1, Dblk, Cin, P2), lambda n, d: (n, d, 0, 0)),
                pl.BlockSpec((1, Dblk, Cin, P2), lambda n, d: (n, d + 1, 0, 0)),
                pl.BlockSpec((9, Cout, 3 * Cin), lambda n, d: (0, 0, 0)),
                pl.BlockSpec((3, CHUNK), lambda n, d: (0, 0)),
            ],
            out_specs=[
                pl.BlockSpec((1, Dblk, Cout, H * S), lambda n, d: (n, d, 0, 0)),
                pl.BlockSpec((1, Dblk, Cout, 2), lambda n, d: (n, d, 0, 0)),
            ],
            scratch_shapes=[pltpu.VMEM(((Dblk + 2) * Cin, P2), jnp.bfloat16)],
        ),
        compiler_params=pltpu.CompilerParams(
            dimension_semantics=("parallel", "parallel")),
    )(xp, xp, w_stk, masks)

    # ---- tiny host reduction: fold InstanceNorm into one scale/shift per (n,c) ----
    cnt = float(D * H * W)
    ssum = jnp.sum(s[:, :D, :, 0], axis=1)                 # (N, Cout)
    ssq = jnp.sum(s[:, :D, :, 1], axis=1)
    mean = ssum / cnt
    var = jnp.maximum(ssq / cnt - mean * mean, 0.0)        # biased var, f32
    inv = lax.rsqrt(var + EPS)
    scale = gamma.astype(jnp.float32).reshape(1, Cout) * inv
    shift = beta.astype(jnp.float32).reshape(1, Cout) - mean * scale
    scale = scale.reshape(N, Cout, 1, 1)
    shift = shift.reshape(N, Cout, 1, 1)

    # ---- pass 2: normalize + LeakyReLU, written directly as NCDHW ----
    y5 = y.reshape(N, D2, Cout, H, S)                      # metadata-only reshape
    norm_kernel = _make_norm_act_kernel(W, Dblk2, NEG_SLOPE)
    out = pl.pallas_call(
        norm_kernel,
        out_shape=jax.ShapeDtypeStruct((N, Cout, D, H, W), x.dtype),
        grid_spec=pltpu.PrefetchScalarGridSpec(
            num_scalar_prefetch=0,
            grid=(N, D // Dblk2),
            in_specs=[
                pl.BlockSpec((1, Dblk2, Cout, H, S), lambda n, d: (n, d, 0, 0, 0)),
                pl.BlockSpec((1, Cout, 1, 1), lambda n, d: (n, 0, 0, 0)),
                pl.BlockSpec((1, Cout, 1, 1), lambda n, d: (n, 0, 0, 0)),
            ],
            out_specs=pl.BlockSpec((1, Cout, Dblk2, H, W),
                                   lambda n, d: (n, 0, d, 0, 0)),
        ),
        compiler_params=pltpu.CompilerParams(
            dimension_semantics=("parallel", "parallel")),
    )(y5, scale, shift)
    return out


def reference(x, weight, gamma, beta):
    """Pure-JAX f32 reference of the PyTorch forward (NCDHW)."""
    y = lax.conv_general_dilated(
        x, weight, window_strides=(1, 1, 1), padding="SAME",
        dimension_numbers=("NCDHW", "OIDHW", "NCDHW"))
    mean = jnp.mean(y, axis=(2, 3, 4), keepdims=True)
    var = jnp.mean(jnp.square(y - mean), axis=(2, 3, 4), keepdims=True)
    yn = (y - mean) * lax.rsqrt(var + EPS)
    yn = yn * gamma.reshape(1, -1, 1, 1, 1) + beta.reshape(1, -1, 1, 1, 1)
    return jnp.where(yn >= 0, yn, NEG_SLOPE * yn)


if __name__ == "__main__":
    # Small shapes consistent with the module: Conv3d(in=4, out=8, k=3, p=1)
    N, Cin, Cout, D, H, W = 2, 4, 8, 16, 16, 16

    key = jax.random.PRNGKey(0)
    kx, kw_, kg, kb = jax.random.split(key, 4)
    x = jax.random.normal(kx, (N, Cin, D, H, W), dtype=jnp.float32)
    weight = jax.random.normal(kw_, (Cout, Cin, 3, 3, 3), dtype=jnp.float32) * 0.1
    gamma = 1.0 + 0.1 * jax.random.normal(kg, (Cout,), dtype=jnp.float32)
    beta = 0.1 * jax.random.normal(kb, (Cout,), dtype=jnp.float32)

    out = jax.block_until_ready(conv_block_forward(x, weight, gamma, beta))
    ref = jax.block_until_ready(reference(x, weight, gamma, beta))

    # Activations / weights / intermediate y stream as bf16 (f32 accumulation),
    # so compare against the f32 reference with bf16-appropriate tolerance.
    np.testing.assert_allclose(np.asarray(out), np.asarray(ref), rtol=2e-2, atol=4e-2)
    print("KERNEL_OK")
</pallas_src>

<mosaic_0001>
module attributes {stable_mosaic.version = 11 : i64} {
  func.func @kernel(%arg0: i32, %arg1: i32, %arg2: memref<1x4x4x2432xbf16, #tpu.memory_space<vmem>>, %arg3: memref<1x4x4x2432xbf16, #tpu.memory_space<vmem>>, %arg4: memref<9x8x12xbf16, #tpu.memory_space<vmem>>, %arg5: memref<3x1024xf32, #tpu.memory_space<vmem>>, %arg6: memref<1x4x8x2048xbf16, #tpu.memory_space<vmem>>, %arg7: memref<1x4x8x2xf32, #tpu.memory_space<vmem>>, %arg8: memref<24x2432xbf16, #tpu.memory_space<vmem>>) attributes {dimension_semantics = [#tpu.dimension_semantics<parallel>, #tpu.dimension_semantics<parallel>], iteration_bounds = array<i64: 2, 4>, scalar_prefetch = 0 : i64, scratch_operands = 1 : i64, tpu.core_type = #tpu.core_type<tc>, window_params = [{transform_indices = @transform_0, window_bounds = array<i64: 1, 4, 4, 2432>}, {transform_indices = @transform_1, window_bounds = array<i64: 1, 4, 4, 2432>}, {pipeline_mode = #tpu.pipeline_mode<synchronous>, transform_indices = @transform_2, window_bounds = array<i64: 9, 8, 12>}, {pipeline_mode = #tpu.pipeline_mode<synchronous>, transform_indices = @transform_3, window_bounds = array<i64: 3, 1024>}, {transform_indices = @transform_4, window_bounds = array<i64: 1, 4, 8, 2048>}, {transform_indices = @transform_5, window_bounds = array<i64: 1, 4, 8, 2>}]} {
    %c0 = arith.constant 0 : index
    %c0_0 = arith.constant 0 : index
    %c0_1 = arith.constant 0 : index
    %c0_2 = arith.constant 0 : index
    %0 = vector.load %arg2[%c0, %c0_0, %c0_1, %c0_2] : memref<1x4x4x2432xbf16, #tpu.memory_space<vmem>>, vector<1x1x4x2432xbf16>
    %1 = vector.shape_cast %0 : vector<1x1x4x2432xbf16> to vector<4x2432xbf16>
    %c0_3 = arith.constant 0 : index
    %c0_4 = arith.constant 0 : index
    %2 = vector.load %arg8[%c0_3, %c0_4] : memref<24x2432xbf16, #tpu.memory_space<vmem>>, vector<4x2432xbf16>
    tpu.vector_store %arg8[%c0_3, %c0_4], %1 {strides = array<i32>} : memref<24x2432xbf16, #tpu.memory_space<vmem>>, vector<4x2432xbf16>,
    %c0_5 = arith.constant 0 : index
    %c1 = arith.constant 1 : index
    %c0_6 = arith.constant 0 : index
    %c0_7 = arith.constant 0 : index
    %3 = vector.load %arg2[%c0_5, %c1, %c0_6, %c0_7] : memref<1x4x4x2432xbf16, #tpu.memory_space<vmem>>, vector<1x1x4x2432xbf16>
    %4 = vector.shape_cast %3 : vector<1x1x4x2432xbf16> to vector<4x2432xbf16>
    %c4 = arith.constant 4 : index
    %c0_8 = arith.constant 0 : index
    %5 = vector.load %arg8[%c4, %c0_8] : memref<24x2432xbf16, #tpu.memory_space<vmem>>, vector<4x2432xbf16>
    tpu.vector_store %arg8[%c4, %c0_8], %4 {strides = array<i32>} : memref<24x2432xbf16, #tpu.memory_space<vmem>>, vector<4x2432xbf16>,
    %c0_9 = arith.constant 0 : index
    %c2 = arith.constant 2 : index
    %c0_10 = arith.constant 0 : index
    %c0_11 = arith.constant 0 : index
    %6 = vector.load %arg2[%c0_9, %c2, %c0_10, %c0_11] : memref<1x4x4x2432xbf16, #tpu.memory_space<vmem>>, vector<1x1x4x2432xbf16>
    %7 = vector.shape_cast %6 : vector<1x1x4x2432xbf16> to vector<4x2432xbf16>
    %c8 = arith.constant 8 : index
    %c0_12 = arith.constant 0 : index
    %8 = vector.load %arg8[%c8, %c0_12] : memref<24x2432xbf16, #tpu.memory_space<vmem>>, vector<4x2432xbf16>
    tpu.vector_store %arg8[%c8, %c0_12], %7 {strides = array<i32>} : memref<24x2432xbf16, #tpu.memory_space<vmem>>, vector<4x2432xbf16>,
    %c0_13 = arith.constant 0 : index
    %c3 = arith.constant 3 : index
    %c0_14 = arith.constant 0 : index
    %c0_15 = arith.constant 0 : index
    %9 = vector.load %arg2[%c0_13, %c3, %c0_14, %c0_15] : memref<1x4x4x2432xbf16, #tpu.memory_space<vmem>>, vector<1x1x4x2432xbf16>
    %10 = vector.shape_cast %9 : vector<1x1x4x2432xbf16> to vector<4x2432xbf16>
    %c12 = arith.constant 12 : index
    %c0_16 = arith.constant 0 : index
    %11 = vector.load %arg8[%c12, %c0_16] : memref<24x2432xbf16, #tpu.memory_space<vmem>>, vector<4x2432xbf16>
    tpu.vector_store %arg8[%c12, %c0_16], %10 {strides = array<i32>} : memref<24x2432xbf16, #tpu.memory_space<vmem>>, vector<4x2432xbf16>,
    %c0_17 = arith.constant 0 : index
    %c0_18 = arith.constant 0 : index
    %c0_19 = arith.constant 0 : index
    %c0_20 = arith.constant 0 : index
    %12 = vector.load %arg3[%c0_17, %c0_18, %c0_19, %c0_20] : memref<1x4x4x2432xbf16, #tpu.memory_space<vmem>>, vector<1x1x4x2432xbf16>
    %13 = vector.shape_cast %12 : vector<1x1x4x2432xbf16> to vector<4x2432xbf16>
    %c16 = arith.constant 16 : index
    %c0_21 = arith.constant 0 : index
    %14 = vector.load %arg8[%c16, %c0_21] : memref<24x2432xbf16, #tpu.memory_space<vmem>>, vector<4x2432xbf16>
    tpu.vector_store %arg8[%c16, %c0_21], %13 {strides = array<i32>} : memref<24x2432xbf16, #tpu.memory_space<vmem>>, vector<4x2432xbf16>,
    %c0_22 = arith.constant 0 : index
    %c1_23 = arith.constant 1 : index
    %c0_24 = arith.constant 0 : index
    %c0_25 = arith.constant 0 : index
    %15 = vector.load %arg3[%c0_22, %c1_23, %c0_24, %c0_25] : memref<1x4x4x2432xbf16, #tpu.memory_space<vmem>>, vector<1x1x4x2432xbf16>
    %16 = vector.shape_cast %15 : vector<1x1x4x2432xbf16> to vector<4x2432xbf16>
    %c20 = arith.constant 20 : index
    %c0_26 = arith.constant 0 : index
    %17 = vector.load %arg8[%c20, %c0_26] : memref<24x2432xbf16, #tpu.memory_space<vmem>>, vector<4x2432xbf16>
    tpu.vector_store %arg8[%c20, %c0_26], %16 {strides = array<i32>} : memref<24x2432xbf16, #tpu.memory_space<vmem>>, vector<4x2432xbf16>,
    %c0_27 = arith.constant 0 : index
    %c0_28 = arith.constant 0 : index
    %c0_29 = arith.constant 0 : index
    %18 = vector.load %arg4[%c0_27, %c0_28, %c0_29] : memref<9x8x12xbf16, #tpu.memory_space<vmem>>, vector<9x8x12xbf16>
    %c0_30 = arith.constant 0 : index
    %c0_31 = arith.constant 0 : index
    %19 = vector.load %arg5[%c0_30, %c0_31] : memref<3x1024xf32, #tpu.memory_space<vmem>>, vector<1x1024xf32>
    %cst = arith.constant 0.000000e+00 : f32
    %20 = vector.broadcast %cst : f32 to vector<8x1xf32>
    %cst_32 = arith.constant 0.000000e+00 : f32
    %21 = vector.broadcast %cst_32 : f32 to vector<8x1024xf32>
    %c0_33 = arith.constant 0 : index
    %c0_34 = arith.constant 0 : index
    %22 = vector.load %arg8[%c0_33, %c0_34] : memref<24x2432xbf16, #tpu.memory_space<vmem>>, vector<12x1024xbf16>
    %23 = vector.extract_strided_slice %18 {offsets = [0, 0, 0], sizes = [1, 8, 12], strides = [1, 1, 1]} : vector<9x8x12xbf16> to vector<1x8x12xbf16>
    %24 = vector.shape_cast %23 : vector<1x8x12xbf16> to vector<8x12xbf16>
    %cst_35 = arith.constant dense<0.000000e+00> : vector<8x1024xf32>
    %25 = tpu.matmul %24, %22, %cst_35 {dimension_numbers = #tpu.dot_dimension_numbers<[1], [0], [0], [1], [0, 0, 1, 1], [], []>} : vector<8x12xbf16>, vector<12x1024xbf16>, vector<8x1024xf32> -> vector<8x1024xf32>
    %26 = arith.addf %21, %25 : vector<8x1024xf32>
    %c0_36 = arith.constant 0 : index
    %c1_37 = arith.constant 1 : index
    %27 = vector.load %arg8[%c0_36, %c1_37] : memref<24x2432xbf16, #tpu.memory_space<vmem>>, vector<12x1024xbf16>
    %28 = vector.extract_strided_slice %18 {offsets = [1, 0, 0], sizes = [1, 8, 12], strides = [1, 1, 1]} : vector<9x8x12xbf16> to vector<1x8x12xbf16>
    %29 = vector.shape_cast %28 : vector<1x8x12xbf16> to vector<8x12xbf16>
    %cst_38 = arith.constant dense<0.000000e+00> : vector<8x1024xf32>
    %30 = tpu.matmul %29, %27, %cst_38 {dimension_numbers = #tpu.dot_dimension_numbers<[1], [0], [0], [1], [0, 0, 1, 1], [], []>} : vector<8x12xbf16>, vector<12x1024xbf16>, vector<8x1024xf32> -> vector<8x1024xf32>
    %31 = arith.addf %26, %30 : vector<8x1024xf32>
    %c0_39 = arith.constant 0 : index
    %c2_40 = arith.constant 2 : index
    %32 = vector.load %arg8[%c0_39, %c2_40] : memref<24x2432xbf16, #tpu.memory_space<vmem>>, vector<12x1024xbf16>
    %33 = vector.extract_strided_slice %18 {offsets = [2, 0, 0], sizes = [1, 8, 12], strides = [1, 1, 1]} : vector<9x8x12xbf16> to vector<1x8x12xbf16>
    %34 = vector.shape_cast %33 : vector<1x8x12xbf16> to vector<8x12xbf16>
    %cst_41 = arith.constant dense<0.000000e+00> : vector<8x1024xf32>
    %35 = tpu.matmul %34, %32, %cst_41 {dimension_numbers = #tpu.dot_dimension_numbers<[1], [0], [0], [1], [0, 0, 1, 1], [], []>} : vector<8x12xbf16>, vector<12x1024xbf16>, vector<8x1024xf32> -> vector<8x1024xf32>
    %36 = arith.addf %31, %35 : vector<8x1024xf32>
    %c0_42 = arith.constant 0 : index
    %c128 = arith.constant 128 : index
    %37 = vector.load %arg8[%c0_42, %c128] : memref<24x2432xbf16, #tpu.memory_space<vmem>>, vector<12x1024xbf16>
    %38 = vector.extract_strided_slice %18 {offsets = [3, 0, 0], sizes = [1, 8, 12], strides = [1, 1, 1]} : vector<9x8x12xbf16> to vector<1x8x12xbf16>
    %39 = vector.shape_cast %38 : vector<1x8x12xbf16> to vector<8x12xbf16>
    %cst_43 = arith.constant dense<0.000000e+00> : vector<8x1024xf32>
    %40 = tpu.matmul %39, %37, %cst_43 {dimension_numbers = #tpu.dot_dimension_numbers<[1], [0], [0], [1], [0, 0, 1, 1], [], []>} : vector<8x12xbf16>, vector<12x1024xbf16>, vector<8x1024xf32> -> vector<8x1024xf32>
    %41 = arith.addf %36, %40 : vector<8x1024xf32>
    %c0_44 = arith.constant 0 : index
    %c129 = arith.constant 129 : index
    %42 = vector.load %arg8[%c0_44, %c129] : memref<24x2432xbf16, #tpu.memory_space<vmem>>, vector<12x1024xbf16>
    %43 = vector.extract_strided_slice %18 {offsets = [4, 0, 0], sizes = [1, 8, 12], strides = [1, 1, 1]} : vector<9x8x12xbf16> to vector<1x8x12xbf16>
    %44 = vector.shape_cast %43 : vector<1x8x12xbf16> to vector<8x12xbf16>
    %cst_45 = arith.constant dense<0.000000e+00> : vector<8x1024xf32>
    %45 = tpu.matmul %44, %42, %cst_45 {dimension_numbers = #tpu.dot_dimension_numbers<[1], [0], [0], [1], [0, 0, 1, 1], [], []>} : vector<8x12xbf16>, vector<12x1024xbf16>, vector<8x1024xf32> -> vector<8x1024xf32>
    %46 = arith.addf %41, %45 : vector<8x1024xf32>
    %c0_46 = arith.constant 0 : index
    %c130 = arith.constant 130 : index
    %47 = vector.load %arg8[%c0_46, %c130] : memref<24x2432xbf16, #tpu.memory_space<vmem>>, vector<12x1024xbf16>
    %48 = vector.extract_strided_slice %18 {offsets = [5, 0, 0], sizes = [1, 8, 12], strides = [1, 1, 1]} : vector<9x8x12xbf16> to vector<1x8x12xbf16>
    %49 = vector.shape_cast %48 : vector<1x8x12xbf16> to vector<8x12xbf16>
    %cst_47 = arith.constant dense<0.000000e+00> : vector<8x1024xf32>
    %50 = tpu.matmul %49, %47, %cst_47 {dimension_numbers = #tpu.dot_dimension_numbers<[1], [0], [0], [1], [0, 0, 1, 1], [], []>} : vector<8x12xbf16>, vector<12x1024xbf16>, vector<8x1024xf32> -> vector<8x1024xf32>
    %51 = arith.addf %46, %50 : vector<8x1024xf32>
    %c0_48 = arith.constant 0 : index
    %c256 = arith.constant 256 : index
    %52 = vector.load %arg8[%c0_48, %c256] : memref<24x2432xbf16, #tpu.memory_space<vmem>>, vector<12x1024xbf16>
    %53 = vector.extract_strided_slice %18 {offsets = [6, 0, 0], sizes = [1, 8, 12], strides = [1, 1, 1]} : vector<9x8x12xbf16> to vector<1x8x12xbf16>
    %54 = vector.shape_cast %53 : vector<1x8x12xbf16> to vector<8x12xbf16>
    %cst_49 = arith.constant dense<0.000000e+00> : vector<8x1024xf32>
    %55 = tpu.matmul %54, %52, %cst_49 {dimension_numbers = #tpu.dot_dimension_numbers<[1], [0], [0], [1], [0, 0, 1, 1], [], []>} : vector<8x12xbf16>, vector<12x1024xbf16>, vector<8x1024xf32> -> vector<8x1024xf32>
    %56 = arith.addf %51, %55 : vector<8x1024xf32>
    %c0_50 = arith.constant 0 : index
    %c257 = arith.constant 257 : index
    %57 = vector.load %arg8[%c0_50, %c257] : memref<24x2432xbf16, #tpu.memory_space<vmem>>, vector<12x1024xbf16>
    %58 = vector.extract_strided_slice %18 {offsets = [7, 0, 0], sizes = [1, 8, 12], strides = [1, 1, 1]} : vector<9x8x12xbf16> to vector<1x8x12xbf16>
    %59 = vector.shape_cast %58 : vector<1x8x12xbf16> to vector<8x12xbf16>
    %cst_51 = arith.constant dense<0.000000e+00> : vector<8x1024xf32>
    %60 = tpu.matmul %59, %57, %cst_51 {dimension_numbers = #tpu.dot_dimension_numbers<[1], [0], [0], [1], [0, 0, 1, 1], [], []>} : vector<8x12xbf16>, vector<12x1024xbf16>, vector<8x1024xf32> -> vector<8x1024xf32>
    %61 = arith.addf %56, %60 : vector<8x1024xf32>
    %c0_52 = arith.constant 0 : index
    %c258 = arith.constant 258 : index
    %62 = vector.load %arg8[%c0_52, %c258] : memref<24x2432xbf16, #tpu.memory_space<vmem>>, vector<12x1024xbf16>
    %63 = vector.extract_strided_slice %18 {offsets = [8, 0, 0], sizes = [1, 8, 12], strides = [1, 1, 1]} : vector<9x8x12xbf16> to vector<1x8x12xbf16>
    %64 = vector.shape_cast %63 : vector<1x8x12xbf16> to vector<8x12xbf16>
    %cst_53 = arith.constant dense<0.000000e+00> : vector<8x1024xf32>
    %65 = tpu.matmul %64, %62, %cst_53 {dimension_numbers = #tpu.dot_dimension_numbers<[1], [0], [0], [1], [0, 0, 1, 1], [], []>} : vector<8x12xbf16>, vector<12x1024xbf16>, vector<8x1024xf32> -> vector<8x1024xf32>
    %66 = arith.addf %61, %65 : vector<8x1024xf32>
    %67 = vector.broadcast %19 : vector<1x1024xf32> to vector<8x1024xf32>
    %68 = arith.mulf %66, %67 : vector<8x1024xf32>
    %69 = arith.truncf %66 : vector<8x1024xf32> to vector<8x1024xbf16>
    %c0_54 = arith.constant 0 : index
    %c0_55 = arith.constant 0 : index
    %c0_56 = arith.constant 0 : index
    %c0_57 = arith.constant 0 : index
    %70 = vector.load %arg6[%c0_54, %c0_55, %c0_56, %c0_57] : memref<1x4x8x2048xbf16, #tpu.memory_space<vmem>>, vector<1x1x8x1024xbf16>
    %71 = vector.shape_cast %70 : vector<1x1x8x1024xbf16> to vector<8x1024xbf16>
    %72 = vector.shape_cast %69 : vector<8x1024xbf16> to vector<1x1x8x1024xbf16>
    tpu.vector_store %arg6[%c0_54, %c0_55, %c0_56, %c0_57], %72 {strides = array<i32>} : memref<1x4x8x2048xbf16, #tpu.memory_space<vmem>>, vector<1x1x8x1024xbf16>,
    %cst_58 = arith.constant dense<0.000000e+00> : vector<8xf32>
    %73 = vector.multi_reduction <add>, %68, %cst_58 [1] : vector<8x1024xf32> to vector<8xf32>
    %74 = vector.shape_cast %73 : vector<8xf32> to vector<8x1xf32>
    %75 = arith.addf %20, %74 : vector<8x1xf32>
    %76 = arith.mulf %68, %66 : vector<8x1024xf32>
    %cst_59 = arith.constant dense<0.000000e+00> : vector<8xf32>
    %77 = vector.multi_reduction <add>, %76, %cst_59 [1] : vector<8x1024xf32> to vector<8xf32>
    %78 = vector.shape_cast %77 : vector<8xf32> to vector<8x1xf32>
    %79 = arith.addf %20, %78 : vector<8x1xf32>
    %cst_60 = arith.constant 0.000000e+00 : f32
    %80 = vector.broadcast %cst_60 : f32 to vector<8x1024xf32>
    %c0_61 = arith.constant 0 : index
    %c1024 = arith.constant 1024 : index
    %81 = vector.load %arg8[%c0_61, %c1024] : memref<24x2432xbf16, #tpu.memory_space<vmem>>, vector<12x1024xbf16>
    %82 = vector.extract_strided_slice %18 {offsets = [0, 0, 0], sizes = [1, 8, 12], strides = [1, 1, 1]} : vector<9x8x12xbf16> to vector<1x8x12xbf16>
    %83 = vector.shape_cast %82 : vector<1x8x12xbf16> to vector<8x12xbf16>
    %cst_62 = arith.constant dense<0.000000e+00> : vector<8x1024xf32>
    %84 = tpu.matmul %83, %81, %cst_62 {dimension_numbers = #tpu.dot_dimension_numbers<[1], [0], [0], [1], [0, 0, 1, 1], [], []>} : vector<8x12xbf16>, vector<12x1024xbf16>, vector<8x1024xf32> -> vector<8x1024xf32>
    %85 = arith.addf %80, %84 : vector<8x1024xf32>
    %c0_63 = arith.constant 0 : index
    %c1025 = arith.constant 1025 : index
    %86 = vector.load %arg8[%c0_63, %c1025] : memref<24x2432xbf16, #tpu.memory_space<vmem>>, vector<12x1024xbf16>
    %87 = vector.extract_strided_slice %18 {offsets = [1, 0, 0], sizes = [1, 8, 12], strides = [1, 1, 1]} : vector<9x8x12xbf16> to vector<1x8x12xbf16>
    %88 = vector.shape_cast %87 : vector<1x8x12xbf16> to vector<8x12xbf16>
    %cst_64 = arith.constant dense<0.000000e+00> : vector<8x1024xf32>
    %89 = tpu.matmul %88, %86, %cst_64 {dimension_numbers = #tpu.dot_dimension_numbers<[1], [0], [0], [1], [0, 0, 1, 1], [], []>} : vector<8x12xbf16>, vector<12x1024xbf16>, vector<8x1024xf32> -> vector<8x1024xf32>
    %90 = arith.addf %85, %89 : vector<8x1024xf32>
    %c0_65 = arith.constant 0 : index
    %c1026 = arith.constant 1026 : index
    %91 = vector.load %arg8[%c0_65, %c1026] : memref<24x2432xbf16, #tpu.memory_space<vmem>>, vector<12x1024xbf16>
    %92 = vector.extract_strided_slice %18 {offsets = [2, 0, 0], sizes = [1, 8, 12], strides = [1, 1, 1]} : vector<9x8x12xbf16> to vector<1x8x12xbf16>
    %93 = vector.shape_cast %92 : vector<1x8x12xbf16> to vector<8x12xbf16>
    %cst_66 = arith.constant dense<0.000000e+00> : vector<8x1024xf32>
    %94 = tpu.matmul %93, %91, %cst_66 {dimension_numbers = #tpu.dot_dimension_numbers<[1], [0], [0], [1], [0, 0, 1, 1], [], []>} : vector<8x12xbf16>, vector<12x1024xbf16>, vector<8x1024xf32> -> vector<8x1024xf32>
    %95 = arith.addf %90, %94 : vector<8x1024xf32>
    %c0_67 = arith.constant 0 : index
    %c1152 = arith.constant 1152 : index
    %96 = vector.load %arg8[%c0_67, %c1152] : memref<24x2432xbf16, #tpu.memory_space<vmem>>, vector<12x1024xbf16>
    %97 = vector.extract_strided_slice %18 {offsets = [3, 0, 0], sizes = [1, 8, 12], strides = [1, 1, 1]} : vector<9x8x12xbf16> to vector<1x8x12xbf16>
    %98 = vector.shape_cast %97 : vector<1x8x12xbf16> to vector<8x12xbf16>
    %cst_68 = arith.constant dense<0.000000e+00> : vector<8x1024xf32>
    %99 = tpu.matmul %98, %96, %cst_68 {dimension_numbers = #tpu.dot_dimension_numbers<[1], [0], [0], [1], [0, 0, 1, 1], [], []>} : vector<8x12xbf16>, vector<12x1024xbf16>, vector<8x1024xf32> -> vector<8x1024xf32>
    %100 = arith.addf %95, %99 : vector<8x1024xf32>
    %c0_69 = arith.constant 0 : index
    %c1153 = arith.constant 1153 : index
    %101 = vector.load %arg8[%c0_69, %c1153] : memref<24x2432xbf16, #tpu.memory_space<vmem>>, vector<12x1024xbf16>
    %102 = vector.extract_strided_slice %18 {offsets = [4, 0, 0], sizes = [1, 8, 12], strides = [1, 1, 1]} : vector<9x8x12xbf16> to vector<1x8x12xbf16>
    %103 = vector.shape_cast %102 : vector<1x8x12xbf16> to vector<8x12xbf16>
    %cst_70 = arith.constant dense<0.000000e+00> : vector<8x1024xf32>
    %104 = tpu.matmul %103, %101, %cst_70 {dimension_numbers = #tpu.dot_dimension_numbers<[1], [0], [0], [1], [0, 0, 1, 1], [], []>} : vector<8x12xbf16>, vector<12x1024xbf16>, vector<8x1024xf32> -> vector<8x1024xf32>
    %105 = arith.addf %100, %104 : vector<8x1024xf32>
    %c0_71 = arith.constant 0 : index
    %c1154 = arith.constant 1154 : index
    %106 = vector.load %arg8[%c0_71, %c1154] : memref<24x2432xbf16, #tpu.memory_space<vmem>>, vector<12x1024xbf16>
    %107 = vector.extract_strided_slice %18 {offsets = [5, 0, 0], sizes = [1, 8, 12], strides = [1, 1, 1]} : vector<9x8x12xbf16> to vector<1x8x12xbf16>
    %108 = vector.shape_cast %107 : vector<1x8x12xbf16> to vector<8x12xbf16>
    %cst_72 = arith.constant dense<0.000000e+00> : vector<8x1024xf32>
    %109 = tpu.matmul %108, %106, %cst_72 {dimension_numbers = #tpu.dot_dimension_numbers<[1], [0], [0], [1], [0, 0, 1, 1], [], []>} : vector<8x12xbf16>, vector<12x1024xbf16>, vector<8x1024xf32> -> vector<8x1024xf32>
    %110 = arith.addf %105, %109 : vector<8x1024xf32>
    %c0_73 = arith.constant 0 : index
    %c1280 = arith.constant 1280 : index
    %111 = vector.load %arg8[%c0_73, %c1280] : memref<24x2432xbf16, #tpu.memory_space<vmem>>, vector<12x1024xbf16>
    %112 = vector.extract_strided_slice %18 {offsets = [6, 0, 0], sizes = [1, 8, 12], strides = [1, 1, 1]} : vector<9x8x12xbf16> to vector<1x8x12xbf16>
    %113 = vector.shape_cast %112 : vector<1x8x12xbf16> to vector<8x12xbf16>
    %cst_74 = arith.constant dense<0.000000e+00> : vector<8x1024xf32>
    %114 = tpu.matmul %113, %111, %cst_74 {dimension_numbers = #tpu.dot_dimension_numbers<[1], [0], [0], [1], [0, 0, 1, 1], [], []>} : vector<8x12xbf16>, vector<12x1024xbf16>, vector<8x1024xf32> -> vector<8x1024xf32>
    %115 = arith.addf %110, %114 : vector<8x1024xf32>
    %c0_75 = arith.constant 0 : index
    %c1281 = arith.constant 1281 : index
    %116 = vector.load %arg8[%c0_75, %c1281] : memref<24x2432xbf16, #tpu.memory_space<vmem>>, vector<12x1024xbf16>
    %117 = vector.extract_strided_slice %18 {offsets = [7, 0, 0], sizes = [1, 8, 12], strides = [1, 1, 1]} : vector<9x8x12xbf16> to vector<1x8x12xbf16>
    %118 = vector.shape_cast %117 : vector<1x8x12xbf16> to vector<8x12xbf16>
    %cst_76 = arith.constant dense<0.000000e+00> : vector<8x1024xf32>
    %119 = tpu.matmul %118, %116, %cst_76 {dimension_numbers = #tpu.dot_dimension_numbers<[1], [0], [0], [1], [0, 0, 1, 1], [], []>} : vector<8x12xbf16>, vector<12x1024xbf16>, vector<8x1024xf32> -> vector<8x1024xf32>
    %120 = arith.addf %115, %119 : vector<8x1024xf32>
    %c0_77 = arith.constant 0 : index
    %c1282 = arith.constant 1282 : index
    %121 = vector.load %arg8[%c0_77, %c1282] : memref<24x2432xbf16, #tpu.memory_space<vmem>>, vector<12x1024xbf16>
    %122 = vector.extract_strided_slice %18 {offsets = [8, 0, 0], sizes = [1, 8, 12], strides = [1, 1, 1]} : vector<9x8x12xbf16> to vector<1x8x12xbf16>
    %123 = vector.shape_cast %122 : vector<1x8x12xbf16> to vector<8x12xbf16>
    %cst_78 = arith.constant dense<0.000000e+00> : vector<8x1024xf32>
    %124 = tpu.matmul %123, %121, %cst_78 {dimension_numbers = #tpu.dot_dimension_numbers<[1], [0], [0], [1], [0, 0, 1, 1], [], []>} : vector<8x12xbf16>, vector<12x1024xbf16>, vector<8x1024xf32> -> vector<8x1024xf32>
    %125 = arith.addf %120, %124 : vector<8x1024xf32>
    %126 = vector.broadcast %19 : vector<1x1024xf32> to vector<8x1024xf32>
    %127 = arith.mulf %125, %126 : vector<8x1024xf32>
    %128 = arith.truncf %125 : vector<8x1024xf32> to vector<8x1024xbf16>
    %c0_79 = arith.constant 0 : index
    %c0_80 = arith.constant 0 : index
    %c0_81 = arith.constant 0 : index
    %c1024_82 = arith.constant 1024 : index
    %129 = vector.load %arg6[%c0_79, %c0_80, %c0_81, %c1024_82] : memref<1x4x8x2048xbf16, #tpu.memory_space<vmem>>, vector<1x1x8x1024xbf16>
    %130 = vector.shape_cast %129 : vector<1x1x8x1024xbf16> to vector<8x1024xbf16>
    %131 = vector.shape_cast %128 : vector<8x1024xbf16> to vector<1x1x8x1024xbf16>
    tpu.vector_store %arg6[%c0_79, %c0_80, %c0_81, %c1024_82], %131 {strides = array<i32>} : memref<1x4x8x2048xbf16, #tpu.memory_space<vmem>>, vector<1x1x8x1024xbf16>,
    %cst_83 = arith.constant dense<0.000000e+00> : vector<8xf32>
    %132 = vector.multi_reduction <add>, %127, %cst_83 [1] : vector<8x1024xf32> to vector<8xf32>
    %133 = vector.shape_cast %132 : vector<8xf32> to vector<8x1xf32>
    %134 = arith.addf %75, %133 : vector<8x1xf32>
    %135 = arith.mulf %127, %125 : vector<8x1024xf32>
    %cst_84 = arith.constant dense<0.000000e+00> : vector<8xf32>
    %136 = vector.multi_reduction <add>, %135, %cst_84 [1] : vector<8x1024xf32> to vector<8xf32>
    %137 = vector.shape_cast %136 : vector<8xf32> to vector<8x1xf32>
    %138 = arith.addf %79, %137 : vector<8x1xf32>
    %c0_85 = arith.constant 0 : index
    %c0_86 = arith.constant 0 : index
    %c0_87 = arith.constant 0 : index
    %c0_88 = arith.constant 0 : index
    %139 = vector.load %arg7[%c0_85, %c0_86, %c0_87, %c0_88] : memref<1x4x8x2xf32, #tpu.memory_space<vmem>>, vector<1x1x8x1xf32>
    %140 = vector.shape_cast %139 : vector<1x1x8x1xf32> to vector<8x1xf32>
    %141 = vector.shape_cast %134 : vector<8x1xf32> to vector<1x1x8x1xf32>
    tpu.vector_store %arg7[%c0_85, %c0_86, %c0_87, %c0_88], %141 {strides = array<i32>} : memref<1x4x8x2xf32, #tpu.memory_space<vmem>>, vector<1x1x8x1xf32>,
    %c0_89 = arith.constant 0 : index
    %c0_90 = arith.constant 0 : index
    %c0_91 = arith.constant 0 : index
    %c1_92 = arith.constant 1 : index
    %142 = vector.load %arg7[%c0_89, %c0_90, %c0_91, %c1_92] : memref<1x4x8x2xf32, #tpu.memory_space<vmem>>, vector<1x1x8x1xf32>
    %143 = vector.shape_cast %142 : vector<1x1x8x1xf32> to vector<8x1xf32>
    %144 = vector.shape_cast %138 : vector<8x1xf32> to vector<1x1x8x1xf32>
    tpu.vector_store %arg7[%c0_89, %c0_90, %c0_91, %c1_92], %144 {strides = array<i32>} : memref<1x4x8x2xf32, #tpu.memory_space<vmem>>, vector<1x1x8x1xf32>,
    %cst_93 = arith.constant 0.000000e+00 : f32
    %145 = vector.broadcast %cst_93 : f32 to vector<8x1xf32>
    %cst_94 = arith.constant 0.000000e+00 : f32
    %146 = vector.broadcast %cst_94 : f32 to vector<8x1024xf32>
    %c4_95 = arith.constant 4 : index
    %c0_96 = arith.constant 0 : index
    %147 = vector.load %arg8[%c4_95, %c0_96] : memref<24x2432xbf16, #tpu.memory_space<vmem>>, vector<12x1024xbf16>
    %148 = vector.extract_strided_slice %18 {offsets = [0, 0, 0], sizes = [1, 8, 12], strides = [1, 1, 1]} : vector<9x8x12xbf16> to vector<1x8x12xbf16>
    %149 = vector.shape_cast %148 : vector<1x8x12xbf16> to vector<8x12xbf16>
    %cst_97 = arith.constant dense<0.000000e+00> : vector<8x1024xf32>
    %150 = tpu.matmul %149, %147, %cst_97 {dimension_numbers = #tpu.dot_dimension_numbers<[1], [0], [0], [1], [0, 0, 1, 1], [], []>} : vector<8x12xbf16>, vector<12x1024xbf16>, vector<8x1024xf32> -> vector<8x1024xf32>
    %151 = arith.addf %146, %150 : vector<8x1024xf32>
    %c4_98 = arith.constant 4 : index
    %c1_99 = arith.constant 1 : index
    %152 = vector.load %arg8[%c4_98, %c1_99] : memref<24x2432xbf16, #tpu.memory_space<vmem>>, vector<12x1024xbf16>
    %153 = vector.extract_strided_slice %18 {offsets = [1, 0, 0], sizes = [1, 8, 12], strides = [1, 1, 1]} : vector<9x8x12xbf16> to vector<1x8x12xbf16>
    %154 = vector.shape_cast %153 : vector<1x8x12xbf16> to vector<8x12xbf16>
    %cst_100 = arith.constant dense<0.000000e+00> : vector<8x1024xf32>
    %155 = tpu.matmul %154, %152, %cst_100 {dimension_numbers = #tpu.dot_dimension_numbers<[1], [0], [0], [1], [0, 0, 1, 1], [], []>} : vector<8x12xbf16>, vector<12x1024xbf16>, vector<8x1024xf32> -> vector<8x1024xf32>
    %156 = arith.addf %151, %155 : vector<8x1024xf32>
    %c4_101 = arith.constant 4 : index
    %c2_102 = arith.constant 2 : index
    %157 = vector.load %arg8[%c4_101, %c2_102] : memref<24x2432xbf16, #tpu.memory_space<vmem>>, vector<12x1024xbf16>
    %158 = vector.extract_strided_slice %18 {offsets = [2, 0, 0], sizes = [1, 8, 12], strides = [1, 1, 1]} : vector<9x8x12xbf16> to vector<1x8x12xbf16>
    %159 = vector.shape_cast %158 : vector<1x8x12xbf16> to vector<8x12xbf16>
    %cst_103 = arith.constant dense<0.000000e+00> : vector<8x1024xf32>
    %160 = tpu.matmul %159, %157, %cst_103 {dimension_numbers = #tpu.dot_dimension_numbers<[1], [0], [0], [1], [0, 0, 1, 1], [], []>} : vector<8x12xbf16>, vector<12x1024xbf16>, vector<8x1024xf32> -> vector<8x1024xf32>
    %161 = arith.addf %156, %160 : vector<8x1024xf32>
    %c4_104 = arith.constant 4 : index
    %c128_105 = arith.constant 128 : index
    %162 = vector.load %arg8[%c4_104, %c128_105] : memref<24x2432xbf16, #tpu.memory_space<vmem>>, vector<12x1024xbf16>
    %163 = vector.extract_strided_slice %18 {offsets = [3, 0, 0], sizes = [1, 8, 12], strides = [1, 1, 1]} : vector<9x8x12xbf16> to vector<1x8x12xbf16>
    %164 = vector.shape_cast %163 : vector<1x8x12xbf16> to vector<8x12xbf16>
    %cst_106 = arith.constant dense<0.000000e+00> : vector<8x1024xf32>
    %165 = tpu.matmul %164, %162, %cst_106 {dimension_numbers = #tpu.dot_dimension_numbers<[1], [0], [0], [1], [0, 0, 1, 1], [], []>} : vector<8x12xbf16>, vector<12x1024xbf16>, vector<8x1024xf32> -> vector<8x1024xf32>
    %166 = arith.addf %161, %165 : vector<8x1024xf32>
    %c4_107 = arith.constant 4 : index
    %c129_108 = arith.constant 129 : index
    %167 = vector.load %arg8[%c4_107, %c129_108] : memref<24x2432xbf16, #tpu.memory_space<vmem>>, vector<12x1024xbf16>
    %168 = vector.extract_strided_slice %18 {offsets = [4, 0, 0], sizes = [1, 8, 12], strides = [1, 1, 1]} : vector<9x8x12xbf16> to vector<1x8x12xbf16>
    %169 = vector.shape_cast %168 : vector<1x8x12xbf16> to vector<8x12xbf16>
    %cst_109 = arith.constant dense<0.000000e+00> : vector<8x1024xf32>
    %170 = tpu.matmul %169, %167, %cst_109 {dimension_numbers = #tpu.dot_dimension_numbers<[1], [0], [0], [1], [0, 0, 1, 1], [], []>} : vector<8x12xbf16>, vector<12x1024xbf16>, vector<8x1024xf32> -> vector<8x1024xf32>
    %171 = arith.addf %166, %170 : vector<8x1024xf32>
    %c4_110 = arith.constant 4 : index
    %c130_111 = arith.constant 130 : index
    %172 = vector.load %arg8[%c4_110, %c130_111] : memref<24x2432xbf16, #tpu.memory_space<vmem>>, vector<12x1024xbf16>
    %173 = vector.extract_strided_slice %18 {offsets = [5, 0, 0], sizes = [1, 8, 12], strides = [1, 1, 1]} : vector<9x8x12xbf16> to vector<1x8x12xbf16>
    %174 = vector.shape_cast %173 : vector<1x8x12xbf16> to vector<8x12xbf16>
    %cst_112 = arith.constant dense<0.000000e+00> : vector<8x1024xf32>
    %175 = tpu.matmul %174, %172, %cst_112 {dimension_numbers = #tpu.dot_dimension_numbers<[1], [0], [0], [1], [0, 0, 1, 1], [], []>} : vector<8x12xbf16>, vector<12x1024xbf16>, vector<8x1024xf32> -> vector<8x1024xf32>
    %176 = arith.addf %171, %175 : vector<8x1024xf32>
    %c4_113 = arith.constant 4 : index
    %c256_114 = arith.constant 256 : index
    %177 = vector.load %arg8[%c4_113, %c256_114] : memref<24x2432xbf16, #tpu.memory_space<vmem>>, vector<12x1024xbf16>
    %178 = vector.extract_strided_slice %18 {offsets = [6, 0, 0], sizes = [1, 8, 12], strides = [1, 1, 1]} : vector<9x8x12xbf16> to vector<1x8x12xbf16>
    %179 = vector.shape_cast %178 : vector<1x8x12xbf16> to vector<8x12xbf16>
    %cst_115 = arith.constant dense<0.000000e+00> : vector<8x1024xf32>
    %180 = tpu.matmul %179, %177, %cst_115 {dimension_numbers = #tpu.dot_dimension_numbers<[1], [0], [0], [1], [0, 0, 1, 1], [], []>} : vector<8x12xbf16>, vector<12x1024xbf16>, vector<8x1024xf32> -> vector<8x1024xf32>
    %181 = arith.addf %176, %180 : vector<8x1024xf32>
    %c4_116 = arith.constant 4 : index
    %c257_117 = arith.constant 257 : index
    %182 = vector.load %arg8[%c4_116, %c257_117] : memref<24x2432xbf16, #tpu.memory_space<vmem>>, vector<12x1024xbf16>
    %183 = vector.extract_strided_slice %18 {offsets = [7, 0, 0], sizes = [1, 8, 12], strides = [1, 1, 1]} : vector<9x8x12xbf16> to vector<1x8x12xbf16>
    %184 = vector.shape_cast %183 : vector<1x8x12xbf16> to vector<8x12xbf16>
    %cst_118 = arith.constant dense<0.000000e+00> : vector<8x1024xf32>
    %185 = tpu.matmul %184, %182, %cst_118 {dimension_numbers = #tpu.dot_dimension_numbers<[1], [0], [0], [1], [0, 0, 1, 1], [], []>} : vector<8x12xbf16>, vector<12x1024xbf16>, vector<8x1024xf32> -> vector<8x1024xf32>
    %186 = arith.addf %181, %185 : vector<8x1024xf32>
    %c4_119 = arith.constant 4 : index
    %c258_120 = arith.constant 258 : index
    %187 = vector.load %arg8[%c4_119, %c258_120] : memref<24x2432xbf16, #tpu.memory_space<vmem>>, vector<12x1024xbf16>
    %188 = vector.extract_strided_slice %18 {offsets = [8, 0, 0], sizes = [1, 8, 12], strides = [1, 1, 1]} : vector<9x8x12xbf16> to vector<1x8x12xbf16>
    %189 = vector.shape_cast %188 : vector<1x8x12xbf16> to vector<8x12xbf16>
    %cst_121 = arith.constant dense<0.000000e+00> : vector<8x1024xf32>
    %190 = tpu.matmul %189, %187, %cst_121 {dimension_numbers = #tpu.dot_dimension_numbers<[1], [0], [0], [1], [0, 0, 1, 1], [], []>} : vector<8x12xbf16>, vector<12x1024xbf16>, vector<8x1024xf32> -> vector<8x1024xf32>
    %191 = arith.addf %186, %190 : vector<8x1024xf32>
    %192 = vector.broadcast %19 : vector<1x1024xf32> to vector<8x1024xf32>
    %193 = arith.mulf %191, %192 : vector<8x1024xf32>
    %194 = arith.truncf %191 : vector<8x1024xf32> to vector<8x1024xbf16>
    %c0_122 = arith.constant 0 : index
    %c1_123 = arith.constant 1 : index
    %c0_124 = arith.constant 0 : index
    %c0_125 = arith.constant 0 : index
    %195 = vector.load %arg6[%c0_122, %c1_123, %c0_124, %c0_125] : memref<1x4x8x2048xbf16, #tpu.memory_space<vmem>>, vector<1x1x8x1024xbf16>
    %196 = vector.shape_cast %195 : vector<1x1x8x1024xbf16> to vector<8x1024xbf16>
    %197 = vector.shape_cast %194 : vector<8x1024xbf16> to vector<1x1x8x1024xbf16>
    tpu.vector_store %arg6[%c0_122, %c1_123, %c0_124, %c0_125], %197 {strides = array<i32>} : memref<1x4x8x2048xbf16, #tpu.memory_space<vmem>>, vector<1x1x8x1024xbf16>,
    %cst_126 = arith.constant dense<0.000000e+00> : vector<8xf32>
    %198 = vector.multi_reduction <add>, %193, %cst_126 [1] : vector<8x1024xf32> to vector<8xf32>
    %199 = vector.shape_cast %198 : vector<8xf32> to vector<8x1xf32>
    %200 = arith.addf %145, %199 : vector<8x1xf32>
    %201 = arith.mulf %193, %191 : vector<8x1024xf32>
    %cst_127 = arith.constant dense<0.000000e+00> : vector<8xf32>
    %202 = vector.multi_reduction <add>, %201, %cst_127 [1] : vector<8x1024xf32> to vector<8xf32>
    %203 = vector.shape_cast %202 : vector<8xf32> to vector<8x1xf32>
    %204 = arith.addf %145, %203 : vector<8x1xf32>
    %cst_128 = arith.constant 0.000000e+00 : f32
    %205 = vector.broadcast %cst_128 : f32 to vector<8x1024xf32>
    %c4_129 = arith.constant 4 : index
    %c1024_130 = arith.constant 1024 : index
    %206 = vector.load %arg8[%c4_129, %c1024_130] : memref<24x2432xbf16, #tpu.memory_space<vmem>>, vector<12x1024xbf16>
    %207 = vector.extract_strided_slice %18 {offsets = [0, 0, 0], sizes = [1, 8, 12], strides = [1, 1, 1]} : vector<9x8x12xbf16> to vector<1x8x12xbf16>
    %208 = vector.shape_cast %207 : vector<1x8x12xbf16> to vector<8x12xbf16>
    %cst_131 = arith.constant dense<0.000000e+00> : vector<8x1024xf32>
    %209 = tpu.matmul %208, %206, %cst_131 {dimension_numbers = #tpu.dot_dimension_numbers<[1], [0], [0], [1], [0, 0, 1, 1], [], []>} : vector<8x12xbf16>, vector<12x1024xbf16>, vector<8x1024xf32> -> vector<8x1024xf32>
    %210 = arith.addf %205, %209 : vector<8x1024xf32>
    %c4_132 = arith.constant 4 : index
    %c1025_133 = arith.constant 1025 : index
    %211 = vector.load %arg8[%c4_132, %c1025_133] : memref<24x2432xbf16, #tpu.memory_space<vmem>>, vector<12x1024xbf16>
    %212 = vector.extract_strided_slice %18 {offsets = [1, 0, 0], sizes = [1, 8, 12], strides = [1, 1, 1]} : vector<9x8x12xbf16> to vector<1x8x12xbf16>
    %213 = vector.shape_cast %212 : vector<1x8x12xbf16> to vector<8x12xbf16>
    %cst_134 = arith.constant dense<0.000000e+00> : vector<8x1024xf32>
    %214 = tpu.matmul %213, %211, %cst_134 {dimension_numbers = #tpu.dot_dimension_numbers<[1], [0], [0], [1], [0, 0, 1, 1], [], []>} : vector<8x12xbf16>, vector<12x1024xbf16>, vector<8x1024xf32> -> vector<8x1024xf32>
    %215 = arith.addf %210, %214 : vector<8x1024xf32>
    %c4_135 = arith.constant 4 : index
    %c1026_136 = arith.constant 1026 : index
    %216 = vector.load %arg8[%c4_135, %c1026_136] : memref<24x2432xbf16, #tpu.memory_space<vmem>>, vector<12x1024xbf16>
    %217 = vector.extract_strided_slice %18 {offsets = [2, 0, 0], sizes = [1, 8, 12], strides = [1, 1, 1]} : vector<9x8x12xbf16> to vector<1x8x12xbf16>
    %218 = vector.shape_cast %217 : vector<1x8x12xbf16> to vector<8x12xbf16>
    %cst_137 = arith.constant dense<0.000000e+00> : vector<8x1024xf32>
    %219 = tpu.matmul %218, %216, %cst_137 {dimension_numbers = #tpu.dot_dimension_numbers<[1], [0], [0], [1], [0, 0, 1, 1], [], []>} : vector<8x12xbf16>, vector<12x1024xbf16>, vector<8x1024xf32> -> vector<8x1024xf32>
    %220 = arith.addf %215, %219 : vector<8x1024xf32>
    %c4_138 = arith.constant 4 : index
    %c1152_139 = arith.constant 1152 : index
    %221 = vector.load %arg8[%c4_138, %c1152_139] : memref<24x2432xbf16, #tpu.memory_space<vmem>>, vector<12x1024xbf16>
    %222 = vector.extract_strided_slice %18 {offsets = [3, 0, 0], sizes = [1, 8, 12], strides = [1, 1, 1]} : vector<9x8x12xbf16> to vector<1x8x12xbf16>
    %223 = vector.shape_cast %222 : vector<1x8x12xbf16> to vector<8x12xbf16>
    %cst_140 = arith.constant dense<0.000000e+00> : vector<8x1024xf32>
    %224 = tpu.matmul %223, %221, %cst_140 {dimension_numbers = #tpu.dot_dimension_numbers<[1], [0], [0], [1], [0, 0, 1, 1], [], []>} : vector<8x12xbf16>, vector<12x1024xbf16>, vector<8x1024xf32> -> vector<8x1024xf32>
    %225 = arith.addf %220, %224 : vector<8x1024xf32>
    %c4_141 = arith.constant 4 : index
    %c1153_142 = arith.constant 1153 : index
    %226 = vector.load %arg8[%c4_141, %c1153_142] : memref<24x2432xbf16, #tpu.memory_space<vmem>>, vector<12x1024xbf16>
    %227 = vector.extract_strided_slice %18 {offsets = [4, 0, 0], sizes = [1, 8, 12], strides = [1, 1, 1]} : vector<9x8x12xbf16> to vector<1x8x12xbf16>
    %228 = vector.shape_cast %227 : vector<1x8x12xbf16> to vector<8x12xbf16>
    %cst_143 = arith.constant dense<0.000000e+00> : vector<8x1024xf32>
    %229 = tpu.matmul %228, %226, %cst_143 {dimension_numbers = #tpu.dot_dimension_numbers<[1], [0], [0], [1], [0, 0, 1, 1], [], []>} : vector<8x12xbf16>, vector<12x1024xbf16>, vector<8x1024xf32> -> vector<8x1024xf32>
    %230 = arith.addf %225, %229 : vector<8x1024xf32>
    %c4_144 = arith.constant 4 : index
    %c1154_145 = arith.constant 1154 : index
    %231 = vector.load %arg8[%c4_144, %c1154_145] : memref<24x2432xbf16, #tpu.memory_space<vmem>>, vector<12x1024xbf16>
    %232 = vector.extract_strided_slice %18 {offsets = [5, 0, 0], sizes = [1, 8, 12], strides = [1, 1, 1]} : vector<9x8x12xbf16> to vector<1x8x12xbf16>
    %233 = vector.shape_cast %232 : vector<1x8x12xbf16> to vector<8x12xbf16>
    %cst_146 = arith.constant dense<0.000000e+00> : vector<8x1024xf32>
    %234 = tpu.matmul %233, %231, %cst_146 {dimension_numbers = #tpu.dot_dimension_numbers<[1], [0], [0], [1], [0, 0, 1, 1], [], []>} : vector<8x12xbf16>, vector<12x1024xbf16>, vector<8x1024xf32> -> vector<8x1024xf32>
    %235 = arith.addf %230, %234 : vector<8x1024xf32>
    %c4_147 = arith.constant 4 : index
    %c1280_148 = arith.constant 1280 : index
    %236 = vector.load %arg8[%c4_147, %c1280_148] : memref<24x2432xbf16, #tpu.memory_space<vmem>>, vector<12x1024xbf16>
    %237 = vector.extract_strided_slice %18 {offsets = [6, 0, 0], sizes = [1, 8, 12], strides = [1, 1, 1]} : vector<9x8x12xbf16> to vector<1x8x12xbf16>
    %238 = vector.shape_cast %237 : vector<1x8x12xbf16> to vector<8x12xbf16>
    %cst_149 = arith.constant dense<0.000000e+00> : vector<8x1024xf32>
    %239 = tpu.matmul %238, %236, %cst_149 {dimension_numbers = #tpu.dot_dimension_numbers<[1], [0], [0], [1], [0, 0, 1, 1], [], []>} : vector<8x12xbf16>, vector<12x1024xbf16>, vector<8x1024xf32> -> vector<8x1024xf32>
    %240 = arith.addf %235, %239 : vector<8x1024xf32>
    %c4_150 = arith.constant 4 : index
    %c1281_151 = arith.constant 1281 : index
    %241 = vector.load %arg8[%c4_150, %c1281_151] : memref<24x2432xbf16, #tpu.memory_space<vmem>>, vector<12x1024xbf16>
    %242 = vector.extract_strided_slice %18 {offsets = [7, 0, 0], sizes = [1, 8, 12], strides = [1, 1, 1]} : vector<9x8x12xbf16> to vector<1x8x12xbf16>
    %243 = vector.shape_cast %242 : vector<1x8x12xbf16> to vector<8x12xbf16>
    %cst_152 = arith.constant dense<0.000000e+00> : vector<8x1024xf32>
    %244 = tpu.matmul %243, %241, %cst_152 {dimension_numbers = #tpu.dot_dimension_numbers<[1], [0], [0], [1], [0, 0, 1, 1], [], []>} : vector<8x12xbf16>, vector<12x1024xbf16>, vector<8x1024xf32> -> vector<8x1024xf32>
    %245 = arith.addf %240, %244 : vector<8x1024xf32>
    %c4_153 = arith.constant 4 : index
    %c1282_154 = arith.constant 1282 : index
    %246 = vector.load %arg8[%c4_153, %c1282_154] : memref<24x2432xbf16, #tpu.memory_space<vmem>>, vector<12x1024xbf16>
    %247 = vector.extract_strided_slice %18 {offsets = [8, 0, 0], sizes = [1, 8, 12], strides = [1, 1, 1]} : vector<9x8x12xbf16> to vector<1x8x12xbf16>
    %248 = vector.shape_cast %247 : vector<1x8x12xbf16> to vector<8x12xbf16>
    %cst_155 = arith.constant dense<0.000000e+00> : vector<8x1024xf32>
    %249 = tpu.matmul %248, %246, %cst_155 {dimension_numbers = #tpu.dot_dimension_numbers<[1], [0], [0], [1], [0, 0, 1, 1], [], []>} : vector<8x12xbf16>, vector<12x1024xbf16>, vector<8x1024xf32> -> vector<8x1024xf32>
    %250 = arith.addf %245, %249 : vector<8x1024xf32>
    %251 = vector.broadcast %19 : vector<1x1024xf32> to vector<8x1024xf32>
    %252 = arith.mulf %250, %251 : vector<8x1024xf32>
    %253 = arith.truncf %250 : vector<8x1024xf32> to vector<8x1024xbf16>
    %c0_156 = arith.constant 0 : index
    %c1_157 = arith.constant 1 : index
    %c0_158 = arith.constant 0 : index
    %c1024_159 = arith.constant 1024 : index
    %254 = vector.load %arg6[%c0_156, %c1_157, %c0_158, %c1024_159] : memref<1x4x8x2048xbf16, #tpu.memory_space<vmem>>, vector<1x1x8x1024xbf16>
    %255 = vector.shape_cast %254 : vector<1x1x8x1024xbf16> to vector<8x1024xbf16>
    %256 = vector.shape_cast %253 : vector<8x1024xbf16> to vector<1x1x8x1024xbf16>
    tpu.vector_store %arg6[%c0_156, %c1_157, %c0_158, %c1024_159], %256 {strides = array<i32>} : memref<1x4x8x2048xbf16, #tpu.memory_space<vmem>>, vector<1x1x8x1024xbf16>,
    %cst_160 = arith.constant dense<0.000000e+00> : vector<8xf32>
    %257 = vector.multi_reduction <add>, %252, %cst_160 [1] : vector<8x1024xf32> to vector<8xf32>
    %258 = vector.shape_cast %257 : vector<8xf32> to vector<8x1xf32>
    %259 = arith.addf %200, %258 : vector<8x1xf32>
    %260 = arith.mulf %252, %250 : vector<8x1024xf32>
    %cst_161 = arith.constant dense<0.000000e+00> : vector<8xf32>
    %261 = vector.multi_reduction <add>, %260, %cst_161 [1] : vector<8x1024xf32> to vector<8xf32>
    %262 = vector.shape_cast %261 : vector<8xf32> to vector<8x1xf32>
    %263 = arith.addf %204, %262 : vector<8x1xf32>
    %c0_162 = arith.constant 0 : index
    %c1_163 = arith.constant 1 : index
    %c0_164 = arith.constant 0 : index
    %c0_165 = arith.constant 0 : index
    %264 = vector.load %arg7[%c0_162, %c1_163, %c0_164, %c0_165] : memref<1x4x8x2xf32, #tpu.memory_space<vmem>>, vector<1x1x8x1xf32>
    %265 = vector.shape_cast %264 : vector<1x1x8x1xf32> to vector<8x1xf32>
    %266 = vector.shape_cast %259 : vector<8x1xf32> to vector<1x1x8x1xf32>
    tpu.vector_store %arg7[%c0_162, %c1_163, %c0_164, %c0_165], %266 {strides = array<i32>} : memref<1x4x8x2xf32, #tpu.memory_space<vmem>>, vector<1x1x8x1xf32>,
    %c0_166 = arith.constant 0 : index
    %c1_167 = arith.constant 1 : index
    %c0_168 = arith.constant 0 : index
    %c1_169 = arith.constant 1 : index
    %267 = vector.load %arg7[%c0_166, %c1_167, %c0_168, %c1_169] : memref<1x4x8x2xf32, #tpu.memory_space<vmem>>, vector<1x1x8x1xf32>
    %268 = vector.shape_cast %267 : vector<1x1x8x1xf32> to vector<8x1xf32>
    %269 = vector.shape_cast %263 : vector<8x1xf32> to vector<1x1x8x1xf32>
    tpu.vector_store %arg7[%c0_166, %c1_167, %c0_168, %c1_169], %269 {strides = array<i32>} : memref<1x4x8x2xf32, #tpu.memory_space<vmem>>, vector<1x1x8x1xf32>,
    %cst_170 = arith.constant 0.000000e+00 : f32
    %270 = vector.broadcast %cst_170 : f32 to vector<8x1xf32>
    %cst_171 = arith.constant 0.000000e+00 : f32
    %271 = vector.broadcast %cst_171 : f32 to vector<8x1024xf32>
    %c8_172 = arith.constant 8 : index
    %c0_173 = arith.constant 0 : index
    %272 = vector.load %arg8[%c8_172, %c0_173] : memref<24x2432xbf16, #tpu.memory_space<vmem>>, vector<12x1024xbf16>
    %273 = vector.extract_strided_slice %18 {offsets = [0, 0, 0], sizes = [1, 8, 12], strides = [1, 1, 1]} : vector<9x8x12xbf16> to vector<1x8x12xbf16>
    %274 = vector.shape_cast %273 : vector<1x8x12xbf16> to vector<8x12xbf16>
    %cst_174 = arith.constant dense<0.000000e+00> : vector<8x1024xf32>
    %275 = tpu.matmul %274, %272, %cst_174 {dimension_numbers = #tpu.dot_dimension_numbers<[1], [0], [0], [1], [0, 0, 1, 1], [], []>} : vector<8x12xbf16>, vector<12x1024xbf16>, vector<8x1024xf32> -> vector<8x1024xf32>
    %276 = arith.addf %271, %275 : vector<8x1024xf32>
    %c8_175 = arith.constant 8 : index
    %c1_176 = arith.constant 1 : index
    %277 = vector.load %arg8[%c8_175, %c1_176] : memref<24x2432xbf16, #tpu.memory_space<vmem>>, vector<12x1024xbf16>
    %278 = vector.extract_strided_slice %18 {offsets = [1, 0, 0], sizes = [1, 8, 12], strides = [1, 1, 1]} : vector<9x8x12xbf16> to vector<1x8x12xbf16>
    %279 = vector.shape_cast %278 : vector<1x8x12xbf16> to vector<8x12xbf16>
    %cst_177 = arith.constant dense<0.000000e+00> : vector<8x1024xf32>
    %280 = tpu.matmul %279, %277, %cst_177 {dimension_numbers = #tpu.dot_dimension_numbers<[1], [0], [0], [1], [0, 0, 1, 1], [], []>} : vector<8x12xbf16>, vector<12x1024xbf16>, vector<8x1024xf32> -> vector<8x1024xf32>
    %281 = arith.addf %276, %280 : vector<8x1024xf32>
    %c8_178 = arith.constant 8 : index
    %c2_179 = arith.constant 2 : index
    %282 = vector.load %arg8[%c8_178, %c2_179] : memref<24x2432xbf16, #tpu.memory_space<vmem>>, vector<12x1024xbf16>
    %283 = vector.extract_strided_slice %18 {offsets = [2, 0, 0], sizes = [1, 8, 12], strides = [1, 1, 1]} : vector<9x8x12xbf16> to vector<1x8x12xbf16>
    %284 = vector.shape_cast %283 : vector<1x8x12xbf16> to vector<8x12xbf16>
    %cst_180 = arith.constant dense<0.000000e+00> : vector<8x1024xf32>
    %285 = tpu.matmul %284, %282, %cst_180 {dimension_numbers = #tpu.dot_dimension_numbers<[1], [0], [0], [1], [0, 0, 1, 1], [], []>} : vector<8x12xbf16>, vector<12x1024xbf16>, vector<8x1024xf32> -> vector<8x1024xf32>
    %286 = arith.addf %281, %285 : vector<8x1024xf32>
    %c8_181 = arith.constant 8 : index
    %c128_182 = arith.constant 128 : index
    %287 = vector.load %arg8[%c8_181, %c128_182] : memref<24x2432xbf16, #tpu.memory_space<vmem>>, vector<12x1024xbf16>
    %288 = vector.extract_strided_slice %18 {offsets = [3, 0, 0], sizes = [1, 8, 12], strides = [1, 1, 1]} : vector<9x8x12xbf16> to vector<1x8x12xbf16>
    %289 = vector.shape_cast %288 : vector<1x8x12xbf16> to vector<8x12xbf16>
    %cst_183 = arith.constant dense<0.000000e+00> : vector<8x1024xf32>
    %290 = tpu.matmul %289, %287, %cst_183 {dimension_numbers = #tpu.dot_dimension_numbers<[1], [0], [0], [1], [0, 0, 1, 1], [], []>} : vector<8x12xbf16>, vector<12x1024xbf16>, vector<8x1024xf32> -> vector<8x1024xf32>
    %291 = arith.addf %286, %290 : vector<8x1024xf32>
    %c8_184 = arith.constant 8 : index
    %c129_185 = arith.constant 129 : index
    %292 = vector.load %arg8[%c8_184, %c129_185] : memref<24x2432xbf16, #tpu.memory_space<vmem>>, vector<12x1024xbf16>
    %293 = vector.extract_strided_slice %18 {offsets = [4, 0, 0], sizes = [1, 8, 12], strides = [1, 1, 1]} : vector<9x8x12xbf16> to vector<1x8x12xbf16>
    %294 = vector.shape_cast %293 : vector<1x8x12xbf16> to vector<8x12xbf16>
    %cst_186 = arith.constant dense<0.000000e+00> : vector<8x1024xf32>
    %295 = tpu.matmul %294, %292, %cst_186 {dimension_numbers = #tpu.dot_dimension_numbers<[1], [0], [0], [1], [0, 0, 1, 1], [], []>} : vector<8x12xbf16>, vector<12x1024xbf16>, vector<8x1024xf32> -> vector<8x1024xf32>
    %296 = arith.addf %291, %295 : vector<8x1024xf32>
    %c8_187 = arith.constant 8 : index
    %c130_188 = arith.constant 130 : index
    %297 = vector.load %arg8[%c8_187, %c130_188] : memref<24x2432xbf16, #tpu.memory_space<vmem>>, vector<12x1024xbf16>
    %298 = vector.extract_strided_slice %18 {offsets = [5, 0, 0], sizes = [1, 8, 12], strides = [1, 1, 1]} : vector<9x8x12xbf16> to vector<1x8x12xbf16>
    %299 = vector.shape_cast %298 : vector<1x8x12xbf16> to vector<8x12xbf16>
    %cst_189 = arith.constant dense<0.000000e+00> : vector<8x1024xf32>
    %300 = tpu.matmul %299, %297, %cst_189 {dimension_numbers = #tpu.dot_dimension_numbers<[1], [0], [0], [1], [0, 0, 1, 1], [], []>} : vector<8x12xbf16>, vector<12x1024xbf16>, vector<8x1024xf32> -> vector<8x1024xf32>
    %301 = arith.addf %296, %300 : vector<8x1024xf32>
    %c8_190 = arith.constant 8 : index
    %c256_191 = arith.constant 256 : index
    %302 = vector.load %arg8[%c8_190, %c256_191] : memref<24x2432xbf16, #tpu.memory_space<vmem>>, vector<12x1024xbf16>
    %303 = vector.extract_strided_slice %18 {offsets = [6, 0, 0], sizes = [1, 8, 12], strides = [1, 1, 1]} : vector<9x8x12xbf16> to vector<1x8x12xbf16>
    %304 = vector.shape_cast %303 : vector<1x8x12xbf16> to vector<8x12xbf16>
    %cst_192 = arith.constant dense<0.000000e+00> : vector<8x1024xf32>
    %305 = tpu.matmul %304, %302, %cst_192 {dimension_numbers = #tpu.dot_dimension_numbers<[1], [0], [0], [1], [0, 0, 1, 1], [], []>} : vector<8x12xbf16>, vector<12x1024xbf16>, vector<8x1024xf32> -> vector<8x1024xf32>
    %306 = arith.addf %301, %305 : vector<8x1024xf32>
    %c8_193 = arith.constant 8 : index
    %c257_194 = arith.constant 257 : index
    %307 = vector.load %arg8[%c8_193, %c257_194] : memref<24x2432xbf16, #tpu.memory_space<vmem>>, vector<12x1024xbf16>
    %308 = vector.extract_strided_slice %18 {offsets = [7, 0, 0], sizes = [1, 8, 12], strides = [1, 1, 1]} : vector<9x8x12xbf16> to vector<1x8x12xbf16>
    %309 = vector.shape_cast %308 : vector<1x8x12xbf16> to vector<8x12xbf16>
    %cst_195 = arith.constant dense<0.000000e+00> : vector<8x1024xf32>
    %310 = tpu.matmul %309, %307, %cst_195 {dimension_numbers = #tpu.dot_dimension_numbers<[1], [0], [0], [1], [0, 0, 1, 1], [], []>} : vector<8x12xbf16>, vector<12x1024xbf16>, vector<8x1024xf32> -> vector<8x1024xf32>
    %311 = arith.addf %306, %310 : vector<8x1024xf32>
    %c8_196 = arith.constant 8 : index
    %c258_197 = arith.constant 258 : index
    %312 = vector.load %arg8[%c8_196, %c258_197] : memref<24x2432xbf16, #tpu.memory_space<vmem>>, vector<12x1024xbf16>
    %313 = vector.extract_strided_slice %18 {offsets = [8, 0, 0], sizes = [1, 8, 12], strides = [1, 1, 1]} : vector<9x8x12xbf16> to vector<1x8x12xbf16>
    %314 = vector.shape_cast %313 : vector<1x8x12xbf16> to vector<8x12xbf16>
    %cst_198 = arith.constant dense<0.000000e+00> : vector<8x1024xf32>
    %315 = tpu.matmul %314, %312, %cst_198 {dimension_numbers = #tpu.dot_dimension_numbers<[1], [0], [0], [1], [0, 0, 1, 1], [], []>} : vector<8x12xbf16>, vector<12x1024xbf16>, vector<8x1024xf32> -> vector<8x1024xf32>
    %316 = arith.addf %311, %315 : vector<8x1024xf32>
    %317 = vector.broadcast %19 : vector<1x1024xf32> to vector<8x1024xf32>
    %318 = arith.mulf %316, %317 : vector<8x1024xf32>
    %319 = arith.truncf %316 : vector<8x1024xf32> to vector<8x1024xbf16>
    %c0_199 = arith.constant 0 : index
    %c2_200 = arith.constant 2 : index
    %c0_201 = arith.constant 0 : index
    %c0_202 = arith.constant 0 : index
    %320 = vector.load %arg6[%c0_199, %c2_200, %c0_201, %c0_202] : memref<1x4x8x2048xbf16, #tpu.memory_space<vmem>>, vector<1x1x8x1024xbf16>
    %321 = vector.shape_cast %320 : vector<1x1x8x1024xbf16> to vector<8x1024xbf16>
    %322 = vector.shape_cast %319 : vector<8x1024xbf16> to vector<1x1x8x1024xbf16>
    tpu.vector_store %arg6[%c0_199, %c2_200, %c0_201, %c0_202], %322 {strides = array<i32>} : memref<1x4x8x2048xbf16, #tpu.memory_space<vmem>>, vector<1x1x8x1024xbf16>,
    %cst_203 = arith.constant dense<0.000000e+00> : vector<8xf32>
    %323 = vector.multi_reduction <add>, %318, %cst_203 [1] : vector<8x1024xf32> to vector<8xf32>
    %324 = vector.shape_cast %323 : vector<8xf32> to vector<8x1xf32>
    %325 = arith.addf %270, %324 : vector<8x1xf32>
    %326 = arith.mulf %318, %316 : vector<8x1024xf32>
    %cst_204 = arith.constant dense<0.000000e+00> : vector<8xf32>
    %327 = vector.multi_reduction <add>, %326, %cst_204 [1] : vector<8x1024xf32> to vector<8xf32>
    %328 = vector.shape_cast %327 : vector<8xf32> to vector<8x1xf32>
    %329 = arith.addf %270, %328 : vector<8x1xf32>
    %cst_205 = arith.constant 0.000000e+00 : f32
    %330 = vector.broadcast %cst_205 : f32 to vector<8x1024xf32>
    %c8_206 = arith.constant 8 : index
    %c1024_207 = arith.constant 1024 : index
    %331 = vector.load %arg8[%c8_206, %c1024_207] : memref<24x2432xbf16, #tpu.memory_space<vmem>>, vector<12x1024xbf16>
    %332 = vector.extract_strided_slice %18 {offsets = [0, 0, 0], sizes = [1, 8, 12], strides = [1, 1, 1]} : vector<9x8x12xbf16> to vector<1x8x12xbf16>
    %333 = vector.shape_cast %332 : vector<1x8x12xbf16> to vector<8x12xbf16>
    %cst_208 = arith.constant dense<0.000000e+00> : vector<8x1024xf32>
    %334 = tpu.matmul %333, %331, %cst_208 {dimension_numbers = #tpu.dot_dimension_numbers<[1], [0], [0], [1], [0, 0, 1, 1], [], []>} : vector<8x12xbf16>, vector<12x1024xbf16>, vector<8x1024xf32> -> vector<8x1024xf32>
    %335 = arith.addf %330, %334 : vector<8x1024xf32>
    %c8_209 = arith.constant 8 : index
    %c1025_210 = arith.constant 1025 : index
    %336 = vector.load %arg8[%c8_209, %c1025_210] : memref<24x2432xbf16, #tpu.memory_space<vmem>>, vector<12x1024xbf16>
    %337 = vector.extract_strided_slice %18 {offsets = [1, 0, 0], sizes = [1, 8, 12], strides = [1, 1, 1]} : vector<9x8x12xbf16> to vector<1x8x12xbf16>
    %338 = vector.shape_cast %337 : vector<1x8x12xbf16> to vector<8x12xbf16>
    %cst_211 = arith.constant dense<0.000000e+00> : vector<8x1024xf32>
    %339 = tpu.matmul %338, %336, %cst_211 {dimension_numbers = #tpu.dot_dimension_numbers<[1], [0], [0], [1], [0, 0, 1, 1], [], []>} : vector<8x12xbf16>, vector<12x1024xbf16>, vector<8x1024xf32> -> vector<8x1024xf32>
    %340 = arith.addf %335, %339 : vector<8x1024xf32>
    %c8_212 = arith.constant 8 : index
    %c1026_213 = arith.constant 1026 : index
    %341 = vector.load %arg8[%c8_212, %c1026_213] : memref<24x2432xbf16, #tpu.memory_space<vmem>>, vector<12x1024xbf16>
    %342 = vector.extract_strided_slice %18 {offsets = [2, 0, 0], sizes = [1, 8, 12], strides = [1, 1, 1]} : vector<9x8x12xbf16> to vector<1x8x12xbf16>
    %343 = vector.shape_cast %342 : vector<1x8x12xbf16> to vector<8x12xbf16>
    %cst_214 = arith.constant dense<0.000000e+00> : vector<8x1024xf32>
    %344 = tpu.matmul %343, %341, %cst_214 {dimension_numbers = #tpu.dot_dimension_numbers<[1], [0], [0], [1], [0, 0, 1, 1], [], []>} : vector<8x12xbf16>, vector<12x1024xbf16>, vector<8x1024xf32> -> vector<8x1024xf32>
    %345 = arith.addf %340, %344 : vector<8x1024xf32>
    %c8_215 = arith.constant 8 : index
    %c1152_216 = arith.constant 1152 : index
    %346 = vector.load %arg8[%c8_215, %c1152_216] : memref<24x2432xbf16, #tpu.memory_space<vmem>>, vector<12x1024xbf16>
    %347 = vector.extract_strided_slice %18 {offsets = [3, 0, 0], sizes = [1, 8, 12], strides = [1, 1, 1]} : vector<9x8x12xbf16> to vector<1x8x12xbf16>
    %348 = vector.shape_cast %347 : vector<1x8x12xbf16> to vector<8x12xbf16>
    %cst_217 = arith.constant dense<0.000000e+00> : vector<8x1024xf32>
    %349 = tpu.matmul %348, %346, %cst_217 {dimension_numbers = #tpu.dot_dimension_numbers<[1], [0], [0], [1], [0, 0, 1, 1], [], []>} : vector<8x12xbf16>, vector<12x1024xbf16>, vector<8x1024xf32> -> vector<8x1024xf32>
    %350 = arith.addf %345, %349 : vector<8x1024xf32>
    %c8_218 = arith.constant 8 : index
    %c1153_219 = arith.constant 1153 : index
    %351 = vector.load %arg8[%c8_218, %c1153_219] : memref<24x2432xbf16, #tpu.memory_space<vmem>>, vector<12x1024xbf16>
    %352 = vector.extract_strided_slice %18 {offsets = [4, 0, 0], sizes = [1, 8, 12], strides = [1, 1, 1]} : vector<9x8x12xbf16> to vector<1x8x12xbf16>
    %353 = vector.shape_cast %352 : vector<1x8x12xbf16> to vector<8x12xbf16>
    %cst_220 = arith.constant dense<0.000000e+00> : vector<8x1024xf32>
    %354 = tpu.matmul %353, %351, %cst_220 {dimension_numbers = #tpu.dot_dimension_numbers<[1], [0], [0], [1], [0, 0, 1, 1], [], []>} : vector<8x12xbf16>, vector<12x1024xbf16>, vector<8x1024xf32> -> vector<8x1024xf32>
    %355 = arith.addf %350, %354 : vector<8x1024xf32>
    %c8_221 = arith.constant 8 : index
    %c1154_222 = arith.constant 1154 : index
    %356 = vector.load %arg8[%c8_221, %c1154_222] : memref<24x2432xbf16, #tpu.memory_space<vmem>>, vector<12x1024xbf16>
    %357 = vector.extract_strided_slice %18 {offsets = [5, 0, 0], sizes = [1, 8, 12], strides = [1, 1, 1]} : vector<9x8x12xbf16> to vector<1x8x12xbf16>
    %358 = vector.shape_cast %357 : vector<1x8x12xbf16> to vector<8x12xbf16>
    %cst_223 = arith.constant dense<0.000000e+00> : vector<8x1024xf32>
    %359 = tpu.matmul %358, %356, %cst_223 {dimension_numbers = #tpu.dot_dimension_numbers<[1], [0], [0], [1], [0, 0, 1, 1], [], []>} : vector<8x12xbf16>, vector<12x1024xbf16>, vector<8x1024xf32> -> vector<8x1024xf32>
    %360 = arith.addf %355, %359 : vector<8x1024xf32>
    %c8_224 = arith.constant 8 : index
    %c1280_225 = arith.constant 1280 : index
    %361 = vector.load %arg8[%c8_224, %c1280_225] : memref<24x2432xbf16, #tpu.memory_space<vmem>>, vector<12x1024xbf16>
    %362 = vector.extract_strided_slice %18 {offsets = [6, 0, 0], sizes = [1, 8, 12], strides = [1, 1, 1]} : vector<9x8x12xbf16> to vector<1x8x12xbf16>
    %363 = vector.shape_cast %362 : vector<1x8x12xbf16> to vector<8x12xbf16>
    %cst_226 = arith.constant dense<0.000000e+00> : vector<8x1024xf32>
    %364 = tpu.matmul %363, %361, %cst_226 {dimension_numbers = #tpu.dot_dimension_numbers<[1], [0], [0], [1], [0, 0, 1, 1], [], []>} : vector<8x12xbf16>, vector<12x1024xbf16>, vector<8x1024xf32> -> vector<8x1024xf32>
    %365 = arith.addf %360, %364 : vector<8x1024xf32>
    %c8_227 = arith.constant 8 : index
    %c1281_228 = arith.constant 1281 : index
    %366 = vector.load %arg8[%c8_227, %c1281_228] : memref<24x2432xbf16, #tpu.memory_space<vmem>>, vector<12x1024xbf16>
    %367 = vector.extract_strided_slice %18 {offsets = [7, 0, 0], sizes = [1, 8, 12], strides = [1, 1, 1]} : vector<9x8x12xbf16> to vector<1x8x12xbf16>
    %368 = vector.shape_cast %367 : vector<1x8x12xbf16> to vector<8x12xbf16>
    %cst_229 = arith.constant dense<0.000000e+00> : vector<8x1024xf32>
    %369 = tpu.matmul %368, %366, %cst_229 {dimension_numbers = #tpu.dot_dimension_numbers<[1], [0], [0], [1], [0, 0, 1, 1], [], []>} : vector<8x12xbf16>, vector<12x1024xbf16>, vector<8x1024xf32> -> vector<8x1024xf32>
    %370 = arith.addf %365, %369 : vector<8x1024xf32>
    %c8_230 = arith.constant 8 : index
    %c1282_231 = arith.constant 1282 : index
    %371 = vector.load %arg8[%c8_230, %c1282_231] : memref<24x2432xbf16, #tpu.memory_space<vmem>>, vector<12x1024xbf16>
    %372 = vector.extract_strided_slice %18 {offsets = [8, 0, 0], sizes = [1, 8, 12], strides = [1, 1, 1]} : vector<9x8x12xbf16> to vector<1x8x12xbf16>
    %373 = vector.shape_cast %372 : vector<1x8x12xbf16> to vector<8x12xbf16>
    %cst_232 = arith.constant dense<0.000000e+00> : vector<8x1024xf32>
    %374 = tpu.matmul %373, %371, %cst_232 {dimension_numbers = #tpu.dot_dimension_numbers<[1], [0], [0], [1], [0, 0, 1, 1], [], []>} : vector<8x12xbf16>, vector<12x1024xbf16>, vector<8x1024xf32> -> vector<8x1024xf32>
    %375 = arith.addf %370, %374 : vector<8x1024xf32>
    %376 = vector.broadcast %19 : vector<1x1024xf32> to vector<8x1024xf32>
    %377 = arith.mulf %375, %376 : vector<8x1024xf32>
    %378 = arith.truncf %375 : vector<8x1024xf32> to vector<8x1024xbf16>
    %c0_233 = arith.constant 0 : index
    %c2_234 = arith.constant 2 : index
    %c0_235 = arith.constant 0 : index
    %c1024_236 = arith.constant 1024 : index
    %379 = vector.load %arg6[%c0_233, %c2_234, %c0_235, %c1024_236] : memref<1x4x8x2048xbf16, #tpu.memory_space<vmem>>, vector<1x1x8x1024xbf16>
    %380 = vector.shape_cast %379 : vector<1x1x8x1024xbf16> to vector<8x1024xbf16>
    %381 = vector.shape_cast %378 : vector<8x1024xbf16> to vector<1x1x8x1024xbf16>
    tpu.vector_store %arg6[%c0_233, %c2_234, %c0_235, %c1024_236], %381 {strides = array<i32>} : memref<1x4x8x2048xbf16, #tpu.memory_space<vmem>>, vector<1x1x8x1024xbf16>,
    %cst_237 = arith.constant dense<0.000000e+00> : vector<8xf32>
    %382 = vector.multi_reduction <add>, %377, %cst_237 [1] : vector<8x1024xf32> to vector<8xf32>
    %383 = vector.shape_cast %382 : vector<8xf32> to vector<8x1xf32>
    %384 = arith.addf %325, %383 : vector<8x1xf32>
    %385 = arith.mulf %377, %375 : vector<8x1024xf32>
    %cst_238 = arith.constant dense<0.000000e+00> : vector<8xf32>
    %386 = vector.multi_reduction <add>, %385, %cst_238 [1] : vector<8x1024xf32> to vector<8xf32>
    %387 = vector.shape_cast %386 : vector<8xf32> to vector<8x1xf32>
    %388 = arith.addf %329, %387 : vector<8x1xf32>
    %c0_239 = arith.constant 0 : index
    %c2_240 = arith.constant 2 : index
    %c0_241 = arith.constant 0 : index
    %c0_242 = arith.constant 0 : index
    %389 = vector.load %arg7[%c0_239, %c2_240, %c0_241, %c0_242] : memref<1x4x8x2xf32, #tpu.memory_space<vmem>>, vector<1x1x8x1xf32>
    %390 = vector.shape_cast %389 : vector<1x1x8x1xf32> to vector<8x1xf32>
    %391 = vector.shape_cast %384 : vector<8x1xf32> to vector<1x1x8x1xf32>
    tpu.vector_store %arg7[%c0_239, %c2_240, %c0_241, %c0_242], %391 {strides = array<i32>} : memref<1x4x8x2xf32, #tpu.memory_space<vmem>>, vector<1x1x8x1xf32>,
    %c0_243 = arith.constant 0 : index
    %c2_244 = arith.constant 2 : index
    %c0_245 = arith.constant 0 : index
    %c1_246 = arith.constant 1 : index
    %392 = vector.load %arg7[%c0_243, %c2_244, %c0_245, %c1_246] : memref<1x4x8x2xf32, #tpu.memory_space<vmem>>, vector<1x1x8x1xf32>
    %393 = vector.shape_cast %392 : vector<1x1x8x1xf32> to vector<8x1xf32>
    %394 = vector.shape_cast %388 : vector<8x1xf32> to vector<1x1x8x1xf32>
    tpu.vector_store %arg7[%c0_243, %c2_244, %c0_245, %c1_246], %394 {strides = array<i32>} : memref<1x4x8x2xf32, #tpu.memory_space<vmem>>, vector<1x1x8x1xf32>,
    %cst_247 = arith.constant 0.000000e+00 : f32
    %395 = vector.broadcast %cst_247 : f32 to vector<8x1xf32>
    %cst_248 = arith.constant 0.000000e+00 : f32
    %396 = vector.broadcast %cst_248 : f32 to vector<8x1024xf32>
    %c12_249 = arith.constant 12 : index
    %c0_250 = arith.constant 0 : index
    %397 = vector.load %arg8[%c12_249, %c0_250] : memref<24x2432xbf16, #tpu.memory_space<vmem>>, vector<12x1024xbf16>
    %398 = vector.extract_strided_slice %18 {offsets = [0, 0, 0], sizes = [1, 8, 12], strides = [1, 1, 1]} : vector<9x8x12xbf16> to vector<1x8x12xbf16>
    %399 = vector.shape_cast %398 : vector<1x8x12xbf16> to vector<8x12xbf16>
    %cst_251 = arith.constant dense<0.000000e+00> : vector<8x1024xf32>
    %400 = tpu.matmul %399, %397, %cst_251 {dimension_numbers = #tpu.dot_dimension_numbers<[1], [0], [0], [1], [0, 0, 1, 1], [], []>} : vector<8x12xbf16>, vector<12x1024xbf16>, vector<8x1024xf32> -> vector<8x1024xf32>
    %401 = arith.addf %396, %400 : vector<8x1024xf32>
    %c12_252 = arith.constant 12 : index
    %c1_253 = arith.constant 1 : index
    %402 = vector.load %arg8[%c12_252, %c1_253] : memref<24x2432xbf16, #tpu.memory_space<vmem>>, vector<12x1024xbf16>
    %403 = vector.extract_strided_slice %18 {offsets = [1, 0, 0], sizes = [1, 8, 12], strides = [1, 1, 1]} : vector<9x8x12xbf16> to vector<1x8x12xbf16>
    %404 = vector.shape_cast %403 : vector<1x8x12xbf16> to vector<8x12xbf16>
    %cst_254 = arith.constant dense<0.000000e+00> : vector<8x1024xf32>
    %405 = tpu.matmul %404, %402, %cst_254 {dimension_numbers = #tpu.dot_dimension_numbers<[1], [0], [0], [1], [0, 0, 1, 1], [], []>} : vector<8x12xbf16>, vector<12x1024xbf16>, vector<8x1024xf32> -> vector<8x1024xf32>
    %406 = arith.addf %401, %405 : vector<8x1024xf32>
    %c12_255 = arith.constant 12 : index
    %c2_256 = arith.constant 2 : index
    %407 = vector.load %arg8[%c12_255, %c2_256] : memref<24x2432xbf16, #tpu.memory_space<vmem>>, vector<12x1024xbf16>
    %408 = vector.extract_strided_slice %18 {offsets = [2, 0, 0], sizes = [1, 8, 12], strides = [1, 1, 1]} : vector<9x8x12xbf16> to vector<1x8x12xbf16>
    %409 = vector.shape_cast %408 : vector<1x8x12xbf16> to vector<8x12xbf16>
    %cst_257 = arith.constant dense<0.000000e+00> : vector<8x1024xf32>
    %410 = tpu.matmul %409, %407, %cst_257 {dimension_numbers = #tpu.dot_dimension_numbers<[1], [0], [0], [1], [0, 0, 1, 1], [], []>} : vector<8x12xbf16>, vector<12x1024xbf16>, vector<8x1024xf32> -> vector<8x1024xf32>
    %411 = arith.addf %406, %410 : vector<8x1024xf32>
    %c12_258 = arith.constant 12 : index
    %c128_259 = arith.constant 128 : index
    %412 = vector.load %arg8[%c12_258, %c128_259] : memref<24x2432xbf16, #tpu.memory_space<vmem>>, vector<12x1024xbf16>
    %413 = vector.extract_strided_slice %18 {offsets = [3, 0, 0], sizes = [1, 8, 12], strides = [1, 1, 1]} : vector<9x8x12xbf16> to vector<1x8x12xbf16>
    %414 = vector.shape_cast %413 : vector<1x8x12xbf16> to vector<8x12xbf16>
    %cst_260 = arith.constant dense<0.000000e+00> : vector<8x1024xf32>
    %415 = tpu.matmul %414, %412, %cst_260 {dimension_numbers = #tpu.dot_dimension_numbers<[1], [0], [0], [1], [0, 0, 1, 1], [], []>} : vector<8x12xbf16>, vector<12x1024xbf16>, vector<8x1024xf32> -> vector<8x1024xf32>
    %416 = arith.addf %411, %415 : vector<8x1024xf32>
    %c12_261 = arith.constant 12 : index
    %c129_262 = arith.constant 129 : index
    %417 = vector.load %arg8[%c12_261, %c129_262] : memref<24x2432xbf16, #tpu.memory_space<vmem>>, vector<12x1024xbf16>
    %418 = vector.extract_strided_slice %18 {offsets = [4, 0, 0], sizes = [1, 8, 12], strides = [1, 1, 1]} : vector<9x8x12xbf16> to vector<1x8x12xbf16>
    %419 = vector.shape_cast %418 : vector<1x8x12xbf16> to vector<8x12xbf16>
    %cst_263 = arith.constant dense<0.000000e+00> : vector<8x1024xf32>
    %420 = tpu.matmul %419, %417, %cst_263 {dimension_numbers = #tpu.dot_dimension_numbers<[1], [0], [0], [1], [0, 0, 1, 1], [], []>} : vector<8x12xbf16>, vector<12x1024xbf16>, vector<8x1024xf32> -> vector<8x1024xf32>
    %421 = arith.addf %416, %420 : vector<8x1024xf32>
    %c12_264 = arith.constant 12 : index
    %c130_265 = arith.constant 130 : index
    %422 = vector.load %arg8[%c12_264, %c130_265] : memref<24x2432xbf16, #tpu.memory_space<vmem>>, vector<12x1024xbf16>
    %423 = vector.extract_strided_slice %18 {offsets = [5, 0, 0], sizes = [1, 8, 12], strides = [1, 1, 1]} : vector<9x8x12xbf16> to vector<1x8x12xbf16>
    %424 = vector.shape_cast %423 : vector<1x8x12xbf16> to vector<8x12xbf16>
    %cst_266 = arith.constant dense<0.000000e+00> : vector<8x1024xf32>
    %425 = tpu.matmul %424, %422, %cst_266 {dimension_numbers = #tpu.dot_dimension_numbers<[1], [0], [0], [1], [0, 0, 1, 1], [], []>} : vector<8x12xbf16>, vector<12x1024xbf16>, vector<8x1024xf32> -> vector<8x1024xf32>
    %426 = arith.addf %421, %425 : vector<8x1024xf32>
    %c12_267 = arith.constant 12 : index
    %c256_268 = arith.constant 256 : index
    %427 = vector.load %arg8[%c12_267, %c256_268] : memref<24x2432xbf16, #tpu.memory_space<vmem>>, vector<12x1024xbf16>
    %428 = vector.extract_strided_slice %18 {offsets = [6, 0, 0], sizes = [1, 8, 12], strides = [1, 1, 1]} : vector<9x8x12xbf16> to vector<1x8x12xbf16>
    %429 = vector.shape_cast %428 : vector<1x8x12xbf16> to vector<8x12xbf16>
    %cst_269 = arith.constant dense<0.000000e+00> : vector<8x1024xf32>
    %430 = tpu.matmul %429, %427, %cst_269 {dimension_numbers = #tpu.dot_dimension_numbers<[1], [0], [0], [1], [0, 0, 1, 1], [], []>} : vector<8x12xbf16>, vector<12x1024xbf16>, vector<8x1024xf32> -> vector<8x1024xf32>
    %431 = arith.addf %426, %430 : vector<8x1024xf32>
    %c12_270 = arith.constant 12 : index
    %c257_271 = arith.constant 257 : index
    %432 = vector.load %arg8[%c12_270, %c257_271] : memref<24x2432xbf16, #tpu.memory_space<vmem>>, vector<12x1024xbf16>
    %433 = vector.extract_strided_slice %18 {offsets = [7, 0, 0], sizes = [1, 8, 12], strides = [1, 1, 1]} : vector<9x8x12xbf16> to vector<1x8x12xbf16>
    %434 = vector.shape_cast %433 : vector<1x8x12xbf16> to vector<8x12xbf16>
    %cst_272 = arith.constant dense<0.000000e+00> : vector<8x1024xf32>
    %435 = tpu.matmul %434, %432, %cst_272 {dimension_numbers = #tpu.dot_dimension_numbers<[1], [0], [0], [1], [0, 0, 1, 1], [], []>} : vector<8x12xbf16>, vector<12x1024xbf16>, vector<8x1024xf32> -> vector<8x1024xf32>
    %436 = arith.addf %431, %435 : vector<8x1024xf32>
    %c12_273 = arith.constant 12 : index
    %c258_274 = arith.constant 258 : index
    %437 = vector.load %arg8[%c12_273, %c258_274] : memref<24x2432xbf16, #tpu.memory_space<vmem>>, vector<12x1024xbf16>
    %438 = vector.extract_strided_slice %18 {offsets = [8, 0, 0], sizes = [1, 8, 12], strides = [1, 1, 1]} : vector<9x8x12xbf16> to vector<1x8x12xbf16>
    %439 = vector.shape_cast %438 : vector<1x8x12xbf16> to vector<8x12xbf16>
    %cst_275 = arith.constant dense<0.000000e+00> : vector<8x1024xf32>
    %440 = tpu.matmul %439, %437, %cst_275 {dimension_numbers = #tpu.dot_dimension_numbers<[1], [0], [0], [1], [0, 0, 1, 1], [], []>} : vector<8x12xbf16>, vector<12x1024xbf16>, vector<8x1024xf32> -> vector<8x1024xf32>
    %441 = arith.addf %436, %440 : vector<8x1024xf32>
    %442 = vector.broadcast %19 : vector<1x1024xf32> to vector<8x1024xf32>
    %443 = arith.mulf %441, %442 : vector<8x1024xf32>
    %444 = arith.truncf %441 : vector<8x1024xf32> to vector<8x1024xbf16>
    %c0_276 = arith.constant 0 : index
    %c3_277 = arith.constant 3 : index
    %c0_278 = arith.constant 0 : index
    %c0_279 = arith.constant 0 : index
    %445 = vector.load %arg6[%c0_276, %c3_277, %c0_278, %c0_279] : memref<1x4x8x2048xbf16, #tpu.memory_space<vmem>>, vector<1x1x8x1024xbf16>
    %446 = vector.shape_cast %445 : vector<1x1x8x1024xbf16> to vector<8x1024xbf16>
    %447 = vector.shape_cast %444 : vector<8x1024xbf16> to vector<1x1x8x1024xbf16>
    tpu.vector_store %arg6[%c0_276, %c3_277, %c0_278, %c0_279], %447 {strides = array<i32>} : memref<1x4x8x2048xbf16, #tpu.memory_space<vmem>>, vector<1x1x8x1024xbf16>,
    %cst_280 = arith.constant dense<0.000000e+00> : vector<8xf32>
    %448 = vector.multi_reduction <add>, %443, %cst_280 [1] : vector<8x1024xf32> to vector<8xf32>
    %449 = vector.shape_cast %448 : vector<8xf32> to vector<8x1xf32>
    %450 = arith.addf %395, %449 : vector<8x1xf32>
    %451 = arith.mulf %443, %441 : vector<8x1024xf32>
    %cst_281 = arith.constant dense<0.000000e+00> : vector<8xf32>
    %452 = vector.multi_reduction <add>, %451, %cst_281 [1] : vector<8x1024xf32> to vector<8xf32>
    %453 = vector.shape_cast %452 : vector<8xf32> to vector<8x1xf32>
    %454 = arith.addf %395, %453 : vector<8x1xf32>
    %cst_282 = arith.constant 0.000000e+00 : f32
    %455 = vector.broadcast %cst_282 : f32 to vector<8x1024xf32>
    %c12_283 = arith.constant 12 : index
    %c1024_284 = arith.constant 1024 : index
    %456 = vector.load %arg8[%c12_283, %c1024_284] : memref<24x2432xbf16, #tpu.memory_space<vmem>>, vector<12x1024xbf16>
    %457 = vector.extract_strided_slice %18 {offsets = [0, 0, 0], sizes = [1, 8, 12], strides = [1, 1, 1]} : vector<9x8x12xbf16> to vector<1x8x12xbf16>
    %458 = vector.shape_cast %457 : vector<1x8x12xbf16> to vector<8x12xbf16>
    %cst_285 = arith.constant dense<0.000000e+00> : vector<8x1024xf32>
    %459 = tpu.matmul %458, %456, %cst_285 {dimension_numbers = #tpu.dot_dimension_numbers<[1], [0], [0], [1], [0, 0, 1, 1], [], []>} : vector<8x12xbf16>, vector<12x1024xbf16>, vector<8x1024xf32> -> vector<8x1024xf32>
    %460 = arith.addf %455, %459 : vector<8x1024xf32>
    %c12_286 = arith.constant 12 : index
    %c1025_287 = arith.constant 1025 : index
    %461 = vector.load %arg8[%c12_286, %c1025_287] : memref<24x2432xbf16, #tpu.memory_space<vmem>>, vector<12x1024xbf16>
    %462 = vector.extract_strided_slice %18 {offsets = [1, 0, 0], sizes = [1, 8, 12], strides = [1, 1, 1]} : vector<9x8x12xbf16> to vector<1x8x12xbf16>
    %463 = vector.shape_cast %462 : vector<1x8x12xbf16> to vector<8x12xbf16>
    %cst_288 = arith.constant dense<0.000000e+00> : vector<8x1024xf32>
    %464 = tpu.matmul %463, %461, %cst_288 {dimension_numbers = #tpu.dot_dimension_numbers<[1], [0], [0], [1], [0, 0, 1, 1], [], []>} : vector<8x12xbf16>, vector<12x1024xbf16>, vector<8x1024xf32> -> vector<8x1024xf32>
    %465 = arith.addf %460, %464 : vector<8x1024xf32>
    %c12_289 = arith.constant 12 : index
    %c1026_290 = arith.constant 1026 : index
    %466 = vector.load %arg8[%c12_289, %c1026_290] : memref<24x2432xbf16, #tpu.memory_space<vmem>>, vector<12x1024xbf16>
    %467 = vector.extract_strided_slice %18 {offsets = [2, 0, 0], sizes = [1, 8, 12], strides = [1, 1, 1]} : vector<9x8x12xbf16> to vector<1x8x12xbf16>
    %468 = vector.shape_cast %467 : vector<1x8x12xbf16> to vector<8x12xbf16>
    %cst_291 = arith.constant dense<0.000000e+00> : vector<8x1024xf32>
    %469 = tpu.matmul %468, %466, %cst_291 {dimension_numbers = #tpu.dot_dimension_numbers<[1], [0], [0], [1], [0, 0, 1, 1], [], []>} : vector<8x12xbf16>, vector<12x1024xbf16>, vector<8x1024xf32> -> vector<8x1024xf32>
    %470 = arith.addf %465, %469 : vector<8x1024xf32>
    %c12_292 = arith.constant 12 : index
    %c1152_293 = arith.constant 1152 : index
    %471 = vector.load %arg8[%c12_292, %c1152_293] : memref<24x2432xbf16, #tpu.memory_space<vmem>>, vector<12x1024xbf16>
    %472 = vector.extract_strided_slice %18 {offsets = [3, 0, 0], sizes = [1, 8, 12], strides = [1, 1, 1]} : vector<9x8x12xbf16> to vector<1x8x12xbf16>
    %473 = vector.shape_cast %472 : vector<1x8x12xbf16> to vector<8x12xbf16>
    %cst_294 = arith.constant dense<0.000000e+00> : vector<8x1024xf32>
    %474 = tpu.matmul %473, %471, %cst_294 {dimension_numbers = #tpu.dot_dimension_numbers<[1], [0], [0], [1], [0, 0, 1, 1], [], []>} : vector<8x12xbf16>, vector<12x1024xbf16>, vector<8x1024xf32> -> vector<8x1024xf32>
    %475 = arith.addf %470, %474 : vector<8x1024xf32>
    %c12_295 = arith.constant 12 : index
    %c1153_296 = arith.constant 1153 : index
    %476 = vector.load %arg8[%c12_295, %c1153_296] : memref<24x2432xbf16, #tpu.memory_space<vmem>>, vector<12x1024xbf16>
    %477 = vector.extract_strided_slice %18 {offsets = [4, 0, 0], sizes = [1, 8, 12], strides = [1, 1, 1]} : vector<9x8x12xbf16> to vector<1x8x12xbf16>
    %478 = vector.shape_cast %477 : vector<1x8x12xbf16> to vector<8x12xbf16>
    %cst_297 = arith.constant dense<0.000000e+00> : vector<8x1024xf32>
    %479 = tpu.matmul %478, %476, %cst_297 {dimension_numbers = #tpu.dot_dimension_numbers<[1], [0], [0], [1], [0, 0, 1, 1], [], []>} : vector<8x12xbf16>, vector<12x1024xbf16>, vector<8x1024xf32> -> vector<8x1024xf32>
    %480 = arith.addf %475, %479 : vector<8x1024xf32>
    %c12_298 = arith.constant 12 : index
    %c1154_299 = arith.constant 1154 : index
    %481 = vector.load %arg8[%c12_298, %c1154_299] : memref<24x2432xbf16, #tpu.memory_space<vmem>>, vector<12x1024xbf16>
    %482 = vector.extract_strided_slice %18 {offsets = [5, 0, 0], sizes = [1, 8, 12], strides = [1, 1, 1]} : vector<9x8x12xbf16> to vector<1x8x12xbf16>
    %483 = vector.shape_cast %482 : vector<1x8x12xbf16> to vector<8x12xbf16>
    %cst_300 = arith.constant dense<0.000000e+00> : vector<8x1024xf32>
    %484 = tpu.matmul %483, %481, %cst_300 {dimension_numbers = #tpu.dot_dimension_numbers<[1], [0], [0], [1], [0, 0, 1, 1], [], []>} : vector<8x12xbf16>, vector<12x1024xbf16>, vector<8x1024xf32> -> vector<8x1024xf32>
    %485 = arith.addf %480, %484 : vector<8x1024xf32>
    %c12_301 = arith.constant 12 : index
    %c1280_302 = arith.constant 1280 : index
    %486 = vector.load %arg8[%c12_301, %c1280_302] : memref<24x2432xbf16, #tpu.memory_space<vmem>>, vector<12x1024xbf16>
    %487 = vector.extract_strided_slice %18 {offsets = [6, 0, 0], sizes = [1, 8, 12], strides = [1, 1, 1]} : vector<9x8x12xbf16> to vector<1x8x12xbf16>
    %488 = vector.shape_cast %487 : vector<1x8x12xbf16> to vector<8x12xbf16>
    %cst_303 = arith.constant dense<0.000000e+00> : vector<8x1024xf32>
    %489 = tpu.matmul %488, %486, %cst_303 {dimension_numbers = #tpu.dot_dimension_numbers<[1], [0], [0], [1], [0, 0, 1, 1], [], []>} : vector<8x12xbf16>, vector<12x1024xbf16>, vector<8x1024xf32> -> vector<8x1024xf32>
    %490 = arith.addf %485, %489 : vector<8x1024xf32>
    %c12_304 = arith.constant 12 : index
    %c1281_305 = arith.constant 1281 : index
    %491 = vector.load %arg8[%c12_304, %c1281_305] : memref<24x2432xbf16, #tpu.memory_space<vmem>>, vector<12x1024xbf16>
    %492 = vector.extract_strided_slice %18 {offsets = [7, 0, 0], sizes = [1, 8, 12], strides = [1, 1, 1]} : vector<9x8x12xbf16> to vector<1x8x12xbf16>
    %493 = vector.shape_cast %492 : vector<1x8x12xbf16> to vector<8x12xbf16>
    %cst_306 = arith.constant dense<0.000000e+00> : vector<8x1024xf32>
    %494 = tpu.matmul %493, %491, %cst_306 {dimension_numbers = #tpu.dot_dimension_numbers<[1], [0], [0], [1], [0, 0, 1, 1], [], []>} : vector<8x12xbf16>, vector<12x1024xbf16>, vector<8x1024xf32> -> vector<8x1024xf32>
    %495 = arith.addf %490, %494 : vector<8x1024xf32>
    %c12_307 = arith.constant 12 : index
    %c1282_308 = arith.constant 1282 : index
    %496 = vector.load %arg8[%c12_307, %c1282_308] : memref<24x2432xbf16, #tpu.memory_space<vmem>>, vector<12x1024xbf16>
    %497 = vector.extract_strided_slice %18 {offsets = [8, 0, 0], sizes = [1, 8, 12], strides = [1, 1, 1]} : vector<9x8x12xbf16> to vector<1x8x12xbf16>
    %498 = vector.shape_cast %497 : vector<1x8x12xbf16> to vector<8x12xbf16>
    %cst_309 = arith.constant dense<0.000000e+00> : vector<8x1024xf32>
    %499 = tpu.matmul %498, %496, %cst_309 {dimension_numbers = #tpu.dot_dimension_numbers<[1], [0], [0], [1], [0, 0, 1, 1], [], []>} : vector<8x12xbf16>, vector<12x1024xbf16>, vector<8x1024xf32> -> vector<8x1024xf32>
    %500 = arith.addf %495, %499 : vector<8x1024xf32>
    %501 = vector.broadcast %19 : vector<1x1024xf32> to vector<8x1024xf32>
    %502 = arith.mulf %500, %501 : vector<8x1024xf32>
    %503 = arith.truncf %500 : vector<8x1024xf32> to vector<8x1024xbf16>
    %c0_310 = arith.constant 0 : index
    %c3_311 = arith.constant 3 : index
    %c0_312 = arith.constant 0 : index
    %c1024_313 = arith.constant 1024 : index
    %504 = vector.load %arg6[%c0_310, %c3_311, %c0_312, %c1024_313] : memref<1x4x8x2048xbf16, #tpu.memory_space<vmem>>, vector<1x1x8x1024xbf16>
    %505 = vector.shape_cast %504 : vector<1x1x8x1024xbf16> to vector<8x1024xbf16>
    %506 = vector.shape_cast %503 : vector<8x1024xbf16> to vector<1x1x8x1024xbf16>
    tpu.vector_store %arg6[%c0_310, %c3_311, %c0_312, %c1024_313], %506 {strides = array<i32>} : memref<1x4x8x2048xbf16, #tpu.memory_space<vmem>>, vector<1x1x8x1024xbf16>,
    %cst_314 = arith.constant dense<0.000000e+00> : vector<8xf32>
    %507 = vector.multi_reduction <add>, %502, %cst_314 [1] : vector<8x1024xf32> to vector<8xf32>
    %508 = vector.shape_cast %507 : vector<8xf32> to vector<8x1xf32>
    %509 = arith.addf %450, %508 : vector<8x1xf32>
    %510 = arith.mulf %502, %500 : vector<8x1024xf32>
    %cst_315 = arith.constant dense<0.000000e+00> : vector<8xf32>
    %511 = vector.multi_reduction <add>, %510, %cst_315 [1] : vector<8x1024xf32> to vector<8xf32>
    %512 = vector.shape_cast %511 : vector<8xf32> to vector<8x1xf32>
    %513 = arith.addf %454, %512 : vector<8x1xf32>
    %c0_316 = arith.constant 0 : index
    %c3_317 = arith.constant 3 : index
    %c0_318 = arith.constant 0 : index
    %c0_319 = arith.constant 0 : index
    %514 = vector.load %arg7[%c0_316, %c3_317, %c0_318, %c0_319] : memref<1x4x8x2xf32, #tpu.memory_space<vmem>>, vector<1x1x8x1xf32>
    %515 = vector.shape_cast %514 : vector<1x1x8x1xf32> to vector<8x1xf32>
    %516 = vector.shape_cast %509 : vector<8x1xf32> to vector<1x1x8x1xf32>
    tpu.vector_store %arg7[%c0_316, %c3_317, %c0_318, %c0_319], %516 {strides = array<i32>} : memref<1x4x8x2xf32, #tpu.memory_space<vmem>>, vector<1x1x8x1xf32>,
    %c0_320 = arith.constant 0 : index
    %c3_321 = arith.constant 3 : index
    %c0_322 = arith.constant 0 : index
    %c1_323 = arith.constant 1 : index
    %517 = vector.load %arg7[%c0_320, %c3_321, %c0_322, %c1_323] : memref<1x4x8x2xf32, #tpu.memory_space<vmem>>, vector<1x1x8x1xf32>
    %518 = vector.shape_cast %517 : vector<1x1x8x1xf32> to vector<8x1xf32>
    %519 = vector.shape_cast %513 : vector<8x1xf32> to vector<1x1x8x1xf32>
    tpu.vector_store %arg7[%c0_320, %c3_321, %c0_322, %c1_323], %519 {strides = array<i32>} : memref<1x4x8x2xf32, #tpu.memory_space<vmem>>, vector<1x1x8x1xf32>,
    return
  }
  func.func @transform_0(%arg0: i32, %arg1: i32) -> (i32, i32, i32, i32) {
    %c0_i32 = arith.constant 0 : i32
    %c0_i32_0 = arith.constant 0 : i32
    %c0_i32_1 = arith.constant 0 : i32
    return %arg0, %arg1, %c0_i32, %c0_i32_0 : i32, i32, i32, i32
  }
  func.func @transform_1(%arg0: i32, %arg1: i32) -> (i32, i32, i32, i32) {
    %c1_i32 = arith.constant 1 : i32
    %0 = arith.addi %arg1, %c1_i32 : i32
    %c0_i32 = arith.constant 0 : i32
    %c0_i32_0 = arith.constant 0 : i32
    %c0_i32_1 = arith.constant 0 : i32
    return %arg0, %0, %c0_i32, %c0_i32_0 : i32, i32, i32, i32
  }
  func.func @transform_2(%arg0: i32, %arg1: i32) -> (i32, i32, i32) {
    %c0_i32 = arith.constant 0 : i32
    %c0_i32_0 = arith.constant 0 : i32
    %c0_i32_1 = arith.constant 0 : i32
    %c0_i32_2 = arith.constant 0 : i32
    return %c0_i32, %c0_i32_0, %c0_i32_1 : i32, i32, i32
  }
  func.func @transform_3(%arg0: i32, %arg1: i32) -> (i32, i32) {
    %c0_i32 = arith.constant 0 : i32
    %c0_i32_0 = arith.constant 0 : i32
    %c0_i32_1 = arith.constant 0 : i32
    return %c0_i32, %c0_i32_0 : i32, i32
  }
  func.func @transform_4(%arg0: i32, %arg1: i32) -> (i32, i32, i32, i32) {
    %c0_i32 = arith.constant 0 : i32
    %c0_i32_0 = arith.constant 0 : i32
    %c0_i32_1 = arith.constant 0 : i32
    return %arg0, %arg1, %c0_i32, %c0_i32_0 : i32, i32, i32, i32
  }
  func.func @transform_5(%arg0: i32, %arg1: i32) -> (i32, i32, i32, i32) {
    %c0_i32 = arith.constant 0 : i32
    %c0_i32_0 = arith.constant 0 : i32
    %c0_i32_1 = arith.constant 0 : i32
    return %arg0, %arg1, %c0_i32, %c0_i32_0 : i32, i32, i32, i32
  }
}

module attributes {stable_mosaic.version = 11 : i64} {
  func.func @kernel(%arg0: i32, %arg1: i32, %arg2: memref<1x4x8x16x128xbf16, #tpu.memory_space<vmem>>, %arg3: memref<1x8x1x1xf32, #tpu.memory_space<vmem>>, %arg4: memref<1x8x1x1xf32, #tpu.memory_space<vmem>>, %arg5: memref<1x8x4x16x16xf32, #tpu.memory_space<vmem>>) attributes {dimension_semantics = [#tpu.dimension_semantics<parallel>, #tpu.dimension_semantics<parallel>], iteration_bounds = array<i64: 2, 4>, scalar_prefetch = 0 : i64, scratch_operands = 0 : i64, tpu.core_type = #tpu.core_type<tc>, window_params = [{transform_indices = @transform_0, window_bounds = array<i64: 1, 4, 8, 16, 128>}, {transform_indices = @transform_1, window_bounds = array<i64: 1, 8, 1, 1>}, {transform_indices = @transform_2, window_bounds = array<i64: 1, 8, 1, 1>}, {transform_indices = @transform_3, window_bounds = array<i64: 1, 8, 4, 16, 16>}]} {
    %c0 = arith.constant 0 : index
    %c0_0 = arith.constant 0 : index
    %c0_1 = arith.constant 0 : index
    %c0_2 = arith.constant 0 : index
    %0 = vector.load %arg3[%c0, %c0_0, %c0_1, %c0_2] : memref<1x8x1x1xf32, #tpu.memory_space<vmem>>, vector<1x8x1x1xf32>
    %1 = vector.shape_cast %0 : vector<1x8x1x1xf32> to vector<8x1x1xf32>
    %c0_3 = arith.constant 0 : index
    %c0_4 = arith.constant 0 : index
    %c0_5 = arith.constant 0 : index
    %c0_6 = arith.constant 0 : index
    %2 = vector.load %arg4[%c0_3, %c0_4, %c0_5, %c0_6] : memref<1x8x1x1xf32, #tpu.memory_space<vmem>>, vector<1x8x1x1xf32>
    %3 = vector.shape_cast %2 : vector<1x8x1x1xf32> to vector<8x1x1xf32>
    %c0_7 = arith.constant 0 : index
    %c0_8 = arith.constant 0 : index
    %c0_9 = arith.constant 0 : index
    %c0_10 = arith.constant 0 : index
    %c0_11 = arith.constant 0 : index
    %4 = vector.load %arg2[%c0_7, %c0_8, %c0_9, %c0_10, %c0_11] : memref<1x4x8x16x128xbf16, #tpu.memory_space<vmem>>, vector<1x1x8x16x128xbf16>
    %5 = vector.shape_cast %4 : vector<1x1x8x16x128xbf16> to vector<8x16x128xbf16>
    %6 = arith.extf %5 : vector<8x16x128xbf16> to vector<8x16x128xf32>
    %7 = vector.broadcast %1 : vector<8x1x1xf32> to vector<8x16x128xf32>
    %8 = arith.mulf %6, %7 : vector<8x16x128xf32>
    %9 = vector.broadcast %3 : vector<8x1x1xf32> to vector<8x16x128xf32>
    %10 = arith.addf %8, %9 : vector<8x16x128xf32>
    %cst = arith.constant 0.000000e+00 : f32
    %11 = vector.broadcast %cst : f32 to vector<8x16x128xf32>
    %12 = arith.cmpf oge, %10, %11 : vector<8x16x128xf32>
    %cst_12 = arith.constant 1.000000e-01 : f32
    %13 = vector.broadcast %cst_12 : f32 to vector<8x16x128xf32>
    %14 = arith.mulf %13, %10 : vector<8x16x128xf32>
    %15 = arith.select %12, %10, %14 : vector<8x16x128xi1>, vector<8x16x128xf32>
    %16 = vector.extract_strided_slice %15 {offsets = [0, 0, 0], sizes = [8, 16, 16], strides = [1, 1, 1]} : vector<8x16x128xf32> to vector<8x16x16xf32>
    %c0_13 = arith.constant 0 : index
    %c0_14 = arith.constant 0 : index
    %c0_15 = arith.constant 0 : index
    %c0_16 = arith.constant 0 : index
    %c0_17 = arith.constant 0 : index
    %17 = vector.load %arg5[%c0_13, %c0_14, %c0_15, %c0_16, %c0_17] : memref<1x8x4x16x16xf32, #tpu.memory_space<vmem>>, vector<1x8x1x16x16xf32>
    %18 = vector.shape_cast %17 : vector<1x8x1x16x16xf32> to vector<8x16x16xf32>
    %19 = vector.shape_cast %16 : vector<8x16x16xf32> to vector<1x8x1x16x16xf32>
    tpu.vector_store %arg5[%c0_13, %c0_14, %c0_15, %c0_16, %c0_17], %19 {strides = array<i32>} : memref<1x8x4x16x16xf32, #tpu.memory_space<vmem>>, vector<1x8x1x16x16xf32>,
    %c0_18 = arith.constant 0 : index
    %c1 = arith.constant 1 : index
    %c0_19 = arith.constant 0 : index
    %c0_20 = arith.constant 0 : index
    %c0_21 = arith.constant 0 : index
    %20 = vector.load %arg2[%c0_18, %c1, %c0_19, %c0_20, %c0_21] : memref<1x4x8x16x128xbf16, #tpu.memory_space<vmem>>, vector<1x1x8x16x128xbf16>
    %21 = vector.shape_cast %20 : vector<1x1x8x16x128xbf16> to vector<8x16x128xbf16>
    %22 = arith.extf %21 : vector<8x16x128xbf16> to vector<8x16x128xf32>
    %23 = vector.broadcast %1 : vector<8x1x1xf32> to vector<8x16x128xf32>
    %24 = arith.mulf %22, %23 : vector<8x16x128xf32>
    %25 = vector.broadcast %3 : vector<8x1x1xf32> to vector<8x16x128xf32>
    %26 = arith.addf %24, %25 : vector<8x16x128xf32>
    %cst_22 = arith.constant 0.000000e+00 : f32
    %27 = vector.broadcast %cst_22 : f32 to vector<8x16x128xf32>
    %28 = arith.cmpf oge, %26, %27 : vector<8x16x128xf32>
    %cst_23 = arith.constant 1.000000e-01 : f32
    %29 = vector.broadcast %cst_23 : f32 to vector<8x16x128xf32>
    %30 = arith.mulf %29, %26 : vector<8x16x128xf32>
    %31 = arith.select %28, %26, %30 : vector<8x16x128xi1>, vector<8x16x128xf32>
    %32 = vector.extract_strided_slice %31 {offsets = [0, 0, 0], sizes = [8, 16, 16], strides = [1, 1, 1]} : vector<8x16x128xf32> to vector<8x16x16xf32>
    %c0_24 = arith.constant 0 : index
    %c0_25 = arith.constant 0 : index
    %c1_26 = arith.constant 1 : index
    %c0_27 = arith.constant 0 : index
    %c0_28 = arith.constant 0 : index
    %33 = vector.load %arg5[%c0_24, %c0_25, %c1_26, %c0_27, %c0_28] : memref<1x8x4x16x16xf32, #tpu.memory_space<vmem>>, vector<1x8x1x16x16xf32>
    %34 = vector.shape_cast %33 : vector<1x8x1x16x16xf32> to vector<8x16x16xf32>
    %35 = vector.shape_cast %32 : vector<8x16x16xf32> to vector<1x8x1x16x16xf32>
    tpu.vector_store %arg5[%c0_24, %c0_25, %c1_26, %c0_27, %c0_28], %35 {strides = array<i32>} : memref<1x8x4x16x16xf32, #tpu.memory_space<vmem>>, vector<1x8x1x16x16xf32>,
    %c0_29 = arith.constant 0 : index
    %c2 = arith.constant 2 : index
    %c0_30 = arith.constant 0 : index
    %c0_31 = arith.constant 0 : index
    %c0_32 = arith.constant 0 : index
    %36 = vector.load %arg2[%c0_29, %c2, %c0_30, %c0_31, %c0_32] : memref<1x4x8x16x128xbf16, #tpu.memory_space<vmem>>, vector<1x1x8x16x128xbf16>
    %37 = vector.shape_cast %36 : vector<1x1x8x16x128xbf16> to vector<8x16x128xbf16>
    %38 = arith.extf %37 : vector<8x16x128xbf16> to vector<8x16x128xf32>
    %39 = vector.broadcast %1 : vector<8x1x1xf32> to vector<8x16x128xf32>
    %40 = arith.mulf %38, %39 : vector<8x16x128xf32>
    %41 = vector.broadcast %3 : vector<8x1x1xf32> to vector<8x16x128xf32>
    %42 = arith.addf %40, %41 : vector<8x16x128xf32>
    %cst_33 = arith.constant 0.000000e+00 : f32
    %43 = vector.broadcast %cst_33 : f32 to vector<8x16x128xf32>
    %44 = arith.cmpf oge, %42, %43 : vector<8x16x128xf32>
    %cst_34 = arith.constant 1.000000e-01 : f32
    %45 = vector.broadcast %cst_34 : f32 to vector<8x16x128xf32>
    %46 = arith.mulf %45, %42 : vector<8x16x128xf32>
    %47 = arith.select %44, %42, %46 : vector<8x16x128xi1>, vector<8x16x128xf32>
    %48 = vector.extract_strided_slice %47 {offsets = [0, 0, 0], sizes = [8, 16, 16], strides = [1, 1, 1]} : vector<8x16x128xf32> to vector<8x16x16xf32>
    %c0_35 = arith.constant 0 : index
    %c0_36 = arith.constant 0 : index
    %c2_37 = arith.constant 2 : index
    %c0_38 = arith.constant 0 : index
    %c0_39 = arith.constant 0 : index
    %49 = vector.load %arg5[%c0_35, %c0_36, %c2_37, %c0_38, %c0_39] : memref<1x8x4x16x16xf32, #tpu.memory_space<vmem>>, vector<1x8x1x16x16xf32>
    %50 = vector.shape_cast %49 : vector<1x8x1x16x16xf32> to vector<8x16x16xf32>
    %51 = vector.shape_cast %48 : vector<8x16x16xf32> to vector<1x8x1x16x16xf32>
    tpu.vector_store %arg5[%c0_35, %c0_36, %c2_37, %c0_38, %c0_39], %51 {strides = array<i32>} : memref<1x8x4x16x16xf32, #tpu.memory_space<vmem>>, vector<1x8x1x16x16xf32>,
    %c0_40 = arith.constant 0 : index
    %c3 = arith.constant 3 : index
    %c0_41 = arith.constant 0 : index
    %c0_42 = arith.constant 0 : index
    %c0_43 = arith.constant 0 : index
    %52 = vector.load %arg2[%c0_40, %c3, %c0_41, %c0_42, %c0_43] : memref<1x4x8x16x128xbf16, #tpu.memory_space<vmem>>, vector<1x1x8x16x128xbf16>
    %53 = vector.shape_cast %52 : vector<1x1x8x16x128xbf16> to vector<8x16x128xbf16>
    %54 = arith.extf %53 : vector<8x16x128xbf16> to vector<8x16x128xf32>
    %55 = vector.broadcast %1 : vector<8x1x1xf32> to vector<8x16x128xf32>
    %56 = arith.mulf %54, %55 : vector<8x16x128xf32>
    %57 = vector.broadcast %3 : vector<8x1x1xf32> to vector<8x16x128xf32>
    %58 = arith.addf %56, %57 : vector<8x16x128xf32>
    %cst_44 = arith.constant 0.000000e+00 : f32
    %59 = vector.broadcast %cst_44 : f32 to vector<8x16x128xf32>
    %60 = arith.cmpf oge, %58, %59 : vector<8x16x128xf32>
    %cst_45 = arith.constant 1.000000e-01 : f32
    %61 = vector.broadcast %cst_45 : f32 to vector<8x16x128xf32>
    %62 = arith.mulf %61, %58 : vector<8x16x128xf32>
    %63 = arith.select %60, %58, %62 : vector<8x16x128xi1>, vector<8x16x128xf32>
    %64 = vector.extract_strided_slice %63 {offsets = [0, 0, 0], sizes = [8, 16, 16], strides = [1, 1, 1]} : vector<8x16x128xf32> to vector<8x16x16xf32>
    %c0_46 = arith.constant 0 : index
    %c0_47 = arith.constant 0 : index
    %c3_48 = arith.constant 3 : index
    %c0_49 = arith.constant 0 : index
    %c0_50 = arith.constant 0 : index
    %65 = vector.load %arg5[%c0_46, %c0_47, %c3_48, %c0_49, %c0_50] : memref<1x8x4x16x16xf32, #tpu.memory_space<vmem>>, vector<1x8x1x16x16xf32>
    %66 = vector.shape_cast %65 : vector<1x8x1x16x16xf32> to vector<8x16x16xf32>
    %67 = vector.shape_cast %64 : vector<8x16x16xf32> to vector<1x8x1x16x16xf32>
    tpu.vector_store %arg5[%c0_46, %c0_47, %c3_48, %c0_49, %c0_50], %67 {strides = array<i32>} : memref<1x8x4x16x16xf32, #tpu.memory_space<vmem>>, vector<1x8x1x16x16xf32>,
    return
  }
  func.func @transform_0(%arg0: i32, %arg1: i32) -> (i32, i32, i32, i32, i32) {
    %c0_i32 = arith.constant 0 : i32
    %c0_i32_0 = arith.constant 0 : i32
    %c0_i32_1 = arith.constant 0 : i32
    %c0_i32_2 = arith.constant 0 : i32
    return %arg0, %arg1, %c0_i32, %c0_i32_0, %c0_i32_1 : i32, i32, i32, i32, i32
  }
  func.func @transform_1(%arg0: i32, %arg1: i32) -> (i32, i32, i32, i32) {
    %c0_i32 = arith.constant 0 : i32
    %c0_i32_0 = arith.constant 0 : i32
    %c0_i32_1 = arith.constant 0 : i32
    %c0_i32_2 = arith.constant 0 : i32
    return %arg0, %c0_i32, %c0_i32_0, %c0_i32_1 : i32, i32, i32, i32
  }
  func.func @transform_2(%arg0: i32, %arg1: i32) -> (i32, i32, i32, i32) {
    %c0_i32 = arith.constant 0 : i32
    %c0_i32_0 = arith.constant 0 : i32
    %c0_i32_1 = arith.constant 0 : i32
    %c0_i32_2 = arith.constant 0 : i32
    return %arg0, %c0_i32, %c0_i32_0, %c0_i32_1 : i32, i32, i32, i32
  }
  func.func @transform_3(%arg0: i32, %arg1: i32) -> (i32, i32, i32, i32, i32) {
    %c0_i32 = arith.constant 0 : i32
    %c0_i32_0 = arith.constant 0 : i32
    %c0_i32_1 = arith.constant 0 : i32
    %c0_i32_2 = arith.constant 0 : i32
    return %arg0, %c0_i32, %arg1, %c0_i32_0, %c0_i32_1 : i32, i32, i32, i32, i32
  }
}

</mosaic_0001>

<bundles_post_ra>
// kernel: conv_block_forward.3
= control target key start
LH: loop header
LB: loop body
LE: loop exit
PB: predicated region body
PF: predicated region fallthrough
CT: control target
= control target key end

     0   :  { %8 = vsyncpa [#allocation3], 0  ;;  %s2276_s0 = inlined_call_operand.vmem [shape: bf16[2,16,8,16,128], index: 0, kind: input, shape index: {}]   ;;  %s2277_s1 = inlined_call_operand.vmem [shape: f32[2,8,1,1], index: 1, kind: input, shape index: {}]   ;;  %s2278_s2 = inlined_call_operand.vmem [shape: f32[2,8,1,1], index: 2, kind: input, shape index: {}]   ;;  %s2279_s3 = inlined_call_operand.hbm [shape: f32[2,8,16,16,16], index: 3, kind: output, shape index: {}]  }
   0x1   :  { %10 = vsyncpa [#allocation3 + $0x1], 0  ;;  %s1543_s12 = smov 0   ;;  %s1545_s13 = smov 0  }
   0x2   :  { %s1547_s14 = smov 0   ;;  %s1549_s15 = smov 0  }
   0x3   :  { %s1551_s16 = smov 0   ;;  %s1553_s17 = smov 0  }
   0x4   :  { %s1555_s18 = smov 0   ;;  %s1557_s19 = smov 0  }
   0x5 LB: > { %s1071_s20 = sadd.s32 4294967295, %s1514_s19   ;;  %s1072_s21 = sadd.s32 4294967294, %s1514_s19   ;;  %s1514_s19 = sphi %s1557_s19, %s16_s19   ;;  %s1510_s18 = sphi %s1555_s18, %s2363_s18   ;;  %s1506_s17 = sphi %s1553_s17, %s2362_s17   ;;  %s1502_s16 = sphi %s1551_s16, %s2361_s16   ;;  %s1498_s15 = sphi %s1549_s15, %s2360_s15   ;;  %s1494_s14 = sphi %s1547_s14, %s2359_s14   ;;  %s1490_s13 = sphi %s1545_s13, %s2358_s13   ;;  %s1486_s12 = sphi %s1543_s12, %s2357_s12  }
   0x6   : > { %s25_s22 = sadd.s32 1, %s1506_s17  ;;  %s28_s23 = sadd.s32 1, %s1510_s18 }
   0x7   : > { %p26_p0 = scmp.ge.s32.totalorder %s25_s22, 4  ;;  %p127_p1 = scmp.ne.s32.totalorder %s1494_s14, %s1490_s13 }
   0x8   : > { %p128_p2 = scmp.eq.s32.totalorder %s1071_s20, 7  ;;  %p133_p5 = scmp.ne.s32.totalorder %s1490_s13, %s1486_s12 }
   0x9   : > { %s2365_s22 = smov (%p26_p0, %s25_s22), 0  ;;  %s2367_s23 = smov (!%p26_p0, %s28_s23), %s1510_s18 }
   0xa   : > { %s113_s24 = ssub.s32 %s1506_s17, %s2365_s22  ;;  %p1594_p3 = por %p128_p2, %p127_p1 }
   0xb   : > { %p30_p4 = scmp.ge.s32.totalorder %s2367_s23, 2  ;;  %p134_p6 = scmp.eq.s32.totalorder %s1072_s21, 7 }
   0xc   : > { %p1075_p7 = scmp.ge.s32.totalorder %s1514_s19, 1  ;;  %p180_p9 = scmp.lt.s32.totalorder %s1514_s19, 9 }
   0xd   : > { %s2369_s23 = smov (%p30_p4, %s2367_s23), 0  ;;  %p1603_p8 = por %p134_p6, %p133_p5 }
   0xe   : > { %s112_s27 = ssub.s32 %s1510_s18, %s2369_s23  ;;  %s117_s28 = sadd.s32 1, %s1494_s14 }
   0xf   : > { %s114_s29 = sor.u32 %s113_s24, %s112_s27  ;;  %p181_p10 = pnand %p1075_p7, %p180_p9 }
  0x10   : > { %p115_p11 = scmp.eq.s32.totalorder %s114_s29, 0 }
  0x11   : > { %184 = sbr.rel (%p181_p10) target bundleno = 263 (0x107), region = 32 }
  0x12   : > { %s1612_s30 = scalar_select %p115_p11, %s1494_s14, %s117_s28  }
  0x18   : > { %p218_p12 = scmp.lt.s32.totalorder %s1502_s16, 1  ;;  %v1516_v0 = vmov 0   ;;  %s214_s20 = sand.u32 1, %s1490_s13   ;;  %vm509_vm0 = vcmask 130048  }
  0x19   : > { %1447 = vset.pattern.permute.xlu1 %v1516_v0  ;;  %1446 = vset.pattern.permute.xlu0 %v1516_v0  ;;  %s1077_s21 = sshll.u32 %s1498_s15, 2  ;;  %s917_s9 = scalar_lea.sflag [#allocation3], %s214_s20 }
  0x1a   : > { %s1616_s4 = scalar_select %p218_p12, %s1502_s16, 1 }
  0x1b   : > { %p220_p13 = scmp.lt.s32.totalorder %s1077_s21, 15 }
  0x1c   : > { %s1081_s5 = sshll.u32 %s1616_s4, 3  ;;  %s1079_s27 = sshll.u32 %s1616_s4, 8 }
  0x1d   : > { %s231_s8 = scalar_lea.vmem %s2277_s1, %s1081_s5  ;;  %s235_s11 = scalar_lea.vmem %s2278_s2, %s1081_s5 }
  0x1e   : > { %v1085_v1 = vld [vmem:[%s231_s8 + $0x2] ss:$0 sm:$0xff]  ;;  %v1083_v2 = vld [vmem:[%s231_s8] ss:$0 sm:$0xff]  ;;  %v1086_v3 = vld [vmem:[%s231_s8 + $0x3] ss:$0 sm:$0xff] }
  0x1f   : > { %334 = vperm.xlu1 %1447, %v1085_v1   ;;  %326 = vperm.xlu0 %1446, %v1083_v2   ;;  %v1084_v4 = vld [vmem:[%s231_s8 + $0x1] ss:$0 sm:$0xff]  ;;  %v1088_v5 = vld [vmem:[%s231_s8 + $0x5] ss:$0 sm:$0xff]  ;;  %v1087_v6 = vld [vmem:[%s231_s8 + $0x4] ss:$0 sm:$0xff] }
  0x20   : > { %v1090_v7 = vld [vmem:[%s231_s8 + $0x7] ss:$0 sm:$0xff]  ;;  %v1089_v8 = vld [vmem:[%s231_s8 + $0x6] ss:$0 sm:$0xff]  ;;  %v1092_v9 = vld [vmem:[%s235_s11 + $0x1] ss:$0 sm:$0xff] }
  0x21   : > { %v1091_v10 = vld [vmem:[%s235_s11] ss:$0 sm:$0xff]  ;;  %v1094_v11 = vld [vmem:[%s235_s11 + $0x3] ss:$0 sm:$0xff]  ;;  %v1093_v12 = vld [vmem:[%s235_s11 + $0x2] ss:$0 sm:$0xff] }
  0x22   : > { %v1096_v13 = vld [vmem:[%s235_s11 + $0x5] ss:$0 sm:$0xff]  ;;  %v1095_v14 = vld [vmem:[%s235_s11 + $0x4] ss:$0 sm:$0xff]  ;;  %v1098_v15 = vld [vmem:[%s235_s11 + $0x7] ss:$0 sm:$0xff] }
  0x23   : > { %338 = vperm.xlu1 %1447, %v1086_v3   ;;  %330 = vperm.xlu0 %1446, %v1084_v4   ;;  %v1097_v16 = vld [vmem:[%s235_s11 + $0x6] ss:$0 sm:$0xff]  ;;  %s2371_s21 = smov (!%p220_p13, %s1077_s21), 15  ;;  %s2003_s4 = sshll.u32 %s214_s20, 9 }
  0x24   : > { %s1078_s24 = sshll.u32 %s2371_s21, 4  ;;  %s2038_s8 = scalar_lea.vmem [#allocation2], %s2003_s4 }
  0x25   : > { %s224_s28 = sadd.s32 %s1079_s27, %s1078_s24 }
  0x26   : > { %s1080_s29 = sshll.u32 %s224_s28, 2 }
  0x27   : > { %346 = vperm.xlu1 %1447, %v1088_v5   ;;  %342 = vperm.xlu0 %1446, %v1087_v6   ;;  %s1631_s7 = scalar_lea.vmem %s2276_s0, %s1080_s29 }
  0x28   : > { %v1634_v17 = vld [vmem:[%s1631_s7 + $0x10] sm:$0xff]   ;;  %v1646_v21 = vld [vmem:[%s1631_s7] sm:$0xff]   ;;  %v1666_v33 = vld [vmem:[%s1631_s7 + $0x18] sm:$0xff]  }
  0x29   : > { %v1637_v18 = vld [vmem:[%s1631_s7 + $0x50] sm:$0xff]   ;;  %v1649_v22 = vld [vmem:[%s1631_s7 + $0x40] sm:$0xff]   ;;  %v1213_v23 = vunpack.c.l.bf16 %v1634_v17  ;;  %v1214_v24 = vunpack.c.h.bf16 %v1634_v17  ;;  %v1669_v34 = vld [vmem:[%s1631_s7 + $0x58] sm:$0xff]   ;;  %v1205_v35 = vunpack.c.l.bf16 %v1646_v21  ;;  %v1206_v36 = vunpack.c.h.bf16 %v1646_v21 }
  0x2a   : > { %v1640_v19 = vld [vmem:[%s1631_s7 + $0x90] sm:$0xff]   ;;  %v1245_v25 = vunpack.c.l.bf16 %v1637_v18  ;;  %v1246_v26 = vunpack.c.h.bf16 %v1637_v18  ;;  %v1656_v27 = vld [vmem:[%s1631_s7 + $0x80] sm:$0xff]   ;;  %v1237_v37 = vunpack.c.l.bf16 %v1649_v22  ;;  %v1238_v38 = vunpack.c.h.bf16 %v1649_v22  ;;  %v1676_v39 = vld [vmem:[%s1631_s7 + $0x98] sm:$0xff]  }
  0x2b   : > { %354 = vperm.xlu1 %1447, %v1090_v7   ;;  %350 = vperm.xlu0 %1446, %v1089_v8   ;;  %v1643_v20 = vld [vmem:[%s1631_s7 + $0xd0] sm:$0xff]   ;;  %v1659_v28 = vld [vmem:[%s1631_s7 + $0xc0] sm:$0xff]   ;;  %v1277_v29 = vunpack.c.l.bf16 %v1640_v19  ;;  %v1278_v30 = vunpack.c.h.bf16 %v1640_v19  ;;  %v1679_v40 = vld [vmem:[%s1631_s7 + $0xd8] sm:$0xff]   ;;  %v1269_v41 = vunpack.c.l.bf16 %v1656_v27  ;;  %v1270_v42 = vunpack.c.h.bf16 %v1656_v27 }
  0x2c   : > { %v1309_v31 = vunpack.c.l.bf16 %v1643_v20  ;;  %v1310_v32 = vunpack.c.h.bf16 %v1643_v20  ;;  %v1301_v43 = vunpack.c.l.bf16 %v1659_v28  ;;  %v1302_v44 = vunpack.c.h.bf16 %v1659_v28  ;;  %v1686_v45 = vld [vmem:[%s1631_s7 + $0x8] sm:$0xff]   ;;  %v1726_v5 = vld [vmem:[%s1631_s7 + $0x20] sm:$0xff]   ;;  %v1746_v8 = vld [vmem:[%s1631_s7 + $0x38] sm:$0xff]  }
  0x2d   : > { %v1689_v46 = vld [vmem:[%s1631_s7 + $0x48] sm:$0xff]   ;;  %v1217_v47 = vunpack.c.l.bf16 %v1666_v33  ;;  %v1218_v48 = vunpack.c.h.bf16 %v1666_v33  ;;  %v1249_v49 = vunpack.c.l.bf16 %v1669_v34  ;;  %v1250_v50 = vunpack.c.h.bf16 %v1669_v34  ;;  %v1729_v6 = vld [vmem:[%s1631_s7 + $0x60] sm:$0xff]   ;;  %v1749_v7 = vld [vmem:[%s1631_s7 + $0x78] sm:$0xff]  }
  0x2e   : > { %v1696_v51 = vld [vmem:[%s1631_s7 + $0x88] sm:$0xff]   ;;  %v1281_v53 = vunpack.c.l.bf16 %v1676_v39  ;;  %v1759_v3 = vld [vmem:[%s1631_s7 + $0xf8] sm:$0xff]   ;;  %v1766_v1 = vld [vmem:[%s1631_s7 + $0x30] sm:$0xff]   ;;  %v2283_v33 = vunpack.c.l.bf16 %v1679_v40  ;;  %v2285_v34 = vunpack.c.l.bf16 %v1686_v45  ;;  %v2302_v62 = vunpack.c.h.bf16 %v1726_v5 }
  0x2f   : > { %418 = vperm.xlu1 %1447, %v1092_v9   ;;  %414 = vperm.xlu0 %1446, %v1091_v10   ;;  %v1699_v52 = vld [vmem:[%s1631_s7 + $0xc8] sm:$0xff]   ;;  %v1769_v9 = vld [vmem:[%s1631_s7 + $0x70] sm:$0xff]  }
  0x30   : > { %v1706_v57 = vld [vmem:[%s1631_s7 + $0x28] sm:$0xff]   ;;  %v1776_v60 = vld [vmem:[%s1631_s7 + $0xb0] sm:$0xff]  }
  0x31   : > { %v1709_v58 = vld [vmem:[%s1631_s7 + $0x68] sm:$0xff]  }
  0x32   : > { %v1716_v63 = vld [vmem:[%s1631_s7 + $0xa8] sm:$0xff]  }
  0x33   : > { %426 = vperm.xlu1 %1447, %v1094_v11   ;;  %422 = vperm.xlu0 %1446, %v1093_v12   ;;  %v1719_v0 = vld [vmem:[%s1631_s7 + $0xe8] sm:$0xff]   ;;  %v1736_v11 = vld [vmem:[%s1631_s7 + $0xa0] sm:$0xff]  }
  0x34   : > { %v1739_v12 = vld [vmem:[%s1631_s7 + $0xe0] sm:$0xff]   ;;  %v2300_v2 = vunpack.c.h.bf16 %v1719_v0 }
  0x37   : > { %434 = vperm.xlu1 %1447, %v1096_v13   ;;  %430 = vperm.xlu0 %1446, %v1095_v14   ;;  %v1756_v14 = vld [vmem:[%s1631_s7 + $0xb8] sm:$0xff]   ;;  %v2306_v13 = vunpack.c.h.bf16 %v1729_v6 }
  0x3b   : > { %442 = vperm.xlu1 %1447, %v1098_v15   ;;  %438 = vperm.xlu0 %1446, %v1097_v16   ;;  %v1779_v16 = vld [vmem:[%s1631_s7 + $0xf0] sm:$0xff]   ;;  %v2293_v15 = vunpack.c.l.bf16 %v1706_v57 }
  0x9e   : > { %v335_v56 = vpop.permute.xlu1 %334  ;;  %v327_v55 = vpop.permute.xlu0 %326 }
  0x9f   : > { %v1795_v59 = vmul.f32 %v1213_v23, %v335_v56  ;;  %v1799_v4 = vmul.f32 %v1214_v24, %v335_v56  ;;  %v1803_v61 = vmul.f32 %v1245_v25, %v335_v56  ;;  %v1807_v54 = vmul.f32 %v1246_v26, %v335_v56 }
  0xa0   : > { %v1811_v10 = vmul.f32 %v1277_v29, %v335_v56  ;;  %v1815_v23 = vmul.f32 %v1278_v30, %v335_v56  ;;  %v1819_v17 = vmul.f32 %v1309_v31, %v335_v56  ;;  %v1823_v24 = vmul.f32 %v1310_v32, %v335_v56 }
  0xa1   : > { %v1827_v18 = vmul.f32 %v1205_v35, %v327_v55  ;;  %v1831_v25 = vmul.f32 %v1206_v36, %v327_v55  ;;  %v1835_v19 = vmul.f32 %v1237_v37, %v327_v55  ;;  %v1839_v26 = vmul.f32 %v1238_v38, %v327_v55 }
  0xa2   : > { %v1843_v20 = vmul.f32 %v1269_v41, %v327_v55  ;;  %v1847_v29 = vmul.f32 %v1270_v42, %v327_v55  ;;  %v1851_v21 = vmul.f32 %v1301_v43, %v327_v55  ;;  %v1855_v30 = vmul.f32 %v1302_v44, %v327_v55  ;;  %v339_v31 = vpop.permute.xlu1 %338  ;;  %v331_v22 = vpop.permute.xlu0 %330 }
  0xa3   : > { %v1859_v32 = vmul.f32 %v1217_v47, %v339_v31  ;;  %v1863_v35 = vmul.f32 %v1218_v48, %v339_v31  ;;  %v1867_v27 = vmul.f32 %v1249_v49, %v339_v31  ;;  %v1871_v36 = vmul.f32 %v1250_v50, %v339_v31 }
  0xa4   : > { %v1875_v28 = vmul.f32 %v1281_v53, %v339_v31  ;;  %v2282_v37 = vunpack.c.h.bf16 %v1676_v39  ;;  %v1883_v41 = vmul.f32 %v2283_v33, %v339_v31  ;;  %v2284_v42 = vunpack.c.h.bf16 %v1679_v40 }
  0xa5   : > { %v359_v44 = vmul.f32 %v2285_v34, %v331_v22  ;;  %v2286_v47 = vunpack.c.h.bf16 %v1686_v45  ;;  %v2287_v49 = vunpack.c.l.bf16 %v1689_v46  ;;  %v2288_v39 = vunpack.c.h.bf16 %v1689_v46 }
  0xa6   : > { %v1879_v38 = vmul.f32 %v2282_v37, %v339_v31  ;;  %v1887_v43 = vmul.f32 %v2284_v42, %v339_v31  ;;  %v2289_v55 = vunpack.c.l.bf16 %v1696_v51  ;;  %v2290_v37 = vunpack.c.h.bf16 %v1696_v51  ;;  %v347_v45 = vpop.permute.xlu1 %346 }
  0xa7   : > { %v360_v48 = vmul.f32 %v2286_v47, %v331_v22  ;;  %v561_v50 = vmul.f32 %v2287_v49, %v331_v22  ;;  %v562_v53 = vmul.f32 %v2288_v39, %v331_v22  ;;  %v2291_v31 = vunpack.c.l.bf16 %v1699_v52  ;;  %v343_v47 = vpop.permute.xlu0 %342 }
  0xa8   : > { %v691_v56 = vmul.f32 %v2289_v55, %v331_v22  ;;  %v692_v40 = vmul.f32 %v2290_v37, %v331_v22  ;;  %v2292_v42 = vunpack.c.h.bf16 %v1699_v52  ;;  %v1907_v49 = vmul.f32 %v2293_v15, %v347_v45 }
  0xa9   : > { %v821_v33 = vmul.f32 %v2291_v31, %v331_v22  ;;  %v2294_v46 = vunpack.c.h.bf16 %v1706_v57  ;;  %v2295_v55 = vunpack.c.l.bf16 %v1709_v58  ;;  %v2296_v37 = vunpack.c.h.bf16 %v1709_v58 }
  0xaa   : > { %v822_v34 = vmul.f32 %v2292_v42, %v331_v22  ;;  %v2297_v52 = vunpack.c.l.bf16 %v1716_v63  ;;  %v2298_v42 = vunpack.c.h.bf16 %v1716_v63  ;;  %v2299_v57 = vunpack.c.l.bf16 %v1719_v0 }
  0xab   : > { %v1911_v39 = vmul.f32 %v2294_v46, %v347_v45  ;;  %v1915_v51 = vmul.f32 %v2295_v55, %v347_v45  ;;  %v1919_v31 = vmul.f32 %v2296_v37, %v347_v45  ;;  %v1935_v55 = vmul.f32 %v2300_v2, %v347_v45 }
  0xac   : > { %v1923_v22 = vmul.f32 %v2297_v52, %v347_v45  ;;  %v1927_v15 = vmul.f32 %v2298_v42, %v347_v45  ;;  %v1931_v46 = vmul.f32 %v2299_v57, %v347_v45  ;;  %v2301_v58 = vunpack.c.l.bf16 %v1726_v5 }
  0xad   : > { %v1943_v52 = vmul.f32 %v2302_v62, %v343_v47  ;;  %v2304_v63 = vunpack.c.l.bf16 %v1729_v6  ;;  %v1951_v57 = vmul.f32 %v2306_v13, %v343_v47  ;;  %v2308_v0 = vunpack.c.l.bf16 %v1736_v11  ;;  %v355_v6 = vpop.permute.xlu1 %354  ;;  %v351_v13 = vpop.permute.xlu0 %350 }
  0xae   : > { %v1939_v37 = vmul.f32 %v2301_v58, %v343_v47  ;;  %v2310_v45 = vunpack.c.h.bf16 %v1736_v11  ;;  %v2311_v62 = vunpack.c.l.bf16 %v1739_v12  ;;  %v2317_v11 = vunpack.c.l.bf16 %v1749_v7 }
  0xaf   : > { %2303 = vst [vmem:[#allocation7_spill] sm:$0xff] %v1943_v52  ;;  %v1947_v42 = vmul.f32 %v2304_v63, %v343_v47  ;;  %2307 = vst [vmem:[#allocation9_spill] sm:$0xff] %v1951_v57  ;;  %v1955_v2 = vmul.f32 %v2308_v0, %v343_v47  ;;  %v2313_v63 = vunpack.c.h.bf16 %v1739_v12  ;;  %v2314_v57 = vunpack.c.l.bf16 %v1746_v8 }
  0xb0   : > { %v1959_v58 = vmul.f32 %v2310_v45, %v343_v47  ;;  %v1963_v5 = vmul.f32 %v2311_v62, %v343_v47  ;;  %v2315_v0 = vunpack.c.h.bf16 %v1746_v8  ;;  %v1979_v45 = vmul.f32 %v2317_v11, %v355_v6 }
  0xb1   : > { %2305 = vst [vmem:[#allocation8_spill] sm:$0xff] %v1947_v42  ;;  %2309 = vst [vmem:[#allocation10_spill] sm:$0xff] %v1955_v2  ;;  %v1967_v42 = vmul.f32 %v2313_v63, %v343_v47  ;;  %v1971_v52 = vmul.f32 %v2314_v57, %v355_v6  ;;  %v2318_v62 = vunpack.c.h.bf16 %v1749_v7  ;;  %v2319_v12 = vunpack.c.l.bf16 %v1756_v14 }
  0xb2   : > { %2312 = vst [vmem:[#allocation11_spill] sm:$0xff] %v1963_v5  ;;  %v1975_v2 = vmul.f32 %v2315_v0, %v355_v6  ;;  %v2321_v63 = vunpack.c.h.bf16 %v1756_v14  ;;  %v2323_v8 = vunpack.c.l.bf16 %v1759_v3  ;;  %v2327_v7 = vunpack.c.l.bf16 %v1766_v1 }
  0xb3   : > { %v1983_v5 = vmul.f32 %v2318_v62, %v355_v6  ;;  %v1987_v47 = vmul.f32 %v2319_v12, %v355_v6  ;;  %v2329_v12 = vunpack.c.h.bf16 %v1766_v1  ;;  %v2338_v1 = vunpack.c.l.bf16 %v1779_v16 }
  0xb4   : > { %2316 = vst [vmem:[#allocation12_spill] sm:$0xff] %v1975_v2  ;;  %v1991_v57 = vmul.f32 %v2321_v63, %v355_v6  ;;  %v1995_v0 = vmul.f32 %v2323_v8, %v355_v6  ;;  %v2325_v2 = vunpack.c.h.bf16 %v1759_v3  ;;  %v2007_v62 = vmul.f32 %v2327_v7, %v351_v13 }
  0xb5   : > { %2320 = vst [vmem:[#allocation13_spill] sm:$0xff] %v1987_v47  ;;  %v2011_v14 = vmul.f32 %v2329_v12, %v351_v13  ;;  %v2331_v63 = vunpack.c.l.bf16 %v1769_v9  ;;  %v2333_v8 = vunpack.c.h.bf16 %v1769_v9  ;;  %v2337_v7 = vunpack.c.h.bf16 %v1776_v60 }
  0xb6   : > { %2322 = vst [vmem:[#allocation14_spill] sm:$0xff] %v1991_v57  ;;  %2324 = vst [vmem:[#allocation15_spill] sm:$0xff] %v1995_v0  ;;  %v1999_v11 = vmul.f32 %v2325_v2, %v355_v6  ;;  %v419_v2 = vpop.permute.xlu1 %418  ;;  %v2335_v6 = vunpack.c.l.bf16 %v1776_v60  ;;  %v2031_v12 = vmul.f32 %v2338_v1, %v351_v13 }
  0xb7   : > { %2328 = vst [vmem:[#allocation17_spill] sm:$0xff] %v2007_v62  ;;  %2330 = vst [vmem:[#allocation18_spill] sm:$0xff] %v2011_v14  ;;  %v2015_v57 = vmul.f32 %v2331_v63, %v351_v13  ;;  %v2019_v3 = vmul.f32 %v2333_v8, %v351_v13  ;;  %v2027_v62 = vmul.f32 %v2337_v7, %v351_v13  ;;  %v2340_v63 = vunpack.c.h.bf16 %v1779_v16 }
  0xb8   : > { %2326 = vst [vmem:[#allocation16_spill] sm:$0xff] %v1999_v11  ;;  %v2023_v11 = vmul.f32 %v2335_v6, %v351_v13  ;;  %2339 = vst [vmem:[#allocation22_spill] sm:$0xff] %v2031_v12  ;;  %v447_v9 = vadd.f32 %v419_v2, %v359_v44  ;;  %v448_v8 = vadd.f32 %v419_v2, %v360_v48  ;;  %v415_v44 = vpop.permute.xlu0 %414 }
  0xb9   : > { %2332 = vst [vmem:[#allocation19_spill] sm:$0xff] %v2015_v57  ;;  %2334 = vst [vmem:[#allocation20_spill] sm:$0xff] %v2019_v3  ;;  %v2035_v57 = vmul.f32 %v2340_v63, %v351_v13  ;;  %v577_v3 = vadd.f32 %v561_v50, %v419_v2  ;;  %v578_v14 = vadd.f32 %v562_v53, %v419_v2 }
  0xba   : > { %2336 = vst [vmem:[#allocation21_spill] sm:$0xff] %v2023_v11  ;;  %v707_v0 = vadd.f32 %v691_v56, %v419_v2  ;;  %v708_v47 = vadd.f32 %v692_v40, %v419_v2  ;;  %v837_v6 = vadd.f32 %v821_v33, %v419_v2  ;;  %v838_v11 = vadd.f32 %v822_v34, %v419_v2 }
  0xbb   : > { %vm463_vm1 = vcmp.ge.f32.partialorder %v447_v9, 0.0  ;;  %vm464_vm2 = vcmp.ge.f32.partialorder %v448_v8, 0.0  ;;  %v479_v60 = vmul.f32 0.1, %v447_v9  ;;  %v480_v7 = vmul.f32 0.1, %v448_v8 }
  0xbc   : > { %vm593_vm3 = vcmp.ge.f32.partialorder %v577_v3, 0.0  ;;  %vm594_vm4 = vcmp.ge.f32.partialorder %v578_v14, 0.0  ;;  %v609_v1 = vmul.f32 0.1, %v577_v3  ;;  %v610_v12 = vmul.f32 0.1, %v578_v14 }
  0xbd   : > { %v495_v16 = vsel %vm463_vm1, %v447_v9, %v479_v60  ;;  %v496_v13 = vsel %vm464_vm2, %v448_v8, %v480_v7  ;;  %vm723_vm5 = vcmp.ge.f32.partialorder %v707_v0, 0.0  ;;  %vm724_vm6 = vcmp.ge.f32.partialorder %v708_v47, 0.0 }
  0xbe   : > { %512 = vst.msk [vmem:[%s2038_s8 + $0x40] sm:$0xff] %vm509_vm0, %v495_v16  ;;  %513 = vst.msk [vmem:[%s2038_s8 + $0x48] sm:$0xff] %vm509_vm0, %v496_v13  ;;  %v625_v48 = vsel %vm593_vm3, %v577_v3, %v609_v1  ;;  %v626_v50 = vsel %vm594_vm4, %v578_v14, %v610_v12  ;;  %v739_v53 = vmul.f32 0.1, %v707_v0  ;;  %v740_v56 = vmul.f32 0.1, %v708_v47  ;;  %v427_v13 = vpop.permute.xlu1 %426 }
  0xbf   : > { %1117 = vst.msk [vmem:[%s2038_s8 + $0x50] sm:$0xff] %vm509_vm0, %v625_v48  ;;  %1118 = vst.msk [vmem:[%s2038_s8 + $0x58] sm:$0xff] %vm509_vm0, %v626_v50  ;;  %vm853_vm7 = vcmp.ge.f32.partialorder %v837_v6, 0.0  ;;  %vm854_vm8 = vcmp.ge.f32.partialorder %v838_v11, 0.0  ;;  %v869_v40 = vmul.f32 0.1, %v837_v6  ;;  %v445_v63 = vadd.f32 %v415_v44, %v1827_v18 }
  0xc0   : > { %v870_v33 = vmul.f32 0.1, %v838_v11  ;;  %v755_v34 = vsel %vm723_vm5, %v707_v0, %v739_v53  ;;  %v756_v2 = vsel %vm724_vm6, %v708_v47, %v740_v56  ;;  %v446_v14 = vadd.f32 %v415_v44, %v1831_v25 }
  0xc1   : > { %1149 = vst.msk [vmem:[%s2038_s8 + $0x60] sm:$0xff] %vm509_vm0, %v755_v34  ;;  %1150 = vst.msk [vmem:[%s2038_s8 + $0x68] sm:$0xff] %vm509_vm0, %v756_v2  ;;  %v885_v3 = vsel %vm853_vm7, %v837_v6, %v869_v40  ;;  %v575_v9 = vadd.f32 %v1835_v19, %v415_v44  ;;  %v576_v8 = vadd.f32 %v1839_v26, %v415_v44  ;;  %vm461_vm9 = vcmp.ge.f32.partialorder %v445_v63, 0.0 }
  0xc2   : > { %v886_v12 = vsel %vm854_vm8, %v838_v11, %v870_v33  ;;  %1181 = vst.msk [vmem:[%s2038_s8 + $0x70] sm:$0xff] %vm509_vm0, %v885_v3  ;;  %vm462_vm10 = vcmp.ge.f32.partialorder %v446_v14, 0.0  ;;  %v477_v18 = vmul.f32 0.1, %v445_v63  ;;  %v478_v25 = vmul.f32 0.1, %v446_v14 }
  0xc3   : > { %1182 = vst.msk [vmem:[%s2038_s8 + $0x78] sm:$0xff] %vm509_vm0, %v886_v12  ;;  %vm591_vm11 = vcmp.ge.f32.partialorder %v575_v9, 0.0  ;;  %vm592_vm12 = vcmp.ge.f32.partialorder %v576_v8, 0.0  ;;  %v607_v47 = vmul.f32 0.1, %v575_v9  ;;  %v705_v6 = vadd.f32 %v1843_v20, %v415_v44 }
  0xc4   : > { %v608_v0 = vmul.f32 0.1, %v576_v8  ;;  %v493_v11 = vsel %vm461_vm9, %v445_v63, %v477_v18  ;;  %v494_v19 = vsel %vm462_vm10, %v446_v14, %v478_v25  ;;  %v706_v26 = vadd.f32 %v1847_v29, %v415_v44  ;;  %v423_v25 = vpop.permute.xlu0 %422 }
  0xc5   : > { %510 = vst.msk [vmem:[%s2038_s8] sm:$0xff] %vm509_vm0, %v493_v11  ;;  %511 = vst.msk [vmem:[%s2038_s8 + $0x8] sm:$0xff] %vm509_vm0, %v494_v19  ;;  %v623_v60 = vsel %vm591_vm11, %v575_v9, %v607_v47  ;;  %v835_v1 = vadd.f32 %v1851_v21, %v415_v44  ;;  %v836_v16 = vadd.f32 %v1855_v30, %v415_v44  ;;  %vm721_vm13 = vcmp.ge.f32.partialorder %v705_v6, 0.0 }
  0xc6   : > { %v624_v7 = vsel %vm592_vm12, %v576_v8, %v608_v0  ;;  %1115 = vst.msk [vmem:[%s2038_s8 + $0x10] sm:$0xff] %vm509_vm0, %v623_v60  ;;  %vm722_vm14 = vcmp.ge.f32.partialorder %v706_v26, 0.0  ;;  %v737_v20 = vmul.f32 0.1, %v705_v6  ;;  %v738_v29 = vmul.f32 0.1, %v706_v26 }
  0xc7   : > { %1116 = vst.msk [vmem:[%s2038_s8 + $0x18] sm:$0xff] %vm509_vm0, %v624_v7  ;;  %vm851_vm15 = vcmp.ge.f32.partialorder %v835_v1, 0.0  ;;  %vm852_vm1 = vcmp.ge.f32.partialorder %v836_v16, 0.0  ;;  %v867_v48 = vmul.f32 0.1, %v835_v1  ;;  %v451_v30 = vadd.f32 %v427_v13, %v1859_v32 }
  0xc8   : > { %v868_v50 = vmul.f32 0.1, %v836_v16  ;;  %v753_v21 = vsel %vm721_vm13, %v705_v6, %v737_v20  ;;  %v754_v53 = vsel %vm722_vm14, %v706_v26, %v738_v29  ;;  %v452_v44 = vadd.f32 %v427_v13, %v1863_v35 }
  0xc9   : > { %1147 = vst.msk [vmem:[%s2038_s8 + $0x20] sm:$0xff] %vm509_vm0, %v753_v21  ;;  %1148 = vst.msk [vmem:[%s2038_s8 + $0x28] sm:$0xff] %vm509_vm0, %v754_v53  ;;  %v883_v56 = vsel %vm851_vm15, %v835_v1, %v867_v48  ;;  %v581_v33 = vadd.f32 %v1867_v27, %v427_v13  ;;  %v582_v34 = vadd.f32 %v1871_v36, %v427_v13  ;;  %vm467_vm2 = vcmp.ge.f32.partialorder %v451_v30, 0.0  ;;  %v435_v53 = vpop.permute.xlu1 %434 }
  0xca   : > { %v884_v40 = vsel %vm852_vm1, %v836_v16, %v868_v50  ;;  %1179 = vst.msk [vmem:[%s2038_s8 + $0x30] sm:$0xff] %vm509_vm0, %v883_v56  ;;  %vm468_vm3 = vcmp.ge.f32.partialorder %v452_v44, 0.0  ;;  %v483_v32 = vmul.f32 0.1, %v451_v30  ;;  %v484_v35 = vmul.f32 0.1, %v452_v44 }
  0xcb   : > { %1180 = vst.msk [vmem:[%s2038_s8 + $0x38] sm:$0xff] %vm509_vm0, %v884_v40  ;;  %vm597_vm4 = vcmp.ge.f32.partialorder %v581_v33, 0.0  ;;  %vm598_vm5 = vcmp.ge.f32.partialorder %v582_v34, 0.0  ;;  %v613_v2 = vmul.f32 0.1, %v581_v33  ;;  %v711_v3 = vadd.f32 %v1875_v28, %v427_v13 }
  0xcc   : > { %v614_v63 = vmul.f32 0.1, %v582_v34  ;;  %v499_v14 = vsel %vm467_vm2, %v451_v30, %v483_v32  ;;  %v500_v27 = vsel %vm468_vm3, %v452_v44, %v484_v35  ;;  %v712_v36 = vadd.f32 %v1879_v38, %v427_v13 }
  0xcd   : > { %516 = vst.msk [vmem:[%s2038_s8 + $0xc0] sm:$0xff] %vm509_vm0, %v499_v14  ;;  %517 = vst.msk [vmem:[%s2038_s8 + $0xc8] sm:$0xff] %vm509_vm0, %v500_v27  ;;  %v629_v12 = vsel %vm597_vm4, %v581_v33, %v613_v2  ;;  %v841_v8 = vadd.f32 %v1883_v41, %v427_v13  ;;  %v842_v18 = vadd.f32 %v1887_v43, %v427_v13  ;;  %vm727_vm6 = vcmp.ge.f32.partialorder %v711_v3, 0.0 }
  0xce   : > { %v630_v9 = vsel %vm598_vm5, %v582_v34, %v614_v63  ;;  %1121 = vst.msk [vmem:[%s2038_s8 + $0xd0] sm:$0xff] %vm509_vm0, %v629_v12  ;;  %vm728_vm7 = vcmp.ge.f32.partialorder %v712_v36, 0.0  ;;  %v743_v28 = vmul.f32 0.1, %v711_v3  ;;  %v744_v38 = vmul.f32 0.1, %v712_v36 }
  0xcf   : > { %1122 = vst.msk [vmem:[%s2038_s8 + $0xd8] sm:$0xff] %vm509_vm0, %v630_v9  ;;  %vm857_vm8 = vcmp.ge.f32.partialorder %v841_v8, 0.0  ;;  %vm858_vm9 = vcmp.ge.f32.partialorder %v842_v18, 0.0  ;;  %v873_v47 = vmul.f32 0.1, %v841_v8  ;;  %v449_v43 = vadd.f32 %v423_v25, %v1795_v59 }
  0xd0   : > { %v874_v0 = vmul.f32 0.1, %v842_v18  ;;  %v759_v41 = vsel %vm727_vm6, %v711_v3, %v743_v28  ;;  %v760_v11 = vsel %vm728_vm7, %v712_v36, %v744_v38  ;;  %v450_v19 = vadd.f32 %v423_v25, %v1799_v4  ;;  %v2341_v38 = vld [vmem:[#allocation7_spill] sm:$0xff] }
  0xd1   : > { %1153 = vst.msk [vmem:[%s2038_s8 + $0xe0] sm:$0xff] %vm509_vm0, %v759_v41  ;;  %1154 = vst.msk [vmem:[%s2038_s8 + $0xe8] sm:$0xff] %vm509_vm0, %v760_v11  ;;  %v889_v6 = vsel %vm857_vm8, %v841_v8, %v873_v47  ;;  %v579_v60 = vadd.f32 %v1803_v61, %v423_v25  ;;  %v580_v7 = vadd.f32 %v1807_v54, %v423_v25  ;;  %vm465_vm10 = vcmp.ge.f32.partialorder %v449_v43, 0.0  ;;  %v431_v8 = vpop.permute.xlu0 %430  ;;  %v2342_v11 = vld [vmem:[#allocation8_spill] sm:$0xff] }
  0xd2   : > { %v890_v26 = vsel %vm858_vm9, %v842_v18, %v874_v0  ;;  %1185 = vst.msk [vmem:[%s2038_s8 + $0xf0] sm:$0xff] %vm509_vm0, %v889_v6  ;;  %vm466_vm11 = vcmp.ge.f32.partialorder %v450_v19, 0.0  ;;  %v481_v59 = vmul.f32 0.1, %v449_v43  ;;  %v482_v4 = vmul.f32 0.1, %v450_v19 }
  0xd3   : > { %1186 = vst.msk [vmem:[%s2038_s8 + $0xf8] sm:$0xff] %vm509_vm0, %v890_v26  ;;  %vm595_vm12 = vcmp.ge.f32.partialorder %v579_v60, 0.0  ;;  %vm596_vm13 = vcmp.ge.f32.partialorder %v580_v7, 0.0  ;;  %v611_v1 = vmul.f32 0.1, %v579_v60  ;;  %v709_v20 = vadd.f32 %v1811_v10, %v423_v25 }
  0xd4   : > { %v612_v16 = vmul.f32 0.1, %v580_v7  ;;  %v497_v13 = vsel %vm465_vm10, %v449_v43, %v481_v59  ;;  %v498_v61 = vsel %vm466_vm11, %v450_v19, %v482_v4  ;;  %v710_v54 = vadd.f32 %v1815_v23, %v423_v25  ;;  %v2343_v19 = vld [vmem:[#allocation9_spill] sm:$0xff] }
  0xd5   : > { %514 = vst.msk [vmem:[%s2038_s8 + $0x80] sm:$0xff] %vm509_vm0, %v497_v13  ;;  %515 = vst.msk [vmem:[%s2038_s8 + $0x88] sm:$0xff] %vm509_vm0, %v498_v61  ;;  %v627_v29 = vsel %vm595_vm12, %v579_v60, %v611_v1  ;;  %v839_v50 = vadd.f32 %v1819_v17, %v423_v25  ;;  %v840_v21 = vadd.f32 %v1823_v24, %v423_v25  ;;  %vm725_vm14 = vcmp.ge.f32.partialorder %v709_v20, 0.0  ;;  %v2344_v1 = vld [vmem:[#allocation10_spill] sm:$0xff] }
  0xd6   : > { %v628_v48 = vsel %vm596_vm13, %v580_v7, %v612_v16  ;;  %1119 = vst.msk [vmem:[%s2038_s8 + $0x90] sm:$0xff] %vm509_vm0, %v627_v29  ;;  %vm726_vm15 = vcmp.ge.f32.partialorder %v710_v54, 0.0  ;;  %v741_v10 = vmul.f32 0.1, %v709_v20  ;;  %v742_v23 = vmul.f32 0.1, %v710_v54 }
  0xd7   : > { %1120 = vst.msk [vmem:[%s2038_s8 + $0x98] sm:$0xff] %vm509_vm0, %v628_v48  ;;  %vm855_vm1 = vcmp.ge.f32.partialorder %v839_v50, 0.0  ;;  %vm856_vm2 = vcmp.ge.f32.partialorder %v840_v21, 0.0  ;;  %v871_v30 = vmul.f32 0.1, %v839_v50  ;;  %v455_v24 = vadd.f32 %v435_v53, %v1907_v49 }
  0xd8   : > { %v872_v44 = vmul.f32 0.1, %v840_v21  ;;  %v757_v17 = vsel %vm725_vm14, %v709_v20, %v741_v10  ;;  %v758_v56 = vsel %vm726_vm15, %v710_v54, %v742_v23  ;;  %v456_v40 = vadd.f32 %v435_v53, %v1911_v39  ;;  %v2345_v54 = vld [vmem:[#allocation11_spill] sm:$0xff] }
  0xd9   : > { %1151 = vst.msk [vmem:[%s2038_s8 + $0xa0] sm:$0xff] %vm509_vm0, %v757_v17  ;;  %1152 = vst.msk [vmem:[%s2038_s8 + $0xa8] sm:$0xff] %vm509_vm0, %v758_v56  ;;  %v887_v33 = vsel %vm855_vm1, %v839_v50, %v871_v30  ;;  %v585_v32 = vadd.f32 %v1915_v51, %v435_v53  ;;  %v586_v35 = vadd.f32 %v1919_v31, %v435_v53  ;;  %vm471_vm3 = vcmp.ge.f32.partialorder %v455_v24, 0.0  ;;  %v443_v50 = vpop.permute.xlu1 %442 }
  0xda   : > { %v888_v34 = vsel %vm856_vm2, %v840_v21, %v872_v44  ;;  %1183 = vst.msk [vmem:[%s2038_s8 + $0xb0] sm:$0xff] %vm509_vm0, %v887_v33  ;;  %vm472_vm4 = vcmp.ge.f32.partialorder %v456_v40, 0.0  ;;  %v487_v49 = vmul.f32 0.1, %v455_v24  ;;  %v488_v39 = vmul.f32 0.1, %v456_v40 }
  0xdb   : > { %1184 = vst.msk [vmem:[%s2038_s8 + $0xb8] sm:$0xff] %vm509_vm0, %v888_v34  ;;  %vm601_vm5 = vcmp.ge.f32.partialorder %v585_v32, 0.0  ;;  %vm602_vm6 = vcmp.ge.f32.partialorder %v586_v35, 0.0  ;;  %v617_v2 = vmul.f32 0.1, %v585_v32  ;;  %v715_v27 = vadd.f32 %v1923_v22, %v435_v53  ;;  %v2346_v44 = vld [vmem:[#allocation12_spill] sm:$0xff] }
  0xdc   : > { %v618_v63 = vmul.f32 0.1, %v586_v35  ;;  %v503_v14 = vsel %vm471_vm3, %v455_v24, %v487_v49  ;;  %v504_v51 = vsel %vm472_vm4, %v456_v40, %v488_v39  ;;  %v716_v31 = vadd.f32 %v1927_v15, %v435_v53  ;;  %v2347_v39 = vld [vmem:[#allocation13_spill] sm:$0xff] }
  0xdd   : > { %520 = vst.msk [vmem:[%s2038_s8 + $0x140] sm:$0xff] %vm509_vm0, %v503_v14  ;;  %521 = vst.msk [vmem:[%s2038_s8 + $0x148] sm:$0xff] %vm509_vm0, %v504_v51  ;;  %v633_v3 = vsel %vm601_vm5, %v585_v32, %v617_v2  ;;  %v845_v12 = vadd.f32 %v1931_v46, %v435_v53  ;;  %v846_v9 = vadd.f32 %v1935_v55, %v435_v53  ;;  %vm731_vm7 = vcmp.ge.f32.partialorder %v715_v27, 0.0 }
  0xde   : > { %v634_v36 = vsel %vm602_vm6, %v586_v35, %v618_v63  ;;  %1125 = vst.msk [vmem:[%s2038_s8 + $0x150] sm:$0xff] %vm509_vm0, %v633_v3  ;;  %vm732_vm8 = vcmp.ge.f32.partialorder %v716_v31, 0.0  ;;  %v747_v22 = vmul.f32 0.1, %v715_v27  ;;  %v748_v15 = vmul.f32 0.1, %v716_v31 }
  0xdf   : > { %1126 = vst.msk [vmem:[%s2038_s8 + $0x158] sm:$0xff] %vm509_vm0, %v634_v36  ;;  %vm861_vm9 = vcmp.ge.f32.partialorder %v845_v12, 0.0  ;;  %vm862_vm10 = vcmp.ge.f32.partialorder %v846_v9, 0.0  ;;  %v877_v18 = vmul.f32 0.1, %v845_v12  ;;  %v453_v55 = vadd.f32 %v431_v8, %v1939_v37  ;;  %v2350_v3 = vld [vmem:[#allocation16_spill] sm:$0xff] }
  0xe0   : > { %v878_v25 = vmul.f32 0.1, %v846_v9  ;;  %v763_v46 = vsel %vm731_vm7, %v715_v27, %v747_v22  ;;  %v764_v28 = vsel %vm732_vm8, %v716_v31, %v748_v15  ;;  %v454_v47 = vadd.f32 %v431_v8, %v2341_v38  ;;  %v2349_v27 = vld [vmem:[#allocation15_spill] sm:$0xff] }
  0xe1   : > { %1157 = vst.msk [vmem:[%s2038_s8 + $0x160] sm:$0xff] %vm509_vm0, %v763_v46  ;;  %1158 = vst.msk [vmem:[%s2038_s8 + $0x168] sm:$0xff] %vm509_vm0, %v764_v28  ;;  %v893_v0 = vsel %vm861_vm9, %v845_v12, %v877_v18  ;;  %v583_v43 = vadd.f32 %v2342_v11, %v431_v8  ;;  %v584_v6 = vadd.f32 %v2343_v19, %v431_v8  ;;  %vm469_vm11 = vcmp.ge.f32.partialorder %v453_v55, 0.0  ;;  %v439_v12 = vpop.permute.xlu0 %438  ;;  %v2351_v46 = vld [vmem:[#allocation17_spill] sm:$0xff] }
  0xe2   : > { %v894_v41 = vsel %vm862_vm10, %v846_v9, %v878_v25  ;;  %1189 = vst.msk [vmem:[%s2038_s8 + $0x170] sm:$0xff] %vm509_vm0, %v893_v0  ;;  %vm470_vm12 = vcmp.ge.f32.partialorder %v454_v47, 0.0  ;;  %v485_v37 = vmul.f32 0.1, %v453_v55  ;;  %v486_v26 = vmul.f32 0.1, %v454_v47 }
  0xe3   : > { %1190 = vst.msk [vmem:[%s2038_s8 + $0x178] sm:$0xff] %vm509_vm0, %v894_v41  ;;  %vm599_vm13 = vcmp.ge.f32.partialorder %v583_v43, 0.0  ;;  %vm600_vm14 = vcmp.ge.f32.partialorder %v584_v6, 0.0  ;;  %v615_v60 = vmul.f32 0.1, %v583_v43  ;;  %v713_v16 = vadd.f32 %v2344_v1, %v431_v8  ;;  %v2353_v41 = vld [vmem:[#allocation19_spill] sm:$0xff] }
  0xe4   : > { %v616_v7 = vmul.f32 0.1, %v584_v6  ;;  %v501_v59 = vsel %vm469_vm11, %v453_v55, %v485_v37  ;;  %v502_v4 = vsel %vm470_vm12, %v454_v47, %v486_v26  ;;  %v714_v13 = vadd.f32 %v1959_v58, %v431_v8  ;;  %v2352_v55 = vld [vmem:[#allocation18_spill] sm:$0xff] }
  0xe5   : > { %518 = vst.msk [vmem:[%s2038_s8 + $0x100] sm:$0xff] %vm509_vm0, %v501_v59  ;;  %519 = vst.msk [vmem:[%s2038_s8 + $0x108] sm:$0xff] %vm509_vm0, %v502_v4  ;;  %v631_v61 = vsel %vm599_vm13, %v583_v43, %v615_v60  ;;  %v843_v29 = vadd.f32 %v2345_v54, %v431_v8  ;;  %v844_v48 = vadd.f32 %v1967_v42, %v431_v8  ;;  %vm729_vm15 = vcmp.ge.f32.partialorder %v713_v16, 0.0  ;;  %v2354_v43 = vld [vmem:[#allocation20_spill] sm:$0xff]  ;;  %v2355_v4 = vld [vmem:[#allocation21_spill] sm:$0xff] }
  0xe6   : > { %v632_v20 = vsel %vm600_vm14, %v584_v6, %v616_v7  ;;  %1123 = vst.msk [vmem:[%s2038_s8 + $0x110] sm:$0xff] %vm509_vm0, %v631_v61  ;;  %vm730_vm1 = vcmp.ge.f32.partialorder %v714_v13, 0.0  ;;  %v745_v58 = vmul.f32 0.1, %v713_v16  ;;  %v746_v21 = vmul.f32 0.1, %v714_v13 }
  0xe7   : > { %1124 = vst.msk [vmem:[%s2038_s8 + $0x118] sm:$0xff] %vm509_vm0, %v632_v20  ;;  %vm859_vm2 = vcmp.ge.f32.partialorder %v843_v29, 0.0  ;;  %vm860_vm3 = vcmp.ge.f32.partialorder %v844_v48, 0.0  ;;  %v875_v53 = vmul.f32 0.1, %v843_v29  ;;  %v459_v42 = vadd.f32 %v443_v50, %v1971_v52  ;;  %v2356_v20 = vld [vmem:[#allocation22_spill] sm:$0xff] }
  0xe8   : > { %v876_v10 = vmul.f32 0.1, %v844_v48  ;;  %v761_v23 = vsel %vm729_vm15, %v713_v16, %v745_v58  ;;  %v762_v30 = vsel %vm730_vm1, %v714_v13, %v746_v21  ;;  %v460_v17 = vadd.f32 %v443_v50, %v2346_v44 }
  0xe9   : > { %1155 = vst.msk [vmem:[%s2038_s8 + $0x120] sm:$0xff] %vm509_vm0, %v761_v23  ;;  %1156 = vst.msk [vmem:[%s2038_s8 + $0x128] sm:$0xff] %vm509_vm0, %v762_v30  ;;  %v891_v56 = vsel %vm859_vm2, %v843_v29, %v875_v53  ;;  %v589_v40 = vadd.f32 %v1979_v45, %v443_v50  ;;  %v590_v33 = vadd.f32 %v1983_v5, %v443_v50  ;;  %vm475_vm4 = vcmp.ge.f32.partialorder %v459_v42, 0.0  ;;  %v2348_v5 = vld [vmem:[#allocation14_spill] sm:$0xff] }
  0xea   : > { %v892_v24 = vsel %vm860_vm3, %v844_v48, %v876_v10  ;;  %1187 = vst.msk [vmem:[%s2038_s8 + $0x130] sm:$0xff] %vm509_vm0, %v891_v56  ;;  %vm476_vm5 = vcmp.ge.f32.partialorder %v460_v17, 0.0  ;;  %v491_v52 = vmul.f32 0.1, %v459_v42  ;;  %v492_v34 = vmul.f32 0.1, %v460_v17 }
  0xeb   : > { %1188 = vst.msk [vmem:[%s2038_s8 + $0x138] sm:$0xff] %vm509_vm0, %v892_v24  ;;  %vm605_vm6 = vcmp.ge.f32.partialorder %v589_v40, 0.0  ;;  %vm606_vm7 = vcmp.ge.f32.partialorder %v590_v33, 0.0  ;;  %v621_v32 = vmul.f32 0.1, %v589_v40  ;;  %v719_v2 = vadd.f32 %v2347_v39, %v443_v50 }
  0xec   : > { %v622_v35 = vmul.f32 0.1, %v590_v33  ;;  %v507_v49 = vsel %vm475_vm4, %v459_v42, %v491_v52  ;;  %v508_v45 = vsel %vm476_vm5, %v460_v17, %v492_v34  ;;  %v720_v63 = vadd.f32 %v2348_v5, %v443_v50 }
  0xed   : > { %524 = vst.msk [vmem:[%s2038_s8 + $0x1c0] sm:$0xff] %vm509_vm0, %v507_v49  ;;  %525 = vst.msk [vmem:[%s2038_s8 + $0x1c8] sm:$0xff] %vm509_vm0, %v508_v45  ;;  %v637_v14 = vsel %vm605_vm6, %v589_v40, %v621_v32  ;;  %v849_v31 = vadd.f32 %v2349_v27, %v443_v50  ;;  %v850_v36 = vadd.f32 %v2350_v3, %v443_v50  ;;  %vm735_vm8 = vcmp.ge.f32.partialorder %v719_v2, 0.0 }
  0xee   : > { %v638_v51 = vsel %vm606_vm7, %v590_v33, %v622_v35  ;;  %1129 = vst.msk [vmem:[%s2038_s8 + $0x1d0] sm:$0xff] %vm509_vm0, %v637_v14  ;;  %vm736_vm9 = vcmp.ge.f32.partialorder %v720_v63, 0.0  ;;  %v751_v9 = vmul.f32 0.1, %v719_v2  ;;  %v752_v8 = vmul.f32 0.1, %v720_v63 }
  0xef   : > { %1130 = vst.msk [vmem:[%s2038_s8 + $0x1d8] sm:$0xff] %vm509_vm0, %v638_v51  ;;  %vm865_vm10 = vcmp.ge.f32.partialorder %v849_v31, 0.0  ;;  %vm866_vm11 = vcmp.ge.f32.partialorder %v850_v36, 0.0  ;;  %v881_v22 = vmul.f32 0.1, %v849_v31  ;;  %v457_v28 = vadd.f32 %v439_v12, %v2351_v46 }
  0xf0   : > { %v882_v15 = vmul.f32 0.1, %v850_v36  ;;  %v767_v18 = vsel %vm735_vm8, %v719_v2, %v751_v9  ;;  %v768_v25 = vsel %vm736_vm9, %v720_v63, %v752_v8  ;;  %v458_v38 = vadd.f32 %v439_v12, %v2352_v55 }
  0xf1   : > { %1161 = vst.msk [vmem:[%s2038_s8 + $0x1e0] sm:$0xff] %vm509_vm0, %v767_v18  ;;  %1162 = vst.msk [vmem:[%s2038_s8 + $0x1e8] sm:$0xff] %vm509_vm0, %v768_v25  ;;  %v897_v47 = vsel %vm865_vm10, %v849_v31, %v881_v22  ;;  %v587_v11 = vadd.f32 %v2353_v41, %v439_v12  ;;  %v588_v19 = vadd.f32 %v2354_v43, %v439_v12  ;;  %vm473_vm12 = vcmp.ge.f32.partialorder %v457_v28, 0.0 }
  0xf2   : > { %v898_v0 = vsel %vm866_vm11, %v850_v36, %v882_v15  ;;  %1193 = vst.msk [vmem:[%s2038_s8 + $0x1f0] sm:$0xff] %vm509_vm0, %v897_v47  ;;  %vm474_vm13 = vcmp.ge.f32.partialorder %v458_v38, 0.0  ;;  %v489_v6 = vmul.f32 0.1, %v457_v28  ;;  %v490_v37 = vmul.f32 0.1, %v458_v38 }
  0xf3   : > { %1194 = vst.msk [vmem:[%s2038_s8 + $0x1f8] sm:$0xff] %vm509_vm0, %v898_v0  ;;  %vm603_vm14 = vcmp.ge.f32.partialorder %v587_v11, 0.0  ;;  %vm604_vm15 = vcmp.ge.f32.partialorder %v588_v19, 0.0  ;;  %v619_v26 = vmul.f32 0.1, %v587_v11  ;;  %v717_v1 = vadd.f32 %v2355_v4, %v439_v12 }
  0xf4   : > { %v620_v60 = vmul.f32 0.1, %v588_v19  ;;  %v505_v7 = vsel %vm473_vm12, %v457_v28, %v489_v6  ;;  %v506_v59 = vsel %vm474_vm13, %v458_v38, %v490_v37  ;;  %v718_v16 = vadd.f32 %v2027_v62, %v439_v12 }
  0xf5   : > { %522 = vst.msk [vmem:[%s2038_s8 + $0x180] sm:$0xff] %vm509_vm0, %v505_v7  ;;  %523 = vst.msk [vmem:[%s2038_s8 + $0x188] sm:$0xff] %vm509_vm0, %v506_v59  ;;  %v635_v13 = vsel %vm603_vm14, %v587_v11, %v619_v26  ;;  %v847_v54 = vadd.f32 %v2356_v20, %v439_v12  ;;  %v848_v29 = vadd.f32 %v2035_v57, %v439_v12  ;;  %vm733_vm1 = vcmp.ge.f32.partialorder %v717_v1, 0.0 }
  0xf6   : > { %v636_v61 = vsel %vm604_vm15, %v588_v19, %v620_v60  ;;  %1127 = vst.msk [vmem:[%s2038_s8 + $0x190] sm:$0xff] %vm509_vm0, %v635_v13  ;;  %vm734_vm2 = vcmp.ge.f32.partialorder %v718_v16, 0.0  ;;  %v749_v62 = vmul.f32 0.1, %v717_v1  ;;  %v750_v48 = vmul.f32 0.1, %v718_v16 }
  0xf7   : > { %1128 = vst.msk [vmem:[%s2038_s8 + $0x198] sm:$0xff] %vm509_vm0, %v636_v61  ;;  %vm863_vm3 = vcmp.ge.f32.partialorder %v847_v54, 0.0  ;;  %vm864_vm4 = vcmp.ge.f32.partialorder %v848_v29, 0.0  ;;  %v879_v50 = vmul.f32 0.1, %v847_v54 }
  0xf8   : > { %v880_v58 = vmul.f32 0.1, %v848_v29  ;;  %v765_v21 = vsel %vm733_vm1, %v717_v1, %v749_v62  ;;  %v766_v53 = vsel %vm734_vm2, %v718_v16, %v750_v48 }
  0xf9   : > { %1159 = vst.msk [vmem:[%s2038_s8 + $0x1a0] sm:$0xff] %vm509_vm0, %v765_v21  ;;  %1160 = vst.msk [vmem:[%s2038_s8 + $0x1a8] sm:$0xff] %vm509_vm0, %v766_v53  ;;  %v895_v57 = vsel %vm863_vm3, %v847_v54, %v879_v50 }
  0xfa   : > { %v896_v10 = vsel %vm864_vm4, %v848_v29, %v880_v58  ;;  %1191 = vst.msk [vmem:[%s2038_s8 + $0x1b0] sm:$0xff] %vm509_vm0, %v895_v57 }
  0xfb   : > { %1192 = vst.msk [vmem:[%s2038_s8 + $0x1b8] sm:$0xff] %vm509_vm0, %v896_v10 }
  0xfc   : > { %s1202_s10 = sshll.u32 %s1498_s15, 3  ;;  %s1198_s11 = sshll.u32 %s1502_s16, 8 }
  0xfd   : > { %s930_s21 = sadd.s32 %s1202_s10, %s1198_s11  ;;  %s949_s24 = sshll.u32 %s2038_s8, 4  ;;  %s950_s24 = int_to_ptr.vmem [resolvable:$true] %s949_s24 }
  0xfe   : > { %s1199_s27 = sshll.u32 %s930_s21, 7  ;;  %s1517_s5 = smov 1024  }
  0xff   : > { %s932_s20 = scalar_lea.hbm %s2279_s3, %s1199_s27  ;;  %1362 = sst [smem:[#allocation5]] (%p1594_p3), %s1517_s5 }
 0x100   : > { %s1518_s6 = smov 4096   ;;  %s1519_s7 = smov 8  }
 0x101   : > { %1363 = sst [smem:[#allocation5 + $0x1]] (%p1594_p3), %s1518_s6  ;;  %s1520_s15 = smov 128  }
 0x102   : > { %1364 = sst [smem:[#allocation5 + $0x2]] (%p1594_p3), %s1519_s7  ;;  %s1521_s16 = smov [#allocation4]  }
 0x103   : > { %1365 = sst [smem:[#allocation5 + $0x3]] (%p1594_p3), %s1520_s15  ;;  %s1522_s4 = smov 0  }
 0x104   : > { %1366 = sst [smem:[#allocation5 + $0x4]] (%p1594_p3), %s1520_s15 }
 0x105   : > { %1367 = sst [smem:[#allocation5 + $0x5]] (%p1594_p3), %s1519_s7 }
 0x106   : > { %1368 = dma.general (%p1594_p3), %s950_s24, 8192, %s932_s20, %s917_s9, %s1521_s16, [#allocation5], %s1522_s4, 0  }
 0x107 PF: > { %p1374_p0 = scmp.ge.s32.totalorder %s1514_s19, 2  ;;  %s977_s8 = sand.u32 1, %s1486_s12  }
 0x108   : > { %s978_s10 = scalar_lea.sflag [#allocation3], %s977_s8 }
 0x109   : > { %p1371_p1 = pnand %p1374_p0, %p1603_p8 }
 0x10b   : > { %1481 = dma.done.wait (!%p1371_p1), %s978_s10, 8192  }
 0x10c   : > { %1483 = vsyncadd (!%p1371_p1), %s978_s10, 4294959104  ;;  %s16_s19 = sadd.s32 1, %s1514_s19   ;;  %s2357_s12 = smov %s1490_s13 }
 0x10d   : > { %p13_p2 = scmp.ge.s32.totalorder %s16_s19, 10   ;;  %s2358_s13 = smov %s1494_s14 }
 0x10e   : > { %s2359_s14 = smov %s1612_s30  ;;  %s2360_s15 = smov %s1506_s17 }
 0x10f   : > { %s2361_s16 = smov %s1510_s18  ;;  %s2362_s17 = smov %s2365_s22 }
 0x110   : > { %s2363_s18 = smov %s2369_s23  ;;  %15 = sbr.rel (!%p13_p2) target bundleno = 5 (0x5), region = 84 }
 0x117   :  { %983 = vsyncpa [#allocation3], 1 }
 0x118   :  { %985 = vsyncpa [#allocation3 + $0x1], 1 }

// kernel: conv_block_forward.2
= control target key start
LH: loop header
LB: loop body
LE: loop exit
PB: predicated region body
PF: predicated region fallthrough
CT: control target
= control target key end

     0   :  { %s21640_s18 = smov 0   ;;  %s21642_s19 = smov 0   ;;  %s26944_s0 = inlined_call_operand.vmem [shape: bf16[2,20,4,2432], index: 0, kind: input, shape index: {}, may-alias: {0,1}]   ;;  %s26945_s1 = inlined_call_operand.vmem [shape: bf16[2,20,4,2432], index: 1, kind: input, shape index: {}, may-alias: {0,1}]   ;;  %s26946_s2 = inlined_call_operand.vmem [shape: bf16[9,8,12], index: 2, kind: input, shape index: {}]   ;;  %s26947_s3 = inlined_call_operand.vmem [shape: f32[3,1024], index: 3, kind: input, shape index: {}]   ;;  %s26948_s4 = inlined_call_operand.vmem [shape: bf16[2,16,8,2048], index: 4, kind: output, shape index: {0}]   ;;  %s26949_s5 = inlined_call_operand.vmem [shape: f32[2,16,8,2], index: 5, kind: output, shape index: {1}]  }
   0x1   :  { %s21644_s20 = smov 0   ;;  %s21646_s21 = smov 0  }
   0x2   :  { %s21648_s22 = smov 0  }
   0x3 LB: > { %s25_s23 = sadd.s32 1, %s21597_s20  ;;  %s28_s24 = sadd.s32 1, %s21601_s21  ;;  %s21605_s22 = sphi %s21648_s22, %s16_s22   ;;  %s21601_s21 = sphi %s21646_s21, %s27615_s21   ;;  %s21597_s20 = sphi %s21644_s20, %s27614_s20   ;;  %s21593_s19 = sphi %s21642_s19, %s27613_s19   ;;  %s21589_s18 = sphi %s21640_s18, %s27612_s18  }
   0x4   : > { %p26_p0 = scmp.ge.s32.totalorder %s25_s23, 4  ;;  %p18994_p1 = scmp.ge.s32.totalorder %s21605_s22, 1 }
   0x5   : > { %p236_p2 = scmp.lt.s32.totalorder %s21605_s22, 9 }
   0x6   : > { %s27617_s23 = smov (%p26_p0, %s25_s23), 0  ;;  %s27619_s24 = smov (!%p26_p0, %s28_s24), %s21601_s21 }
   0x7   : > { %p237_p3 = pnand %p18994_p1, %p236_p2  ;;  %p30_p4 = scmp.ge.s32.totalorder %s27619_s24, 2 }
   0x9   : > { %s27621_s24 = smov (%p30_p4, %s27619_s24), 0  ;;  %240 = sbr.rel (%p237_p3) target bundleno = 1696 (0x6a0), region = 36 }
  0x10   : > { %s21670_s25 = sshll.u32 %s21589_s18, 2  ;;  %p295_p5 = scmp.lt.s32.totalorder %s21593_s19, 1  ;;  %v26957_v28 = vmov 0   ;;  %vm1049_vm0 = vcmask 1039360   ;;  %vm1062_vm1 = vcmask 1045504   ;;  %vm1058_vm2 = vcmask 97280  }
  0x11   : > { %p297_p6 = scmp.lt.s32.totalorder %s21670_s25, 19  ;;  %1119 = vmatprep.mubr.bf16.mxu0 %v26957_v28  ;;  %1160 = vmatprep.mubr.bf16.mxu1 %v26957_v28  ;;  %s21608_s9 = smov 127   ;;  %vm1460_vm3 = vcmask 1031168   ;;  %vm5450_vm4 = vcmask 7168   ;;  %vm5452_vm5 = vcmask 15368  }
  0x12   : > { %s27623_s19 = smov (!%p295_p5, %s21593_s19), 1  ;;  %s21609_s10 = smov 126  }
  0x13   : > { %s298_s26 = scalar_select %p297_p6, %s21670_s25, 19 }
  0x14   : > { %s21129_s27 = smul.u32 380, %s27623_s19  ;;  %s20071_s18 = sadd.s32 4, %s21670_s25 }
  0x15   : > { %s21128_s28 = smul.u32 19, %s298_s26  ;;  %p309_p7 = scmp.lt.s32.totalorder %s20071_s18, 19 }
  0x16   : > { %p321_p8 = scmp.lt.s32.totalorder %s21670_s25, 15  ;;  %s19001_s15 = sshll.u32 %s27623_s19, 8 }
  0x17   : > { %s301_s29 = sadd.s32 %s21129_s27, %s21128_s28  ;;  %s27625_s18 = smov (!%p309_p7, %s20071_s18), 19 }
  0x18   : > { %s18996_s30 = sshll.u32 %s301_s29, 1  ;;  %s21130_s26 = smul.u32 19, %s27625_s18 }
  0x19   : > { %s21682_s8 = scalar_lea.vmem %s26944_s0, %s18996_s30  ;;  %s27627_s25 = smov (!%p321_p8, %s21670_s25), 15 }
  0x1a   : > { %v340_v0 = vld [vmem:[%s21682_s8] sm:$0xff]  ;;  %v19031_v2 = vld [vmem:[%s21682_s8 + $0x4c] sm:$0xff]  ;;  %v19032_v8 = vld [vmem:[%s21682_s8 + $0x54] sm:$0xff]  ;;  %s313_s28 = sadd.s32 %s21130_s26, %s21129_s27  ;;  %s19000_s14 = sshll.u32 %s27627_s25, 4 }
  0x1b   : > { %v19016_v1 = vld [vmem:[%s21682_s8 + $0x26] sm:$0xff]  ;;  %19006 = vst.sshfl [vmem:[#allocation2] sm:$0xf pattern:$0x76325410] %v340_v0  ;;  %v350_v4 = vcombine.high %v340_v0, %v340_v0  ;;  %v562_v5 = vcombine.high %v19031_v2, %v19031_v2  ;;  %v19017_v7 = vld [vmem:[%s21682_s8 + $0x2e] sm:$0xff]  ;;  %v577_v11 = vcombine.high %v19032_v8, %v19032_v8  ;;  %s23598_s18 = sadd.s32 %s19001_s15, %s19000_s14 }
  0x1c   : > { %v456_v3 = vcombine.low %v19016_v1, %v19016_v1  ;;  %19036 = vst.sshfl [vmem:[#allocation2 + $0x4c] sm:$0xf pattern:$0x76325410] %v19031_v2  ;;  %v341_v6 = vld [vmem:[%s21682_s8 + $0x8] sm:$0xff]  ;;  %v471_v9 = vcombine.low %v19017_v7, %v19017_v7  ;;  %v342_v12 = vld [vmem:[%s21682_s8 + $0x10] sm:$0xff] }
  0x1d   : > { %19022 = vst.sshfl [vmem:[#allocation2 + $0x8] sm:$0xf0 pattern:$0x76325410] %v19016_v1  ;;  %v365_v10 = vcombine.high %v341_v6, %v341_v6  ;;  %v19018_v13 = vld [vmem:[%s21682_s8 + $0x36] sm:$0xff]  ;;  %v380_v16 = vcombine.high %v342_v12, %v342_v12  ;;  %v19019_v19 = vld [vmem:[%s21682_s8 + $0x3e] sm:$0xff] }
  0x1e   : > { %19008 = vst.sshfl [vmem:[#allocation2 + $0x10] sm:$0xf pattern:$0x76325410] %v341_v6  ;;  %v19033_v14 = vld [vmem:[%s21682_s8 + $0x5c] sm:$0xff]  ;;  %v486_v15 = vcombine.low %v19018_v13, %v19018_v13  ;;  %v19034_v20 = vld [vmem:[%s21682_s8 + $0x64] sm:$0xff]  ;;  %v501_v21 = vcombine.low %v19019_v19, %v19019_v19 }
  0x1f   : > { %19038 = vst.sshfl [vmem:[#allocation2 + $0x5c] sm:$0xf pattern:$0x76325410] %v19032_v8  ;;  %v592_v17 = vcombine.high %v19033_v14, %v19033_v14  ;;  %v343_v18 = vld [vmem:[%s21682_s8 + $0x18] sm:$0xff]  ;;  %v607_v23 = vcombine.high %v19034_v20, %v19034_v20  ;;  %s18998_s29 = sshll.u32 %s313_s28, 1 }
  0x20   : > { %19024 = vst.sshfl [vmem:[#allocation2 + $0x18] sm:$0xf0 pattern:$0x76325410] %v19017_v7  ;;  %v395_v22 = vcombine.high %v343_v18, %v343_v18  ;;  %v344_v24 = vld [vmem:[%s21682_s8 + $0x20] sm:$0x3f]  ;;  %s22729_s6 = scalar_lea.vmem %s26945_s1, %s18998_s29 }
  0x21   : > { %19021 = vst.sshfl [vmem:[#allocation2] sm:$0xf0 pattern:$0x76325410] %v456_v3  ;;  %v19020_v25 = vld [vmem:[%s21682_s8 + $0x46] sm:$0x3f]  ;;  %v410_v30 = vcombine.high %v344_v24, %v344_v24 }
  0x22   : > { %19007 = vst.sshfl [vmem:[#allocation2 + $0x8] sm:$0xf pattern:$0x76325410] %v350_v4  ;;  %v516_v26 = vcombine.low %v19020_v25, %v19020_v25  ;;  %v19035_v27 = vld [vmem:[%s21682_s8 + $0x6c] sm:$0x3f] }
  0x23   : > { %19037 = vst.sshfl [vmem:[#allocation2 + $0x54] sm:$0xf pattern:$0x76325410] %v562_v5  ;;  %v988_v29 = vld [vmem:[#allocation2 + $0x4c] sm:$0x33]  ;;  %v622_v31 = vcombine.high %v19035_v27, %v19035_v27 }
  0x24   : > { %19010 = vst.sshfl [vmem:[#allocation2 + $0x20] sm:$0xf pattern:$0x76325410] %v342_v12  ;;  %v19046_v8 = vld [vmem:[%s21682_s8 + $0x72] sm:$0xff]  ;;  %s19002_s29 = sshll.u32 %s23598_s18, 2 }
  0x25   : > { %19040 = vst.sshfl [vmem:[#allocation2 + $0x6c] sm:$0xf pattern:$0x76325410] %v19033_v14  ;;  %s23652_s7 = scalar_lea.vmem %s26948_s4, %s19002_s29  ;;  %s19004_s11 = sshll.u32 %s27623_s19, 4 }
  0x26   : > { %19026 = vst.sshfl [vmem:[#allocation2 + $0x28] sm:$0xf0 pattern:$0x76325410] %v19018_v13  ;;  %v990_v39 = vld [vmem:[#allocation2 + $0x5c] sm:$0x33]  ;;  %s335_s12 = sadd.s32 %s19004_s11, %s27627_s25 }
  0x27   : > { %19023 = vst.sshfl [vmem:[#allocation2 + $0x10] sm:$0xf0 pattern:$0x76325410] %v471_v9  ;;  %v2649_v3 = vld [vmem:[#allocation2 + $0x5c] sm:$0x33] }
  0x28   : > { %19009 = vst.sshfl [vmem:[#allocation2 + $0x18] sm:$0xf pattern:$0x76325410] %v365_v10  ;;  %v984_v32 = vld [vmem:[#allocation2] sm:$0xff]  ;;  %v668_v10 = vcombine.low %v19046_v8, %v19046_v8  ;;  %s19005_s19 = sshll.u32 %s335_s12, 3 }
  0x29   : > { %19039 = vst.sshfl [vmem:[#allocation2 + $0x64] sm:$0xf pattern:$0x76325410] %v577_v11  ;;  %v21703_v34 = vld [vmem:[#allocation2 + $0x8] sm:$0xff]  ;;  %v21710_v37 = vcombine.high %v984_v32, %v988_v29 }
  0x2a   : > { %19012 = vst.sshfl [vmem:[#allocation2 + $0x30] sm:$0xf pattern:$0x76325410] %v343_v18  ;;  %v989_v35 = vld [vmem:[#allocation2 + $0x54] sm:$0x33] }
  0x2b   : > { %19042 = vst.sshfl [vmem:[#allocation2 + $0x7c] sm:$0xf pattern:$0x76325410] %v19034_v20  ;;  %v21708_v36 = vcombine.low %v21703_v34, %v989_v35  ;;  %v21717_v40 = vcombine.high %v21703_v34, %v989_v35  ;;  %v21758_v48 = vld [vmem:[#allocation2 + $0x4] sm:$0xff] }
  0x2c   : > { %19028 = vst.sshfl [vmem:[#allocation2 + $0x38] sm:$0xf0 pattern:$0x76325410] %v19019_v19  ;;  %v1912_v49 = vld [vmem:[#allocation2 + $0x50] sm:$0x33] }
  0x2d   : > { %19025 = vst.sshfl [vmem:[#allocation2 + $0x20] sm:$0xf0 pattern:$0x76325410] %v486_v15  ;;  %1035 = vrot.lane.b32.xlu1 %v21708_v36, %s21608_s9  ;;  %v19135_v50 = vcombine.low %v21758_v48, %v1912_v49  ;;  %v1913_v52 = vld [vmem:[#allocation2 + $0x58] sm:$0x33]  ;;  %v19136_v53 = vcombine.high %v21758_v48, %v1912_v49 }
  0x2e   : > { %19011 = vst.sshfl [vmem:[#allocation2 + $0x28] sm:$0xf pattern:$0x76325410] %v380_v16  ;;  %v21712_v38 = vld [vmem:[#allocation2 + $0x10] sm:$0xff]  ;;  %v19047_v16 = vld [vmem:[%s21682_s8 + $0x7a] sm:$0xff] }
  0x2f   : > { %19041 = vst.sshfl [vmem:[#allocation2 + $0x74] sm:$0xf pattern:$0x76325410] %v592_v17  ;;  %v21722_v41 = vcombine.low %v21712_v38, %v990_v39  ;;  %v21724_v42 = vld [vmem:[#allocation2 + $0x18] sm:$0xff]  ;;  %v21729_v44 = vcombine.high %v21712_v38, %v990_v39  ;;  %v21765_v51 = vld [vmem:[#allocation2 + $0xc] sm:$0xff]  ;;  %v19178_v5 = vcombine.low %v21712_v38, %v2649_v3  ;;  %v19179_v7 = vcombine.high %v21712_v38, %v2649_v3 }
  0x30   : > { %19014 = vst.sshfl [vmem:[#allocation2 + $0x40] sm:$0xf pattern:$0x76325410] %v344_v24  ;;  %v991_v43 = vld [vmem:[#allocation2 + $0x64] sm:$0x33]  ;;  %v19137_v54 = vcombine.low %v21765_v51, %v1913_v52  ;;  %v19138_v57 = vcombine.high %v21765_v51, %v1913_v52  ;;  %v683_v17 = vcombine.low %v19047_v16, %v19047_v16 }
  0x31   : > { %19030 = vst.sshfl [vmem:[#allocation2 + $0x48] sm:$0x30 pattern:$0x76325410] %v19020_v25  ;;  %1037 = vrot.lane.b32.xlu1 %v21717_v40, %s21608_s9  ;;  %v21734_v45 = vcombine.low %v21724_v42, %v991_v43  ;;  %v21739_v46 = vcombine.high %v21724_v42, %v991_v43  ;;  %v21771_v55 = vld [vmem:[#allocation2 + $0x14] sm:$0xff]  ;;  %v19048_v19 = vld [vmem:[%s21682_s8 + $0x82] sm:$0xff] }
  0x32   : > { %19027 = vst.sshfl [vmem:[#allocation2 + $0x30] sm:$0xf0 pattern:$0x76325410] %v501_v21  ;;  %v1914_v56 = vld [vmem:[#allocation2 + $0x60] sm:$0x33]  ;;  %v698_v20 = vcombine.low %v19048_v19, %v19048_v19 }
  0x33   : > { %19013 = vst.sshfl [vmem:[#allocation2 + $0x38] sm:$0xf pattern:$0x76325410] %v395_v22  ;;  %v19139_v58 = vcombine.low %v21771_v55, %v1914_v56  ;;  %v1915_v60 = vld [vmem:[#allocation2 + $0x68] sm:$0x33]  ;;  %v19140_v61 = vcombine.high %v21771_v55, %v1914_v56 }
  0x34   : > { %19043 = vst.sshfl [vmem:[#allocation2 + $0x84] sm:$0xf pattern:$0x76325410] %v607_v23  ;;  %v21777_v59 = vld [vmem:[#allocation2 + $0x1c] sm:$0xff] }
  0x35   : > { %19044 = vst.sshfl [vmem:[#allocation2 + $0x8c] sm:$0xf pattern:$0x76325410] %v19035_v27  ;;  %1041 = vrot.lane.b32.xlu1 %v21729_v44, %s21608_s9  ;;  %v19141_v62 = vcombine.low %v21777_v59, %v1915_v60  ;;  %v19142_v63 = vcombine.high %v21777_v59, %v1915_v60  ;;  %v2648_v1 = vld [vmem:[#allocation2 + $0x54] sm:$0x33] }
  0x36   : > { %19029 = vst.sshfl [vmem:[#allocation2 + $0x40] sm:$0xf0 pattern:$0x76325410] %v516_v26  ;;  %v19176_v2 = vcombine.low %v21703_v34, %v2648_v1  ;;  %v19177_v4 = vcombine.high %v21703_v34, %v2648_v1  ;;  %v2650_v6 = vld [vmem:[#allocation2 + $0x64] sm:$0x33] }
  0x37   : > { %v21701_v33 = vld [vmem:[#allocation2] ss:$76 sps:$4 sm:$0x3f]   ;;  %v21193_v0 = vld [vmem:[#allocation2 + $0x24] ss:$76 sps:$4 sm:$0x3f]   ;;  %v19180_v9 = vcombine.low %v21724_v42, %v2650_v6  ;;  %v19181_v13 = vcombine.high %v21724_v42, %v2650_v6 }
  0x38   : > { %19015 = vst.sshfl [vmem:[#allocation2 + $0x48] sm:$0x3 pattern:$0x76325410] %v410_v30  ;;  %1031 = vrot.lane.b32.xlu0 %v21701_v33, %s21608_s9  ;;  %v21806_v11 = vld [vmem:[#allocation2 + $0x20] sm:$0xff]  ;;  %v21826_v22 = vld [vmem:[#allocation2 + $0x28] sm:$0xff] }
  0x39   : > { %19045 = vst.sshfl [vmem:[#allocation2 + $0x94] sm:$0x3 pattern:$0x76325410] %v622_v31  ;;  %1045 = vrot.lane.b32.xlu1 %v21739_v46, %s21608_s9  ;;  %v2651_v12 = vld [vmem:[#allocation2 + $0x6c] sm:$0x33] }
  0x3a   : > { %v21184_v47 = vld [vmem:[#allocation2 + $0x20] ss:$76 sps:$4 sm:$0x3f]   ;;  %v19182_v14 = vcombine.low %v21806_v11, %v2651_v12  ;;  %v19183_v15 = vcombine.high %v21806_v11, %v2651_v12  ;;  %v21196_v18 = vld [vmem:[#allocation2 + $0x28] ss:$76 sps:$4 sm:$0x3f]  }
  0x3b   : > { %19052 = vst.sshfl [vmem:[#allocation2 + $0x54] sm:$0xf0 pattern:$0x76325410] %v19046_v8  ;;  %v3257_v21 = vld [vmem:[#allocation2 + $0x6c] sm:$0x33] }
  0x3c   : > { %1033 = vrot.lane.b32.xlu0 %v21710_v37, %s21608_s9  ;;  %19051 = vst.sshfl [vmem:[#allocation2 + $0x4c] sm:$0xf0 pattern:$0x76325410] %v668_v10  ;;  %v3258_v23 = vld [vmem:[#allocation2 + $0x74] sm:$0x33]  ;;  %v21830_v24 = vcombine.low %v21806_v11, %v3257_v21  ;;  %v21834_v25 = vcombine.high %v21806_v11, %v3257_v21 }
  0x3d   : > { %1442 = vrot.lane.b32.xlu1 %v21701_v33, %s21609_s10  ;;  %19054 = vst.sshfl [vmem:[#allocation2 + $0x64] sm:$0xf0 pattern:$0x76325410] %v19047_v16  ;;  %v21839_v26 = vcombine.low %v21826_v22, %v3258_v23  ;;  %v21841_v27 = vld [vmem:[#allocation2 + $0x30] sm:$0xff]  ;;  %v21846_v30 = vcombine.high %v21826_v22, %v3258_v23  ;;  %v21853_v32 = vld [vmem:[#allocation2 + $0x38] sm:$0xff] }
  0x3e   : > { %19053 = vst.sshfl [vmem:[#allocation2 + $0x5c] sm:$0xf0 pattern:$0x76325410] %v683_v17  ;;  %v3259_v29 = vld [vmem:[#allocation2 + $0x7c] sm:$0x33] }
  0x3f   : > { %19056 = vst.sshfl [vmem:[#allocation2 + $0x74] sm:$0xf0 pattern:$0x76325410] %v19048_v19  ;;  %v21851_v31 = vcombine.low %v21841_v27, %v3259_v29  ;;  %v3260_v35 = vld [vmem:[#allocation2 + $0x84] sm:$0x33]  ;;  %v21858_v39 = vcombine.high %v21841_v27, %v3259_v29 }
  0x40   : > { %1039 = vrot.lane.b32.xlu0 %v21722_v41, %s21608_s9  ;;  %19055 = vst.sshfl [vmem:[#allocation2 + $0x6c] sm:$0xf0 pattern:$0x76325410] %v698_v20  ;;  %v21863_v43 = vcombine.low %v21853_v32, %v3260_v35  ;;  %v21868_v49 = vcombine.high %v21853_v32, %v3260_v35  ;;  %v1273_v17 = vsel %vm1062_vm1, %v21734_v45, 0 }
  0x41   : > { %1446 = vrot.lane.b32.xlu1 %v21708_v36, %s21609_s10  ;;  %v21206_v56 = vld [vmem:[#allocation2 + $0x40] ss:$76 sps:$4 sm:$0x3f]   ;;  %v21955_v21 = vld [vmem:[#allocation2 + $0x30] ss:$76 sps:$4 sm:$0x3f]  }
  0x44   : > { %1043 = vrot.lane.b32.xlu0 %v21734_v45, %s21608_s9 }
  0x45   : > { %1450 = vrot.lane.b32.xlu1 %v21722_v41, %s21609_s10 }
  0x48   : > { %1047 = vrot.lane.b32.xlu0 %v21184_v47, %s21608_s9 }
  0x49   : > { %1454 = vrot.lane.b32.xlu1 %v21734_v45, %s21609_s10 }
  0x4c   : > { %1444 = vrot.lane.b32.xlu0 %v21710_v37, %s21609_s10 }
  0x4d   : > { %1458 = vrot.lane.b32.xlu1 %v21184_v47, %s21609_s10 }
  0x50   : > { %1448 = vrot.lane.b32.xlu0 %v21717_v40, %s21609_s10 }
  0x51   : > { %1956 = vrot.lane.b32.xlu1 %v19136_v53, %s21608_s9 }
  0x54   : > { %1452 = vrot.lane.b32.xlu0 %v21729_v44, %s21609_s10 }
  0x55   : > { %1960 = vrot.lane.b32.xlu1 %v19138_v57, %s21608_s9 }
  0x58   : > { %1456 = vrot.lane.b32.xlu0 %v21739_v46, %s21609_s10 }
  0x59   : > { %1964 = vrot.lane.b32.xlu1 %v19140_v61, %s21608_s9 }
  0x5c   : > { %1954 = vrot.lane.b32.xlu0 %v19135_v50, %s21608_s9 }
  0x5d   : > { %1968 = vrot.lane.b32.xlu1 %v19142_v63, %s21608_s9 }
  0x60   : > { %1958 = vrot.lane.b32.xlu0 %v19137_v54, %s21608_s9 }
  0x61   : > { %2179 = vrot.lane.b32.xlu1 %v19135_v50, %s21609_s10 }
  0x64   : > { %1962 = vrot.lane.b32.xlu0 %v19139_v58, %s21608_s9 }
  0x65   : > { %2183 = vrot.lane.b32.xlu1 %v19137_v54, %s21609_s10 }
  0x68   : > { %1966 = vrot.lane.b32.xlu0 %v19141_v62, %s21608_s9 }
  0x69   : > { %2187 = vrot.lane.b32.xlu1 %v19139_v58, %s21609_s10 }
  0x6c   : > { %1970 = vrot.lane.b32.xlu0 %v21193_v0, %s21608_s9 }
  0x6d   : > { %2191 = vrot.lane.b32.xlu1 %v19141_v62, %s21609_s10 }
  0x70   : > { %2181 = vrot.lane.b32.xlu0 %v19136_v53, %s21609_s10 }
  0x71   : > { %2195 = vrot.lane.b32.xlu1 %v21193_v0, %s21609_s10 }
  0x74   : > { %2185 = vrot.lane.b32.xlu0 %v19138_v57, %s21609_s10  ;;  %v975_v57 = vld [vmem:[%s26946_s2 + $0x4] sm:$0xf] }
  0x75   : > { %2692 = vrot.lane.b32.xlu1 %v19177_v4, %s21608_s9 }
  0x78   : > { %2189 = vrot.lane.b32.xlu0 %v19140_v61, %s21609_s10 }
  0x79   : > { %2696 = vrot.lane.b32.xlu1 %v19179_v7, %s21608_s9 }
  0x7c   : > { %2193 = vrot.lane.b32.xlu0 %v19142_v63, %s21609_s10 }
  0x7d   : > { %2700 = vrot.lane.b32.xlu1 %v19181_v13, %s21608_s9 }
  0x80   : > { %2690 = vrot.lane.b32.xlu0 %v19176_v2, %s21608_s9 }
  0x81   : > { %2704 = vrot.lane.b32.xlu1 %v19183_v15, %s21608_s9 }
  0x84   : > { %2694 = vrot.lane.b32.xlu0 %v19178_v5, %s21608_s9 }
  0x85   : > { %2915 = vrot.lane.b32.xlu1 %v19176_v2, %s21609_s10 }
  0x88   : > { %2698 = vrot.lane.b32.xlu0 %v19180_v9, %s21608_s9 }
  0x89   : > { %2919 = vrot.lane.b32.xlu1 %v19178_v5, %s21609_s10 }
  0x8c   : > { %2702 = vrot.lane.b32.xlu0 %v19182_v14, %s21608_s9 }
  0x8d   : > { %2923 = vrot.lane.b32.xlu1 %v19180_v9, %s21609_s10 }
  0x90   : > { %2706 = vrot.lane.b32.xlu0 %v21196_v18, %s21608_s9 }
  0x91   : > { %2927 = vrot.lane.b32.xlu1 %v19182_v14, %s21609_s10  ;;  %v21937_v14 = vld [vmem:[#allocation2 + $0x24] ss:$76 sps:$4 sm:$0x3f]  }
  0x94   : > { %2917 = vrot.lane.b32.xlu0 %v19177_v4, %s21609_s10 }
  0x95   : > { %2931 = vrot.lane.b32.xlu1 %v21196_v18, %s21609_s10  ;;  %v21949_v18 = vld [vmem:[#allocation2 + $0x2c] ss:$76 sps:$4 sm:$0x3f]  }
  0x98   : > { %2921 = vrot.lane.b32.xlu0 %v19179_v7, %s21609_s10  ;;  %v1255_v7 = vsel %vm1062_vm1, %v21701_v33, 0 }
  0x99   : > { %3302 = vrot.lane.b32.xlu1 %v21834_v25, %s21608_s9 }
  0x9c   : > { %2925 = vrot.lane.b32.xlu0 %v19181_v13, %s21609_s10  ;;  %v974_v13 = vld [vmem:[%s26946_s2] sm:$0xf] }
  0x9d   : > { %3306 = vrot.lane.b32.xlu1 %v21846_v30, %s21608_s9 }
  0x9f   : > { %v1036_v42 = vpop.permute.xlu1 %1035 }
  0xa0   : > { %2929 = vrot.lane.b32.xlu0 %v19183_v15, %s21609_s10 }
  0xa1   : > { %3310 = vrot.lane.b32.xlu1 %v21858_v39, %s21608_s9 }
  0xa3   : > { %v1038_v53 = vpop.permute.xlu1 %1037 }
  0xa4   : > { %3300 = vrot.lane.b32.xlu0 %v21830_v24, %s21608_s9  ;;  %v1052_v60 = vsel %vm1049_vm0, %v1036_v42, %v1038_v53 }
  0xa5   : > { %3314 = vrot.lane.b32.xlu1 %v21868_v49, %s21608_s9  ;;  %v1070_v0 = vsel %vm1062_vm1, %v1052_v60, 0  ;;  %v976_v60 = vld [vmem:[%s26946_s2 + $0x8] sm:$0xf] }
  0xa7   : > { %v1042_v62 = vpop.permute.xlu1 %1041 }
  0xa8   : > { %3304 = vrot.lane.b32.xlu0 %v21839_v26, %s21608_s9 }
  0xa9   : > { %3702 = vrot.lane.b32.xlu1 %v21830_v24, %s21609_s10 }
  0xaa   : > { %v1032_v38 = vpop.permute.xlu0 %1031 }
  0xab   : > { %v1046_v3 = vpop.permute.xlu1 %1045 }
  0xac   : > { %3308 = vrot.lane.b32.xlu0 %v21851_v31, %s21608_s9 }
  0xad   : > { %3706 = vrot.lane.b32.xlu1 %v21839_v26, %s21609_s10 }
  0xae   : > { %v1034_v47 = vpop.permute.xlu0 %1033 }
  0xaf   : > { %v1051_v50 = vsel %vm1049_vm0, %v1034_v47, %v1036_v42  ;;  %v1050_v52 = vsel %vm1049_vm0, %v1032_v38, %v1034_v47  ;;  %v1443_v9 = vpop.permute.xlu1 %1442  ;;  %v21965_v38 = vld [vmem:[#allocation2 + $0x34] ss:$76 sps:$4 sm:$0x3f]   ;;  %v21970_v47 = vld [vmem:[#allocation2 + $0x38] ss:$76 sps:$4 sm:$0x3f]  }
  0xb0   : > { %3312 = vrot.lane.b32.xlu0 %v21863_v43, %s21608_s9  ;;  %19095 = vmatprep.subr.msk.bf16.mxu0 %vm1062_vm1, %v1051_v50  ;;  %v1064_v54 = vsel %vm1062_vm1, %v1050_v52, 0 }
  0xb1   : > { %1088 = vmatpush1.bf16.msra.mxu0 %v1064_v54  ;;  %3710 = vrot.lane.b32.xlu1 %v21851_v31, %s21609_s10  ;;  %v1672_v54 = vld [vmem:[#allocation2 + $0x50] sm:$0x33] }
  0xb2   : > { %v1040_v58 = vpop.permute.xlu0 %1039 }
  0xb3   : > { %v1053_v61 = vsel %vm1049_vm0, %v1038_v53, %v1040_v58  ;;  %v1054_v63 = vsel %vm1049_vm0, %v1040_v58, %v1042_v62  ;;  %v1447_v12 = vpop.permute.xlu1 %1446 }
  0xb4   : > { %3316 = vrot.lane.b32.xlu0 %v21206_v56, %s21608_s9  ;;  %19096 = vmatmul.mubr.msk.bf16.vlgmr.msra.gmra.mrb[0].mxu0 %vm1058_vm2, %v975_v57  ;;  %v1076_v4 = vsel %vm1062_vm1, %v1054_v63, 0  ;;  %v19120_v63 = vcombine.high %v21758_v48, %v1672_v54 }
  0xb5   : > { %19097 = vmatprep.subr.msk.bf16.mxu1 %vm1062_vm1, %v1053_v61  ;;  %1201 = vmatprep.mubr.bf16.mxu0 %v26957_v28  ;;  %v21990_v61 = vld [vmem:[#allocation2 + $0x40] ss:$76 sps:$4 sm:$0x3f]  }
  0xb6   : > { %1129 = vmatpush1.bf16.msra.mxu1 %v1070_v0  ;;  %v1044_v1 = vpop.permute.xlu0 %1043  ;;  %3714 = vrot.lane.b32.xlu1 %v21863_v43, %s21609_s10 }
  0xb7   : > { %v1055_v2 = vsel %vm1049_vm0, %v1042_v62, %v1044_v1  ;;  %v1056_v5 = vsel %vm1049_vm0, %v1044_v1, %v1046_v3  ;;  %v1451_v15 = vpop.permute.xlu1 %1450 }
  0xb8   : > { %3704 = vrot.lane.b32.xlu0 %v21834_v25, %s21609_s10  ;;  %19099 = vmatprep.subr.msk.bf16.mxu0 %vm1062_vm1, %v1055_v2  ;;  %v1082_v10 = vsel %vm1062_vm1, %v1056_v5, 0  ;;  %v22002_v2 = vld [vmem:[#allocation2 + $0x44] ss:$76 sps:$4 sm:$0x3f]   ;;  %v19119_v5 = vcombine.low %v21758_v48, %v1672_v54 }
  0xb9   : > { %19098 = vmatmul.mubr.msk.bf16.vlgmr.msra.gmra.mrb[0].mxu1 %vm1058_vm2, %v975_v57  ;;  %1170 = vmatpush1.bf16.msra.mxu0 %v1076_v4  ;;  %v4894_v54 = vld [vmem:[#allocation2 + $0x84] sm:$0x33] }
  0xba   : > { %v1048_v6 = vpop.permute.xlu0 %1047  ;;  %1242 = vmatprep.mubr.bf16.mxu1 %v26957_v28  ;;  %19103 = vmatprep.subr.msk.bf16.mxu0 %vm1062_vm1, %v21710_v37  ;;  %v1261_v37 = vsel %vm1062_vm1, %v21708_v36, 0  ;;  %v1267_v36 = vsel %vm1062_vm1, %v21722_v41, 0  ;;  %v21941_v41 = vld [vmem:[#allocation2 + $0x28] ss:$76 sps:$4 sm:$0x3f]   ;;  %v1712_v48 = vsel %vm1062_vm1, %v19119_v5, 0 }
  0xbb   : > { %v1057_v8 = vsel %vm1049_vm0, %v1046_v3, %v1048_v6  ;;  %3718 = vrot.lane.b32.xlu1 %v21206_v56, %s21609_s10  ;;  %v1455_v20 = vpop.permute.xlu1 %1454  ;;  %v21979_v56 = vld [vmem:[#allocation2 + $0x3c] ss:$76 sps:$4 sm:$0x3f]  }
  0xbc   : > { %3708 = vrot.lane.b32.xlu0 %v21846_v30, %s21609_s10  ;;  %19100 = vmatmul.mubr.msk.bf16.vlgmr.msra.gmra.mrb[4].mxu0 %vm1058_vm2, %v975_v57  ;;  %v1673_v3 = vld [vmem:[#allocation2 + $0x58] sm:$0x33] }
  0xbd   : > { %19101 = vmatprep.subr.msk.bf16.mxu1 %vm1062_vm1, %v1057_v8  ;;  %1279 = vmatpush1.bf16.msra.mxu0 %v1255_v7  ;;  %v19122_v8 = vcombine.high %v21765_v51, %v1673_v3 }
  0xbe   : > { %1211 = vmatpush1.bf16.msra.mxu1 %v1082_v10  ;;  %v1445_v33 = vpop.permute.xlu0 %1444  ;;  %1310 = vmatprep.mubr.bf16.mxu0 %v26957_v28 }
  0xbf   : > { %19105 = vmatprep.subr.msk.bf16.mxu1 %vm1062_vm1, %v21717_v40  ;;  %19107 = vmatprep.subr.msk.bf16.mxu0 %vm1062_vm1, %v21729_v44  ;;  %v1462_v44 = vsel %vm1460_vm3, %v1445_v33, %v1447_v12  ;;  %v1461_v16 = vsel %vm1460_vm3, %v1443_v9, %v1445_v33  ;;  %v1459_v42 = vpop.permute.xlu1 %1458  ;;  %v1674_v9 = vld [vmem:[#allocation2 + $0x60] sm:$0x33] }
  0xc0   : > { %3712 = vrot.lane.b32.xlu0 %v21858_v39, %s21609_s10  ;;  %4209 = vrot.lane.b32.xlu1 %v21941_v41, %s21608_s9  ;;  %v1473_v23 = vsel %vm1062_vm1, %v1461_v16, 0  ;;  %v19124_v33 = vcombine.high %v21771_v55, %v1674_v9 }
  0xc1   : > { %19102 = vmatmul.mubr.msk.bf16.vlgmr.msra.gmra.mrb[4].mxu1 %vm1058_vm2, %v975_v57 }
  0xc2   : > { %1320 = vmatpush1.bf16.msra.mxu1 %v1261_v37  ;;  %v1449_v40 = vpop.permute.xlu0 %1448  ;;  %1351 = vmatprep.mubr.bf16.mxu1 %v26957_v28 }
  0xc3   : > { %19109 = vmatprep.subr.msk.bf16.mxu1 %vm1062_vm1, %v21739_v46  ;;  %v1464_v19 = vsel %vm1460_vm3, %v1449_v40, %v1451_v15  ;;  %v1463_v35 = vsel %vm1460_vm3, %v1447_v12, %v1449_v40  ;;  %v21982_v58 = vpop.permute.xlu1 %1956  ;;  %v19121_v12 = vcombine.low %v21765_v51, %v1673_v3  ;;  %v19123_v40 = vcombine.low %v21771_v55, %v1674_v9 }
  0xc4   : > { %3716 = vrot.lane.b32.xlu0 %v21868_v49, %s21609_s10  ;;  %19104 = vmatmul.mubr.msk.bf16.vlgmr.msra.gmra.mrb[0].mxu0 %vm1058_vm2, %v974_v13  ;;  %v1479_v52 = vsel %vm1062_vm1, %v1463_v35, 0  ;;  %v4893_v35 = vld [vmem:[#allocation2 + $0x7c] sm:$0x33] }
  0xc5   : > { %1361 = vmatpush1.bf16.msra.mxu0 %v1267_v36  ;;  %1392 = vmatprep.mubr.bf16.mxu0 %v26957_v28  ;;  %v1718_v51 = vsel %vm1062_vm1, %v19121_v12, 0  ;;  %v1724_v55 = vsel %vm1062_vm1, %v19123_v40, 0 }
  0xc6   : > { %19111 = vmatprep.subr.msk.bf16.mxu0 %vm1062_vm1, %v1462_v44  ;;  %v1453_v46 = vpop.permute.xlu0 %1452  ;;  %4213 = vrot.lane.b32.xlu1 %v21955_v21, %s21608_s9 }
  0xc7   : > { %v1466_v45 = vsel %vm1460_vm3, %v1453_v46, %v1455_v20  ;;  %v1465_v53 = vsel %vm1460_vm3, %v1451_v15, %v1453_v46  ;;  %v22004_v4 = vpop.permute.xlu1 %1960 }
  0xc8   : > { %4207 = vrot.lane.b32.xlu0 %v21937_v14, %s21608_s9  ;;  %v1485_v62 = vsel %vm1062_vm1, %v1465_v53, 0 }
  0xc9   : > { %19106 = vmatmul.mubr.msk.bf16.vlgmr.msra.gmra.mrb[0].mxu1 %vm1058_vm2, %v974_v13 }
  0xca   : > { %1402 = vmatpush1.bf16.msra.mxu1 %v1273_v17  ;;  %v1457_v29 = vpop.permute.xlu0 %1456  ;;  %1433 = vmatprep.mubr.bf16.mxu1 %v26957_v28 }
  0xcb   : > { %19113 = vmatprep.subr.msk.bf16.mxu1 %vm1062_vm1, %v1464_v19  ;;  %v1468_v57 = vsel %vm1460_vm3, %v1457_v29, %v1459_v42  ;;  %4217 = vrot.lane.b32.xlu1 %v21970_v47, %s21608_s9  ;;  %v1467_v1 = vsel %vm1460_vm3, %v1455_v20, %v1457_v29  ;;  %v22017_v10 = vpop.permute.xlu1 %1964  ;;  %v4892_v19 = vld [vmem:[#allocation2 + $0x74] sm:$0x33] }
  0xcc   : > { %4211 = vrot.lane.b32.xlu0 %v21949_v18, %s21608_s9  ;;  %19108 = vmatmul.mubr.msk.bf16.vlgmr.msra.gmra.mrb[4].mxu0 %vm1058_vm2, %v974_v13  ;;  %v1491_v7 = vsel %vm1062_vm1, %v1467_v1, 0 }
  0xcd   : > { %1497 = vmatpush1.bf16.msra.mxu0 %v1473_v23  ;;  %1528 = vmatprep.mubr.bf16.mxu0 %v26957_v28  ;;  %v22078_v23 = vcombine.low %v21826_v22, %v4892_v19 }
  0xce   : > { %19115 = vmatprep.subr.msk.bf16.mxu0 %vm1062_vm1, %v1466_v45  ;;  %v21973_v50 = vpop.permute.xlu0 %1954 }
  0xcf   : > { %4221 = vrot.lane.b32.xlu1 %v21990_v61, %s21608_s9  ;;  %v22032_v36 = vpop.permute.xlu1 %1968 }
  0xd0   : > { %4215 = vrot.lane.b32.xlu0 %v21965_v38, %s21608_s9 }
  0xd1   : > { %19110 = vmatmul.mubr.msk.bf16.vlgmr.msra.gmra.mrb[4].mxu1 %vm1058_vm2, %v974_v13  ;;  %v1675_v13 = vld [vmem:[#allocation2 + $0x68] sm:$0x33] }
  0xd2   : > { %1538 = vmatpush1.bf16.msra.mxu1 %v1479_v52  ;;  %v21994_v0 = vpop.permute.xlu0 %1958  ;;  %1569 = vmatprep.mubr.bf16.mxu1 %v26957_v28  ;;  %v19125_v17 = vcombine.low %v21777_v59, %v1675_v13 }
  0xd3   : > { %19117 = vmatprep.subr.msk.bf16.mxu1 %vm1062_vm1, %v1468_v57  ;;  %4429 = vrot.lane.b32.xlu1 %v21937_v14, %s21609_s10  ;;  %v19126_v14 = vcombine.high %v21777_v59, %v1675_v13  ;;  %v22043_v15 = vpop.permute.xlu1 %2179  ;;  %v1973_v16 = vsel %vm1049_vm0, %v21982_v58, %v21994_v0  ;;  %v1972_v59 = vsel %vm1049_vm0, %v21973_v50, %v21982_v58 }
  0xd4   : > { %4219 = vrot.lane.b32.xlu0 %v21979_v56, %s21608_s9  ;;  %19112 = vmatmul.mubr.msk.bf16.vlgmr.msra.gmra.mrb[0].mxu0 %vm1058_vm2, %v976_v60  ;;  %v1984_v42 = vsel %vm1062_vm1, %v1972_v59, 0  ;;  %v1974_v52 = vsel %vm1049_vm0, %v21994_v0, %v22004_v4  ;;  %v22137_v0 = vcombine.high %v21853_v32, %v4894_v54 }
  0xd5   : > { %1579 = vmatpush1.bf16.msra.mxu0 %v1485_v62  ;;  %1610 = vmatprep.mubr.bf16.mxu0 %v26957_v28 }
  0xd6   : > { %19127 = vmatprep.subr.msk.bf16.mxu0 %vm1062_vm1, %v19120_v63  ;;  %v22011_v6 = vpop.permute.xlu0 %1962  ;;  %v978_v63 = vld [vmem:[%s26946_s2 + $0x10] sm:$0xf] }
  0xd7   : > { %4433 = vrot.lane.b32.xlu1 %v21949_v18, %s21609_s10  ;;  %v22063_v18 = vpop.permute.xlu1 %2183  ;;  %v1975_v29 = vsel %vm1049_vm0, %v22004_v4, %v22011_v6  ;;  %v1976_v58 = vsel %vm1049_vm0, %v22011_v6, %v22017_v10  ;;  %v22160_v6 = vld [vmem:[#allocation2 + $0x44] ss:$76 sps:$4 sm:$0x3f]  }
  0xd8   : > { %4223 = vrot.lane.b32.xlu0 %v22002_v2, %s21608_s9  ;;  %v1996_v1 = vsel %vm1062_vm1, %v1976_v58, 0  ;;  %v22251_v58 = vld [vmem:[#allocation2 + $0x54] sm:$0xff] }
  0xd9   : > { %19114 = vmatmul.mubr.msk.bf16.vlgmr.msra.gmra.mrb[0].mxu1 %vm1058_vm2, %v976_v60 }
  0xda   : > { %1620 = vmatpush1.bf16.msra.mxu1 %v1491_v7  ;;  %v22024_v37 = vpop.permute.xlu0 %1966  ;;  %1651 = vmatprep.mubr.bf16.mxu1 %v26957_v28 }
  0xdb   : > { %19129 = vmatprep.subr.msk.bf16.mxu1 %vm1062_vm1, %v19122_v8  ;;  %4437 = vrot.lane.b32.xlu1 %v21965_v38, %s21609_s10  ;;  %v22083_v45 = vpop.permute.xlu1 %2187  ;;  %v22089_v38 = vcombine.high %v21826_v22, %v4892_v19  ;;  %v1977_v50 = vsel %vm1049_vm0, %v22017_v10, %v22024_v37  ;;  %v22106_v22 = vcombine.low %v21841_v27, %v4893_v35  ;;  %v19049_v10 = vld [vmem:[%s21682_s8 + $0x8a] sm:$0xff] }
  0xdc   : > { %4431 = vrot.lane.b32.xlu0 %v21941_v41, %s21609_s10  ;;  %19116 = vmatmul.mubr.msk.bf16.vlgmr.msra.gmra.mrb[4].mxu0 %vm1058_vm2, %v976_v60  ;;  %v977_v41 = vld [vmem:[%s26946_s2 + $0xc] sm:$0xf]  ;;  %v1978_v4 = vsel %vm1049_vm0, %v22024_v37, %v22032_v36  ;;  %v713_v12 = vcombine.low %v19049_v10, %v19049_v10  ;;  %19058 = vst.sshfl [vmem:[#allocation2 + $0x84] sm:$0xf0 pattern:$0x76325410] %v19049_v10 }
  0xdd   : > { %1736 = vmatpush1.bf16.msra.mxu0 %v1712_v48  ;;  %1767 = vmatprep.mubr.bf16.mxu0 %v26957_v28  ;;  %v2002_v8 = vsel %vm1062_vm1, %v1978_v4, 0  ;;  %v22172_v48 = vld [vmem:[#allocation2 + $0x48] ss:$76 sps:$4 sm:$0x3f]   ;;  %v22262_v4 = vld [vmem:[#allocation2 + $0x5c] sm:$0xff] }
  0xde   : > { %19131 = vmatprep.subr.msk.bf16.mxu0 %vm1062_vm1, %v19124_v33  ;;  %v1971_v44 = vpop.permute.xlu0 %1970  ;;  %19057 = vst.sshfl [vmem:[#allocation2 + $0x7c] sm:$0xf0 pattern:$0x76325410] %v713_v12 }
  0xdf   : > { %4441 = vrot.lane.b32.xlu1 %v21979_v56, %s21609_s10  ;;  %v22108_v53 = vpop.permute.xlu1 %2191  ;;  %v22114_v56 = vcombine.high %v21841_v27, %v4893_v35  ;;  %v1979_v27 = vsel %vm1049_vm0, %v22032_v36, %v1971_v44  ;;  %v5458_v35 = vld [vmem:[#allocation2 + $0x4c] sm:$0xff] }
  0xe0   : > { %4435 = vrot.lane.b32.xlu0 %v21955_v21, %s21609_s10  ;;  %v1730_v21 = vsel %vm1062_vm1, %v19125_v17, 0  ;;  %v19050_v17 = vld [vmem:[%s21682_s8 + $0x92] sm:$0x3f] }
  0xe1   : > { %19118 = vmatmul.mubr.msk.bf16.vlgmr.msra.gmra.mrb[4].mxu1 %vm1058_vm2, %v976_v60  ;;  %v1990_v60 = vsel %vm1062_vm1, %v1974_v52, 0  ;;  %v728_v19 = vcombine.low %v19050_v17, %v19050_v17  ;;  %19060 = vst.sshfl [vmem:[#allocation2 + $0x94] sm:$0x30 pattern:$0x76325410] %v19050_v17 }
  0xe2   : > { %1777 = vmatpush1.bf16.msra.mxu1 %v1718_v51  ;;  %v22052_v46 = vpop.permute.xlu0 %2181  ;;  %1808 = vmatprep.mubr.bf16.mxu1 %v26957_v28  ;;  %v21225_v52 = vld [vmem:[#allocation2] ss:$76 sps:$4 sm:$0xfc]  }
  0xe3   : > { %19133 = vmatprep.subr.msk.bf16.mxu1 %vm1062_vm1, %v19126_v14  ;;  %4445 = vrot.lane.b32.xlu1 %v22002_v2, %s21609_s10  ;;  %v2196_v62 = vpop.permute.xlu1 %2195  ;;  %v2198_v3 = vsel %vm1460_vm3, %v22052_v46, %v22063_v18  ;;  %v2197_v9 = vsel %vm1460_vm3, %v22043_v15, %v22052_v46  ;;  %19059 = vst.sshfl [vmem:[#allocation2 + $0x8c] sm:$0xf0 pattern:$0x76325410] %v728_v19 }
  0xe4   : > { %4439 = vrot.lane.b32.xlu0 %v21970_v47, %s21609_s10  ;;  %19128 = vmatmul.mubr.msk.bf16.vlgmr.msra.gmra.mrb[0].mxu0 %vm1058_vm2, %v977_v41  ;;  %v2209_v13 = vsel %vm1062_vm1, %v2197_v9, 0 }
  0xe5   : > { %1818 = vmatpush1.bf16.msra.mxu0 %v1724_v55  ;;  %1849 = vmatprep.mubr.bf16.mxu0 %v26957_v28  ;;  %v2408_v55 = vld [vmem:[#allocation2 + $0x54] sm:$0x33] }
  0xe6   : > { %19144 = vmatprep.subr.msk.bf16.mxu0 %vm1062_vm1, %v1973_v16  ;;  %v22069_v20 = vpop.permute.xlu0 %2185  ;;  %v19161_v59 = vcombine.high %v21703_v34, %v2408_v55  ;;  %v5454_v34 = vld [vmem:[#allocation2] sm:$0xcc] }
  0xe7   : > { %4936 = vrot.lane.b32.xlu1 %v22089_v38, %s21608_s9  ;;  %v22155_v5 = vpop.permute.xlu1 %2692  ;;  %v2200_v33 = vsel %vm1460_vm3, %v22069_v20, %v22083_v45  ;;  %v2199_v44 = vsel %vm1460_vm3, %v22063_v18, %v22069_v20  ;;  %v22219_v18 = vld [vmem:[%s26946_s2 + $0x14] sm:$0xf] }
  0xe8   : > { %4443 = vrot.lane.b32.xlu0 %v21990_v61, %s21609_s10  ;;  %v22126_v61 = vcombine.low %v21853_v32, %v4894_v54  ;;  %v22153_v32 = vld [vmem:[#allocation2 + $0x40] ss:$76 sps:$4 sm:$0x3f]   ;;  %v2215_v15 = vsel %vm1062_vm1, %v2199_v44, 0  ;;  %v2410_v54 = vld [vmem:[#allocation2 + $0x64] sm:$0x33] }
  0xe9   : > { %19130 = vmatmul.mubr.msk.bf16.vlgmr.msra.gmra.mrb[0].mxu1 %vm1058_vm2, %v977_v41 }
  0xea   : > { %1859 = vmatpush1.bf16.msra.mxu1 %v1730_v21  ;;  %v22092_v47 = vpop.permute.xlu0 %2189  ;;  %1890 = vmatprep.mubr.bf16.mxu1 %v26957_v28 }
  0xeb   : > { %19146 = vmatprep.subr.msk.bf16.mxu1 %vm1062_vm1, %v1975_v29  ;;  %4940 = vrot.lane.b32.xlu1 %v22114_v56, %s21608_s9  ;;  %v22177_v37 = vpop.permute.xlu1 %2696  ;;  %v2202_v40 = vsel %vm1460_vm3, %v22092_v47, %v22108_v53  ;;  %v2409_v29 = vld [vmem:[#allocation2 + $0x5c] sm:$0x33] }
  0xec   : > { %4934 = vrot.lane.b32.xlu0 %v22078_v23, %s21608_s9  ;;  %19132 = vmatmul.mubr.msk.bf16.vlgmr.msra.gmra.mrb[4].mxu0 %vm1058_vm2, %v977_v41 }
  0xed   : > { %2008 = vmatpush1.bf16.msra.mxu0 %v1984_v42  ;;  %2039 = vmatprep.mubr.bf16.mxu0 %v26957_v28 }
  0xee   : > { %19148 = vmatprep.subr.msk.bf16.mxu0 %vm1062_vm1, %v1977_v50  ;;  %v22117_v57 = vpop.permute.xlu0 %2193 }
  0xef   : > { %4944 = vrot.lane.b32.xlu1 %v22137_v0, %s21608_s9  ;;  %v22196_v51 = vpop.permute.xlu1 %2700  ;;  %v2204_v46 = vsel %vm1460_vm3, %v22117_v57, %v2196_v62 }
  0xf0   : > { %4938 = vrot.lane.b32.xlu0 %v22106_v22, %s21608_s9 }
  0xf1   : > { %19134 = vmatmul.mubr.msk.bf16.vlgmr.msra.gmra.mrb[4].mxu1 %vm1058_vm2, %v977_v41  ;;  %v2201_v41 = vsel %vm1460_vm3, %v22083_v45, %v22092_v47 }
  0xf2   : > { %2049 = vmatpush1.bf16.msra.mxu1 %v1990_v60  ;;  %v22140_v2 = vpop.permute.xlu0 %2690  ;;  %2080 = vmatprep.mubr.bf16.mxu1 %v26957_v28  ;;  %v2221_v20 = vsel %vm1062_vm1, %v2201_v41, 0  ;;  %v19325_v60 = vcombine.high %v5454_v34, %v5458_v35  ;;  %v980_v41 = vld [vmem:[%s26946_s2 + $0x18] sm:$0xf] }
  0xf3   : > { %19150 = vmatprep.subr.msk.bf16.mxu1 %vm1062_vm1, %v1979_v27  ;;  %4948 = vrot.lane.b32.xlu1 %v22160_v6, %s21608_s9  ;;  %v22212_v16 = vpop.permute.xlu1 %2704  ;;  %v21511_v27 = vld [vmem:[#allocation2 + $0x18] sm:$0xff] }
  0xf4   : > { %4942 = vrot.lane.b32.xlu0 %v22126_v61, %s21608_s9  ;;  %19145 = vmatmul.mubr.msk.bf16.vlgmr.msra.gmra.mrb[0].mxu0 %vm1058_vm2, %v978_v63  ;;  %v19165_v62 = vcombine.high %v21511_v27, %v2410_v54  ;;  %v22274_v10 = vrot.slane %v19325_v60, 2 }
  0xf5   : > { %2090 = vmatpush1.bf16.msra.mxu0 %v1996_v1  ;;  %2121 = vmatprep.mubr.bf16.mxu0 %v26957_v28 }
  0xf6   : > { %19152 = vmatprep.subr.msk.bf16.mxu0 %vm1062_vm1, %v2198_v3  ;;  %v22163_v7 = vpop.permute.xlu0 %2694  ;;  %v5456_v3 = vld [vmem:[#allocation2 + $0x10] sm:$0xcc] }
  0xf7   : > { %5156 = vrot.lane.b32.xlu1 %v22078_v23, %s21609_s10  ;;  %v2203_v23 = vsel %vm1460_vm3, %v22108_v53, %v22117_v57  ;;  %v22236_v45 = vpop.permute.xlu1 %2915  ;;  %v5455_v57 = vld [vmem:[#allocation2 + $0x8] sm:$0xcc]  ;;  %v19329_v19 = vcombine.high %v5456_v3, %v22262_v4 }
  0xf8   : > { %4946 = vrot.lane.b32.xlu0 %v22153_v32, %s21608_s9  ;;  %v2227_v50 = vsel %vm1062_vm1, %v2203_v23, 0 }
  0xf9   : > { %19147 = vmatmul.mubr.msk.bf16.vlgmr.msra.gmra.mrb[0].mxu1 %vm1058_vm2, %v978_v63 }
  0xfa   : > { %2131 = vmatpush1.bf16.msra.mxu1 %v2002_v8  ;;  %v22183_v36 = vpop.permute.xlu0 %2698  ;;  %2162 = vmatprep.mubr.bf16.mxu1 %v26957_v28  ;;  %v2411_v8 = vld [vmem:[#allocation2 + $0x6c] sm:$0x33] }
  0xfb   : > { %19154 = vmatprep.subr.msk.bf16.mxu1 %vm1062_vm1, %v2200_v33  ;;  %5160 = vrot.lane.b32.xlu1 %v22106_v22, %s21609_s10  ;;  %v21510_v22 = vld [vmem:[#allocation2 + $0x10] sm:$0xff]  ;;  %v19327_v33 = vcombine.high %v5455_v57, %v22251_v58  ;;  %v19166_v23 = vcombine.low %v21806_v11, %v2411_v8 }
  0xfc   : > { %4950 = vrot.lane.b32.xlu0 %v22172_v48, %s21608_s9  ;;  %19149 = vmatmul.mubr.msk.bf16.vlgmr.msra.gmra.mrb[4].mxu0 %vm1058_vm2, %v978_v63  ;;  %v19163_v53 = vcombine.high %v21510_v22, %v2409_v29  ;;  %v19162_v1 = vcombine.low %v21510_v22, %v2409_v29  ;;  %v2711_v22 = vsel %vm1049_vm0, %v22177_v37, %v22183_v36 }
  0xfd   : > { %2233 = vmatpush1.bf16.msra.mxu0 %v2209_v13  ;;  %2264 = vmatprep.mubr.bf16.mxu0 %v26957_v28  ;;  %v22298_v17 = vrot.slane %v19327_v33, 2  ;;  %v22386_v33 = vld [vmem:[%s26946_s2 + $0x1c] sm:$0xf] }
  0xfe   : > { %19156 = vmatprep.subr.msk.bf16.mxu0 %vm1062_vm1, %v2202_v40  ;;  %v22202_v14 = vpop.permute.xlu0 %2702  ;;  %v2454_v13 = vsel %vm1062_vm1, %v19162_v1, 0  ;;  %v19167_v40 = vcombine.high %v21806_v11, %v2411_v8  ;;  %v2710_v1 = vsel %vm1049_vm0, %v22163_v7, %v22177_v37 }
  0xff   : > { %5164 = vrot.lane.b32.xlu1 %v22126_v61, %s21609_s10  ;;  %v2726_v37 = vsel %vm1062_vm1, %v2710_v1, 0 }
 0x100   : > { %5158 = vrot.lane.b32.xlu0 %v22089_v38, %s21609_s10  ;;  %v21509_v38 = vld [vmem:[#allocation2 + $0x8] sm:$0xff] }
 0x101   : > { %19151 = vmatmul.mubr.msk.bf16.vlgmr.msra.gmra.mrb[4].mxu1 %vm1058_vm2, %v978_v63  ;;  %v19160_v42 = vcombine.low %v21509_v38, %v2408_v55  ;;  %v5457_v55 = vld [vmem:[#allocation2 + $0x18] sm:$0xcc]  ;;  %v22321_v38 = vrot.slane %v19329_v19, 2 }
 0x102   : > { %2274 = vmatpush1.bf16.msra.mxu1 %v2215_v15  ;;  %v22225_v21 = vpop.permute.xlu0 %2706  ;;  %2305 = vmatprep.mubr.bf16.mxu1 %v26957_v28 }
 0x103   : > { %19158 = vmatprep.subr.msk.bf16.mxu1 %vm1062_vm1, %v2204_v46  ;;  %5168 = vrot.lane.b32.xlu1 %v22153_v32, %s21609_s10  ;;  %v2448_v61 = vsel %vm1062_vm1, %v19160_v42, 0  ;;  %v19326_v32 = vcombine.low %v5455_v57, %v22251_v58  ;;  %v22294_v46 = vld [vmem:[#allocation2 + $0x64] sm:$0xff]  ;;  %v2708_v57 = vsel %vm1049_vm0, %v22140_v2, %v22155_v5 }
 0x104   : > { %5162 = vrot.lane.b32.xlu0 %v22114_v56, %s21609_s10  ;;  %19153 = vmatmul.mubr.msk.bf16.vlgmr.msra.gmra.mrb[0].mxu0 %vm1058_vm2, %v22219_v18  ;;  %v22247_v56 = vpop.permute.xlu1 %2919  ;;  %v19330_v34 = vcombine.low %v5457_v55, %v22294_v46  ;;  %v19331_v11 = vcombine.high %v5457_v55, %v22294_v46  ;;  %v2720_v2 = vsel %vm1062_vm1, %v2708_v57, 0 }
 0x105   : > { %2315 = vmatpush1.bf16.msra.mxu0 %v2221_v20  ;;  %2346 = vmatprep.mubr.bf16.mxu0 %v26957_v28  ;;  %v22284_v44 = vrot.slane %v19326_v32, 2  ;;  %v2715_v32 = vsel %vm1049_vm0, %v22212_v16, %v22225_v21 }
 0x106   : > { %19168 = vmatprep.subr.msk.bf16.mxu0 %vm1062_vm1, %v19161_v59  ;;  %v22242_v47 = vpop.permute.xlu0 %2917  ;;  %v22345_v60 = vrot.slane %v19331_v11, 2 }
 0x107   : > { %5172 = vrot.lane.b32.xlu1 %v22172_v48, %s21609_s10  ;;  %v19328_v48 = vcombine.low %v5456_v3, %v22262_v4 }
 0x108   : > { %5166 = vrot.lane.b32.xlu0 %v22137_v0, %s21609_s10  ;;  %v22259_v0 = vrot.slane %v21225_v52, 2  ;;  %v22269_v9 = vpop.permute.xlu1 %2923  ;;  %v22330_v52 = vrot.slane %v19330_v34, 2 }
 0x109   : > { %19155 = vmatmul.mubr.msk.bf16.vlgmr.msra.gmra.mrb[0].mxu1 %vm1058_vm2, %v22219_v18  ;;  %v22313_v29 = vrot.slane %v19328_v48, 2  ;;  %v2933_v48 = vsel %vm1460_vm3, %v22236_v45, %v22242_v47 }
 0x10a   : > { %2356 = vmatpush1.bf16.msra.mxu1 %v2227_v50  ;;  %v22256_v63 = vpop.permute.xlu0 %2921  ;;  %2387 = vmatprep.mubr.bf16.mxu1 %v26957_v28  ;;  %v2466_v50 = vsel %vm1062_vm1, %v19166_v23, 0  ;;  %v22450_v23 = vld [vmem:[#allocation2 + $0x8] ss:$76 sps:$4 sm:$0xfc]  }
 0x10b   : > { %19170 = vmatprep.subr.msk.bf16.mxu1 %vm1062_vm1, %v19163_v53  ;;  %5512 = vrot.lane.b32.xlu1 %v22274_v10, %s21608_s9  ;;  %v22335_v53 = vld [vmem:[#allocation2 + $0x20] ss:$76 sps:$4 sm:$0xfc]   ;;  %v2935_v19 = vsel %vm1460_vm3, %v22247_v56, %v22256_v63 }
 0x10c   : > { %5170 = vrot.lane.b32.xlu0 %v22160_v6, %s21609_s10  ;;  %19157 = vmatmul.mubr.msk.bf16.vlgmr.msra.gmra.mrb[4].mxu0 %vm1058_vm2, %v22219_v18  ;;  %v19164_v6 = vcombine.low %v21511_v27, %v2410_v54  ;;  %v22287_v15 = vpop.permute.xlu1 %2927  ;;  %v2713_v27 = vsel %vm1049_vm0, %v22196_v51, %v22202_v14  ;;  %v2951_v34 = vsel %vm1062_vm1, %v2935_v19, 0 }
 0x10d   : > { %2472 = vmatpush1.bf16.msra.mxu0 %v2448_v61  ;;  %2503 = vmatprep.mubr.bf16.mxu0 %v26957_v28 }
 0x10e   : > { %19172 = vmatprep.subr.msk.bf16.mxu0 %vm1062_vm1, %v19165_v62  ;;  %v22278_v12 = vpop.permute.xlu0 %2925  ;;  %v2460_v20 = vsel %vm1062_vm1, %v19164_v6, 0 }
 0x10f   : > { %5516 = vrot.lane.b32.xlu1 %v22298_v17, %s21608_s9 }
 0x110   : > { %5510 = vrot.lane.b32.xlu0 %v22259_v0, %s21608_s9  ;;  %v22316_v35 = vpop.permute.xlu1 %2931 }
 0x111   : > { %19159 = vmatmul.mubr.msk.bf16.vlgmr.msra.gmra.mrb[4].mxu1 %vm1058_vm2, %v22219_v18  ;;  %v2709_v18 = vsel %vm1049_vm0, %v22155_v5, %v22163_v7  ;;  %v5509_v5 = vrot.slane %v22335_v53, 2  ;;  %v2712_v7 = vsel %vm1049_vm0, %v22183_v36, %v22196_v51  ;;  %v2934_v36 = vsel %vm1460_vm3, %v22242_v47, %v22247_v56 }
 0x112   : > { %2513 = vmatpush1.bf16.msra.mxu1 %v2454_v13  ;;  %v22302_v59 = vpop.permute.xlu0 %2929  ;;  %2544 = vmatprep.mubr.bf16.mxu1 %v26957_v28  ;;  %v2732_v51 = vsel %vm1062_vm1, %v2712_v7, 0  ;;  %v2714_v13 = vsel %vm1049_vm0, %v22202_v14, %v22212_v16  ;;  %v2945_v16 = vsel %vm1062_vm1, %v2933_v48, 0  ;;  %v2938_v47 = vsel %vm1460_vm3, %v22278_v12, %v22287_v15  ;;  %v22518_v48 = vld [vmem:[#allocation2 + $0x1c] ss:$76 sps:$4 sm:$0xfc]  }
 0x113   : > { %19174 = vmatprep.subr.msk.bf16.mxu1 %vm1062_vm1, %v19167_v40  ;;  %5520 = vrot.lane.b32.xlu1 %v22321_v38, %s21608_s9  ;;  %v2738_v14 = vsel %vm1062_vm1, %v2714_v13, 0  ;;  %v2939_v53 = vsel %vm1460_vm3, %v22287_v15, %v22302_v59 }
 0x114   : > { %5514 = vrot.lane.b32.xlu0 %v22284_v44, %s21608_s9  ;;  %19169 = vmatmul.mubr.msk.bf16.vlgmr.msra.gmra.mrb[0].mxu0 %vm1058_vm2, %v980_v41  ;;  %v22337_v54 = vpop.permute.xlu1 %3302 }
 0x115   : > { %2554 = vmatpush1.bf16.msra.mxu0 %v2460_v20  ;;  %2585 = vmatprep.mubr.bf16.mxu0 %v26957_v28  ;;  %v22443_v20 = vld [vmem:[#allocation2 + $0x4] ss:$76 sps:$4 sm:$0xfc]  }
 0x116   : > { %19185 = vmatprep.subr.msk.bf16.mxu0 %vm1062_vm1, %v2709_v18  ;;  %v22325_v42 = vpop.permute.xlu0 %3300  ;;  %v6425_v11 = vrot.slane %v22443_v20, 2 }
 0x117   : > { %5524 = vrot.lane.b32.xlu1 %v22345_v60, %s21608_s9 }
 0x118   : > { %5518 = vrot.lane.b32.xlu0 %v22313_v29, %s21608_s9  ;;  %v22359_v62 = vpop.permute.xlu1 %3306 }
 0x119   : > { %19171 = vmatmul.mubr.msk.bf16.vlgmr.msra.gmra.mrb[0].mxu1 %vm1058_vm2, %v980_v41 }
 0x11a   : > { %2595 = vmatpush1.bf16.msra.mxu1 %v2466_v50  ;;  %v22347_v61 = vpop.permute.xlu0 %3304  ;;  %2626 = vmatprep.mubr.bf16.mxu1 %v26957_v28  ;;  %v2940_v50 = vsel %vm1460_vm3, %v22302_v59, %v22316_v35  ;;  %v22505_v59 = vld [vmem:[#allocation2 + $0x18] ss:$76 sps:$4 sm:$0xfc]  }
 0x11b   : > { %19187 = vmatprep.subr.msk.bf16.mxu1 %vm1062_vm1, %v2711_v22  ;;  %5912 = vrot.lane.b32.xlu1 %v22259_v0, %s21609_s10  ;;  %v22465_v22 = vld [vmem:[#allocation2 + $0xc] ss:$76 sps:$4 sm:$0xfc]   ;;  %v3319_v1 = vsel %vm1049_vm0, %v22337_v54, %v22347_v61 }
 0x11c   : > { %5522 = vrot.lane.b32.xlu0 %v22330_v52, %s21608_s9  ;;  %19173 = vmatmul.mubr.msk.bf16.vlgmr.msra.gmra.mrb[4].mxu0 %vm1058_vm2, %v980_v41  ;;  %v22376_v8 = vpop.permute.xlu1 %3310 }
 0x11d   : > { %2744 = vmatpush1.bf16.msra.mxu0 %v2720_v2  ;;  %2775 = vmatprep.mubr.bf16.mxu0 %v26957_v28 }
 0x11e   : > { %19189 = vmatprep.subr.msk.bf16.mxu0 %vm1062_vm1, %v2713_v27  ;;  %v22368_v3 = vpop.permute.xlu0 %3308  ;;  %v22479_v27 = vld [vmem:[#allocation2 + $0x10] ss:$76 sps:$4 sm:$0xfc]  }
 0x11f   : > { %5916 = vrot.lane.b32.xlu1 %v22284_v44, %s21609_s10  ;;  %v6428_v15 = vrot.slane %v22479_v27, 2  ;;  %v3527_v27 = vsel %vm1062_vm1, %v21851_v31, 0 }
 0x120   : > { %5526 = vrot.lane.b32.xlu0 %v5509_v5, %s21608_s9  ;;  %v22402_v6 = vpop.permute.xlu1 %3314 }
 0x121   : > { %19175 = vmatmul.mubr.msk.bf16.vlgmr.msra.gmra.mrb[4].mxu1 %vm1058_vm2, %v980_v41  ;;  %v2936_v41 = vsel %vm1460_vm3, %v22256_v63, %v22269_v9  ;;  %v2937_v63 = vsel %vm1460_vm3, %v22269_v9, %v22278_v12  ;;  %v982_v9 = vld [vmem:[%s26946_s2 + $0x20] sm:$0xf]  ;;  %v6426_v12 = vrot.slane %v22450_v23, 2  ;;  %v3521_v23 = vsel %vm1062_vm1, %v21839_v26, 0 }
 0x122   : > { %2785 = vmatpush1.bf16.msra.mxu1 %v2726_v37  ;;  %v22390_v21 = vpop.permute.xlu0 %3312  ;;  %2816 = vmatprep.mubr.bf16.mxu1 %v26957_v28  ;;  %v2957_v35 = vsel %vm1062_vm1, %v2937_v63, 0  ;;  %v3320_v63 = vsel %vm1049_vm0, %v22347_v61, %v22359_v62  ;;  %v3322_v61 = vsel %vm1049_vm0, %v22368_v3, %v22376_v8 }
 0x123   : > { %19191 = vmatprep.subr.msk.bf16.mxu1 %vm1062_vm1, %v2715_v32  ;;  %5920 = vrot.lane.b32.xlu1 %v22313_v29, %s21609_s10  ;;  %v22496_v32 = vld [vmem:[#allocation2 + $0x14] ss:$76 sps:$4 sm:$0xfc]   ;;  %v3323_v19 = vsel %vm1049_vm0, %v22376_v8, %v22390_v21  ;;  %v3324_v8 = vsel %vm1049_vm0, %v22390_v21, %v22402_v6 }
 0x124   : > { %5914 = vrot.lane.b32.xlu0 %v22274_v10, %s21609_s10  ;;  %19186 = vmatmul.mubr.msk.bf16.vlgmr.msra.gmra.mrb[0].mxu0 %vm1058_vm2, %v22386_v33  ;;  %v22421_v55 = vpop.permute.xlu1 %3702  ;;  %v6429_v13 = vrot.slane %v22496_v32, 2 }
 0x125   : > { %2826 = vmatpush1.bf16.msra.mxu0 %v2732_v51  ;;  %2857 = vmatprep.mubr.bf16.mxu0 %v26957_v28  ;;  %v3318_v51 = vsel %vm1049_vm0, %v22325_v42, %v22337_v54  ;;  %v6430_v42 = vrot.slane %v22505_v59, 2  ;;  %v3333_v59 = vsel %vm1062_vm1, %v3320_v63, 0  ;;  %v3533_v63 = vsel %vm1062_vm1, %v21863_v43, 0 }
 0x126   : > { %19193 = vmatprep.subr.msk.bf16.mxu0 %vm1062_vm1, %v2934_v36  ;;  %v22411_v40 = vpop.permute.xlu0 %3316  ;;  %v2963_v36 = vsel %vm1062_vm1, %v2939_v53, 0  ;;  %v3327_v54 = vsel %vm1062_vm1, %v3318_v51, 0 }
 0x127   : > { %5924 = vrot.lane.b32.xlu1 %v22330_v52, %s21609_s10 }
 0x128   : > { %5918 = vrot.lane.b32.xlu0 %v22298_v17, %s21609_s10  ;;  %v22445_v18 = vpop.permute.xlu1 %3706 }
 0x129   : > { %19188 = vmatmul.mubr.msk.bf16.vlgmr.msra.gmra.mrb[0].mxu1 %vm1058_vm2, %v22386_v33 }
 0x12a   : > { %2867 = vmatpush1.bf16.msra.mxu1 %v2738_v14  ;;  %v22429_v45 = vpop.permute.xlu0 %3704  ;;  %2898 = vmatprep.mubr.bf16.mxu1 %v26957_v28 }
 0x12b   : > { %19195 = vmatprep.subr.msk.bf16.mxu1 %vm1062_vm1, %v2936_v41  ;;  %5928 = vrot.lane.b32.xlu1 %v5509_v5, %s21609_s10  ;;  %v6427_v5 = vrot.slane %v22465_v22, 2  ;;  %v3321_v41 = vsel %vm1049_vm0, %v22359_v62, %v22368_v3  ;;  %v22580_v3 = vld [vmem:[%s26946_s2 + $0x4] sm:$0xf]  ;;  %v3721_v26 = vsel %vm1460_vm3, %v22429_v45, %v22445_v18 }
 0x12c   : > { %5922 = vrot.lane.b32.xlu0 %v22321_v38, %s21609_s10  ;;  %19190 = vmatmul.mubr.msk.bf16.vlgmr.msra.gmra.mrb[4].mxu0 %vm1058_vm2, %v22386_v33  ;;  %v22467_v57 = vpop.permute.xlu1 %3710 }
 0x12d   : > { %2969 = vmatpush1.bf16.msra.mxu0 %v2945_v16  ;;  %3000 = vmatprep.mubr.bf16.mxu0 %v26957_v28  ;;  %v22531_v16 = vld [vmem:[#allocation2 + $0x20] ss:$76 sps:$4 sm:$0xfc]  }
 0x12e   : > { %19197 = vmatprep.subr.msk.bf16.mxu0 %vm1062_vm1, %v2938_v47  ;;  %v22453_v56 = vpop.permute.xlu0 %3708 }
 0x12f   : > { %6436 = vrot.lane.b32.xlu1 %v6426_v12, %s21608_s9 }
 0x130   : > { %5926 = vrot.lane.b32.xlu0 %v22345_v60, %s21609_s10  ;;  %v22498_v7 = vpop.permute.xlu1 %3714 }
 0x131   : > { %19192 = vmatmul.mubr.msk.bf16.vlgmr.msra.gmra.mrb[4].mxu1 %vm1058_vm2, %v22386_v33 }
 0x132   : > { %3010 = vmatpush1.bf16.msra.mxu1 %v2951_v34  ;;  %v22481_v2 = vpop.permute.xlu0 %3712  ;;  %3041 = vmatprep.mubr.bf16.mxu1 %v26957_v28  ;;  %v6431_v34 = vrot.slane %v22518_v48, 2  ;;  %v3339_v48 = vsel %vm1062_vm1, %v3322_v61, 0 }
 0x133   : > { %19199 = vmatprep.subr.msk.bf16.mxu1 %vm1062_vm1, %v2940_v50  ;;  %6440 = vrot.lane.b32.xlu1 %v6428_v15, %s21608_s9  ;;  %v22548_v50 = vld [vmem:[#allocation2 + $0x24] ss:$76 sps:$4 sm:$0xfc]  }
 0x134   : > { %6434 = vrot.lane.b32.xlu0 %v6425_v11, %s21608_s9  ;;  %19194 = vmatmul.mubr.msk.bf16.vlgmr.msra.gmra.mrb[0].mxu0 %vm1058_vm2, %v982_v9  ;;  %v22523_v14 = vpop.permute.xlu1 %3718  ;;  %v6433_v62 = vrot.slane %v22548_v50, 2  ;;  %v3723_v50 = vsel %vm1460_vm3, %v22453_v56, %v22467_v57 }
 0x135   : > { %3051 = vmatpush1.bf16.msra.mxu0 %v2957_v35  ;;  %3082 = vmatprep.mubr.bf16.mxu0 %v26957_v28 }
 0x136   : > { %19214 = vmatprep.subr.msk.bf16.mxu0 %vm1062_vm1, %v3319_v1  ;;  %v22508_v37 = vpop.permute.xlu0 %3716  ;;  %v6432_v1 = vrot.slane %v22531_v16, 2 }
 0x137   : > { %6444 = vrot.lane.b32.xlu1 %v6430_v42, %s21608_s9 }
 0x138   : > { %6438 = vrot.lane.b32.xlu0 %v6427_v5, %s21608_s9  ;;  %v22550_v35 = vpop.permute.xlu1 %4209 }
 0x139   : > { %19196 = vmatmul.mubr.msk.bf16.vlgmr.msra.gmra.mrb[0].mxu1 %vm1058_vm2, %v982_v9 }
 0x13a   : > { %3092 = vmatpush1.bf16.msra.mxu1 %v2963_v36  ;;  %v22533_v47 = vpop.permute.xlu0 %4207  ;;  %3123 = vmatprep.mubr.bf16.mxu1 %v26957_v28  ;;  %v3325_v36 = vsel %vm1049_vm0, %v22402_v6, %v22411_v40 }
 0x13b   : > { %19216 = vmatprep.subr.msk.bf16.mxu1 %vm1062_vm1, %v3321_v41  ;;  %6448 = vrot.lane.b32.xlu1 %v6432_v1, %s21608_s9 }
 0x13c   : > { %6442 = vrot.lane.b32.xlu0 %v6429_v13, %s21608_s9  ;;  %19198 = vmatmul.mubr.msk.bf16.vlgmr.msra.gmra.mrb[4].mxu0 %vm1058_vm2, %v982_v9  ;;  %v22567_v51 = vpop.permute.xlu1 %4213 }
 0x13d   : > { %3351 = vmatpush1.bf16.msra.mxu0 %v3327_v54  ;;  %3382 = vmatprep.mubr.bf16.mxu0 %v26957_v28  ;;  %v3345_v54 = vsel %vm1062_vm1, %v3324_v8, 0 }
 0x13e   : > { %19218 = vmatprep.subr.msk.bf16.mxu0 %vm1062_vm1, %v3323_v19  ;;  %v22556_v53 = vpop.permute.xlu0 %4211  ;;  %v3720_v19 = vsel %vm1460_vm3, %v22421_v55, %v22429_v45  ;;  %v7125_v55 = vld [vmem:[#allocation2 + $0x20] sm:$0xcc]  ;;  %v22685_v45 = vld [vmem:[#allocation2 + $0x6c] sm:$0xff] }
 0x13f   : > { %6656 = vrot.lane.b32.xlu1 %v6425_v11, %s21609_s10  ;;  %v19420_v8 = vcombine.low %v7125_v55, %v22685_v45 }
 0x140   : > { %6446 = vrot.lane.b32.xlu0 %v6431_v34, %s21608_s9  ;;  %v22587_v40 = vpop.permute.xlu1 %4217 }
 0x141   : > { %19200 = vmatmul.mubr.msk.bf16.vlgmr.msra.gmra.mrb[4].mxu1 %vm1058_vm2, %v982_v9 }
 0x142   : > { %3392 = vmatpush1.bf16.msra.mxu1 %v3333_v59  ;;  %v22572_v41 = vpop.permute.xlu0 %4215  ;;  %3423 = vmatprep.mubr.bf16.mxu1 %v26957_v28  ;;  %v3729_v59 = vsel %vm1062_vm1, %v3720_v19, 0 }
 0x143   : > { %19220 = vmatprep.subr.msk.bf16.mxu1 %vm1062_vm1, %v3325_v36  ;;  %6660 = vrot.lane.b32.xlu1 %v6427_v5, %s21609_s10  ;;  %v3725_v36 = vsel %vm1460_vm3, %v22481_v2, %v22498_v7 }
 0x144   : > { %6450 = vrot.lane.b32.xlu0 %v6433_v62, %s21608_s9  ;;  %19215 = vmatmul.mubr.msk.bf16.vlgmr.msra.gmra.mrb[8].mxu0 %vm1058_vm2, %v22580_v3  ;;  %v22601_v21 = vpop.permute.xlu1 %4221 }
 0x145   : > { %3433 = vmatpush1.bf16.msra.mxu0 %v3339_v48  ;;  %3464 = vmatprep.mubr.bf16.mxu0 %v26957_v28 }
 0x146   : > { %19222 = vmatprep.subr.msk.bf16.mxu0 %vm1062_vm1, %v21834_v25  ;;  %v22595_v9 = vpop.permute.xlu0 %4219  ;;  %v3515_v25 = vsel %vm1062_vm1, %v21830_v24, 0  ;;  %v7122_v24 = vld [vmem:[#allocation2 + $0x8] sm:$0xcc] }
 0x147   : > { %6664 = vrot.lane.b32.xlu1 %v6429_v13, %s21609_s10  ;;  %v19414_v11 = vcombine.low %v7122_v24, %v22251_v58 }
 0x148   : > { %6658 = vrot.lane.b32.xlu0 %v6426_v12, %s21609_s10  ;;  %v22620_v20 = vpop.permute.xlu1 %4429  ;;  %v7123_v12 = vld [vmem:[#allocation2 + $0x10] sm:$0xcc] }
 0x149   : > { %19217 = vmatmul.mubr.msk.bf16.vlgmr.msra.gmra.mrb[8].mxu1 %vm1058_vm2, %v22580_v3  ;;  %v22655_v31 = vrot.slane %v19414_v11, 2  ;;  %v19416_v32 = vcombine.low %v7123_v12, %v22262_v4  ;;  %v22733_v11 = vrot.slane %v19420_v8, 2 }
 0x14a   : > { %3474 = vmatpush1.bf16.msra.mxu1 %v3345_v54  ;;  %v22610_v6 = vpop.permute.xlu0 %4223  ;;  %3505 = vmatprep.mubr.bf16.mxu1 %v26957_v28 }
 0x14b   : > { %19224 = vmatprep.subr.msk.bf16.mxu1 %vm1062_vm1, %v21846_v30  ;;  %6668 = vrot.lane.b32.xlu1 %v6431_v34, %s21609_s10  ;;  %v22676_v34 = vrot.slane %v19416_v32, 2  ;;  %v21251_v32 = vld [vmem:[#allocation2 + $0x28] ss:$76 sps:$4 sm:$0x3f]  }
 0x14c   : > { %6662 = vrot.lane.b32.xlu0 %v6428_v15, %s21609_s10  ;;  %19219 = vmatmul.mubr.msk.bf16.vlgmr.msra.gmra.mrb[12].mxu0 %vm1058_vm2, %v22580_v3  ;;  %v22634_v22 = vpop.permute.xlu1 %4433 }
 0x14d   : > { %3539 = vmatpush1.bf16.msra.mxu0 %v3515_v25  ;;  %3570 = vmatprep.mubr.bf16.mxu0 %v26957_v28 }
 0x14e   : > { %19226 = vmatprep.subr.msk.bf16.mxu0 %vm1062_vm1, %v21858_v39  ;;  %v22628_v30 = vpop.permute.xlu0 %4431  ;;  %v19415_v39 = vcombine.high %v7122_v24, %v22251_v58  ;;  %v21513_v58 = vld [vmem:[%s26946_s2] sm:$0xf]  ;;  %v19421_v24 = vcombine.high %v7125_v55, %v22685_v45 }
 0x14f   : > { %6672 = vrot.lane.b32.xlu1 %v6433_v62, %s21609_s10 }
 0x150   : > { %6666 = vrot.lane.b32.xlu0 %v6430_v42, %s21609_s10  ;;  %v22658_v15 = vpop.permute.xlu1 %4437  ;;  %v22662_v13 = vrot.slane %v19415_v39, 2  ;;  %v19417_v42 = vcombine.high %v7123_v12, %v22262_v4  ;;  %v3727_v12 = vsel %vm1460_vm3, %v22508_v37, %v22523_v14  ;;  %v22738_v39 = vld [vmem:[#allocation2 + $0x28] ss:$76 sps:$4 sm:$0xfc]  }
 0x151   : > { %19221 = vmatmul.mubr.msk.bf16.vlgmr.msra.gmra.mrb[12].mxu1 %vm1058_vm2, %v22580_v3  ;;  %v7177_v19 = vrot.slane %v22738_v39, 2  ;;  %v4227_v39 = vsel %vm1049_vm0, %v22556_v53, %v22567_v51 }
 0x152   : > { %3580 = vmatpush1.bf16.msra.mxu1 %v3521_v23  ;;  %v22642_v5 = vpop.permute.xlu0 %4435  ;;  %3611 = vmatprep.mubr.bf16.mxu1 %v26957_v28  ;;  %v22689_v43 = vrot.slane %v19417_v42, 2  ;;  %v3724_v23 = vsel %vm1460_vm3, %v22467_v57, %v22481_v2  ;;  %v763_v57 = vld [vmem:[%s22729_s6] sm:$0xff]  ;;  %v22746_v2 = vrot.slane %v19421_v24, 2  ;;  %v3726_v42 = vsel %vm1460_vm3, %v22498_v7, %v22508_v37  ;;  %v764_v7 = vld [vmem:[%s22729_s6 + $0x8] sm:$0xff] }
 0x153   : > { %19228 = vmatprep.subr.msk.bf16.mxu1 %vm1062_vm1, %v21868_v49  ;;  %v7124_v49 = vld [vmem:[#allocation2 + $0x18] sm:$0xcc]  ;;  %7180 = vrot.lane.b32.xlu1 %v22662_v13, %s21608_s9  ;;  %19061 = vst.sshfl [vmem:[#allocation2 + $0x98] sm:$0xf pattern:$0x76325410] %v763_v57  ;;  %v773_v14 = vcombine.high %v763_v57, %v763_v57  ;;  %v788_v24 = vcombine.high %v764_v7, %v764_v7 }
 0x154   : > { %6670 = vrot.lane.b32.xlu0 %v6432_v1, %s21609_s10  ;;  %19223 = vmatmul.mubr.msk.bf16.vlgmr.msra.gmra.mrb[8].mxu0 %vm1058_vm2, %v21513_v58  ;;  %v19418_v4 = vcombine.low %v7124_v49, %v22294_v46  ;;  %v22682_v1 = vpop.permute.xlu1 %4441  ;;  %v19419_v61 = vcombine.high %v7124_v49, %v22294_v46  ;;  %v3722_v46 = vsel %vm1460_vm3, %v22445_v18, %v22453_v56  ;;  %v3747_v55 = vsel %vm1062_vm1, %v3726_v42, 0 }
 0x155   : > { %3621 = vmatpush1.bf16.msra.mxu0 %v3527_v27  ;;  %3652 = vmatprep.mubr.bf16.mxu0 %v26957_v28  ;;  %v3735_v56 = vsel %vm1062_vm1, %v3722_v46, 0  ;;  %19062 = vst.sshfl [vmem:[#allocation2 + $0xa0] sm:$0xf pattern:$0x76325410] %v773_v14 }
 0x156   : > { %19230 = vmatprep.subr.msk.bf16.mxu0 %vm1062_vm1, %v3721_v26  ;;  %v22666_v16 = vpop.permute.xlu0 %4439  ;;  %v22706_v48 = vrot.slane %v19418_v4, 2  ;;  %v22716_v25 = vrot.slane %v19419_v61, 2  ;;  %v3741_v26 = vsel %vm1062_vm1, %v3724_v23, 0  ;;  %v21253_v4 = vld [vmem:[#allocation2 + $0x24] ss:$76 sps:$4 sm:$0x3f]  }
 0x157   : > { %7184 = vrot.lane.b32.xlu1 %v22689_v43, %s21608_s9  ;;  %19063 = vst.sshfl [vmem:[#allocation2 + $0xa8] sm:$0xf pattern:$0x76325410] %v764_v7  ;;  %v3965_v61 = vsel %vm1062_vm1, %v21253_v4, 0 }
 0x158   : > { %7178 = vrot.lane.b32.xlu0 %v22655_v31, %s21608_s9  ;;  %v22709_v54 = vpop.permute.xlu1 %4445  ;;  %v21257_v46 = vld [vmem:[#allocation2 + $0x38] ss:$76 sps:$4 sm:$0x3f]   ;;  %v21262_v23 = vld [vmem:[#allocation2 + $0x40] ss:$76 sps:$4 sm:$0x3f]  }
 0x159   : > { %19225 = vmatmul.mubr.msk.bf16.vlgmr.msra.gmra.mrb[8].mxu1 %vm1058_vm2, %v21513_v58  ;;  %19064 = vst.sshfl [vmem:[#allocation2 + $0xb0] sm:$0xf pattern:$0x76325410] %v788_v24 }
 0x15a   : > { %3662 = vmatpush1.bf16.msra.mxu1 %v3533_v63  ;;  %v22693_v62 = vpop.permute.xlu0 %4443  ;;  %3693 = vmatprep.mubr.bf16.mxu1 %v26957_v28  ;;  %v21264_v14 = vld [vmem:[#allocation2 + $0x3c] ss:$76 sps:$4 sm:$0x3f]  }
 0x15b   : > { %19232 = vmatprep.subr.msk.bf16.mxu1 %vm1062_vm1, %v3723_v50  ;;  %7188 = vrot.lane.b32.xlu1 %v22716_v25, %s21608_s9 }
 0x15c   : > { %7182 = vrot.lane.b32.xlu0 %v22676_v34, %s21608_s9  ;;  %19227 = vmatmul.mubr.msk.bf16.vlgmr.msra.gmra.mrb[12].mxu0 %vm1058_vm2, %v21513_v58  ;;  %v22740_v27 = vpop.permute.xlu1 %4936 }
 0x15d   : > { %3753 = vmatpush1.bf16.msra.mxu0 %v3729_v59  ;;  %3784 = vmatprep.mubr.bf16.mxu0 %v26957_v28  ;;  %v21254_v59 = vld [vmem:[#allocation2 + $0x30] ss:$76 sps:$4 sm:$0x3f]  }
 0x15e   : > { %19234 = vmatprep.subr.msk.bf16.mxu0 %vm1062_vm1, %v3725_v36  ;;  %v22720_v18 = vpop.permute.xlu0 %4934  ;;  %v21256_v36 = vld [vmem:[#allocation2 + $0x2c] ss:$76 sps:$4 sm:$0x3f]  }
 0x15f   : > { %7192 = vrot.lane.b32.xlu1 %v22746_v2, %s21608_s9  ;;  %v3971_v57 = vsel %vm1062_vm1, %v21256_v36, 0  ;;  %v3983_v36 = vsel %vm1062_vm1, %v21264_v14, 0 }
 0x160   : > { %7186 = vrot.lane.b32.xlu0 %v22706_v48, %s21608_s9  ;;  %v22763_v63 = vpop.permute.xlu1 %4940 }
 0x161   : > { %19229 = vmatmul.mubr.msk.bf16.vlgmr.msra.gmra.mrb[12].mxu1 %vm1058_vm2, %v21513_v58  ;;  %v21514_v58 = vld [vmem:[%s26946_s2 + $0x8] sm:$0xf] }
 0x162   : > { %3794 = vmatpush1.bf16.msra.mxu1 %v3735_v56  ;;  %v22749_v49 = vpop.permute.xlu0 %4938  ;;  %3825 = vmatprep.mubr.bf16.mxu1 %v26957_v28 }
 0x163   : > { %19236 = vmatprep.subr.msk.bf16.mxu1 %vm1062_vm1, %v3727_v12  ;;  %7400 = vrot.lane.b32.xlu1 %v22655_v31, %s21609_s10  ;;  %v21259_v31 = vld [vmem:[#allocation2 + $0x34] ss:$76 sps:$4 sm:$0x3f]  }
 0x164   : > { %7190 = vrot.lane.b32.xlu0 %v22733_v11, %s21608_s9  ;;  %19231 = vmatmul.mubr.msk.bf16.vlgmr.msra.gmra.mrb[8].mxu0 %vm1058_vm2, %v21514_v58  ;;  %v22776_v37 = vpop.permute.xlu1 %4944 }
 0x165   : > { %3835 = vmatpush1.bf16.msra.mxu0 %v3741_v26  ;;  %3866 = vmatprep.mubr.bf16.mxu0 %v26957_v28  ;;  %v22803_v26 = vld [vmem:[%s22729_s6 + $0x10] sm:$0xff] }
 0x166   : > { %19246 = vmatprep.subr.msk.bf16.mxu0 %vm1062_vm1, %v21251_v32  ;;  %v22769_v50 = vpop.permute.xlu0 %4942  ;;  %v7695_v32 = vld [vmem:[#allocation2 + $0x20] sm:$0xcc]  ;;  %19065 = vst.sshfl [vmem:[#allocation2 + $0xb8] sm:$0xf pattern:$0x76325410] %v22803_v26 }
 0x167   : > { %7404 = vrot.lane.b32.xlu1 %v22676_v34, %s21609_s10  ;;  %v3977_v34 = vsel %vm1062_vm1, %v21259_v31, 0  ;;  %v22847_v31 = vld [vmem:[#allocation2 + $0x7c] sm:$0xff] }
 0x168   : > { %7194 = vrot.lane.b32.xlu0 %v7177_v19, %s21608_s9  ;;  %v22789_v56 = vpop.permute.xlu1 %4948 }
 0x169   : > { %19233 = vmatmul.mubr.msk.bf16.vlgmr.msra.gmra.mrb[8].mxu1 %vm1058_vm2, %v21514_v58 }
 0x16a   : > { %3876 = vmatpush1.bf16.msra.mxu1 %v3747_v55  ;;  %v22782_v8 = vpop.permute.xlu0 %4946  ;;  %3907 = vmatprep.mubr.bf16.mxu1 %v26957_v28  ;;  %v7696_v55 = vld [vmem:[#allocation2 + $0x28] sm:$0xcc] }
 0x16b   : > { %19248 = vmatprep.subr.msk.bf16.mxu1 %vm1062_vm1, %v21254_v59  ;;  %7408 = vrot.lane.b32.xlu1 %v22706_v48, %s21609_s10  ;;  %v21515_v48 = vld [vmem:[%s26946_s2 + $0xc] sm:$0xf]  ;;  %v22827_v59 = vld [vmem:[#allocation2 + $0x74] sm:$0xff] }
 0x16c   : > { %7402 = vrot.lane.b32.xlu0 %v22662_v13, %s21609_s10  ;;  %19235 = vmatmul.mubr.msk.bf16.vlgmr.msra.gmra.mrb[12].mxu0 %vm1058_vm2, %v21514_v58  ;;  %v22800_v13 = vpop.permute.xlu1 %5156  ;;  %v19449_v24 = vcombine.low %v7696_v55, %v22827_v59 }
 0x16d   : > { %3989 = vmatpush1.bf16.msra.mxu0 %v3965_v61  ;;  %4020 = vmatprep.mubr.bf16.mxu0 %v26957_v28  ;;  %v4225_v61 = vsel %vm1049_vm0, %v22533_v47, %v22550_v35 }
 0x16e   : > { %19250 = vmatprep.subr.msk.bf16.mxu0 %vm1062_vm1, %v21257_v46  ;;  %v22795_v12 = vpop.permute.xlu0 %4950 }
 0x16f   : > { %7412 = vrot.lane.b32.xlu1 %v22733_v11, %s21609_s10  ;;  %v7697_v11 = vld [vmem:[#allocation2 + $0x30] sm:$0xcc] }
 0x170   : > { %7406 = vrot.lane.b32.xlu0 %v22689_v43, %s21609_s10  ;;  %v4226_v43 = vsel %vm1049_vm0, %v22550_v35, %v22556_v53  ;;  %v22824_v4 = vpop.permute.xlu1 %5160  ;;  %v4234_v35 = vsel %vm1062_vm1, %v4225_v61, 0  ;;  %v4240_v61 = vsel %vm1062_vm1, %v4227_v39, 0 }
 0x171   : > { %19237 = vmatmul.mubr.msk.bf16.vlgmr.msra.gmra.mrb[12].mxu1 %vm1058_vm2, %v21514_v58  ;;  %v19447_v58 = vcombine.low %v7695_v32, %v22685_v45 }
 0x172   : > { %4030 = vmatpush1.bf16.msra.mxu1 %v3971_v57  ;;  %v22810_v42 = vpop.permute.xlu0 %5158  ;;  %4061 = vmatprep.mubr.bf16.mxu1 %v26957_v28 }
 0x173   : > { %19252 = vmatprep.subr.msk.bf16.mxu1 %vm1062_vm1, %v21262_v23  ;;  %v22841_v46 = vrot.slane %v19447_v58, 2  ;;  %7416 = vrot.lane.b32.xlu1 %v7177_v19, %s21609_s10  ;;  %v22872_v19 = vrot.slane %v19449_v24, 2  ;;  %v22878_v58 = vld [vmem:[#allocation2 + $0x84] sm:$0xff] }
 0x174   : > { %7410 = vrot.lane.b32.xlu0 %v22716_v25, %s21609_s10  ;;  %19247 = vmatmul.mubr.msk.bf16.vlgmr.msra.gmra.mrb[8].mxu0 %vm1058_vm2, %v21515_v48  ;;  %v19448_v25 = vcombine.high %v7695_v32, %v22685_v45  ;;  %v4228_v45 = vsel %vm1049_vm0, %v22567_v51, %v22572_v41  ;;  %v22849_v23 = vpop.permute.xlu1 %5164  ;;  %v4230_v32 = vsel %vm1049_vm0, %v22587_v40, %v22595_v9 }
 0x175   : > { %4071 = vmatpush1.bf16.msra.mxu0 %v3977_v34  ;;  %4102 = vmatprep.mubr.bf16.mxu0 %v26957_v28  ;;  %27105 = vst [vmem:[#allocation3_spill] sm:$0xff] %v22841_v46  ;;  %27107 = vst [vmem:[#allocation5_spill] sm:$0xff] %v22872_v19  ;;  %v19451_v34 = vcombine.low %v7697_v11, %v22847_v31  ;;  %v19452_v51 = vcombine.high %v7697_v11, %v22847_v31 }
 0x176   : > { %19263 = vmatprep.subr.msk.bf16.mxu0 %vm1062_vm1, %v4226_v43  ;;  %v22833_v7 = vpop.permute.xlu0 %5162  ;;  %v22855_v47 = vrot.slane %v19448_v25, 2  ;;  %v7698_v43 = vld [vmem:[#allocation2 + $0x38] sm:$0xcc]  ;;  %v4229_v25 = vsel %vm1049_vm0, %v22572_v41, %v22587_v40 }
 0x177   : > { %v19453_v24 = vcombine.low %v7698_v43, %v22878_v58  ;;  %v22905_v41 = vrot.slane %v19452_v51, 2  ;;  %v4246_v40 = vsel %vm1062_vm1, %v4229_v25, 0  ;;  %v4447_v51 = vsel %vm1460_vm3, %v22620_v20, %v22628_v30 }
 0x178   : > { %7414 = vrot.lane.b32.xlu0 %v22746_v2, %s21609_s10  ;;  %27106 = vst [vmem:[#allocation4_spill] sm:$0xff] %v22855_v47  ;;  %v19450_v2 = vcombine.high %v7696_v55, %v22827_v59  ;;  %v22875_v14 = vpop.permute.xlu1 %5168  ;;  %7753 = vrot.lane.b32.xlu1 %v22855_v47, %s21608_s9 }
 0x179   : > { %19249 = vmatmul.mubr.msk.bf16.vlgmr.msra.gmra.mrb[8].mxu1 %vm1058_vm2, %v21515_v48  ;;  %27110 = vst [vmem:[#allocation8_spill] sm:$0xff] %v22905_v41  ;;  %v22925_v39 = vrot.slane %v19453_v24, 2  ;;  %v4450_v24 = vsel %vm1460_vm3, %v22642_v5, %v22658_v15 }
 0x17a   : > { %4112 = vmatpush1.bf16.msra.mxu1 %v3983_v36  ;;  %v22859_v57 = vpop.permute.xlu0 %5166  ;;  %4143 = vmatprep.mubr.bf16.mxu1 %v26957_v28  ;;  %v22882_v53 = vrot.slane %v19450_v2, 2  ;;  %v22894_v36 = vrot.slane %v19451_v34, 2  ;;  %v22927_v34 = vld [vmem:[#allocation2 + $0x40] ss:$76 sps:$4 sm:$0xfc]  }
 0x17b   : > { %19265 = vmatprep.subr.msk.bf16.mxu1 %vm1062_vm1, %v4228_v45  ;;  %v4232_v45 = vsel %vm1049_vm0, %v22601_v21, %v22610_v6  ;;  %v4448_v6 = vsel %vm1460_vm3, %v22628_v30, %v22634_v22  ;;  %27111 = vst [vmem:[#allocation9_spill] sm:$0xff] %v22925_v39  ;;  %v4452_v30 = vsel %vm1460_vm3, %v22666_v16, %v22682_v1 }
 0x17c   : > { %7751 = vrot.lane.b32.xlu0 %v22841_v46, %s21608_s9  ;;  %19251 = vmatmul.mubr.msk.bf16.vlgmr.msra.gmra.mrb[12].mxu0 %vm1058_vm2, %v21515_v48  ;;  %27108 = vst [vmem:[#allocation6_spill] sm:$0xff] %v22882_v53  ;;  %27109 = vst [vmem:[#allocation7_spill] sm:$0xff] %v22894_v36  ;;  %v22900_v11 = vpop.permute.xlu1 %5172 }
 0x17d   : > { %4258 = vmatpush1.bf16.msra.mxu0 %v4234_v35  ;;  %4289 = vmatprep.mubr.bf16.mxu0 %v26957_v28  ;;  %v19454_v35 = vcombine.high %v7698_v43, %v22878_v58 }
 0x17e   : > { %19267 = vmatprep.subr.msk.bf16.mxu0 %vm1062_vm1, %v4230_v32  ;;  %v22886_v55 = vpop.permute.xlu0 %5170  ;;  %7757 = vrot.lane.b32.xlu1 %v22882_v53, %s21608_s9  ;;  %v21516_v32 = vld [vmem:[%s26946_s2 + $0x10] sm:$0xf] }
 0x180   : > { %7755 = vrot.lane.b32.xlu0 %v22872_v19, %s21608_s9  ;;  %v22929_v43 = vpop.permute.xlu1 %5512 }
 0x181   : > { %19253 = vmatmul.mubr.msk.bf16.vlgmr.msra.gmra.mrb[12].mxu1 %vm1058_vm2, %v21515_v48  ;;  %v4231_v48 = vsel %vm1049_vm0, %v22595_v9, %v22601_v21  ;;  %v22934_v9 = vrot.slane %v19454_v35, 2  ;;  %v4449_v35 = vsel %vm1460_vm3, %v22634_v22, %v22642_v5  ;;  %v4451_v22 = vsel %vm1460_vm3, %v22658_v15, %v22666_v16  ;;  %v21276_v15 = vld [vmem:[#allocation2 + $0x2c] ss:$76 sps:$4 sm:$0x3f]  }
 0x182   : > { %4299 = vmatpush1.bf16.msra.mxu1 %v4240_v61  ;;  %v22909_v2 = vpop.permute.xlu0 %5510  ;;  %4330 = vmatprep.mubr.bf16.mxu1 %v26957_v28  ;;  %v4252_v25 = vsel %vm1062_vm1, %v4231_v48, 0  ;;  %v26950_v61 = vrot.slane %v22927_v34, 2  ;;  %v4462_v5 = vsel %vm1062_vm1, %v4449_v35, 0  ;;  %v21282_v35 = vld [vmem:[#allocation2 + $0x34] ss:$76 sps:$4 sm:$0x3f]  }
 0x183   : > { %19269 = vmatprep.subr.msk.bf16.mxu1 %vm1062_vm1, %v4232_v45  ;;  %7761 = vrot.lane.b32.xlu1 %v22905_v41, %s21608_s9  ;;  %27112 = vst [vmem:[#allocation10_spill] sm:$0xff] %v22934_v9 }
 0x184   : > { %7759 = vrot.lane.b32.xlu0 %v22894_v36, %s21608_s9  ;;  %19264 = vmatmul.mubr.msk.bf16.vlgmr.msra.gmra.mrb[8].mxu0 %vm1058_vm2, %v21516_v32  ;;  %v22949_v45 = vpop.permute.xlu1 %5516 }
 0x185   : > { %4340 = vmatpush1.bf16.msra.mxu0 %v4246_v40  ;;  %4371 = vmatprep.mubr.bf16.mxu0 %v26957_v28  ;;  %v4456_v40 = vsel %vm1062_vm1, %v4447_v51, 0  ;;  %v4454_v51 = vsel %vm1460_vm3, %v22693_v62, %v22709_v54  ;;  %v4453_v54 = vsel %vm1460_vm3, %v22682_v1, %v22693_v62  ;;  %v21278_v1 = vld [vmem:[#allocation2 + $0x28] ss:$76 sps:$4 sm:$0x3f]  }
 0x186   : > { %19271 = vmatprep.subr.msk.bf16.mxu0 %vm1062_vm1, %v4448_v6  ;;  %v22937_v21 = vpop.permute.xlu0 %5514 }
 0x187   : > { %7765 = vrot.lane.b32.xlu1 %v22934_v9, %s21608_s9 }
 0x188   : > { %7763 = vrot.lane.b32.xlu0 %v22925_v39, %s21608_s9  ;;  %v22969_v6 = vpop.permute.xlu1 %5520 }
 0x189   : > { %19266 = vmatmul.mubr.msk.bf16.vlgmr.msra.gmra.mrb[8].mxu1 %vm1058_vm2, %v21516_v32 }
 0x18a   : > { %4381 = vmatpush1.bf16.msra.mxu1 %v4252_v25  ;;  %v22955_v20 = vpop.permute.xlu0 %5518  ;;  %4412 = vmatprep.mubr.bf16.mxu1 %v26957_v28 }
 0x18b   : > { %19273 = vmatprep.subr.msk.bf16.mxu1 %vm1062_vm1, %v4450_v24  ;;  %8153 = vrot.lane.b32.xlu1 %v22841_v46, %s21609_s10  ;;  %v4468_v24 = vsel %vm1062_vm1, %v4451_v22, 0  ;;  %v23016_v22 = vld [vmem:[#allocation2 + $0x24] ss:$76 sps:$4 sm:$0xfc]  }
 0x18c   : > { %7767 = vrot.lane.b32.xlu0 %v26950_v61, %s21608_s9  ;;  %19268 = vmatmul.mubr.msk.bf16.vlgmr.msra.gmra.mrb[12].mxu0 %vm1058_vm2, %v21516_v32  ;;  %v22986_v25 = vpop.permute.xlu1 %5524  ;;  %v21284_v61 = vld [vmem:[#allocation2 + $0x30] ss:$76 sps:$4 sm:$0x3f]   ;;  %v23063_v46 = vld [vmem:[#allocation2 + $0x38] ss:$76 sps:$4 sm:$0xfc]  }
 0x18d   : > { %4480 = vmatpush1.bf16.msra.mxu0 %v4456_v40  ;;  %4511 = vmatprep.mubr.bf16.mxu0 %v26957_v28 }
 0x18e   : > { %19275 = vmatprep.subr.msk.bf16.mxu0 %vm1062_vm1, %v4452_v30  ;;  %v22975_v48 = vpop.permute.xlu0 %5522  ;;  %v4474_v30 = vsel %vm1062_vm1, %v4453_v54, 0 }
 0x18f   : > { %8157 = vrot.lane.b32.xlu1 %v22872_v19, %s21609_s10  ;;  %v23034_v19 = vld [vmem:[#allocation2 + $0x2c] ss:$76 sps:$4 sm:$0xfc]  }
 0x190   : > { %8155 = vrot.lane.b32.xlu0 %v22855_v47, %s21609_s10  ;;  %v23005_v40 = vpop.permute.xlu1 %5912  ;;  %v21296_v47 = vld [vmem:[#allocation2 + $0x40] ss:$76 sps:$4 sm:$0x3f]  }
 0x191   : > { %19270 = vmatmul.mubr.msk.bf16.vlgmr.msra.gmra.mrb[12].mxu1 %vm1058_vm2, %v21516_v32  ;;  %v21517_v32 = vld [vmem:[%s26946_s2 + $0x14] sm:$0xf] }
 0x192   : > { %4521 = vmatpush1.bf16.msra.mxu1 %v4462_v5  ;;  %v22992_v16 = vpop.permute.xlu0 %5526  ;;  %4552 = vmatprep.mubr.bf16.mxu1 %v26957_v28 }
 0x193   : > { %19277 = vmatprep.subr.msk.bf16.mxu1 %vm1062_vm1, %v4454_v51  ;;  %8161 = vrot.lane.b32.xlu1 %v22894_v36, %s21609_s10  ;;  %v23021_v51 = vld [vmem:[#allocation2 + $0x28] ss:$76 sps:$4 sm:$0xfc]   ;;  %v4698_v36 = vsel %vm1062_vm1, %v21284_v61, 0 }
 0x194   : > { %8159 = vrot.lane.b32.xlu0 %v22882_v53, %s21609_s10  ;;  %19272 = vmatmul.mubr.msk.bf16.vlgmr.msra.gmra.mrb[8].mxu0 %vm1058_vm2, %v21517_v32  ;;  %v23018_v5 = vpop.permute.xlu1 %5916  ;;  %v21291_v53 = vld [vmem:[#allocation2 + $0x44] ss:$76 sps:$4 sm:$0x3f]  }
 0x195   : > { %4562 = vmatpush1.bf16.msra.mxu0 %v4468_v24  ;;  %4593 = vmatprep.mubr.bf16.mxu0 %v26957_v28  ;;  %v4692_v24 = vsel %vm1062_vm1, %v21278_v1, 0  ;;  %v27116_v1 = vrot.slane %v23016_v22, 2 }
 0x196   : > { %19287 = vmatprep.subr.msk.bf16.mxu0 %vm1062_vm1, %v21276_v15  ;;  %v23011_v62 = vpop.permute.xlu0 %5914  ;;  %v21285_v15 = vld [vmem:[#allocation2 + $0x3c] ss:$76 sps:$4 sm:$0x3f]  }
 0x197   : > { %8165 = vrot.lane.b32.xlu1 %v22925_v39, %s21609_s10  ;;  %v23043_v39 = vld [vmem:[#allocation2 + $0x30] ss:$76 sps:$4 sm:$0xfc]  }
 0x198   : > { %8163 = vrot.lane.b32.xlu0 %v22905_v41, %s21609_s10 }
 0x199   : > { %19274 = vmatmul.mubr.msk.bf16.vlgmr.msra.gmra.mrb[8].mxu1 %vm1058_vm2, %v21517_v32 }
 0x19a   : > { %4603 = vmatpush1.bf16.msra.mxu1 %v4474_v30  ;;  %v23026_v54 = vpop.permute.xlu0 %5918  ;;  %4634 = vmatprep.mubr.bf16.mxu1 %v26957_v28  ;;  %v23036_v30 = vpop.permute.xlu1 %5920 }
 0x19b   : > { %27113 = vst [vmem:[#allocation11_spill] sm:$0xff] %v23026_v54  ;;  %19289 = vmatprep.subr.msk.bf16.mxu1 %vm1062_vm1, %v21282_v35  ;;  %v27114_v35 = vrot.slane %v22927_v34, 2  ;;  %v23102_v54 = vld [vmem:[#allocation2 + $0x44] ss:$76 sps:$4 sm:$0xfc]  }
 0x19c   : > { %8167 = vrot.lane.b32.xlu0 %v22934_v9, %s21609_s10  ;;  %19276 = vmatmul.mubr.msk.bf16.vlgmr.msra.gmra.mrb[12].mxu0 %vm1058_vm2, %v21517_v32  ;;  %v21289_v9 = vld [vmem:[#allocation2 + $0x38] ss:$76 sps:$4 sm:$0x3f]  }
 0x19d   : > { %4716 = vmatpush1.bf16.msra.mxu0 %v4692_v24  ;;  %4747 = vmatprep.mubr.bf16.mxu0 %v26957_v28  ;;  %v23053_v28 = vld [vmem:[#allocation2 + $0x34] ss:$76 sps:$4 sm:$0xfc]   ;;  %v4704_v61 = vsel %vm1062_vm1, %v21289_v9, 0  ;;  %v27120_v24 = vmov 0   ;;  %v4710_v9 = vsel %vm1062_vm1, %v21296_v47, 0 }
 0x19e   : > { %8169 = vrot.lane.b32.xlu1 %v27114_v35, %s21609_s10  ;;  %19291 = vmatprep.subr.msk.bf16.mxu0 %vm1062_vm1, %v21285_v15  ;;  %v23046_v41 = vpop.permute.xlu0 %5922  ;;  %v23055_v34 = vpop.permute.xlu1 %5924  ;;  %v27118_v15 = vrot.slane %v23021_v51, 2  ;;  %v23080_v35 = vld [vmem:[#allocation2 + $0x3c] ss:$76 sps:$4 sm:$0xfc]   ;;  %v27126_v47 = vrot.slane %v23063_v46, 2 }
 0x19f   : > { %27115 = vst [vmem:[#allocation12_spill] sm:$0xff] %v23046_v41  ;;  %27117 = vst [vmem:[#allocation13_spill] sm:$0xff] %v23055_v34  ;;  %v23090_v41 = vld [vmem:[#allocation2 + $0x40] ss:$76 sps:$4 sm:$0xfc]  }
 0x1a0   : > { %8675 = vrot.lane.b32.xlu0 %v27116_v1, %s21608_s9 }
 0x1a1   : > { %19278 = vmatmul.mubr.msk.bf16.vlgmr.msra.gmra.mrb[12].mxu1 %vm1058_vm2, %v21517_v32  ;;  %v4953_v32 = vsel %vm1049_vm0, %v22740_v27, %v22749_v49 }
 0x1a2   : > { %8677 = vrot.lane.b32.xlu1 %v27118_v15, %s21608_s9  ;;  %4757 = vmatpush1.bf16.msra.mxu1 %v4698_v36  ;;  %v23065_v1 = vpop.permute.xlu0 %5926  ;;  %v27121_v15 = vrot.slane %v23034_v19, 2  ;;  %v21518_v36 = vld [vmem:[%s26946_s2 + $0x18] sm:$0xf] }
 0x1a3   : > { %27119 = vst [vmem:[#allocation14_spill] sm:$0xff] %v23065_v1  ;;  %4788 = vmatprep.mubr.bf16.mxu1 %v27120_v24  ;;  %19293 = vmatprep.subr.msk.bf16.mxu1 %vm1062_vm1, %v21291_v53  ;;  %v23082_v53 = vpop.permute.xlu1 %5928  ;;  %v27123_v1 = vrot.slane %v23043_v39, 2 }
 0x1a4   : > { %8679 = vrot.lane.b32.xlu0 %v27121_v15, %s21608_s9  ;;  %19288 = vmatmul.mubr.msk.bf16.vlgmr.msra.gmra.mrb[8].mxu0 %vm1058_vm2, %v21518_v36  ;;  %27122 = vst [vmem:[#allocation15_spill] sm:$0xff] %v23082_v53  ;;  %v27125_v53 = vrot.slane %v23053_v28, 2 }
 0x1a5   : > { %4798 = vmatpush1.bf16.msra.mxu0 %v4704_v61  ;;  %4829 = vmatprep.mubr.bf16.mxu0 %v27120_v24 }
 0x1a6   : > { %8681 = vrot.lane.b32.xlu1 %v27123_v1, %s21608_s9  ;;  %19304 = vmatprep.subr.msk.bf16.mxu0 %vm1062_vm1, %v4953_v32  ;;  %v23092_v34 = vpop.permute.xlu0 %6434  ;;  %v4955_v1 = vsel %vm1049_vm0, %v22763_v63, %v22769_v50  ;;  %v4952_v32 = vsel %vm1049_vm0, %v22720_v18, %v22740_v27  ;;  %v27127_v18 = vrot.slane %v23080_v35, 2 }
 0x1a7   : > { %27124 = vst [vmem:[#allocation16_spill] sm:$0xff] %v23092_v34  ;;  %v23104_v15 = vpop.permute.xlu1 %6436  ;;  %v4957_v34 = vsel %vm1049_vm0, %v22776_v37, %v22782_v8  ;;  %v4961_v27 = vsel %vm1062_vm1, %v4952_v32, 0  ;;  %v4959_v32 = vsel %vm1049_vm0, %v22789_v56, %v22795_v12  ;;  %v5175_v12 = vsel %vm1460_vm3, %v22810_v42, %v22824_v4 }
 0x1a8   : > { %8683 = vrot.lane.b32.xlu0 %v27125_v53, %s21608_s9  ;;  %v8673_v53 = vrot.slane %v23090_v41, 2 }
 0x1a9   : > { %19290 = vmatmul.mubr.msk.bf16.vlgmr.msra.gmra.mrb[8].mxu1 %vm1058_vm2, %v21518_v36 }
 0x1aa   : > { %8685 = vrot.lane.b32.xlu1 %v27126_v47, %s21608_s9  ;;  %4839 = vmatpush1.bf16.msra.mxu1 %v4710_v9  ;;  %v23114_v61 = vpop.permute.xlu0 %6438  ;;  %v26965_v9 = vrot.slane %v23102_v54, 2 }
 0x1ab   : > { %4870 = vmatprep.mubr.bf16.mxu1 %v27120_v24  ;;  %19306 = vmatprep.subr.msk.bf16.mxu1 %vm1062_vm1, %v4955_v1  ;;  %v23127_v47 = vpop.permute.xlu1 %6440  ;;  %v4954_v1 = vsel %vm1049_vm0, %v22749_v49, %v22763_v63  ;;  %v4956_v49 = vsel %vm1049_vm0, %v22769_v50, %v22776_v37  ;;  %v27129_v50 = vrot.slane %v23021_v51, 2 }
 0x1ac   : > { %8687 = vrot.lane.b32.xlu0 %v27127_v18, %s21608_s9  ;;  %19292 = vmatmul.mubr.msk.bf16.vlgmr.msra.gmra.mrb[12].mxu0 %vm1058_vm2, %v21518_v36  ;;  %v4967_v63 = vsel %vm1062_vm1, %v4954_v1, 0  ;;  %v4973_v37 = vsel %vm1062_vm1, %v4956_v49, 0  ;;  %v27130_v1 = vrot.slane %v23034_v19, 2  ;;  %v803_v19 = vcombine.high %v22803_v26, %v22803_v26  ;;  %v21519_v49 = vld [vmem:[%s26946_s2 + $0x1c] sm:$0xf] }
 0x1ad   : > { %4985 = vmatpush1.bf16.msra.mxu0 %v4961_v27  ;;  %5016 = vmatprep.mubr.bf16.mxu0 %v27120_v24  ;;  %v5179_v26 = vsel %vm1460_vm3, %v22859_v57, %v22875_v14 }
 0x1ae   : > { %8689 = vrot.lane.b32.xlu1 %v8673_v53, %s21608_s9  ;;  %19308 = vmatprep.subr.msk.bf16.mxu0 %vm1062_vm1, %v4957_v34  ;;  %v23137_v18 = vpop.permute.xlu0 %6442  ;;  %v27128_v34 = vrot.slane %v23016_v22, 2  ;;  %19066 = vst.sshfl [vmem:[#allocation2 + $0xc0] sm:$0xf pattern:$0x76325410] %v803_v19 }
 0x1af   : > { %v23145_v27 = vpop.permute.xlu1 %6444  ;;  %v9365_v19 = vld [vmem:[#allocation2 + $0x38] sm:$0xcc] }
 0x1b0   : > { %8691 = vrot.lane.b32.xlu0 %v26965_v9, %s21608_s9 }
 0x1b1   : > { %19294 = vmatmul.mubr.msk.bf16.vlgmr.msra.gmra.mrb[12].mxu1 %vm1058_vm2, %v21518_v36  ;;  %v4958_v36 = vsel %vm1049_vm0, %v22782_v8, %v22789_v56  ;;  %v5177_v8 = vsel %vm1460_vm3, %v22833_v7, %v22849_v23 }
 0x1b2   : > { %8897 = vrot.lane.b32.xlu1 %v27128_v34, %s21609_s10  ;;  %5026 = vmatpush1.bf16.msra.mxu1 %v4967_v63  ;;  %v23155_v9 = vpop.permute.xlu0 %6446  ;;  %v27132_v63 = vrot.slane %v23053_v28, 2  ;;  %v27133_v28 = vrot.slane %v23063_v46, 2  ;;  %v5178_v46 = vsel %vm1460_vm3, %v22849_v23, %v22859_v57  ;;  %v27135_v23 = vrot.slane %v23102_v54, 2 }
 0x1b3   : > { %5057 = vmatprep.mubr.bf16.mxu1 %v27120_v24  ;;  %19310 = vmatprep.subr.msk.bf16.mxu1 %vm1062_vm1, %v4959_v32  ;;  %v23168_v22 = vpop.permute.xlu1 %6448  ;;  %v27131_v32 = vrot.slane %v23043_v39, 2  ;;  %v5180_v54 = vsel %vm1460_vm3, %v22875_v14, %v22886_v55 }
 0x1b4   : > { %8899 = vrot.lane.b32.xlu0 %v27129_v50, %s21609_s10  ;;  %19305 = vmatmul.mubr.msk.bf16.vlgmr.msra.gmra.mrb[8].mxu0 %vm1058_vm2, %v22386_v33  ;;  %v5174_v33 = vsel %vm1460_vm3, %v22800_v13, %v22810_v42  ;;  %v4979_v13 = vsel %vm1062_vm1, %v4958_v36, 0  ;;  %v9363_v42 = vld [vmem:[#allocation2 + $0x28] sm:$0xcc]  ;;  %v9364_v36 = vld [vmem:[#allocation2 + $0x30] sm:$0xcc] }
 0x1b5   : > { %5067 = vmatpush1.bf16.msra.mxu0 %v4973_v37  ;;  %5098 = vmatprep.mubr.bf16.mxu0 %v27120_v24  ;;  %v5183_v39 = vsel %vm1062_vm1, %v5174_v33, 0  ;;  %v19537_v50 = vcombine.low %v9363_v42, %v22827_v59  ;;  %v19540_v41 = vcombine.high %v9364_v36, %v22847_v31 }
 0x1b6   : > { %8901 = vrot.lane.b32.xlu1 %v27130_v1, %s21609_s10  ;;  %19312 = vmatprep.subr.msk.bf16.mxu0 %vm1062_vm1, %v5175_v12  ;;  %v23178_v51 = vpop.permute.xlu0 %6450  ;;  %v5176_v12 = vsel %vm1460_vm3, %v22824_v4, %v22833_v7  ;;  %v27134_v1 = vrot.slane %v23080_v35, 2  ;;  %v19538_v4 = vcombine.high %v9363_v42, %v22827_v59  ;;  %v19539_v59 = vcombine.low %v9364_v36, %v22847_v31  ;;  %v21520_v31 = vld [vmem:[%s26946_s2 + $0x20] sm:$0xf] }
 0x1b7   : > { %v23189_v56 = vpop.permute.xlu1 %6656  ;;  %v5189_v33 = vsel %vm1062_vm1, %v5176_v12, 0  ;;  %v23237_v35 = vrot.slane %v19537_v50, 2  ;;  %v19541_v42 = vcombine.low %v9365_v19, %v22878_v58  ;;  %v23274_v14 = vrot.slane %v19540_v41, 2  ;;  %v23288_v50 = vld [vmem:[#allocation2 + $0x40] ss:$76 sps:$4 sm:$0xfc]  }
 0x1b8   : > { %8903 = vrot.lane.b32.xlu0 %v27131_v32, %s21609_s10  ;;  %v5181_v32 = vsel %vm1460_vm3, %v22886_v55, %v22900_v11  ;;  %v23246_v57 = vrot.slane %v19538_v4, 2  ;;  %v5195_v11 = vsel %vm1062_vm1, %v5178_v46, 0  ;;  %v19542_v55 = vcombine.high %v9365_v19, %v22878_v58 }
 0x1b9   : > { %19307 = vmatmul.mubr.msk.bf16.vlgmr.msra.gmra.mrb[8].mxu1 %vm1058_vm2, %v21519_v49  ;;  %v5201_v12 = vsel %vm1062_vm1, %v5180_v54, 0  ;;  %v5531_v58 = vsel %vm1049_vm0, %v22949_v45, %v22955_v20  ;;  %v5533_v46 = vsel %vm1049_vm0, %v22969_v6, %v22975_v48 }
 0x1ba   : > { %8905 = vrot.lane.b32.xlu1 %v27132_v63, %s21609_s10  ;;  %5108 = vmatpush1.bf16.msra.mxu1 %v4979_v13  ;;  %v23202_v34 = vpop.permute.xlu0 %6658  ;;  %v23266_v13 = vrot.slane %v19539_v59, 2  ;;  %v23317_v59 = vld [vmem:[#allocation2 + $0x48] ss:$76 sps:$4 sm:$0xfc]  }
 0x1bb   : > { %5139 = vmatprep.mubr.bf16.mxu1 %v27120_v24  ;;  %19314 = vmatprep.subr.msk.bf16.mxu1 %vm1062_vm1, %v5177_v8  ;;  %v23217_v37 = vpop.permute.xlu1 %6660  ;;  %v9418_v41 = vrot.slane %v23317_v59, 2 }
 0x1bc   : > { %8907 = vrot.lane.b32.xlu0 %v27133_v28, %s21609_s10  ;;  %19309 = vmatmul.mubr.msk.bf16.vlgmr.msra.gmra.mrb[12].mxu0 %vm1058_vm2, %v21519_v49  ;;  %v23286_v28 = vrot.slane %v19541_v42, 2 }
 0x1bd   : > { %5207 = vmatpush1.bf16.msra.mxu0 %v5183_v39  ;;  %5238 = vmatprep.mubr.bf16.mxu0 %v27120_v24 }
 0x1be   : > { %8909 = vrot.lane.b32.xlu1 %v27134_v1, %s21609_s10  ;;  %19316 = vmatprep.subr.msk.bf16.mxu0 %vm1062_vm1, %v5179_v26  ;;  %v23225_v7 = vpop.permute.xlu0 %6662  ;;  %v5528_v26 = vsel %vm1049_vm0, %v22909_v2, %v22929_v43  ;;  %v23298_v2 = vrot.slane %v19542_v55, 2  ;;  %v23301_v1 = vld [vmem:[#allocation2 + $0x44] ss:$76 sps:$4 sm:$0xfc]  }
 0x1bf   : > { %v23240_v8 = vpop.permute.xlu1 %6664 }
 0x1c0   : > { %8911 = vrot.lane.b32.xlu0 %v8673_v53, %s21609_s10 }
 0x1c1   : > { %19311 = vmatmul.mubr.msk.bf16.vlgmr.msra.gmra.mrb[12].mxu1 %vm1058_vm2, %v21519_v49  ;;  %v5529_v49 = vsel %vm1049_vm0, %v22929_v43, %v22937_v21  ;;  %v5537_v43 = vsel %vm1062_vm1, %v5528_v26, 0  ;;  %v21521_v26 = vld [vmem:[%s26946_s2 + $0x4] sm:$0xf] }
 0x1c2   : > { %8913 = vrot.lane.b32.xlu1 %v27135_v23, %s21609_s10  ;;  %5248 = vmatpush1.bf16.msra.mxu1 %v5189_v33  ;;  %v23250_v53 = vpop.permute.xlu0 %6666  ;;  %v5530_v33 = vsel %vm1049_vm0, %v22937_v21, %v22949_v45  ;;  %v9417_v23 = vrot.slane %v23301_v1, 2  ;;  %v5532_v45 = vsel %vm1049_vm0, %v22955_v20, %v22969_v6  ;;  %v766_v6 = vld [vmem:[%s22729_s6 + $0x18] sm:$0xff]  ;;  %v5930_v1 = vsel %vm1460_vm3, %v23005_v40, %v23011_v62  ;;  %v9944_v40 = vld [vmem:[#allocation2 + $0xa8] sm:$0x33] }
 0x1c3   : > { %5279 = vmatprep.mubr.bf16.mxu1 %v27120_v24  ;;  %19318 = vmatprep.subr.msk.bf16.mxu1 %vm1062_vm1, %v5181_v32  ;;  %v23269_v39 = vpop.permute.xlu1 %6668  ;;  %v9416_v32 = vrot.slane %v23288_v50, 2  ;;  %v5549_v42 = vsel %vm1062_vm1, %v5532_v45, 0  ;;  %19067 = vst.sshfl [vmem:[#allocation2 + $0xc8] sm:$0xf pattern:$0x76325410] %v766_v6 }
 0x1c4   : > { %9419 = vrot.lane.b32.xlu0 %v23237_v35, %s21608_s9  ;;  %19313 = vmatmul.mubr.msk.bf16.vlgmr.msra.gmra.mrb[8].mxu0 %vm1058_vm2, %v21520_v31  ;;  %v21522_v50 = vld [vmem:[%s26946_s2] sm:$0xf] }
 0x1c5   : > { %5289 = vmatpush1.bf16.msra.mxu0 %v5195_v11  ;;  %5320 = vmatprep.mubr.bf16.mxu0 %v27120_v24  ;;  %v5543_v11 = vsel %vm1062_vm1, %v5530_v33, 0  ;;  %v23452_v45 = vld [vmem:[#allocation2 + $0x5c] sm:$0xff] }
 0x1c6   : > { %9421 = vrot.lane.b32.xlu1 %v23246_v57, %s21608_s9  ;;  %19333 = vmatprep.subr.msk.bf16.mxu0 %vm1062_vm1, %v5529_v49  ;;  %v23278_v63 = vpop.permute.xlu0 %6670  ;;  %v5535_v49 = vsel %vm1049_vm0, %v22986_v25, %v22992_v16  ;;  %v5534_v16 = vsel %vm1049_vm0, %v22975_v48, %v22986_v25  ;;  %v818_v25 = vcombine.high %v766_v6, %v766_v6  ;;  %v6134_v6 = vld [vmem:[#allocation2 + $0x4] sm:$0xcc] }
 0x1c7   : > { %v23293_v36 = vpop.permute.xlu1 %6672  ;;  %v5555_v55 = vsel %vm1062_vm1, %v5534_v16, 0  ;;  %v23467_v16 = vld [vmem:[#allocation2 + $0x50] sm:$0xff] }
 0x1c8   : > { %9423 = vrot.lane.b32.xlu0 %v23266_v13, %s21608_s9  ;;  %19068 = vst.sshfl [vmem:[#allocation2 + $0xd0] sm:$0xf pattern:$0x76325410] %v818_v25 }
 0x1c9   : > { %19315 = vmatmul.mubr.msk.bf16.vlgmr.msra.gmra.mrb[8].mxu1 %vm1058_vm2, %v21520_v31 }
 0x1ca   : > { %9425 = vrot.lane.b32.xlu1 %v23274_v14, %s21608_s9  ;;  %5330 = vmatpush1.bf16.msra.mxu1 %v5201_v12  ;;  %v23303_v4 = vpop.permute.xlu0 %7178  ;;  %v23388_v12 = vld [vmem:[%s22729_s6 + $0x20] sm:$0x3f] }
 0x1cb   : > { %5361 = vmatprep.mubr.bf16.mxu1 %v27120_v24  ;;  %19335 = vmatprep.subr.msk.bf16.mxu1 %vm1062_vm1, %v5531_v58  ;;  %v23319_v19 = vpop.permute.xlu1 %7180  ;;  %19069 = vst.sshfl [vmem:[#allocation2 + $0xd8] sm:$0xf pattern:$0x76325410] %v23388_v12  ;;  %v9943_v58 = vld [vmem:[#allocation2 + $0xa0] sm:$0x33] }
 0x1cc   : > { %9427 = vrot.lane.b32.xlu0 %v23286_v28, %s21608_s9  ;;  %19317 = vmatmul.mubr.msk.bf16.vlgmr.msra.gmra.mrb[12].mxu0 %vm1058_vm2, %v21520_v31 }
 0x1cd   : > { %5561 = vmatpush1.bf16.msra.mxu0 %v5537_v43  ;;  %5592 = vmatprep.mubr.bf16.mxu0 %v27120_v24 }
 0x1ce   : > { %9429 = vrot.lane.b32.xlu1 %v23298_v2, %s21608_s9  ;;  %19337 = vmatprep.subr.msk.bf16.mxu0 %vm1062_vm1, %v5533_v46  ;;  %v23326_v21 = vpop.permute.xlu0 %7182  ;;  %v5743_v46 = vsel %vm1062_vm1, %v22330_v52, 0 }
 0x1cf   : > { %v23337_v54 = vpop.permute.xlu1 %7184 }
 0x1d0   : > { %9431 = vrot.lane.b32.xlu0 %v9416_v32, %s21608_s9 }
 0x1d1   : > { %19319 = vmatmul.mubr.msk.bf16.vlgmr.msra.gmra.mrb[12].mxu1 %vm1058_vm2, %v21520_v31 }
 0x1d2   : > { %9433 = vrot.lane.b32.xlu1 %v9417_v23, %s21608_s9  ;;  %5602 = vmatpush1.bf16.msra.mxu1 %v5543_v11  ;;  %v23342_v20 = vpop.permute.xlu0 %7186 }
 0x1d3   : > { %5633 = vmatprep.mubr.bf16.mxu1 %v27120_v24  ;;  %19339 = vmatprep.subr.msk.bf16.mxu1 %vm1062_vm1, %v5535_v49  ;;  %v23355_v31 = vpop.permute.xlu1 %7188  ;;  %v27146_v49 = vld [vmem:[#allocation12_spill] sm:$0xff] }
 0x1d4   : > { %9435 = vrot.lane.b32.xlu0 %v9418_v41, %s21608_s9  ;;  %19334 = vmatmul.mubr.msk.bf16.vlgmr.msra.gmra.mrb[16].mxu0 %vm1058_vm2, %v22580_v3 }
 0x1d5   : > { %5643 = vmatpush1.bf16.msra.mxu0 %v5549_v42  ;;  %5674 = vmatprep.mubr.bf16.mxu0 %v27120_v24 }
 0x1d6   : > { %9641 = vrot.lane.b32.xlu1 %v23237_v35, %s21609_s10  ;;  %19341 = vmatprep.subr.msk.bf16.mxu0 %vm1062_vm1, %v22274_v10  ;;  %v23362_v48 = vpop.permute.xlu0 %7190  ;;  %v5725_v10 = vsel %vm1062_vm1, %v22259_v0, 0 }
 0x1d7   : > { %v23367_v3 = vpop.permute.xlu1 %7192 }
 0x1d8   : > { %9643 = vrot.lane.b32.xlu0 %v23246_v57, %s21609_s10 }
 0x1d9   : > { %19336 = vmatmul.mubr.msk.bf16.vlgmr.msra.gmra.mrb[16].mxu1 %vm1058_vm2, %v21521_v26 }
 0x1da   : > { %9645 = vrot.lane.b32.xlu1 %v23266_v13, %s21609_s10  ;;  %5684 = vmatpush1.bf16.msra.mxu1 %v5555_v55  ;;  %v23377_v35 = vpop.permute.xlu0 %7194  ;;  %v23476_v55 = vcombine.low %v23452_v45, %v9944_v40 }
 0x1db   : > { %5715 = vmatprep.mubr.bf16.mxu1 %v27120_v24  ;;  %19343 = vmatprep.subr.msk.bf16.mxu1 %vm1062_vm1, %v22298_v17  ;;  %v23385_v57 = vpop.permute.xlu1 %7400  ;;  %v5731_v17 = vsel %vm1062_vm1, %v22284_v44, 0  ;;  %v5931_v44 = vsel %vm1460_vm3, %v23011_v62, %v23018_v5  ;;  %v5939_v62 = vsel %vm1062_vm1, %v5930_v1, 0 }
 0x1dc   : > { %9647 = vrot.lane.b32.xlu0 %v23274_v14, %s21609_s10  ;;  %19338 = vmatmul.mubr.msk.bf16.vlgmr.msra.gmra.mrb[20].mxu0 %vm1058_vm2, %v21521_v26  ;;  %27136 = vst [vmem:[#allocation17_spill] sm:$0xff] %v23385_v57  ;;  %v5737_v14 = vsel %vm1062_vm1, %v22313_v29, 0  ;;  %v23423_v29 = vld [vmem:[#allocation2 + $0x54] sm:$0xff] }
 0x1dd   : > { %5749 = vmatpush1.bf16.msra.mxu0 %v5725_v10  ;;  %5780 = vmatprep.mubr.bf16.mxu0 %v27120_v24  ;;  %v23444_v33 = vcombine.low %v23423_v29, %v9943_v58  ;;  %v23458_v52 = vcombine.high %v23423_v29, %v9943_v58  ;;  %v23481_v10 = vld [vmem:[#allocation2 + $0x64] sm:$0xff]  ;;  %v5934_v58 = vsel %vm1460_vm3, %v23036_v30, %v27146_v49 }
 0x1de   : > { %9649 = vrot.lane.b32.xlu1 %v23286_v28, %s21609_s10  ;;  %19345 = vmatprep.subr.msk.bf16.mxu0 %vm1062_vm1, %v22321_v38  ;;  %v23396_v0 = vpop.permute.xlu0 %7402  ;;  %v23411_v38 = vld [vmem:[#allocation2 + $0x4c] ss:$76 sps:$4 sm:$0x3f]  }
 0x1df   : > { %v23402_v13 = vpop.permute.xlu1 %7404  ;;  %27140 = vst [vmem:[#allocation21_spill] sm:$0xff] %v23444_v33  ;;  %27143 = vst [vmem:[#allocation22_spill] sm:$0xff] %v23458_v52 }
 0x1e0   : > { %9651 = vrot.lane.b32.xlu0 %v23298_v2, %s21609_s10 }
 0x1e1   : > { %19340 = vmatmul.mubr.msk.bf16.vlgmr.msra.gmra.mrb[20].mxu1 %vm1058_vm2, %v21521_v26 }
 0x1e2   : > { %9653 = vrot.lane.b32.xlu1 %v9416_v32, %s21609_s10  ;;  %5790 = vmatpush1.bf16.msra.mxu1 %v5731_v17  ;;  %v23408_v28 = vpop.permute.xlu0 %7406  ;;  %v27141_v32 = vld [vmem:[#allocation11_spill] sm:$0xff]  ;;  %v9945_v17 = vld [vmem:[#allocation2 + $0xb0] sm:$0x33] }
 0x1e3   : > { %27137 = vst [vmem:[#allocation18_spill] sm:$0xff] %v23408_v28  ;;  %5821 = vmatprep.mubr.bf16.mxu1 %v27120_v24  ;;  %19347 = vmatprep.subr.msk.bf16.mxu1 %vm1062_vm1, %v22345_v60  ;;  %v23425_v2 = vpop.permute.xlu1 %7408  ;;  %v23431_v60 = vld [vmem:[#allocation2 + $0x50] ss:$76 sps:$4 sm:$0x3f]   ;;  %v5933_v59 = vsel %vm1460_vm3, %v27141_v32, %v23036_v30  ;;  %v5932_v25 = vsel %vm1460_vm3, %v23018_v5, %v27141_v32 }
 0x1e4   : > { %9655 = vrot.lane.b32.xlu0 %v9417_v23, %s21609_s10  ;;  %19342 = vmatmul.mubr.msk.bf16.vlgmr.msra.gmra.mrb[16].mxu0 %vm1058_vm2, %v21522_v50  ;;  %27138 = vst [vmem:[#allocation19_spill] sm:$0xff] %v23425_v2  ;;  %v23486_v5 = vcombine.high %v23452_v45, %v9944_v40  ;;  %v5945_v1 = vsel %vm1062_vm1, %v5932_v25, 0  ;;  %v27152_v32 = vld [vmem:[#allocation14_spill] sm:$0xff]  ;;  %v23502_v40 = vcombine.low %v23481_v10, %v9945_v17 }
 0x1e5   : > { %5831 = vmatpush1.bf16.msra.mxu0 %v5737_v14  ;;  %5862 = vmatprep.mubr.bf16.mxu0 %v27120_v24  ;;  %v19358_v14 = vcombine.high %v6134_v6, %v23467_v16  ;;  %v23512_v30 = vcombine.high %v23481_v10, %v9945_v17 }
 0x1e6   : > { %9657 = vrot.lane.b32.xlu1 %v9418_v41, %s21609_s10  ;;  %19349 = vmatprep.subr.msk.bf16.mxu0 %vm1062_vm1, %v5931_v44  ;;  %v23434_v43 = vpop.permute.xlu0 %7410  ;;  %v27145_v41 = vld [vmem:[#allocation13_spill] sm:$0xff]  ;;  %27149 = vst [vmem:[#allocation24_spill] sm:$0xff] %v23486_v5 }
 0x1e7   : > { %27139 = vst [vmem:[#allocation20_spill] sm:$0xff] %v23434_v43  ;;  %v23449_v23 = vpop.permute.xlu1 %7412  ;;  %v5935_v42 = vsel %vm1460_vm3, %v27146_v49, %v27145_v41  ;;  %27147 = vst [vmem:[#allocation13_spill] sm:$0xff] %v23476_v55  ;;  %v5951_v49 = vsel %vm1062_vm1, %v5934_v58, 0  ;;  %v6175_v25 = vrot.slane %v19358_v14, 2  ;;  %v5936_v17 = vsel %vm1460_vm3, %v27145_v41, %v27152_v32 }
 0x1e8   : > { %9985 = vrot.lane.b32.xlu0 %v23411_v38, %s21608_s9  ;;  %27142 = vst [vmem:[#allocation11_spill] sm:$0xff] %v23449_v23  ;;  %27155 = vst [vmem:[#allocation26_spill] sm:$0xff] %v23512_v30  ;;  %v23532_v14 = vld [vmem:[#allocation2 + $0x6c] ss:$76 sps:$4 sm:$0x3f]  }
 0x1e9   : > { %19344 = vmatmul.mubr.msk.bf16.vlgmr.msra.gmra.mrb[16].mxu1 %vm1058_vm2, %v21522_v50  ;;  %v23548_v23 = vld [vmem:[#allocation2 + $0x68] sm:$0xff] }
 0x1ea   : > { %9987 = vrot.lane.b32.xlu1 %v23431_v60, %s21608_s9  ;;  %5872 = vmatpush1.bf16.msra.mxu1 %v5743_v46  ;;  %v23460_v11 = vpop.permute.xlu0 %7414  ;;  %v27151_v46 = vld [vmem:[#allocation15_spill] sm:$0xff] }
 0x1eb   : > { %27144 = vst [vmem:[#allocation23_spill] sm:$0xff] %v23460_v11  ;;  %5903 = vmatprep.mubr.bf16.mxu1 %v27120_v24  ;;  %19351 = vmatprep.subr.msk.bf16.mxu1 %vm1062_vm1, %v5933_v59  ;;  %v23478_v26 = vpop.permute.xlu1 %7416  ;;  %v5937_v59 = vsel %vm1460_vm3, %v27152_v32, %v27151_v46  ;;  %27153 = vst [vmem:[#allocation15_spill] sm:$0xff] %v23502_v40  ;;  %v19357_v46 = vcombine.low %v6134_v6, %v23467_v16  ;;  %v21523_v6 = vld [vmem:[%s26946_s2 + $0x8] sm:$0xf] }
 0x1ec   : > { %9989 = vrot.lane.b32.xlu0 %v23444_v33, %s21608_s9  ;;  %19346 = vmatmul.mubr.msk.bf16.vlgmr.msra.gmra.mrb[20].mxu0 %vm1058_vm2, %v21522_v50  ;;  %27148 = vst [vmem:[#allocation12_spill] sm:$0xff] %v23478_v26  ;;  %v23521_v26 = vld [vmem:[#allocation2 + $0x60] sm:$0xff] }
 0x1ed   : > { %5963 = vmatpush1.bf16.msra.mxu0 %v5939_v62  ;;  %5994 = vmatprep.mubr.bf16.mxu0 %v27120_v24  ;;  %v6135_v62 = vld [vmem:[#allocation2 + $0xc] sm:$0xcc]  ;;  %v6174_v41 = vrot.slane %v19357_v46, 2 }
 0x1ee   : > { %9991 = vrot.lane.b32.xlu1 %v23458_v52, %s21608_s9  ;;  %19353 = vmatprep.subr.msk.bf16.mxu0 %vm1062_vm1, %v5935_v42  ;;  %v23490_v44 = vpop.permute.xlu0 %7751  ;;  %v23504_v42 = vld [vmem:[#allocation2 + $0x58] sm:$0xff] }
 0x1ef   : > { %27150 = vst [vmem:[#allocation25_spill] sm:$0xff] %v23490_v44  ;;  %v23506_v44 = vpop.permute.xlu1 %7753  ;;  %v19359_v43 = vcombine.low %v6135_v62, %v23504_v42 }
 0x1f0   : > { %9993 = vrot.lane.b32.xlu0 %v23476_v55, %s21608_s9  ;;  %27154 = vst [vmem:[#allocation14_spill] sm:$0xff] %v23506_v44  ;;  %v6136_v44 = vld [vmem:[#allocation2 + $0x14] sm:$0xcc] }
 0x1f1   : > { %19348 = vmatmul.mubr.msk.bf16.vlgmr.msra.gmra.mrb[20].mxu1 %vm1058_vm2, %v21522_v50  ;;  %v19360_v50 = vcombine.high %v6135_v62, %v23504_v42  ;;  %v6183_v62 = vsel %vm1062_vm1, %v6174_v41, 0 }
 0x1f2   : > { %9995 = vrot.lane.b32.xlu1 %v23486_v5, %s21608_s9  ;;  %6004 = vmatpush1.bf16.msra.mxu1 %v5945_v1  ;;  %v23516_v11 = vpop.permute.xlu0 %7755  ;;  %v19362_v1 = vcombine.high %v6136_v44, %v23521_v26 }
 0x1f3   : > { %27156 = vst [vmem:[#allocation27_spill] sm:$0xff] %v23516_v11  ;;  %6035 = vmatprep.mubr.bf16.mxu1 %v27120_v24  ;;  %19355 = vmatprep.subr.msk.bf16.mxu1 %vm1062_vm1, %v5937_v59  ;;  %v23534_v58 = vpop.permute.xlu1 %7757  ;;  %v5957_v59 = vsel %vm1062_vm1, %v5936_v17, 0  ;;  %v6177_v11 = vrot.slane %v19360_v50, 2  ;;  %v19361_v50 = vcombine.low %v6136_v44, %v23521_v26 }
 0x1f4   : > { %9997 = vrot.lane.b32.xlu0 %v23502_v40, %s21608_s9  ;;  %19350 = vmatmul.mubr.msk.bf16.vlgmr.msra.gmra.mrb[16].mxu0 %vm1058_vm2, %v21523_v6  ;;  %27157 = vst [vmem:[#allocation28_spill] sm:$0xff] %v23534_v58  ;;  %v6137_v58 = vld [vmem:[#allocation2 + $0x1c] sm:$0xcc]  ;;  %v6179_v46 = vrot.slane %v19362_v1, 2 }
 0x1f5   : > { %6045 = vmatpush1.bf16.msra.mxu0 %v5951_v49  ;;  %6076 = vmatprep.mubr.bf16.mxu0 %v27120_v24  ;;  %v3141_v49 = vlaneseq }
 0x1f6   : > { %9999 = vrot.lane.b32.xlu1 %v23512_v30, %s21608_s9  ;;  %19365 = vmatprep.subr.msk.bf16.mxu0 %vm1062_vm1, %v6175_v25  ;;  %v23541_v32 = vpop.permute.xlu0 %7759 }
 0x1f7   : > { %27158 = vst [vmem:[#allocation29_spill] sm:$0xff] %v23541_v32  ;;  %v23550_v25 = vpop.permute.xlu1 %7761  ;;  %v6176_v32 = vrot.slane %v19359_v43, 2  ;;  %v23570_v44 = vshrl.u32 %v3141_v49, 7  ;;  %v6178_v43 = vrot.slane %v19361_v50, 2 }
 0x1f8   : > { %10001 = vrot.lane.b32.xlu0 %v23532_v14, %s21608_s9  ;;  %27159 = vst [vmem:[#allocation30_spill] sm:$0xff] %v23550_v25 }
 0x1f9   : > { %19352 = vmatmul.mubr.msk.bf16.vlgmr.msra.gmra.mrb[16].mxu1 %vm1058_vm2, %v21523_v6  ;;  %v6189_v1 = vsel %vm1062_vm1, %v6176_v32, 0  ;;  %v3143_v49 = vsub.s32 0, %v23570_v44  ;;  %v3147_v32 = vsub.s32 1, %v23570_v44 }
 0x1fa   : > { %10387 = vrot.lane.b32.xlu1 %v23411_v38, %s21609_s10  ;;  %6086 = vmatpush1.bf16.msra.mxu1 %v5957_v59  ;;  %v23557_v17 = vpop.permute.xlu0 %7763  ;;  %v19364_v38 = vcombine.high %v6137_v58, %v23548_v23  ;;  %v19363_v59 = vcombine.low %v6137_v58, %v23548_v23  ;;  %v6195_v58 = vsel %vm1062_vm1, %v6178_v43, 0  ;;  %v23614_v43 = vld [vmem:[%s26946_s2 + $0xc] sm:$0xf] }
 0x1fb   : > { %27160 = vst [vmem:[#allocation31_spill] sm:$0xff] %v23557_v17  ;;  %6117 = vmatprep.mubr.bf16.mxu1 %v27120_v24  ;;  %19367 = vmatprep.subr.msk.bf16.mxu1 %vm1062_vm1, %v6177_v11  ;;  %v23572_v41 = vpop.permute.xlu1 %7765 }
 0x1fc   : > { %10389 = vrot.lane.b32.xlu0 %v23431_v60, %s21609_s10  ;;  %19354 = vmatmul.mubr.msk.bf16.vlgmr.msra.gmra.mrb[20].mxu0 %vm1058_vm2, %v21523_v6  ;;  %27161 = vst [vmem:[#allocation32_spill] sm:$0xff] %v23572_v41  ;;  %v6181_v60 = vrot.slane %v19364_v38, 2  ;;  %v6453_v38 = vsel %vm1049_vm0, %v23104_v15, %v23114_v61 }
 0x1fd   : > { %6207 = vmatpush1.bf16.msra.mxu0 %v6183_v62  ;;  %6238 = vmatprep.mubr.bf16.mxu0 %v27120_v24 }
 0x1fe   : > { %10391 = vrot.lane.b32.xlu1 %v23444_v33, %s21609_s10  ;;  %19369 = vmatprep.subr.msk.bf16.mxu0 %vm1062_vm1, %v6179_v46  ;;  %v23578_v11 = vpop.permute.xlu0 %7767  ;;  %v23593_v46 = vld [vmem:[%s26947_s3] ss:$4 sm:$0xff]  ;;  %v6180_v33 = vrot.slane %v19363_v59, 2  ;;  %v3155_v59 = vsub.s32 3, %v23570_v44 }
 0x1ff   : > { %27162 = vst [vmem:[#allocation33_spill] sm:$0xff] %v23578_v11  ;;  %v23587_v62 = vpop.permute.xlu1 %8153 }
 0x200   : > { %10393 = vrot.lane.b32.xlu0 %v23458_v52, %s21609_s10  ;;  %27163 = vst [vmem:[#allocation34_spill] sm:$0xff] %v23587_v62  ;;  %v6201_v11 = vsel %vm1062_vm1, %v6180_v33, 0  ;;  %v3167_v33 = vsub.s32 6, %v23570_v44  ;;  %v23667_v17 = vrot.slane %v23593_v46, %v3155_v59 }
 0x201   : > { %19356 = vmatmul.mubr.msk.bf16.vlgmr.msra.gmra.mrb[20].mxu1 %vm1058_vm2, %v21523_v6  ;;  %v3151_v6 = vsub.s32 2, %v23570_v44 }
 0x202   : > { %10395 = vrot.lane.b32.xlu1 %v23476_v55, %s21609_s10  ;;  %6248 = vmatpush1.bf16.msra.mxu1 %v6189_v1  ;;  %v23601_v50 = vpop.permute.xlu0 %8155  ;;  %v23619_v1 = vrot.slane %v23593_v46, %v3143_v49  ;;  %v10850_v55 = vld [vmem:[#allocation2 + $0x9c] sm:$0x33]  ;;  %v3163_v49 = vsub.s32 5, %v23570_v44  ;;  %27172 = vst [vmem:[#allocation41_spill] sm:$0xff] %v23667_v17 }
 0x203   : > { %27164 = vst [vmem:[#allocation35_spill] sm:$0xff] %v23601_v50  ;;  %6279 = vmatprep.mubr.bf16.mxu1 %v27120_v24  ;;  %19371 = vmatprep.subr.msk.bf16.mxu1 %vm1062_vm1, %v6181_v60  ;;  %v23621_v52 = vpop.permute.xlu1 %8157  ;;  %v23625_v60 = vrot.slane %v23593_v46, %v3147_v32  ;;  %v27169_v50 = vld [vmem:[#allocation16_spill] sm:$0xff]  ;;  %v23643_v41 = vcombine.low %v23467_v16, %v10850_v55 }
 0x204   : > { %10397 = vrot.lane.b32.xlu0 %v23486_v5, %s21609_s10  ;;  %19366 = vmatmul.mubr.msk.bf16.vlgmr.msra.gmra.mrb[16].mxu0 %vm1058_vm2, %v23614_v43  ;;  %27165 = vst [vmem:[#allocation36_spill] sm:$0xff] %v23619_v1  ;;  %27166 = vst [vmem:[#allocation37_spill] sm:$0xff] %v23621_v52  ;;  %v3159_v5 = vsub.s32 4, %v23570_v44  ;;  %v6452_v32 = vsel %vm1049_vm0, %v27169_v50, %v23104_v15  ;;  %v23640_v52 = vrot.slane %v23593_v46, %v3151_v6 }
 0x205   : > { %27167 = vst [vmem:[#allocation38_spill] sm:$0xff] %v23625_v60  ;;  %6289 = vmatpush1.bf16.msra.mxu0 %v6195_v58  ;;  %6320 = vmatprep.mubr.bf16.mxu0 %v27120_v24  ;;  %v23655_v50 = vcombine.high %v23467_v16, %v10850_v55  ;;  %v6455_v6 = vsel %vm1049_vm0, %v23127_v47, %v23137_v18 }
 0x206   : > { %10399 = vrot.lane.b32.xlu1 %v23502_v40, %s21609_s10  ;;  %19382 = vmatprep.subr.msk.bf16.mxu0 %vm1062_vm1, %v6453_v38  ;;  %v23634_v62 = vpop.permute.xlu0 %8159  ;;  %27170 = vst [vmem:[#allocation16_spill] sm:$0xff] %v23640_v52  ;;  %v10851_v40 = vld [vmem:[#allocation2 + $0xa4] sm:$0x33]  ;;  %v23670_v16 = vrot.slane %v23593_v46, %v3159_v5  ;;  %v23679_v2 = vrot.slane %v23593_v46, %v3163_v49  ;;  %v3171_v49 = vsub.s32 7, %v23570_v44 }
 0x207   : > { %27168 = vst [vmem:[#allocation39_spill] sm:$0xff] %v23634_v62  ;;  %v3002_v58 = vpop.f32.mrb[0].mxu0  ;;  %v23661_v62 = vpop.permute.xlu1 %8161 }
 0x208   : > { %v3181_v38 = vmul.f32 %v23619_v1, %v3002_v58  ;;  %10401 = vrot.lane.b32.xlu0 %v23512_v30, %s21609_s10  ;;  %v3004_v15 = vpop.f32.mrb[1].mxu0  ;;  %27171 = vst [vmem:[#allocation40_spill] sm:$0xff] %v23661_v62  ;;  %27173 = vst [vmem:[#allocation42_spill] sm:$0xff] %v23670_v16  ;;  %v6461_v62 = vsel %vm1062_vm1, %v6452_v32, 0 }
 0x209   : > { %v3182_v30 = vmul.f32 %v23625_v60, %v3004_v15  ;;  %v20072_v1 = vpack.c.bf16 %v3004_v15, %v3002_v58  ;;  %19368 = vmatmul.mubr.msk.bf16.vlgmr.msra.gmra.mrb[16].mxu1 %vm1058_vm2, %v23614_v43  ;;  %v3006_v25 = vpop.f32.mrb[2].mxu0  ;;  %v23676_v60 = vcombine.low %v23504_v42, %v10851_v40  ;;  %27174 = vst [vmem:[#allocation43_spill] sm:$0xff] %v23679_v2 }
 0x20a   : > { %v3235_v55 = vmul.f32 %v3181_v38, %v3002_v58  ;;  %10403 = vrot.lane.b32.xlu1 %v23532_v14, %s21609_s10  ;;  %v3007_v28 = vpop.f32.mrb[3].mxu0  ;;  %6330 = vmatpush1.bf16.msra.mxu1 %v6201_v11  ;;  %v10852_v25 = vld [vmem:[#allocation2 + $0xac] sm:$0x33]  ;;  %v23681_v59 = vpop.permute.xlu0 %8163  ;;  %v6454_v14 = vsel %vm1049_vm0, %v23114_v61, %v23127_v47 }
 0x20b   : > { %27175 = vst [vmem:[#allocation44_spill] sm:$0xff] %v23681_v59  ;;  %3221 = vst [vmem:[%s23652_s7] sm:$0xff] %v20072_v1  ;;  %v3225_v5 = vadd.f32 %v3182_v30, %v3181_v38  ;;  %v3236_v57 = vmul.f32 %v3182_v30, %v3004_v15  ;;  %6361 = vmatprep.mubr.bf16.mxu1 %v27120_v24  ;;  %19384 = vmatprep.subr.msk.bf16.mxu1 %vm1062_vm1, %v6455_v6  ;;  %v23703_v32 = vpop.permute.xlu1 %8165  ;;  %v6467_v59 = vsel %vm1062_vm1, %v6454_v14, 0 }
 0x20c   : > { %v6457_v28 = vsel %vm1049_vm0, %v23145_v27, %v23155_v9  ;;  %v3043_v11 = vpop.f32.mrb[0].mxu1  ;;  %10892 = vrot.lane.b32.xlu0 %v23643_v41, %s21608_s9  ;;  %19370 = vmatmul.mubr.msk.bf16.vlgmr.msra.gmra.mrb[20].mxu0 %vm1058_vm2, %v23614_v43  ;;  %v23697_v30 = vcombine.high %v23504_v42, %v10851_v40  ;;  %v23700_v1 = vrot.slane %v23593_v46, %v3167_v33 }
 0x20d   : > { %v3243_v58 = vadd.f32 %v3236_v57, %v3235_v55  ;;  %v3183_v61 = vmul.f32 %v23640_v52, %v3043_v11  ;;  %v3045_v47 = vpop.f32.mrb[1].mxu1  ;;  %6485 = vmatpush1.bf16.msra.mxu0 %v6461_v62  ;;  %6516 = vmatprep.mubr.bf16.mxu0 %v27120_v24  ;;  %v23708_v38 = vcombine.low %v23521_v26, %v10852_v25 }
 0x20e   : > { %10894 = vrot.lane.b32.xlu1 %v23655_v50, %s21608_s9  ;;  %v3184_v40 = vmul.f32 %v23667_v17, %v3045_v47  ;;  %v20073_v42 = vpack.c.bf16 %v3045_v47, %v3043_v11  ;;  %v3047_v44 = vpop.f32.mrb[2].mxu1  ;;  %19386 = vmatprep.subr.msk.bf16.mxu0 %vm1062_vm1, %v6457_v28  ;;  %v23715_v57 = vcombine.high %v23521_v26, %v10852_v25  ;;  %v23717_v15 = vpop.permute.xlu0 %8167 }
 0x20f   : > { %v6456_v62 = vsel %vm1049_vm0, %v23137_v18, %v23145_v27  ;;  %v3226_v6 = vadd.f32 %v3225_v5, %v3183_v61  ;;  %v3237_v33 = vmul.f32 %v3183_v61, %v3043_v11  ;;  %v3048_v55 = vpop.f32.mrb[3].mxu1  ;;  %v3084_v52 = vpop.f32.mrb[4].mxu0  ;;  %v23728_v25 = vrot.slane %v23593_v46, %v3171_v49 }
 0x210   : > { %3222 = vst [vmem:[%s23652_s7 + $0x8] sm:$0xff] %v20073_v42  ;;  %v3238_v17 = vmul.f32 %v3184_v40, %v3045_v47  ;;  %v3185_v44 = vmul.f32 %v23670_v16, %v3084_v52  ;;  %10896 = vrot.lane.b32.xlu0 %v23676_v60, %s21608_s9  ;;  %v3086_v26 = vpop.f32.mrb[5].mxu0  ;;  %v6459_v18 = vsel %vm1049_vm0, %v23168_v22, %v23178_v51  ;;  %v23733_v27 = vpop.permute.xlu1 %8169  ;;  %v10853_v47 = vld [vmem:[#allocation2 + $0xb4] sm:$0x33] }
 0x211   : > { %27176 = vst [vmem:[#allocation45_spill] sm:$0xff] %v23728_v25  ;;  %v3244_v5 = vadd.f32 %v3243_v58, %v3237_v33  ;;  %v3227_v28 = vadd.f32 %v3226_v6, %v3184_v40  ;;  %v3186_v14 = vmul.f32 %v23679_v2, %v3086_v26  ;;  %v20074_v11 = vpack.c.bf16 %v3086_v26, %v3084_v52  ;;  %v3088_v61 = vpop.f32.mrb[6].mxu0 }
 0x212   : > { %19372 = vmatmul.mubr.msk.bf16.vlgmr.msra.gmra.mrb[20].mxu1 %vm1058_vm2, %v23614_v43  ;;  %v6458_v46 = vsel %vm1049_vm0, %v23155_v9, %v23168_v22  ;;  %v3239_v49 = vmul.f32 %v3185_v44, %v3084_v52  ;;  %10898 = vrot.lane.b32.xlu1 %v23697_v30, %s21608_s9  ;;  %v3089_v51 = vpop.f32.mrb[7].mxu0  ;;  %v6473_v58 = vsel %vm1062_vm1, %v6456_v62, 0  ;;  %v6675_v40 = vsel %vm1460_vm3, %v23202_v34, %v23217_v37  ;;  %v23747_v42 = vpop.permute.xlu0 %8675  ;;  %v21525_v22 = vld [vmem:[%s26946_s2 + $0x10] sm:$0xf] }
 0x213   : > { %6526 = vmatpush1.bf16.msra.mxu1 %v6467_v59  ;;  %v3245_v43 = vadd.f32 %v3244_v5, %v3238_v17  ;;  %v3228_v6 = vadd.f32 %v3227_v28, %v3185_v44  ;;  %3223 = vst [vmem:[%s23652_s7 + $0x10] sm:$0xff] %v20074_v11  ;;  %v3240_v33 = vmul.f32 %v3186_v14, %v3086_v26  ;;  %v6479_v11 = vsel %vm1062_vm1, %v6458_v46, 0 }
 0x214   : > { %6557 = vmatprep.mubr.bf16.mxu1 %v27120_v24  ;;  %19388 = vmatprep.subr.msk.bf16.mxu1 %vm1062_vm1, %v6459_v18  ;;  %v3125_v9 = vpop.f32.mrb[4].mxu1  ;;  %v23759_v52 = vcombine.low %v23548_v23, %v10853_v47  ;;  %v23761_v17 = vpop.permute.xlu1 %8677  ;;  %v23769_v28 = vcombine.high %v23548_v23, %v10853_v47  ;;  %v6674_v61 = vsel %vm1460_vm3, %v23189_v56, %v23202_v34  ;;  %v23781_v23 = vld [vmem:[#allocation2 + $0x70] ss:$76 sps:$4 sm:$0x3f]  }
 0x215   : > { %10900 = vrot.lane.b32.xlu0 %v23708_v38, %s21608_s9  ;;  %19383 = vmatmul.mubr.msk.bf16.vlgmr.msra.gmra.mrb[16].mxu0 %vm1058_vm2, %v21525_v22  ;;  %v3246_v59 = vadd.f32 %v3245_v43, %v3239_v49  ;;  %v3229_v62 = vadd.f32 %v3228_v6, %v3186_v14  ;;  %v3187_v55 = vmul.f32 %v23700_v1, %v3125_v9  ;;  %v3127_v44 = vpop.f32.mrb[5].mxu1  ;;  %v6683_v34 = vsel %vm1062_vm1, %v6674_v61, 0 }
 0x216   : > { %6567 = vmatpush1.bf16.msra.mxu0 %v6473_v58  ;;  %6598 = vmatprep.mubr.bf16.mxu0 %v27120_v24  ;;  %v3188_v26 = vmul.f32 %v23728_v25, %v3127_v44  ;;  %v20075_v18 = vpack.c.bf16 %v3127_v44, %v3125_v9  ;;  %v3129_v5 = vpop.f32.mrb[6].mxu1  ;;  %v23773_v14 = vpop.permute.xlu0 %8679  ;;  %v6677_v47 = vsel %vm1460_vm3, %v23225_v7, %v23240_v8 }
 0x217   : > { %10902 = vrot.lane.b32.xlu1 %v23715_v57, %s21608_s9  ;;  %19390 = vmatprep.subr.msk.bf16.mxu0 %vm1062_vm1, %v6675_v40  ;;  %v3247_v49 = vadd.f32 %v3246_v59, %v3240_v33  ;;  %v3230_v51 = vadd.f32 %v3229_v62, %v3187_v55  ;;  %v3241_v58 = vmul.f32 %v3187_v55, %v3125_v9  ;;  %v3130_v43 = vpop.f32.mrb[7].mxu1  ;;  %v6878_v59 = vld [vmem:[#allocation2 + $0x8] sm:$0xcc] }
 0x218   : > { %3224 = vst [vmem:[%s23652_s7 + $0x18] sm:$0xff] %v20075_v18  ;;  %v3242_v6 = vmul.f32 %v3188_v26, %v3127_v44  ;;  %v23786_v46 = vpop.permute.xlu1 %8681  ;;  %v6679_v9 = vsel %vm1460_vm3, %v23250_v53, %v23269_v39  ;;  %v6676_v55 = vsel %vm1460_vm3, %v23217_v37, %v23225_v7  ;;  %v6678_v37 = vsel %vm1460_vm3, %v23240_v8, %v23250_v53 }
 0x219   : > { %10904 = vrot.lane.b32.xlu0 %v23759_v52, %s21608_s9  ;;  %v3248_v40 = vadd.f32 %v3247_v49, %v3241_v58  ;;  %v23789_v56 = vadd.f32 %v3230_v51, %v3188_v26  ;;  %v19399_v26 = vcombine.high %v6878_v59, %v23423_v29  ;;  %v6689_v7 = vsel %vm1062_vm1, %v6676_v55, 0  ;;  %v21526_v51 = vld [vmem:[%s26946_s2 + $0x14] sm:$0xf] }
 0x21a   : > { %19385 = vmatmul.mubr.msk.bf16.vlgmr.msra.gmra.mrb[16].mxu1 %vm1058_vm2, %v21525_v22  ;;  %v23794_v33 = vpop.permute.xlu0 %8683  ;;  %v6681_v5 = vsel %vm1460_vm3, %v23278_v63, %v23293_v36  ;;  %v6695_v8 = vsel %vm1062_vm1, %v6678_v37, 0  ;;  %v19398_v61 = vcombine.low %v6878_v59, %v23423_v29 }
 0x21b   : > { %27177 = vst [vmem:[#allocation46_spill] sm:$0xff] %v23789_v56  ;;  %10906 = vrot.lane.b32.xlu1 %v23769_v28, %s21608_s9  ;;  %6608 = vmatpush1.bf16.msra.mxu1 %v6479_v11  ;;  %v23801_v62 = vadd.f32 %v3248_v40, %v3242_v6  ;;  %v6919_v53 = vrot.slane %v19399_v26, 2  ;;  %v23863_v40 = vld [vmem:[#allocation2 + $0x6c] sm:$0xff] }
 0x21c   : > { %6639 = vmatprep.mubr.bf16.mxu1 %v27120_v24  ;;  %19392 = vmatprep.subr.msk.bf16.mxu1 %vm1062_vm1, %v6677_v47  ;;  %v23809_v44 = vpop.permute.xlu1 %8685  ;;  %v6881_v47 = vld [vmem:[#allocation2 + $0x20] sm:$0xcc]  ;;  %v12143_v56 = vld [vmem:[#allocation2 + $0xd0] sm:$0x33] }
 0x21d   : > { %27178 = vst [vmem:[#allocation47_spill] sm:$0xff] %v23801_v62  ;;  %10908 = vrot.lane.b32.xlu0 %v23781_v23, %s21608_s9  ;;  %19387 = vmatmul.mubr.msk.bf16.vlgmr.msra.gmra.mrb[20].mxu0 %vm1058_vm2, %v21525_v22  ;;  %v19405_v37 = vcombine.high %v6881_v47, %v23863_v40 }
 0x21e   : > { %6707 = vmatpush1.bf16.msra.mxu0 %v6683_v34  ;;  %6738 = vmatprep.mubr.bf16.mxu0 %v27120_v24  ;;  %v23816_v18 = vpop.permute.xlu0 %8687 }
 0x21f   : > { %11114 = vrot.lane.b32.xlu1 %v23643_v41, %s21609_s10  ;;  %19394 = vmatprep.subr.msk.bf16.mxu0 %vm1062_vm1, %v6679_v9  ;;  %v6879_v41 = vld [vmem:[#allocation2 + $0x10] sm:$0xcc] }
 0x220   : > { %v23827_v11 = vpop.permute.xlu1 %8689  ;;  %v19401_v36 = vcombine.high %v6879_v41, %v23452_v45  ;;  %v19400_v6 = vcombine.low %v6879_v41, %v23452_v45 }
 0x221   : > { %11116 = vrot.lane.b32.xlu0 %v23655_v50, %s21609_s10  ;;  %v6880_v50 = vld [vmem:[#allocation2 + $0x18] sm:$0xcc] }
 0x222   : > { %19389 = vmatmul.mubr.msk.bf16.vlgmr.msra.gmra.mrb[20].mxu1 %vm1058_vm2, %v21525_v22  ;;  %v23834_v49 = vpop.permute.xlu0 %8691  ;;  %v833_v22 = vcombine.high %v23388_v12, %v23388_v12  ;;  %v6921_v43 = vrot.slane %v19401_v36, 2  ;;  %v19402_v55 = vcombine.low %v6880_v50, %v23481_v10  ;;  %v19404_v36 = vcombine.low %v6881_v47, %v23863_v40  ;;  %v11580_v47 = vld [vmem:[#allocation2 + $0xb8] sm:$0x33] }
 0x223   : > { %11118 = vrot.lane.b32.xlu1 %v23676_v60, %s21609_s10  ;;  %6748 = vmatpush1.bf16.msra.mxu1 %v6689_v7  ;;  %v6680_v60 = vsel %vm1460_vm3, %v23269_v39, %v23278_v63  ;;  %v6918_v39 = vrot.slane %v19398_v61, 2  ;;  %v19403_v63 = vcombine.high %v6880_v50, %v23481_v10  ;;  %v6925_v61 = vrot.slane %v19405_v37, 2 }
 0x224   : > { %6779 = vmatprep.mubr.bf16.mxu1 %v27120_v24  ;;  %19396 = vmatprep.subr.msk.bf16.mxu1 %vm1062_vm1, %v6681_v5  ;;  %v23850_v58 = vpop.permute.xlu1 %8897  ;;  %19070 = vst.sshfl [vmem:[#allocation2 + $0xe0] sm:$0x3 pattern:$0x76325410] %v833_v22  ;;  %v11578_v5 = vld [vmem:[#allocation2 + $0xa8] sm:$0x33]  ;;  %v7199_v37 = vsel %vm1049_vm0, %v23337_v54, %v23342_v20 }
 0x225   : > { %11120 = vrot.lane.b32.xlu0 %v23697_v30, %s21609_s10  ;;  %19391 = vmatmul.mubr.msk.bf16.vlgmr.msra.gmra.mrb[16].mxu0 %vm1058_vm2, %v21526_v51  ;;  %v6701_v30 = vsel %vm1062_vm1, %v6680_v60, 0  ;;  %v6927_v9 = vsel %vm1062_vm1, %v6918_v39, 0  ;;  %v6923_v59 = vrot.slane %v19403_v63, 2  ;;  %v23899_v50 = vcombine.low %v23452_v45, %v11578_v5 }
 0x226   : > { %6789 = vmatpush1.bf16.msra.mxu0 %v6695_v8  ;;  %6820 = vmatprep.mubr.bf16.mxu0 %v27120_v24  ;;  %v23857_v12 = vpop.permute.xlu0 %8899  ;;  %v23907_v22 = vcombine.high %v23452_v45, %v11578_v5  ;;  %v6924_v63 = vrot.slane %v19404_v36, 2  ;;  %v21527_v45 = vld [vmem:[%s26946_s2 + $0x18] sm:$0xf]  ;;  %v7196_v5 = vsel %vm1049_vm0, %v23303_v4, %v23319_v19  ;;  %v19072_v4 = vld [vmem:[%s22729_s6 + $0x2e] sm:$0xff] }
 0x227   : > { %11122 = vrot.lane.b32.xlu1 %v23708_v38, %s21609_s10  ;;  %19406 = vmatprep.subr.msk.bf16.mxu0 %vm1062_vm1, %v6919_v53  ;;  %v11577_v38 = vld [vmem:[#allocation2 + $0xa0] sm:$0x33]  ;;  %19079 = vst.sshfl [vmem:[#allocation2 + $0xb0] sm:$0xf0 pattern:$0x76325410] %v19072_v4 }
 0x228   : > { %v23865_v34 = vpop.permute.xlu1 %8901  ;;  %v23889_v41 = vcombine.high %v23423_v29, %v11577_v38  ;;  %v23970_v36 = vld [vmem:[#allocation2 + $0x74] ss:$76 sps:$4 sm:$0x3f]  }
 0x229   : > { %11124 = vrot.lane.b32.xlu0 %v23715_v57, %s21609_s10  ;;  %v6920_v57 = vrot.slane %v19400_v6, 2  ;;  %v19071_v6 = vld [vmem:[%s22729_s6 + $0x26] sm:$0xff] }
 0x22a   : > { %19393 = vmatmul.mubr.msk.bf16.vlgmr.msra.gmra.mrb[16].mxu1 %vm1058_vm2, %v21526_v51  ;;  %v23872_v26 = vpop.permute.xlu0 %8903  ;;  %19077 = vst.sshfl [vmem:[#allocation2 + $0xa0] sm:$0xf0 pattern:$0x76325410] %v19071_v6 }
 0x22b   : > { %11126 = vrot.lane.b32.xlu1 %v23759_v52, %s21609_s10  ;;  %6830 = vmatpush1.bf16.msra.mxu1 %v6701_v30  ;;  %v23881_v52 = vcombine.low %v23423_v29, %v11577_v38  ;;  %v6933_v53 = vsel %vm1062_vm1, %v6920_v57, 0  ;;  %v11579_v29 = vld [vmem:[#allocation2 + $0xb0] sm:$0x33]  ;;  %v879_v38 = vcombine.low %v19071_v6, %v19071_v6  ;;  %v23942_v57 = vcombine.low %v23863_v40, %v11580_v47 }
 0x22c   : > { %6861 = vmatprep.mubr.bf16.mxu1 %v27120_v24  ;;  %19408 = vmatprep.subr.msk.bf16.mxu1 %vm1062_vm1, %v6921_v43  ;;  %v23883_v7 = vpop.permute.xlu1 %8905  ;;  %v23924_v30 = vcombine.low %v23481_v10, %v11579_v29  ;;  %v7203_v6 = vsel %vm1049_vm0, %v23367_v3, %v23377_v35  ;;  %v7419_v35 = vsel %vm1460_vm3, %v23396_v0, %v23402_v13 }
 0x22d   : > { %11128 = vrot.lane.b32.xlu0 %v23769_v28, %s21609_s10  ;;  %19395 = vmatmul.mubr.msk.bf16.vlgmr.msra.gmra.mrb[20].mxu0 %vm1058_vm2, %v21526_v51  ;;  %v6922_v28 = vrot.slane %v19402_v55, 2  ;;  %v6945_v55 = vsel %vm1062_vm1, %v6924_v63, 0  ;;  %19076 = vst.sshfl [vmem:[#allocation2 + $0x98] sm:$0xf0 pattern:$0x76325410] %v879_v38 }
 0x22e   : > { %6951 = vmatpush1.bf16.msra.mxu0 %v6927_v9  ;;  %6982 = vmatprep.mubr.bf16.mxu0 %v27120_v24  ;;  %v23892_v8 = vpop.permute.xlu0 %8907  ;;  %v23933_v9 = vcombine.high %v23481_v10, %v11579_v29 }
 0x22f   : > { %11130 = vrot.lane.b32.xlu1 %v23781_v23, %s21609_s10  ;;  %19410 = vmatprep.subr.msk.bf16.mxu0 %vm1062_vm1, %v6923_v59  ;;  %v6939_v60 = vsel %vm1062_vm1, %v6922_v28, 0  ;;  %v23956_v28 = vcombine.high %v23863_v40, %v11580_v47 }
 0x230   : > { %v23901_v23 = vpop.permute.xlu1 %8909 }
 0x231   : > { %11619 = vrot.lane.b32.xlu0 %v23881_v52, %s21608_s9 }
 0x232   : > { %19397 = vmatmul.mubr.msk.bf16.vlgmr.msra.gmra.mrb[20].mxu1 %vm1058_vm2, %v21526_v51  ;;  %v23910_v39 = vpop.permute.xlu0 %8911  ;;  %v7197_v51 = vsel %vm1049_vm0, %v23319_v19, %v23326_v21  ;;  %v7205_v19 = vsel %vm1062_vm1, %v7196_v5, 0  ;;  %v27179_v5 = vld [vmem:[#allocation17_spill] sm:$0xff] }
 0x233   : > { %11621 = vrot.lane.b32.xlu1 %v23889_v41, %s21608_s9  ;;  %6992 = vmatpush1.bf16.msra.mxu1 %v6933_v53 }
 0x234   : > { %7023 = vmatprep.mubr.bf16.mxu1 %v27120_v24  ;;  %19412 = vmatprep.subr.msk.bf16.mxu1 %vm1062_vm1, %v6925_v61  ;;  %v23926_v43 = vpop.permute.xlu1 %8913  ;;  %v7201_v61 = vsel %vm1049_vm0, %v23355_v31, %v23362_v48 }
 0x235   : > { %11623 = vrot.lane.b32.xlu0 %v23899_v50, %s21608_s9  ;;  %19407 = vmatmul.mubr.msk.bf16.vlgmr.msra.gmra.mrb[16].mxu0 %vm1058_vm2, %v21527_v45 }
 0x236   : > { %7033 = vmatpush1.bf16.msra.mxu0 %v6939_v60  ;;  %7064 = vmatprep.mubr.bf16.mxu0 %v27120_v24  ;;  %v23936_v59 = vpop.permute.xlu0 %9419  ;;  %v894_v60 = vcombine.low %v19072_v4, %v19072_v4  ;;  %v27180_v4 = vld [vmem:[#allocation19_spill] sm:$0xff] }
 0x237   : > { %11625 = vrot.lane.b32.xlu1 %v23907_v22, %s21608_s9  ;;  %19423 = vmatprep.subr.msk.bf16.mxu0 %vm1062_vm1, %v7197_v51  ;;  %v7198_v51 = vsel %vm1049_vm0, %v23326_v21, %v23337_v54  ;;  %v7200_v21 = vsel %vm1049_vm0, %v23342_v20, %v23355_v31  ;;  %v21528_v20 = vld [vmem:[%s26946_s2 + $0x1c] sm:$0xf] }
 0x238   : > { %v23947_v10 = vpop.permute.xlu1 %9421  ;;  %19078 = vst.sshfl [vmem:[#allocation2 + $0xa8] sm:$0xf0 pattern:$0x76325410] %v894_v60  ;;  %v7211_v54 = vsel %vm1062_vm1, %v7198_v51, 0  ;;  %v7217_v31 = vsel %vm1062_vm1, %v7200_v21, 0 }
 0x239   : > { %11627 = vrot.lane.b32.xlu0 %v23924_v30, %s21608_s9  ;;  %v27184_v51 = vld [vmem:[#allocation20_spill] sm:$0xff] }
 0x23a   : > { %19409 = vmatmul.mubr.msk.bf16.vlgmr.msra.gmra.mrb[16].mxu1 %vm1058_vm2, %v21527_v45  ;;  %v23958_v53 = vpop.permute.xlu0 %9423 }
 0x23b   : > { %11629 = vrot.lane.b32.xlu1 %v23933_v9, %s21608_s9  ;;  %7074 = vmatpush1.bf16.msra.mxu1 %v6945_v55  ;;  %v7202_v55 = vsel %vm1049_vm0, %v23362_v48, %v23367_v3 }
 0x23c   : > { %7105 = vmatprep.mubr.bf16.mxu1 %v27120_v24  ;;  %19425 = vmatprep.subr.msk.bf16.mxu1 %vm1062_vm1, %v7199_v37  ;;  %v23972_v29 = vpop.permute.xlu1 %9425  ;;  %v7223_v3 = vsel %vm1062_vm1, %v7202_v55, 0  ;;  %v27187_v55 = vld [vmem:[#allocation23_spill] sm:$0xff] }
 0x23d   : > { %11631 = vrot.lane.b32.xlu0 %v23942_v57, %s21608_s9  ;;  %19411 = vmatmul.mubr.msk.bf16.vlgmr.msra.gmra.mrb[20].mxu0 %vm1058_vm2, %v21527_v45 }
 0x23e   : > { %7229 = vmatpush1.bf16.msra.mxu0 %v7205_v19  ;;  %7260 = vmatprep.mubr.bf16.mxu0 %v27120_v24  ;;  %v23981_v63 = vpop.permute.xlu0 %9427  ;;  %v27181_v19 = vld [vmem:[#allocation18_spill] sm:$0xff] }
 0x23f   : > { %11633 = vrot.lane.b32.xlu1 %v23956_v28, %s21608_s9  ;;  %19427 = vmatprep.subr.msk.bf16.mxu0 %vm1062_vm1, %v7201_v61  ;;  %v7418_v61 = vsel %vm1460_vm3, %v27179_v5, %v23396_v0  ;;  %v7421_v60 = vsel %vm1460_vm3, %v27181_v19, %v27180_v4  ;;  %v7420_v21 = vsel %vm1460_vm3, %v23402_v13, %v27181_v19 }
 0x240   : > { %v23988_v47 = vpop.permute.xlu1 %9429  ;;  %v7422_v13 = vsel %vm1460_vm3, %v27180_v4, %v27184_v51 }
 0x241   : > { %11635 = vrot.lane.b32.xlu0 %v23970_v36, %s21608_s9  ;;  %v7439_v19 = vsel %vm1062_vm1, %v7422_v13, 0  ;;  %v27198_v13 = vld [vmem:[#allocation25_spill] sm:$0xff] }
 0x242   : > { %19413 = vmatmul.mubr.msk.bf16.vlgmr.msra.gmra.mrb[20].mxu1 %vm1058_vm2, %v21527_v45  ;;  %v23997_v38 = vpop.permute.xlu0 %9431  ;;  %v19073_v45 = vld [vmem:[%s22729_s6 + $0x36] sm:$0xff] }
 0x243   : > { %11841 = vrot.lane.b32.xlu1 %v23881_v52, %s21609_s10  ;;  %7270 = vmatpush1.bf16.msra.mxu1 %v7211_v54  ;;  %19081 = vst.sshfl [vmem:[#allocation2 + $0xc0] sm:$0xf0 pattern:$0x76325410] %v19073_v45  ;;  %v909_v37 = vcombine.low %v19073_v45, %v19073_v45  ;;  %v12140_v54 = vld [vmem:[#allocation2 + $0xb8] sm:$0x33] }
 0x244   : > { %7301 = vmatprep.mubr.bf16.mxu1 %v27120_v24  ;;  %19429 = vmatprep.subr.msk.bf16.mxu1 %vm1062_vm1, %v7203_v6  ;;  %v24011_v52 = vpop.permute.xlu1 %9433  ;;  %v27186_v45 = vld [vmem:[#allocation12_spill] sm:$0xff]  ;;  %v24079_v4 = vcombine.high %v23863_v40, %v12140_v54 }
 0x245   : > { %11843 = vrot.lane.b32.xlu0 %v23889_v41, %s21609_s10  ;;  %19424 = vmatmul.mubr.msk.bf16.vlgmr.msra.gmra.mrb[16].mxu0 %vm1058_vm2, %v21528_v20  ;;  %19080 = vst.sshfl [vmem:[#allocation2 + $0xb8] sm:$0xf0 pattern:$0x76325410] %v909_v37  ;;  %v7425_v37 = vsel %vm1460_vm3, %v27187_v55, %v27186_v45 }
 0x246   : > { %7311 = vmatpush1.bf16.msra.mxu0 %v7217_v31  ;;  %7342 = vmatprep.mubr.bf16.mxu0 %v27120_v24  ;;  %v24021_v41 = vpop.permute.xlu0 %9435  ;;  %v24063_v31 = vld [vmem:[#allocation2 + $0x74] sm:$0xff]  ;;  %27190 = vst [vmem:[#allocation20_spill] sm:$0xff] %v24079_v4 }
 0x247   : > { %11845 = vrot.lane.b32.xlu1 %v23899_v50, %s21609_s10  ;;  %19431 = vmatprep.subr.msk.bf16.mxu0 %vm1062_vm1, %v7419_v35  ;;  %v7427_v50 = vsel %vm1062_vm1, %v7418_v61, 0  ;;  %v12141_v61 = vld [vmem:[#allocation2 + $0xc0] sm:$0x33] }
 0x248   : > { %v24031_v48 = vpop.permute.xlu1 %9641 }
 0x249   : > { %11847 = vrot.lane.b32.xlu0 %v23907_v22, %s21609_s10  ;;  %27182 = vst [vmem:[#allocation17_spill] sm:$0xff] %v24031_v48  ;;  %v27183_v22 = vld [vmem:[#allocation11_spill] sm:$0xff] }
 0x24a   : > { %19426 = vmatmul.mubr.msk.bf16.vlgmr.msra.gmra.mrb[16].mxu1 %vm1058_vm2, %v21528_v20  ;;  %v24038_v0 = vpop.permute.xlu0 %9643  ;;  %v7423_v6 = vsel %vm1460_vm3, %v27184_v51, %v27183_v22 }
 0x24b   : > { %11849 = vrot.lane.b32.xlu1 %v23924_v30, %s21609_s10  ;;  %7352 = vmatpush1.bf16.msra.mxu1 %v7223_v3  ;;  %v27193_v3 = vld [vmem:[#allocation14_spill] sm:$0xff] }
 0x24c   : > { %7383 = vmatprep.mubr.bf16.mxu1 %v27120_v24  ;;  %19433 = vmatprep.subr.msk.bf16.mxu1 %vm1062_vm1, %v7421_v60  ;;  %v24051_v30 = vpop.permute.xlu1 %9645 }
 0x24d   : > { %11851 = vrot.lane.b32.xlu0 %v23933_v9, %s21609_s10  ;;  %19428 = vmatmul.mubr.msk.bf16.vlgmr.msra.gmra.mrb[20].mxu0 %vm1058_vm2, %v21528_v20  ;;  %v7433_v9 = vsel %vm1062_vm1, %v7420_v21, 0  ;;  %v24109_v21 = vcombine.high %v24063_v31, %v12141_v61 }
 0x24e   : > { %7451 = vmatpush1.bf16.msra.mxu0 %v7427_v50  ;;  %7482 = vmatprep.mubr.bf16.mxu0 %v27120_v24  ;;  %v24057_v35 = vpop.permute.xlu0 %9647  ;;  %v24099_v50 = vcombine.low %v24063_v31, %v12141_v61 }
 0x24f   : > { %11853 = vrot.lane.b32.xlu1 %v23942_v57, %s21609_s10  ;;  %19435 = vmatprep.subr.msk.bf16.mxu0 %vm1062_vm1, %v7423_v6  ;;  %27185 = vst [vmem:[#allocation19_spill] sm:$0xff] %v24057_v35  ;;  %v24071_v57 = vcombine.low %v23863_v40, %v12140_v54  ;;  %v21529_v40 = vld [vmem:[%s26946_s2 + $0x20] sm:$0xf]  ;;  %27196 = vst [vmem:[#allocation14_spill] sm:$0xff] %v24109_v21 }
 0x250   : > { %v24073_v5 = vpop.permute.xlu1 %9649  ;;  %27194 = vst [vmem:[#allocation23_spill] sm:$0xff] %v24099_v50  ;;  %v24104_v6 = vld [vmem:[#allocation2 + $0x7c] sm:$0xff] }
 0x251   : > { %11855 = vrot.lane.b32.xlu0 %v23956_v28, %s21609_s10  ;;  %27188 = vst [vmem:[#allocation18_spill] sm:$0xff] %v24071_v57  ;;  %27189 = vst [vmem:[#allocation11_spill] sm:$0xff] %v24073_v5  ;;  %v27192_v28 = vld [vmem:[#allocation27_spill] sm:$0xff]  ;;  %v8178_v5 = vsel %vm1460_vm3, %v23717_v15, %v23733_v27 }
 0x252   : > { %19430 = vmatmul.mubr.msk.bf16.vlgmr.msra.gmra.mrb[20].mxu1 %vm1058_vm2, %v21528_v20  ;;  %v24082_v60 = vpop.permute.xlu0 %9651  ;;  %v7770_v20 = vsel %vm1049_vm0, %v27193_v3, %v27192_v28 }
 0x253   : > { %11857 = vrot.lane.b32.xlu1 %v23970_v36, %s21609_s10  ;;  %7492 = vmatpush1.bf16.msra.mxu1 %v7433_v9  ;;  %27191 = vst [vmem:[#allocation12_spill] sm:$0xff] %v24082_v60  ;;  %v7424_v36 = vsel %vm1460_vm3, %v27183_v22, %v27187_v55  ;;  %v12142_v22 = vld [vmem:[#allocation2 + $0xc8] sm:$0x33]  ;;  %v7769_v9 = vsel %vm1049_vm0, %v27198_v13, %v27193_v3 }
 0x254   : > { %7523 = vmatprep.mubr.bf16.mxu1 %v27120_v24  ;;  %19437 = vmatprep.subr.msk.bf16.mxu1 %vm1062_vm1, %v7425_v37  ;;  %v24101_v51 = vpop.permute.xlu1 %9653  ;;  %v7445_v45 = vsel %vm1062_vm1, %v7424_v36, 0  ;;  %v24121_v55 = vcombine.low %v24104_v6, %v12142_v22  ;;  %v27200_v37 = vld [vmem:[#allocation29_spill] sm:$0xff]  ;;  %v24134_v3 = vcombine.high %v24104_v6, %v12142_v22  ;;  %v7778_v36 = vsel %vm1062_vm1, %v7769_v9, 0 }
 0x255   : > { %12183 = vrot.lane.b32.xlu0 %v24071_v57, %s21608_s9  ;;  %19432 = vmatmul.mubr.msk.bf16.vlgmr.msra.gmra.mrb[16].mxu0 %vm1058_vm2, %v21529_v40  ;;  %27195 = vst [vmem:[#allocation27_spill] sm:$0xff] %v24101_v51 }
 0x256   : > { %7533 = vmatpush1.bf16.msra.mxu0 %v7439_v19  ;;  %7564 = vmatprep.mubr.bf16.mxu0 %v27120_v24  ;;  %v24112_v54 = vpop.permute.xlu0 %9655  ;;  %27199 = vst [vmem:[#allocation25_spill] sm:$0xff] %v24121_v55  ;;  %v27201_v19 = vld [vmem:[#allocation28_spill] sm:$0xff] }
 0x257   : > { %12185 = vrot.lane.b32.xlu1 %v24079_v4, %s21608_s9  ;;  %19456 = vmatprep.subr.msk.bf16.mxu0 %vm1062_vm1, %v7770_v20  ;;  %27197 = vst [vmem:[#allocation48_spill] sm:$0xff] %v24112_v54  ;;  %v7772_v61 = vsel %vm1049_vm0, %v27201_v19, %v27200_v37  ;;  %v24129_v20 = vld [vmem:[#allocation2 + $0x84] sm:$0xff]  ;;  %27203 = vst [vmem:[#allocation28_spill] sm:$0xff] %v24134_v3  ;;  %v7771_v51 = vsel %vm1049_vm0, %v27192_v28, %v27201_v19 }
 0x258   : > { %v24126_v62 = vpop.permute.xlu1 %9657  ;;  %v27205_v54 = vld [vmem:[#allocation31_spill] sm:$0xff]  ;;  %v24151_v22 = vcombine.low %v24129_v20, %v12143_v56 }
 0x259   : > { %12187 = vrot.lane.b32.xlu0 %v24099_v50, %s21608_s9  ;;  %27202 = vst [vmem:[#allocation29_spill] sm:$0xff] %v24126_v62  ;;  %v27206_v62 = vld [vmem:[#allocation30_spill] sm:$0xff] }
 0x25a   : > { %19434 = vmatmul.mubr.msk.bf16.vlgmr.msra.gmra.mrb[16].mxu1 %vm1058_vm2, %v21529_v40  ;;  %v24137_v13 = vpop.permute.xlu0 %9985  ;;  %v7774_v60 = vsel %vm1049_vm0, %v27206_v62, %v27205_v54  ;;  %27207 = vst [vmem:[#allocation31_spill] sm:$0xff] %v24151_v22  ;;  %v7773_v19 = vsel %vm1049_vm0, %v27200_v37, %v27206_v62 }
 0x25b   : > { %12189 = vrot.lane.b32.xlu1 %v24109_v21, %s21608_s9  ;;  %7574 = vmatpush1.bf16.msra.mxu1 %v7445_v45  ;;  %27204 = vst [vmem:[#allocation49_spill] sm:$0xff] %v24137_v13  ;;  %v24159_v45 = vcombine.high %v24129_v20, %v12143_v56  ;;  %v27211_v13 = vld [vmem:[#allocation33_spill] sm:$0xff]  ;;  %v7790_v62 = vsel %vm1062_vm1, %v7773_v19, 0  ;;  %v27219_v19 = vld [vmem:[#allocation3_spill] sm:$0xff] }
 0x25c   : > { %7605 = vmatprep.mubr.bf16.mxu1 %v27120_v24  ;;  %19458 = vmatprep.subr.msk.bf16.mxu1 %vm1062_vm1, %v7772_v61  ;;  %v24153_v9 = vpop.permute.xlu1 %9987  ;;  %v7784_v61 = vsel %vm1062_vm1, %v7771_v51, 0 }
 0x25d   : > { %12191 = vrot.lane.b32.xlu0 %v24121_v55, %s21608_s9  ;;  %19436 = vmatmul.mubr.msk.bf16.vlgmr.msra.gmra.mrb[20].mxu0 %vm1058_vm2, %v21529_v40  ;;  %27208 = vst [vmem:[#allocation30_spill] sm:$0xff] %v24153_v9  ;;  %27209 = vst [vmem:[#allocation50_spill] sm:$0xff] %v24159_v45  ;;  %v27212_v9 = vld [vmem:[#allocation32_spill] sm:$0xff] }
 0x25e   : > { %7802 = vmatpush1.bf16.msra.mxu0 %v7778_v36  ;;  %7833 = vmatprep.mubr.bf16.mxu0 %v27120_v24  ;;  %v24162_v28 = vpop.permute.xlu0 %9989  ;;  %v21340_v36 = vld [vmem:[#allocation2 + $0x8c] ss:$76 sps:$4 sm:$0x3f]   ;;  %v7776_v35 = vsel %vm1049_vm0, %v27212_v9, %v27211_v13  ;;  %v7775_v51 = vsel %vm1049_vm0, %v27205_v54, %v27212_v9 }
 0x25f   : > { %12193 = vrot.lane.b32.xlu1 %v24134_v3, %s21608_s9  ;;  %19460 = vmatprep.subr.msk.bf16.mxu0 %vm1062_vm1, %v7774_v60  ;;  %27210 = vst [vmem:[#allocation51_spill] sm:$0xff] %v24162_v28  ;;  %v7796_v13 = vsel %vm1062_vm1, %v7775_v51, 0 }
 0x260   : > { %v24173_v56 = vpop.permute.xlu1 %9991 }
 0x261   : > { %12195 = vrot.lane.b32.xlu0 %v24151_v22, %s21608_s9  ;;  %27213 = vst [vmem:[#allocation33_spill] sm:$0xff] %v24173_v56 }
 0x262   : > { %19438 = vmatmul.mubr.msk.bf16.vlgmr.msra.gmra.mrb[20].mxu1 %vm1058_vm2, %v21529_v40  ;;  %v24179_v60 = vpop.permute.xlu0 %9993  ;;  %v21530_v40 = vld [vmem:[%s26946_s2 + $0x4] sm:$0xf] }
 0x263   : > { %12197 = vrot.lane.b32.xlu1 %v24159_v45, %s21608_s9  ;;  %7843 = vmatpush1.bf16.msra.mxu1 %v7784_v61  ;;  %27214 = vst [vmem:[#allocation32_spill] sm:$0xff] %v24179_v60  ;;  %v7966_v61 = vsel %vm1062_vm1, %v27219_v19, 0  ;;  %v8375_v60 = vld [vmem:[#allocation2 + $0x24] sm:$0xcc] }
 0x264   : > { %7874 = vmatprep.mubr.bf16.mxu1 %v27120_v24  ;;  %19462 = vmatprep.subr.msk.bf16.mxu1 %vm1062_vm1, %v7776_v35  ;;  %v24191_v37 = vpop.permute.xlu1 %9995  ;;  %v27216_v35 = vld [vmem:[#allocation4_spill] sm:$0xff] }
 0x265   : > { %12199 = vrot.lane.b32.xlu0 %v21340_v36, %s21608_s9  ;;  %19457 = vmatmul.mubr.msk.bf16.vlgmr.msra.gmra.mrb[24].mxu0 %vm1058_vm2, %v21530_v40  ;;  %27215 = vst [vmem:[#allocation52_spill] sm:$0xff] %v24191_v37 }
 0x266   : > { %7884 = vmatpush1.bf16.msra.mxu0 %v7790_v62  ;;  %7915 = vmatprep.mubr.bf16.mxu0 %v27120_v24  ;;  %v24198_v54 = vpop.permute.xlu0 %9997 }
 0x267   : > { %12585 = vrot.lane.b32.xlu1 %v24071_v57, %s21609_s10  ;;  %19464 = vmatprep.subr.msk.bf16.mxu0 %vm1062_vm1, %v27216_v35  ;;  %27217 = vst [vmem:[#allocation4_spill] sm:$0xff] %v24198_v54  ;;  %v27221_v35 = vld [vmem:[#allocation6_spill] sm:$0xff] }
 0x268   : > { %v24203_v9 = vpop.permute.xlu1 %9999  ;;  %v13048_v57 = vld [vmem:[#allocation2 + $0xbc] sm:$0x33] }
 0x269   : > { %12587 = vrot.lane.b32.xlu0 %v24079_v4, %s21609_s10  ;;  %27218 = vst [vmem:[#allocation53_spill] sm:$0xff] %v24203_v9 }
 0x26a   : > { %19459 = vmatmul.mubr.msk.bf16.vlgmr.msra.gmra.mrb[24].mxu1 %vm1058_vm2, %v21530_v40  ;;  %v24210_v62 = vpop.permute.xlu0 %10001 }
 0x26b   : > { %12589 = vrot.lane.b32.xlu1 %v24099_v50, %s21609_s10  ;;  %7925 = vmatpush1.bf16.msra.mxu1 %v7796_v13  ;;  %27220 = vst [vmem:[#allocation3_spill] sm:$0xff] %v24210_v62  ;;  %v27223_v13 = vld [vmem:[#allocation8_spill] sm:$0xff]  ;;  %v27225_v50 = vld [vmem:[#allocation5_spill] sm:$0xff] }
 0x26c   : > { %7956 = vmatprep.mubr.bf16.mxu1 %v27120_v24  ;;  %19466 = vmatprep.subr.msk.bf16.mxu1 %vm1062_vm1, %v27221_v35  ;;  %v24218_v51 = vpop.permute.xlu1 %10387  ;;  %v7972_v35 = vsel %vm1062_vm1, %v27225_v50, 0  ;;  %v27229_v50 = vld [vmem:[#allocation37_spill] sm:$0xff] }
 0x26d   : > { %12591 = vrot.lane.b32.xlu0 %v24109_v21, %s21609_s10  ;;  %19461 = vmatmul.mubr.msk.bf16.vlgmr.msra.gmra.mrb[28].mxu0 %vm1058_vm2, %v21530_v40  ;;  %27222 = vst [vmem:[#allocation6_spill] sm:$0xff] %v24218_v51 }
 0x26e   : > { %7990 = vmatpush1.bf16.msra.mxu0 %v7966_v61  ;;  %8021 = vmatprep.mubr.bf16.mxu0 %v27120_v24  ;;  %v24225_v19 = vpop.permute.xlu0 %10389  ;;  %v24234_v61 = vld [vmem:[#allocation2 + $0x70] sm:$0xff] }
 0x26f   : > { %12593 = vrot.lane.b32.xlu1 %v24121_v55, %s21609_s10  ;;  %19468 = vmatprep.subr.msk.bf16.mxu0 %vm1062_vm1, %v27223_v13  ;;  %27224 = vst [vmem:[#allocation8_spill] sm:$0xff] %v24225_v19  ;;  %v27227_v13 = vld [vmem:[#allocation7_spill] sm:$0xff]  ;;  %v27231_v19 = vld [vmem:[#allocation10_spill] sm:$0xff] }
 0x270   : > { %v24231_v21 = vpop.permute.xlu1 %10391  ;;  %v7978_v55 = vsel %vm1062_vm1, %v27227_v13, 0 }
 0x271   : > { %12595 = vrot.lane.b32.xlu0 %v24134_v3, %s21609_s10  ;;  %27226 = vst [vmem:[#allocation5_spill] sm:$0xff] %v24231_v21  ;;  %v27230_v3 = vld [vmem:[#allocation35_spill] sm:$0xff]  ;;  %v27234_v21 = vld [vmem:[#allocation34_spill] sm:$0xff] }
 0x272   : > { %19463 = vmatmul.mubr.msk.bf16.vlgmr.msra.gmra.mrb[28].mxu1 %vm1058_vm2, %v21530_v40  ;;  %v24240_v4 = vpop.permute.xlu0 %10393  ;;  %v8172_v51 = vsel %vm1460_vm3, %v27230_v3, %v27229_v50  ;;  %v21531_v40 = vld [vmem:[%s26946_s2] sm:$0xf]  ;;  %v8171_v9 = vsel %vm1460_vm3, %v27234_v21, %v27230_v3  ;;  %v13050_v21 = vld [vmem:[#allocation2 + $0xcc] sm:$0x33] }
 0x273   : > { %12597 = vrot.lane.b32.xlu1 %v24151_v22, %s21609_s10  ;;  %8031 = vmatpush1.bf16.msra.mxu1 %v7972_v35  ;;  %27228 = vst [vmem:[#allocation7_spill] sm:$0xff] %v24240_v4  ;;  %v24255_v35 = vcombine.low %v24234_v61, %v13048_v57  ;;  %v24260_v22 = vld [vmem:[#allocation2 + $0x78] sm:$0xff]  ;;  %v8180_v3 = vsel %vm1062_vm1, %v8171_v9, 0 }
 0x274   : > { %8062 = vmatprep.mubr.bf16.mxu1 %v27120_v24  ;;  %19470 = vmatprep.subr.msk.bf16.mxu1 %vm1062_vm1, %v27231_v19  ;;  %v24257_v13 = vpop.permute.xlu1 %10395  ;;  %v13049_v19 = vld [vmem:[#allocation2 + $0xc4] sm:$0x33] }
 0x275   : > { %12599 = vrot.lane.b32.xlu0 %v24159_v45, %s21609_s10  ;;  %19465 = vmatmul.mubr.msk.bf16.vlgmr.msra.gmra.mrb[24].mxu0 %vm1058_vm2, %v21531_v40  ;;  %27232 = vst [vmem:[#allocation37_spill] sm:$0xff] %v24257_v13  ;;  %v24264_v45 = vcombine.high %v24234_v61, %v13048_v57  ;;  %v27235_v13 = vld [vmem:[#allocation9_spill] sm:$0xff]  ;;  %v24277_v62 = vcombine.low %v24260_v22, %v13049_v19  ;;  %v27237_v57 = vld [vmem:[#allocation39_spill] sm:$0xff] }
 0x276   : > { %8072 = vmatpush1.bf16.msra.mxu0 %v7978_v55  ;;  %8103 = vmatprep.mubr.bf16.mxu0 %v27120_v24  ;;  %v24267_v4 = vpop.permute.xlu0 %10397  ;;  %v7984_v55 = vsel %vm1062_vm1, %v27235_v13, 0  ;;  %v24291_v13 = vcombine.high %v24260_v22, %v13049_v19  ;;  %v8173_v9 = vsel %vm1460_vm3, %v27229_v50, %v27237_v57 }
 0x277   : > { %12601 = vrot.lane.b32.xlu1 %v21340_v36, %s21609_s10  ;;  %19472 = vmatprep.subr.msk.bf16.mxu0 %vm1062_vm1, %v8172_v51  ;;  %27233 = vst [vmem:[#allocation35_spill] sm:$0xff] %v24267_v4  ;;  %v27236_v36 = vld [vmem:[#allocation40_spill] sm:$0xff]  ;;  %v24285_v4 = vld [vmem:[#allocation2 + $0x80] sm:$0xff] }
 0x278   : > { %v8174_v37 = vsel %vm1460_vm3, %v27237_v57, %v27236_v36  ;;  %v24282_v51 = vpop.permute.xlu1 %10399  ;;  %v24307_v19 = vcombine.low %v24285_v4, %v13050_v21  ;;  %v24317_v50 = vcombine.high %v24285_v4, %v13050_v21  ;;  %v19481_v57 = vcombine.high %v8375_v60, %v24234_v61 }
 0x279   : > { %13090 = vrot.lane.b32.xlu0 %v24255_v35, %s21608_s9  ;;  %27238 = vst [vmem:[#allocation10_spill] sm:$0xff] %v24282_v51  ;;  %v27240_v51 = vld [vmem:[#allocation44_spill] sm:$0xff] }
 0x27a   : > { %19467 = vmatmul.mubr.msk.bf16.vlgmr.msra.gmra.mrb[24].mxu1 %vm1058_vm2, %v21531_v40  ;;  %v24293_v54 = vpop.permute.xlu0 %10401  ;;  %v8176_v56 = vsel %vm1460_vm3, %v27240_v51, %v23703_v32 }
 0x27b   : > { %13092 = vrot.lane.b32.xlu1 %v24264_v45, %s21608_s9  ;;  %8113 = vmatpush1.bf16.msra.mxu1 %v7984_v55  ;;  %27239 = vst [vmem:[#allocation34_spill] sm:$0xff] %v24293_v54  ;;  %v13051_v54 = vld [vmem:[#allocation2 + $0xd4] sm:$0x33] }
 0x27c   : > { %8144 = vmatprep.mubr.bf16.mxu1 %v27120_v24  ;;  %19474 = vmatprep.subr.msk.bf16.mxu1 %vm1062_vm1, %v8174_v37  ;;  %v24309_v55 = vpop.permute.xlu1 %10403  ;;  %v24312_v37 = vld [vmem:[#allocation2 + $0x88] sm:$0xff] }
 0x27d   : > { %13094 = vrot.lane.b32.xlu0 %v24277_v62, %s21608_s9  ;;  %19469 = vmatmul.mubr.msk.bf16.vlgmr.msra.gmra.mrb[28].mxu0 %vm1058_vm2, %v21531_v40  ;;  %27241 = vst [vmem:[#allocation9_spill] sm:$0xff] %v24309_v55  ;;  %v8186_v55 = vsel %vm1062_vm1, %v8173_v9, 0  ;;  %v24333_v21 = vcombine.low %v24312_v37, %v13051_v54  ;;  %v19480_v9 = vcombine.low %v8375_v60, %v24234_v61  ;;  %v21532_v60 = vld [vmem:[%s26946_s2 + $0x8] sm:$0xf] }
 0x27e   : > { %8204 = vmatpush1.bf16.msra.mxu0 %v8180_v3  ;;  %8235 = vmatprep.mubr.bf16.mxu0 %v27120_v24  ;;  %v24321_v28 = vpop.permute.xlu0 %10892  ;;  %v8175_v3 = vsel %vm1460_vm3, %v27236_v36, %v27240_v51  ;;  %v24341_v36 = vcombine.high %v24312_v37, %v13051_v54  ;;  %v8416_v51 = vrot.slane %v19481_v57, 2  ;;  %v24359_v54 = vld [vmem:[#allocation2 + $0x90] ss:$76 sps:$4 sm:$0x3f]  }
 0x27f   : > { %13096 = vrot.lane.b32.xlu1 %v24291_v13, %s21608_s9  ;;  %19476 = vmatprep.subr.msk.bf16.mxu0 %vm1062_vm1, %v8176_v56  ;;  %27242 = vst [vmem:[#allocation40_spill] sm:$0xff] %v24321_v28  ;;  %v8376_v56 = vld [vmem:[#allocation2 + $0x2c] sm:$0xcc]  ;;  %v8192_v27 = vsel %vm1062_vm1, %v8175_v3, 0 }
 0x280   : > { %v24335_v48 = vpop.permute.xlu1 %10894 }
 0x281   : > { %13098 = vrot.lane.b32.xlu0 %v24307_v19, %s21608_s9  ;;  %27243 = vst [vmem:[#allocation39_spill] sm:$0xff] %v24335_v48  ;;  %v8377_v48 = vld [vmem:[#allocation2 + $0x34] sm:$0xcc] }
 0x282   : > { %19471 = vmatmul.mubr.msk.bf16.vlgmr.msra.gmra.mrb[28].mxu1 %vm1058_vm2, %v21531_v40  ;;  %v24345_v28 = vpop.permute.xlu0 %10896  ;;  %v19483_v40 = vcombine.high %v8376_v56, %v24260_v22 }
 0x283   : > { %13100 = vrot.lane.b32.xlu1 %v24317_v50, %s21608_s9  ;;  %8245 = vmatpush1.bf16.msra.mxu1 %v8186_v55  ;;  %27244 = vst [vmem:[#allocation44_spill] sm:$0xff] %v24345_v28  ;;  %v8177_v55 = vsel %vm1460_vm3, %v23703_v32, %v23717_v15  ;;  %v8415_v32 = vrot.slane %v19480_v9, 2  ;;  %v19485_v15 = vcombine.high %v8377_v48, %v24285_v4 }
 0x284   : > { %8276 = vmatprep.mubr.bf16.mxu1 %v27120_v24  ;;  %19478 = vmatprep.subr.msk.bf16.mxu1 %vm1062_vm1, %v8178_v5  ;;  %v24361_v61 = vpop.permute.xlu1 %10898  ;;  %v8198_v57 = vsel %vm1062_vm1, %v8177_v55, 0  ;;  %v8418_v3 = vrot.slane %v19483_v40, 2  ;;  %v19482_v28 = vcombine.low %v8376_v56, %v24260_v22  ;;  %v19484_v55 = vcombine.low %v8377_v48, %v24285_v4 }
 0x285   : > { %13102 = vrot.lane.b32.xlu0 %v24333_v21, %s21608_s9  ;;  %19473 = vmatmul.mubr.msk.bf16.vlgmr.msra.gmra.mrb[24].mxu0 %vm1058_vm2, %v21532_v60  ;;  %27245 = vst [vmem:[#allocation54_spill] sm:$0xff] %v24361_v61  ;;  %v8420_v9 = vrot.slane %v19485_v15, 2 }
 0x286   : > { %8286 = vmatpush1.bf16.msra.mxu0 %v8192_v27  ;;  %8317 = vmatprep.mubr.bf16.mxu0 %v27120_v24  ;;  %v8378_v27 = vld [vmem:[#allocation2 + $0x3c] sm:$0xcc]  ;;  %v8417_v22 = vrot.slane %v19482_v28, 2  ;;  %v8419_v48 = vrot.slane %v19484_v55, 2  ;;  %v27252_v55 = vld [vmem:[#allocation36_spill] sm:$0xff] }
 0x287   : > { %13104 = vrot.lane.b32.xlu1 %v24341_v36, %s21608_s9  ;;  %19488 = vmatprep.subr.msk.bf16.mxu0 %vm1062_vm1, %v8416_v51  ;;  %v24368_v5 = vpop.permute.xlu0 %10900  ;;  %v8424_v51 = vsel %vm1062_vm1, %v8415_v32, 0  ;;  %v19487_v56 = vcombine.high %v8378_v27, %v24312_v37 }
 0x288   : > { %v8430_v28 = vsel %vm1062_vm1, %v8417_v22, 0 }
 0x289   : > { %13106 = vrot.lane.b32.xlu0 %v24359_v54, %s21608_s9  ;;  %v24374_v61 = vpop.permute.xlu1 %10902  ;;  %v8422_v32 = vrot.slane %v19487_v56, 2 }
 0x28a   : > { %19475 = vmatmul.mubr.msk.bf16.vlgmr.msra.gmra.mrb[24].mxu1 %vm1058_vm2, %v21532_v60 }
 0x28b   : > { %13312 = vrot.lane.b32.xlu1 %v24255_v35, %s21609_s10  ;;  %8327 = vmatpush1.bf16.msra.mxu1 %v8198_v57  ;;  %v24381_v40 = vpop.permute.xlu0 %10904 }
 0x28c   : > { %8358 = vmatprep.mubr.bf16.mxu1 %v27120_v24  ;;  %19490 = vmatprep.subr.msk.bf16.mxu1 %vm1062_vm1, %v8418_v3  ;;  %v13775_v3 = vld [vmem:[#allocation2 + $0xc0] sm:$0x33] }
 0x28d   : > { %13314 = vrot.lane.b32.xlu0 %v24264_v45, %s21609_s10  ;;  %19477 = vmatmul.mubr.msk.bf16.vlgmr.msra.gmra.mrb[28].mxu0 %vm1058_vm2, %v21532_v60  ;;  %v24389_v35 = vpop.permute.xlu1 %10906  ;;  %v19486_v45 = vcombine.low %v8378_v27, %v24312_v37  ;;  %v8694_v37 = vsel %vm1049_vm0, %v23761_v17, %v23773_v14  ;;  %v8693_v27 = vsel %vm1049_vm0, %v23747_v42, %v23761_v17  ;;  %v27254_v42 = vld [vmem:[#allocation38_spill] sm:$0xff] }
 0x28e   : > { %27246 = vst [vmem:[#allocation55_spill] sm:$0xff] %v24389_v35  ;;  %8448 = vmatpush1.bf16.msra.mxu0 %v8424_v51  ;;  %8479 = vmatprep.mubr.bf16.mxu0 %v27120_v24 }
 0x28f   : > { %13316 = vrot.lane.b32.xlu1 %v24277_v62, %s21609_s10  ;;  %19492 = vmatprep.subr.msk.bf16.mxu0 %vm1062_vm1, %v8420_v9  ;;  %v24395_v4 = vpop.permute.xlu0 %10908  ;;  %v8436_v62 = vsel %vm1062_vm1, %v8419_v48, 0  ;;  %v8696_v48 = vsel %vm1049_vm0, %v23786_v46, %v23794_v33 }
 0x290   : > { %27247 = vst [vmem:[#allocation56_spill] sm:$0xff] %v24395_v4 }
 0x291   : > { %13318 = vrot.lane.b32.xlu0 %v24291_v13, %s21609_s10  ;;  %v24401_v15 = vpop.permute.xlu1 %11114  ;;  %v8421_v13 = vrot.slane %v19486_v45, 2 }
 0x292   : > { %27248 = vst [vmem:[#allocation57_spill] sm:$0xff] %v24401_v15  ;;  %19479 = vmatmul.mubr.msk.bf16.vlgmr.msra.gmra.mrb[28].mxu1 %vm1058_vm2, %v21532_v60 }
 0x293   : > { %13320 = vrot.lane.b32.xlu1 %v24307_v19, %s21609_s10  ;;  %8489 = vmatpush1.bf16.msra.mxu1 %v8430_v28  ;;  %v24407_v57 = vpop.permute.xlu0 %11116  ;;  %v24419_v19 = vld [vmem:[%s26946_s2 + $0xc] sm:$0xf]  ;;  %v8442_v9 = vsel %vm1062_vm1, %v8421_v13, 0  ;;  %v24452_v13 = vcombine.high %v24063_v31, %v13775_v3 }
 0x294   : > { %27249 = vst [vmem:[#allocation58_spill] sm:$0xff] %v24407_v57  ;;  %8520 = vmatprep.mubr.bf16.mxu1 %v27120_v24  ;;  %19494 = vmatprep.subr.msk.bf16.mxu1 %vm1062_vm1, %v8422_v32 }
 0x295   : > { %13322 = vrot.lane.b32.xlu0 %v24317_v50, %s21609_s10  ;;  %19489 = vmatmul.mubr.msk.bf16.vlgmr.msra.gmra.mrb[24].mxu0 %vm1058_vm2, %v24419_v19  ;;  %v24423_v60 = vpop.permute.xlu1 %11118 }
 0x296   : > { %27250 = vst [vmem:[#allocation59_spill] sm:$0xff] %v24423_v60  ;;  %8530 = vmatpush1.bf16.msra.mxu0 %v8436_v62  ;;  %8561 = vmatprep.mubr.bf16.mxu0 %v27120_v24  ;;  %v13776_v62 = vld [vmem:[#allocation2 + $0xc8] sm:$0x33] }
 0x297   : > { %13324 = vrot.lane.b32.xlu1 %v24333_v21, %s21609_s10  ;;  %19505 = vmatprep.subr.msk.bf16.mxu0 %vm1062_vm1, %v8694_v37  ;;  %v24429_v50 = vpop.permute.xlu0 %11120  ;;  %v5240_v51 = vpop.f32.mrb[8].mxu0  ;;  %v24439_v21 = vcombine.low %v24063_v31, %v13775_v3  ;;  %v8695_v3 = vsel %vm1049_vm0, %v23773_v14, %v23786_v46  ;;  %v13777_v14 = vld [vmem:[#allocation2 + $0xd0] sm:$0x33] }
 0x298   : > { %27251 = vst [vmem:[#allocation60_spill] sm:$0xff] %v24429_v50  ;;  %v5378_v22 = vmul.f32 %v5240_v51, %v27252_v55  ;;  %v5242_v56 = vpop.f32.mrb[9].mxu0  ;;  %v8702_v50 = vsel %vm1062_vm1, %v8693_v27, 0  ;;  %v24471_v27 = vcombine.low %v24104_v6, %v13776_v62  ;;  %v27258_v46 = vld [vmem:[#allocation41_spill] sm:$0xff]  ;;  %v8708_v4 = vsel %vm1062_vm1, %v8695_v3, 0 }
 0x299   : > { %13326 = vrot.lane.b32.xlu0 %v24341_v36, %s21609_s10  ;;  %v24444_v28 = vpop.permute.xlu1 %11122  ;;  %v5379_v17 = vmul.f32 %v5242_v56, %v27254_v42  ;;  %v20076_v32 = vpack.c.bf16 %v5242_v56, %v5240_v51  ;;  %v5244_v45 = vpop.f32.mrb[10].mxu0 }
 0x29a   : > { %27253 = vst [vmem:[#allocation61_spill] sm:$0xff] %v24444_v28  ;;  %19491 = vmatmul.mubr.msk.bf16.vlgmr.msra.gmra.mrb[24].mxu1 %vm1058_vm2, %v24419_v19  ;;  %v5432_v36 = vmul.f32 %v5378_v22, %v5240_v51  ;;  %v5245_v37 = vpop.f32.mrb[11].mxu0 }
 0x29b   : > { %13328 = vrot.lane.b32.xlu1 %v24359_v54, %s21609_s10  ;;  %8571 = vmatpush1.bf16.msra.mxu1 %v8442_v9  ;;  %v24455_v28 = vpop.permute.xlu0 %11124  ;;  %5418 = vst [vmem:[%s23652_s7 + $0x20] sm:$0xff] %v20076_v32  ;;  %v5422_v15 = vadd.f32 %v5379_v17, %v5378_v22  ;;  %v5433_v57 = vmul.f32 %v5379_v17, %v5242_v56  ;;  %v27257_v56 = vld [vmem:[#allocation16_spill] sm:$0xff] }
 0x29c   : > { %27255 = vst [vmem:[#allocation62_spill] sm:$0xff] %v24455_v28  ;;  %8602 = vmatprep.mubr.bf16.mxu1 %v27120_v24  ;;  %19507 = vmatprep.subr.msk.bf16.mxu1 %vm1062_vm1, %v8696_v48  ;;  %v8698_v54 = vsel %vm1049_vm0, %v23809_v44, %v23816_v18  ;;  %v5281_v51 = vpop.f32.mrb[8].mxu1  ;;  %v24481_v28 = vcombine.high %v24104_v6, %v13776_v62 }
 0x29d   : > { %13817 = vrot.lane.b32.xlu0 %v24439_v21, %s21608_s9  ;;  %19493 = vmatmul.mubr.msk.bf16.vlgmr.msra.gmra.mrb[28].mxu0 %vm1058_vm2, %v24419_v19  ;;  %v24473_v9 = vpop.permute.xlu1 %11126  ;;  %v5440_v22 = vadd.f32 %v5433_v57, %v5432_v36  ;;  %v5380_v48 = vmul.f32 %v5281_v51, %v27257_v56  ;;  %v5283_v17 = vpop.f32.mrb[9].mxu1 }
 0x29e   : > { %27256 = vst [vmem:[#allocation63_spill] sm:$0xff] %v24473_v9  ;;  %8726 = vmatpush1.bf16.msra.mxu0 %v8702_v50  ;;  %8757 = vmatprep.mubr.bf16.mxu0 %v27120_v24  ;;  %v5381_v32 = vmul.f32 %v5283_v17, %v27258_v46  ;;  %v20077_v45 = vpack.c.bf16 %v5283_v17, %v5281_v51  ;;  %v5285_v37 = vpop.f32.mrb[10].mxu1 }
 0x29f   : > { %13819 = vrot.lane.b32.xlu1 %v24452_v13, %s21608_s9  ;;  %19509 = vmatprep.subr.msk.bf16.mxu0 %vm1062_vm1, %v8698_v54  ;;  %v24484_v57 = vpop.permute.xlu0 %11128  ;;  %v8697_v50 = vsel %vm1049_vm0, %v23794_v33, %v23809_v44  ;;  %v5423_v36 = vadd.f32 %v5422_v15, %v5380_v48  ;;  %v5434_v9 = vmul.f32 %v5380_v48, %v5281_v51  ;;  %v5286_v60 = vpop.f32.mrb[11].mxu1 }
 0x2a0   : > { %27259 = vst [vmem:[#allocation64_spill] sm:$0xff] %v24484_v57  ;;  %v5322_v35 = vpop.f32.mrb[12].mxu0  ;;  %5419 = vst [vmem:[%s23652_s7 + $0x28] sm:$0xff] %v20077_v45  ;;  %v5435_v46 = vmul.f32 %v5381_v32, %v5283_v17  ;;  %v24495_v54 = vcombine.low %v24129_v20, %v13777_v14  ;;  %v8700_v33 = vsel %vm1049_vm0, %v23827_v11, %v23834_v49  ;;  %v24505_v17 = vld [vmem:[#allocation2 + $0x8c] sm:$0xff]  ;;  %v13778_v45 = vld [vmem:[#allocation2 + $0xd8] sm:$0x33] }
 0x2a1   : > { %v5382_v37 = vmul.f32 %v5322_v35, %v23670_v16  ;;  %13821 = vrot.lane.b32.xlu0 %v24471_v27, %s21608_s9  ;;  %v5324_v62 = vpop.f32.mrb[13].mxu0  ;;  %v24500_v44 = vpop.permute.xlu1 %11130  ;;  %v5441_v15 = vadd.f32 %v5440_v22, %v5434_v9  ;;  %v5424_v60 = vadd.f32 %v5423_v36, %v5381_v32  ;;  %v24510_v9 = vcombine.high %v24129_v20, %v13777_v14 }
 0x2a2   : > { %v5383_v3 = vmul.f32 %v5324_v62, %v23679_v2  ;;  %v20078_v51 = vpack.c.bf16 %v5324_v62, %v5322_v35  ;;  %19495 = vmatmul.mubr.msk.bf16.vlgmr.msra.gmra.mrb[28].mxu1 %vm1058_vm2, %v24419_v19  ;;  %v5326_v48 = vpop.f32.mrb[14].mxu0  ;;  %v8714_v22 = vsel %vm1062_vm1, %v8697_v50, 0  ;;  %v8916_v32 = vsel %vm1460_vm3, %v23857_v12, %v23865_v34 }
 0x2a3   : > { %v5436_v57 = vmul.f32 %v5382_v37, %v5322_v35  ;;  %13823 = vrot.lane.b32.xlu1 %v24481_v28, %s21608_s9  ;;  %8767 = vmatpush1.bf16.msra.mxu1 %v8708_v4  ;;  %v5327_v49 = vpop.f32.mrb[15].mxu0  ;;  %v24516_v19 = vpop.permute.xlu0 %11619  ;;  %v5442_v36 = vadd.f32 %v5441_v15, %v5435_v46  ;;  %v5425_v48 = vadd.f32 %v5424_v60, %v5382_v37  ;;  %v21534_v46 = vld [vmem:[%s26946_s2 + $0x10] sm:$0xf] }
 0x2a4   : > { %27260 = vst [vmem:[#allocation65_spill] sm:$0xff] %v24516_v19  ;;  %5420 = vst [vmem:[%s23652_s7 + $0x30] sm:$0xff] %v20078_v51  ;;  %v5437_v35 = vmul.f32 %v5383_v3, %v5324_v62  ;;  %8798 = vmatprep.mubr.bf16.mxu1 %v27120_v24  ;;  %19511 = vmatprep.subr.msk.bf16.mxu1 %vm1062_vm1, %v8700_v33  ;;  %v8699_v4 = vsel %vm1049_vm0, %v23816_v18, %v23827_v11  ;;  %v5363_v50 = vpop.f32.mrb[12].mxu1  ;;  %v19074_v19 = vld [vmem:[%s22729_s6 + $0x3e] sm:$0xff] }
 0x2a5   : > { %v8915_v14 = vsel %vm1460_vm3, %v23850_v58, %v23857_v12  ;;  %13825 = vrot.lane.b32.xlu0 %v24495_v54, %s21608_s9  ;;  %19506 = vmatmul.mubr.msk.bf16.vlgmr.msra.gmra.mrb[24].mxu0 %vm1058_vm2, %v21534_v46  ;;  %v24534_v37 = vcombine.low %v24505_v17, %v13778_v45  ;;  %v24536_v62 = vpop.permute.xlu1 %11621  ;;  %v5443_v18 = vadd.f32 %v5442_v36, %v5436_v57  ;;  %v5365_v58 = vpop.f32.mrb[13].mxu1 }
 0x2a6   : > { %27261 = vst [vmem:[#allocation66_spill] sm:$0xff] %v24536_v62  ;;  %v5426_v11 = vadd.f32 %v5425_v48, %v5383_v3  ;;  %v5384_v33 = vmul.f32 %v5363_v50, %v23700_v1  ;;  %8808 = vmatpush1.bf16.msra.mxu0 %v8714_v22  ;;  %8839 = vmatprep.mubr.bf16.mxu0 %v27120_v24  ;;  %v5367_v60 = vpop.f32.mrb[14].mxu1  ;;  %v8720_v48 = vsel %vm1062_vm1, %v8699_v4, 0 }
 0x2a7   : > { %13827 = vrot.lane.b32.xlu1 %v24510_v9, %s21608_s9  ;;  %v5385_v12 = vmul.f32 %v5365_v58, %v23728_v25  ;;  %v20079_v15 = vpack.c.bf16 %v5365_v58, %v5363_v50  ;;  %v24544_v51 = vcombine.high %v24505_v17, %v13778_v45  ;;  %19513 = vmatprep.subr.msk.bf16.mxu0 %vm1062_vm1, %v8916_v32  ;;  %v24547_v57 = vpop.permute.xlu0 %11623  ;;  %v5368_v22 = vpop.f32.mrb[15].mxu1  ;;  %v24554_v60 = vld [vmem:[#allocation2 + $0x94] ss:$76 sps:$4 sm:$0x3f]  }
 0x2a8   : > { %v5444_v3 = vadd.f32 %v5443_v18, %v5437_v35  ;;  %v5427_v49 = vadd.f32 %v5426_v11, %v5384_v33  ;;  %v5438_v36 = vmul.f32 %v5384_v33, %v5363_v50  ;;  %v8918_v45 = vsel %vm1460_vm3, %v23872_v26, %v23883_v7  ;;  %19083 = vst.sshfl [vmem:[#allocation2 + $0xd0] sm:$0xf0 pattern:$0x76325410] %v19074_v19  ;;  %v9119_v33 = vld [vmem:[#allocation2 + $0x28] sm:$0xcc] }
 0x2a9   : > { %5421 = vst [vmem:[%s23652_s7 + $0x38] sm:$0xff] %v20079_v15  ;;  %v5439_v62 = vmul.f32 %v5385_v12, %v5365_v58  ;;  %13829 = vrot.lane.b32.xlu0 %v24534_v37, %s21608_s9  ;;  %v24559_v32 = vpop.permute.xlu1 %11625  ;;  %v924_v35 = vcombine.low %v19074_v19, %v19074_v19  ;;  %v8924_v18 = vsel %vm1062_vm1, %v8915_v14, 0  ;;  %v8920_v19 = vsel %vm1460_vm3, %v23892_v8, %v23901_v23 }
 0x2aa   : > { %v5445_v50 = vadd.f32 %v5444_v3, %v5438_v36  ;;  %19508 = vmatmul.mubr.msk.bf16.vlgmr.msra.gmra.mrb[24].mxu1 %vm1058_vm2, %v21534_v46  ;;  %v24562_v4 = vadd.f32 %v5427_v49, %v5385_v12  ;;  %v8917_v14 = vsel %vm1460_vm3, %v23865_v34, %v23872_v26  ;;  %v8919_v34 = vsel %vm1460_vm3, %v23883_v7, %v23892_v8  ;;  %v19075_v36 = vld [vmem:[%s22729_s6 + $0x46] sm:$0x3f] }
 0x2ab   : > { %13831 = vrot.lane.b32.xlu1 %v24544_v51, %s21608_s9  ;;  %8849 = vmatpush1.bf16.msra.mxu1 %v8720_v48  ;;  %v24567_v11 = vpop.permute.xlu0 %11627  ;;  %19082 = vst.sshfl [vmem:[#allocation2 + $0xc8] sm:$0xf0 pattern:$0x76325410] %v924_v35  ;;  %v8930_v26 = vsel %vm1062_vm1, %v8917_v14, 0  ;;  %v8922_v3 = vsel %vm1460_vm3, %v23910_v39, %v23926_v43  ;;  %v8936_v7 = vsel %vm1062_vm1, %v8919_v34, 0  ;;  %v19521_v22 = vcombine.low %v9119_v33, %v24063_v31 }
 0x2ac   : > { %27262 = vst [vmem:[#allocation67_spill] sm:$0xff] %v24562_v4  ;;  %8880 = vmatprep.mubr.bf16.mxu1 %v27120_v24  ;;  %19515 = vmatprep.subr.msk.bf16.mxu1 %vm1062_vm1, %v8918_v45  ;;  %v24574_v58 = vadd.f32 %v5445_v50, %v5439_v62  ;;  %v19522_v62 = vcombine.high %v9119_v33, %v24063_v31  ;;  %19085 = vst.sshfl [vmem:[#allocation2 + $0xe0] sm:$0x30 pattern:$0x76325410] %v19075_v36 }
 0x2ad   : > { %13833 = vrot.lane.b32.xlu0 %v24554_v60, %s21608_s9  ;;  %19510 = vmatmul.mubr.msk.bf16.vlgmr.msra.gmra.mrb[28].mxu0 %vm1058_vm2, %v21534_v46  ;;  %v24582_v12 = vpop.permute.xlu1 %11629  ;;  %v939_v48 = vcombine.low %v19075_v36, %v19075_v36  ;;  %v21535_v31 = vld [vmem:[%s26946_s2 + $0x14] sm:$0xf]  ;;  %v14336_v35 = vld [vmem:[#allocation2 + $0x4c] sm:$0xcc] }
 0x2ae   : > { %27263 = vst [vmem:[#allocation68_spill] sm:$0xff] %v24574_v58  ;;  %8948 = vmatpush1.bf16.msra.mxu0 %v8924_v18  ;;  %8979 = vmatprep.mubr.bf16.mxu0 %v27120_v24  ;;  %v9160_v8 = vrot.slane %v19522_v62, 2  ;;  %v14340_v18 = vld [vmem:[#allocation2 + $0x98] sm:$0xff]  ;;  %v9122_v62 = vld [vmem:[#allocation2 + $0x40] sm:$0xcc] }
 0x2af   : > { %14039 = vrot.lane.b32.xlu1 %v24439_v21, %s21609_s10  ;;  %19517 = vmatprep.subr.msk.bf16.mxu0 %vm1062_vm1, %v8920_v19  ;;  %v24589_v15 = vpop.permute.xlu0 %11631  ;;  %v9120_v21 = vld [vmem:[#allocation2 + $0x30] sm:$0xcc]  ;;  %19084 = vst.sshfl [vmem:[#allocation2 + $0xd8] sm:$0xf0 pattern:$0x76325410] %v939_v48 }
 0x2b0   : > { %v21362_v19 = vld [vmem:[#allocation2 + $0x4c] ss:$76 sps:$4 sm:$0xfc]   ;;  %v19523_v14 = vcombine.low %v9120_v21, %v24104_v6 }
 0x2b1   : > { %14041 = vrot.lane.b32.xlu0 %v24452_v13, %s21609_s10  ;;  %v24600_v49 = vpop.permute.xlu1 %11633  ;;  %v19524_v13 = vcombine.high %v9120_v21, %v24104_v6  ;;  %v14337_v34 = vld [vmem:[#allocation2 + $0x54] sm:$0xcc] }
 0x2b2   : > { %19512 = vmatmul.mubr.msk.bf16.vlgmr.msra.gmra.mrb[28].mxu1 %vm1058_vm2, %v21534_v46  ;;  %v9121_v46 = vld [vmem:[#allocation2 + $0x38] sm:$0xcc] }
 0x2b3   : > { %14043 = vrot.lane.b32.xlu1 %v24471_v27, %s21609_s10  ;;  %8989 = vmatpush1.bf16.msra.mxu1 %v8930_v26  ;;  %v24608_v43 = vpop.permute.xlu0 %11635  ;;  %v8921_v27 = vsel %vm1460_vm3, %v23901_v23, %v23910_v39  ;;  %v9159_v23 = vrot.slane %v19521_v22, 2  ;;  %v19526_v39 = vcombine.high %v9121_v46, %v24129_v20  ;;  %v9162_v33 = vrot.slane %v19524_v13, 2  ;;  %v24638_v26 = vld [vmem:[#allocation2 + $0xa0] sm:$0xff]  ;;  %v24658_v13 = vld [vmem:[#allocation2 + $0xa8] sm:$0xff] }
 0x2b4   : > { %9020 = vmatprep.mubr.bf16.mxu1 %v27120_v24  ;;  %19519 = vmatprep.subr.msk.bf16.mxu1 %vm1062_vm1, %v8922_v3  ;;  %v8942_v50 = vsel %vm1062_vm1, %v8921_v27, 0  ;;  %v19821_v3 = vcombine.high %v14336_v35, %v14340_v18  ;;  %v19525_v6 = vcombine.low %v9121_v46, %v24129_v20  ;;  %v19822_v22 = vcombine.low %v14337_v34, %v24638_v26  ;;  %v14338_v20 = vld [vmem:[#allocation2 + $0x5c] sm:$0xcc] }
 0x2b5   : > { %14045 = vrot.lane.b32.xlu0 %v24481_v28, %s21609_s10  ;;  %19514 = vmatmul.mubr.msk.bf16.vlgmr.msra.gmra.mrb[24].mxu0 %vm1058_vm2, %v21535_v31  ;;  %v24622_v45 = vpop.permute.xlu1 %11841  ;;  %v9168_v36 = vsel %vm1062_vm1, %v9159_v23, 0 }
 0x2b6   : > { %9030 = vmatpush1.bf16.msra.mxu0 %v8936_v7  ;;  %9061 = vmatprep.mubr.bf16.mxu0 %v27120_v24  ;;  %v9164_v7 = vrot.slane %v19526_v39, 2  ;;  %v24662_v46 = vrot.slane %v19821_v3, 2  ;;  %v9163_v27 = vrot.slane %v19525_v6, 2  ;;  %v24672_v18 = vrot.slane %v19822_v22, 2 }
 0x2b7   : > { %14047 = vrot.lane.b32.xlu1 %v24495_v54, %s21609_s10  ;;  %19529 = vmatprep.subr.msk.bf16.mxu0 %vm1062_vm1, %v9160_v8  ;;  %v24629_v28 = vpop.permute.xlu0 %11843  ;;  %v19528_v8 = vcombine.high %v9122_v62, %v24505_v17 }
 0x2b8   : > { %27265 = vst [vmem:[#allocation70_spill] sm:$0xff] %v24662_v46  ;;  %27266 = vst [vmem:[#allocation71_spill] sm:$0xff] %v24672_v18 }
 0x2b9   : > { %14049 = vrot.lane.b32.xlu0 %v24510_v9, %s21609_s10  ;;  %v24635_v54 = vpop.permute.xlu1 %11845  ;;  %v9161_v9 = vrot.slane %v19523_v14, 2  ;;  %v9166_v39 = vrot.slane %v19528_v8, 2  ;;  %v24678_v14 = vld [vmem:[#allocation2 + $0xb0] sm:$0xff] }
 0x2ba   : > { %19516 = vmatmul.mubr.msk.bf16.vlgmr.msra.gmra.mrb[24].mxu1 %vm1058_vm2, %v21535_v31 }
 0x2bb   : > { %14051 = vrot.lane.b32.xlu1 %v24534_v37, %s21609_s10  ;;  %9071 = vmatpush1.bf16.msra.mxu1 %v8942_v50  ;;  %v24644_v21 = vpop.permute.xlu0 %11847  ;;  %v24652_v37 = vrot.slane %v21362_v19, 2  ;;  %v9174_v23 = vsel %vm1062_vm1, %v9161_v9, 0  ;;  %v19527_v50 = vcombine.low %v9122_v62, %v24505_v17  ;;  %v9180_v17 = vsel %vm1062_vm1, %v9163_v27, 0 }
 0x2bc   : > { %9102 = vmatprep.mubr.bf16.mxu1 %v27120_v24  ;;  %19531 = vmatprep.subr.msk.bf16.mxu1 %vm1062_vm1, %v9162_v33  ;;  %v14339_v33 = vld [vmem:[#allocation2 + $0x64] sm:$0xcc]  ;;  %v19825_v62 = vcombine.high %v14338_v20, %v24658_v13 }
 0x2bd   : > { %14053 = vrot.lane.b32.xlu0 %v24544_v51, %s21609_s10  ;;  %19518 = vmatmul.mubr.msk.bf16.vlgmr.msra.gmra.mrb[28].mxu0 %vm1058_vm2, %v21535_v31  ;;  %27264 = vst [vmem:[#allocation69_spill] sm:$0xff] %v24652_v37  ;;  %v24655_v48 = vpop.permute.xlu1 %11849  ;;  %v19823_v51 = vcombine.high %v14337_v34, %v24638_v26  ;;  %v19826_v9 = vcombine.low %v14339_v33, %v24678_v14 }
 0x2be   : > { %9192 = vmatpush1.bf16.msra.mxu0 %v9168_v36  ;;  %9223 = vmatprep.mubr.bf16.mxu0 %v27120_v24  ;;  %v9165_v36 = vrot.slane %v19527_v50, 2  ;;  %v24707_v22 = vrot.slane %v19825_v62, 2  ;;  %v24721_v50 = vld [vmem:[#allocation2 + $0x6c] ss:$76 sps:$4 sm:$0xfc]  }
 0x2bf   : > { %14055 = vrot.lane.b32.xlu1 %v24554_v60, %s21609_s10  ;;  %19533 = vmatprep.subr.msk.bf16.mxu0 %vm1062_vm1, %v9164_v7  ;;  %v24666_v35 = vpop.permute.xlu0 %11851  ;;  %v19824_v60 = vcombine.low %v14338_v20, %v24658_v13  ;;  %v24682_v34 = vrot.slane %v19823_v51, 2  ;;  %v21536_v7 = vld [vmem:[%s26946_s2 + $0x18] sm:$0xf]  ;;  %v19827_v20 = vcombine.high %v14339_v33, %v24678_v14  ;;  %v9437_v33 = vsel %vm1049_vm0, %v23936_v59, %v23947_v10 }
 0x2c0   : > { %27269 = vst [vmem:[#allocation74_spill] sm:$0xff] %v24707_v22  ;;  %v9186_v27 = vsel %vm1062_vm1, %v9165_v36, 0  ;;  %v9446_v59 = vsel %vm1062_vm1, %v9437_v33, 0 }
 0x2c1   : > { %14392 = vrot.lane.b32.xlu0 %v24652_v37, %s21608_s9  ;;  %v24675_v19 = vpop.permute.xlu1 %11853  ;;  %27267 = vst [vmem:[#allocation72_spill] sm:$0xff] %v24682_v34  ;;  %v24699_v6 = vrot.slane %v19824_v60, 2 }
 0x2c2   : > { %19520 = vmatmul.mubr.msk.bf16.vlgmr.msra.gmra.mrb[28].mxu1 %vm1058_vm2, %v21535_v31  ;;  %v9438_v31 = vsel %vm1049_vm0, %v23947_v10, %v23958_v53  ;;  %v27036_v10 = vrot.slane %v24721_v50, 2 }
 0x2c3   : > { %14394 = vrot.lane.b32.xlu1 %v24662_v46, %s21608_s9  ;;  %9233 = vmatpush1.bf16.msra.mxu1 %v9174_v23  ;;  %v24686_v3 = vpop.permute.xlu0 %11855  ;;  %27268 = vst [vmem:[#allocation73_spill] sm:$0xff] %v24699_v6  ;;  %v24716_v23 = vrot.slane %v19826_v9, 2  ;;  %v9439_v9 = vsel %vm1049_vm0, %v23958_v53, %v23972_v29  ;;  %v9441_v53 = vsel %vm1049_vm0, %v23981_v63, %v23988_v47 }
 0x2c4   : > { %9264 = vmatprep.mubr.bf16.mxu1 %v27120_v24  ;;  %19535 = vmatprep.subr.msk.bf16.mxu1 %vm1062_vm1, %v9166_v39  ;;  %v9440_v39 = vsel %vm1049_vm0, %v23972_v29, %v23981_v63  ;;  %v9452_v29 = vsel %vm1062_vm1, %v9439_v9, 0  ;;  %v21537_v63 = vld [vmem:[%s26946_s2 + $0x1c] sm:$0xf]  ;;  %v27272_v9 = vld [vmem:[#allocation17_spill] sm:$0xff] }
 0x2c5   : > { %14396 = vrot.lane.b32.xlu0 %v24672_v18, %s21608_s9  ;;  %19530 = vmatmul.mubr.msk.bf16.vlgmr.msra.gmra.mrb[24].mxu0 %vm1058_vm2, %v21536_v7  ;;  %v24702_v8 = vpop.permute.xlu1 %11857  ;;  %27270 = vst [vmem:[#allocation75_spill] sm:$0xff] %v24716_v23 }
 0x2c6   : > { %9274 = vmatpush1.bf16.msra.mxu0 %v9180_v17  ;;  %9305 = vmatprep.mubr.bf16.mxu0 %v27120_v24  ;;  %v24731_v17 = vrot.slane %v19827_v20, 2 }
 0x2c7   : > { %14398 = vrot.lane.b32.xlu1 %v24682_v34, %s21608_s9  ;;  %19546 = vmatprep.subr.msk.bf16.mxu0 %vm1062_vm1, %v9438_v31  ;;  %v24711_v51 = vpop.permute.xlu0 %12183  ;;  %v9442_v31 = vsel %vm1049_vm0, %v23988_v47, %v23997_v38  ;;  %v9458_v47 = vsel %vm1062_vm1, %v9441_v53, 0  ;;  %v27273_v53 = vld [vmem:[#allocation11_spill] sm:$0xff] }
 0x2c8   : > { %27271 = vst [vmem:[#allocation76_spill] sm:$0xff] %v24731_v17 }
 0x2c9   : > { %14400 = vrot.lane.b32.xlu0 %v24699_v6, %s21608_s9  ;;  %v24723_v60 = vpop.permute.xlu1 %12185 }
 0x2ca   : > { %19532 = vmatmul.mubr.msk.bf16.vlgmr.msra.gmra.mrb[24].mxu1 %vm1058_vm2, %v21536_v7 }
 0x2cb   : > { %14402 = vrot.lane.b32.xlu1 %v24707_v22, %s21608_s9  ;;  %9315 = vmatpush1.bf16.msra.mxu1 %v9186_v27  ;;  %v24733_v62 = vpop.permute.xlu0 %12187  ;;  %v9444_v27 = vsel %vm1049_vm0, %v24011_v52, %v24021_v41  ;;  %v9660_v41 = vsel %vm1460_vm3, %v24038_v0, %v24051_v30 }
 0x2cc   : > { %9346 = vmatprep.mubr.bf16.mxu1 %v27120_v24  ;;  %19548 = vmatprep.subr.msk.bf16.mxu1 %vm1062_vm1, %v9440_v39 }
 0x2cd   : > { %14404 = vrot.lane.b32.xlu0 %v24716_v23, %s21608_s9  ;;  %19534 = vmatmul.mubr.msk.bf16.vlgmr.msra.gmra.mrb[28].mxu0 %vm1058_vm2, %v21536_v7  ;;  %v24745_v36 = vpop.permute.xlu1 %12189 }
 0x2ce   : > { %9470 = vmatpush1.bf16.msra.mxu0 %v9446_v59  ;;  %9501 = vmatprep.mubr.bf16.mxu0 %v27120_v24 }
 0x2cf   : > { %14406 = vrot.lane.b32.xlu1 %v24731_v17, %s21608_s9  ;;  %19550 = vmatprep.subr.msk.bf16.mxu0 %vm1062_vm1, %v9442_v31  ;;  %v24754_v20 = vpop.permute.xlu0 %12191  ;;  %v9443_v31 = vsel %vm1049_vm0, %v23997_v38, %v24011_v52 }
 0x2d0   : > { %v9464_v38 = vsel %vm1062_vm1, %v9443_v31, 0 }
 0x2d1   : > { %14408 = vrot.lane.b32.xlu0 %v27036_v10, %s21608_s9  ;;  %v24762_v39 = vpop.permute.xlu1 %12193 }
 0x2d2   : > { %19536 = vmatmul.mubr.msk.bf16.vlgmr.msra.gmra.mrb[28].mxu1 %vm1058_vm2, %v21536_v7 }
 0x2d3   : > { %14794 = vrot.lane.b32.xlu1 %v24652_v37, %s21609_s10  ;;  %9511 = vmatpush1.bf16.msra.mxu1 %v9452_v29  ;;  %v24771_v33 = vpop.permute.xlu0 %12195  ;;  %v27274_v29 = vld [vmem:[#allocation19_spill] sm:$0xff] }
 0x2d4   : > { %9542 = vmatprep.mubr.bf16.mxu1 %v27120_v24  ;;  %19552 = vmatprep.subr.msk.bf16.mxu1 %vm1062_vm1, %v9444_v27  ;;  %v9659_v27 = vsel %vm1460_vm3, %v27272_v9, %v24038_v0  ;;  %v27278_v9 = vld [vmem:[#allocation12_spill] sm:$0xff]  ;;  %v9661_v31 = vsel %vm1460_vm3, %v24051_v30, %v27274_v29 }
 0x2d5   : > { %14796 = vrot.lane.b32.xlu0 %v24662_v46, %s21609_s10  ;;  %19547 = vmatmul.mubr.msk.bf16.vlgmr.msra.gmra.mrb[24].mxu0 %vm1058_vm2, %v21537_v63  ;;  %v24785_v7 = vpop.permute.xlu1 %12197  ;;  %v9668_v52 = vsel %vm1062_vm1, %v9659_v27, 0  ;;  %v24824_v27 = vld [vmem:[#allocation2 + $0x50] ss:$76 sps:$4 sm:$0xfc]  }
 0x2d6   : > { %9552 = vmatpush1.bf16.msra.mxu0 %v9458_v47  ;;  %9583 = vmatprep.mubr.bf16.mxu0 %v27120_v24  ;;  %v9662_v47 = vsel %vm1460_vm3, %v27274_v29, %v27273_v53  ;;  %v9663_v29 = vsel %vm1460_vm3, %v27273_v53, %v27278_v9  ;;  %v27284_v53 = vrot.slane %v24721_v50, 2  ;;  %v27287_v46 = vld [vmem:[#allocation30_spill] sm:$0xff]  ;;  %v27288_v50 = vrot.slane %v24824_v27, 2 }
 0x2d7   : > { %14798 = vrot.lane.b32.xlu1 %v24672_v18, %s21609_s10  ;;  %19554 = vmatprep.subr.msk.bf16.mxu0 %vm1062_vm1, %v9660_v41  ;;  %v24794_v59 = vpop.permute.xlu0 %12199  ;;  %v27277_v41 = vld [vmem:[#allocation27_spill] sm:$0xff] }
 0x2d8   : > { %v9664_v18 = vsel %vm1460_vm3, %v27278_v9, %v27277_v41 }
 0x2d9   : > { %14800 = vrot.lane.b32.xlu0 %v24682_v34, %s21609_s10  ;;  %v24804_v10 = vpop.permute.xlu1 %12585  ;;  %v27282_v34 = vld [vmem:[#allocation48_spill] sm:$0xff] }
 0x2da   : > { %27275 = vst [vmem:[#allocation17_spill] sm:$0xff] %v24804_v10  ;;  %19549 = vmatmul.mubr.msk.bf16.vlgmr.msra.gmra.mrb[24].mxu1 %vm1058_vm2, %v21537_v63 }
 0x2db   : > { %14802 = vrot.lane.b32.xlu1 %v24699_v6, %s21609_s10  ;;  %9593 = vmatpush1.bf16.msra.mxu1 %v9464_v38  ;;  %v24811_v0 = vpop.permute.xlu0 %12587  ;;  %v9674_v6 = vsel %vm1062_vm1, %v9661_v31, 0  ;;  %v24856_v31 = vld [vmem:[#allocation2 + $0x5c] ss:$76 sps:$4 sm:$0xfc]  }
 0x2dc   : > { %27276 = vst [vmem:[#allocation11_spill] sm:$0xff] %v24811_v0  ;;  %9624 = vmatprep.mubr.bf16.mxu1 %v27120_v24  ;;  %19556 = vmatprep.subr.msk.bf16.mxu1 %vm1062_vm1, %v9662_v47  ;;  %v24832_v47 = vld [vmem:[#allocation2 + $0x54] ss:$76 sps:$4 sm:$0xfc]  }
 0x2dd   : > { %14804 = vrot.lane.b32.xlu0 %v24707_v22, %s21609_s10  ;;  %19551 = vmatmul.mubr.msk.bf16.vlgmr.msra.gmra.mrb[28].mxu0 %vm1058_vm2, %v21537_v63  ;;  %v24826_v38 = vpop.permute.xlu1 %12589  ;;  %v27281_v22 = vld [vmem:[#allocation29_spill] sm:$0xff] }
 0x2de   : > { %27279 = vst [vmem:[#allocation19_spill] sm:$0xff] %v24826_v38  ;;  %9692 = vmatpush1.bf16.msra.mxu0 %v9668_v52  ;;  %9723 = vmatprep.mubr.bf16.mxu0 %v27120_v24  ;;  %v9666_v52 = vsel %vm1460_vm3, %v27282_v34, %v27281_v22  ;;  %v9680_v22 = vsel %vm1062_vm1, %v9663_v29, 0  ;;  %v21538_v29 = vld [vmem:[%s26946_s2 + $0x20] sm:$0xf]  ;;  %v27306_v0 = vld [vmem:[#allocation53_spill] sm:$0xff] }
 0x2df   : > { %14806 = vrot.lane.b32.xlu1 %v24716_v23, %s21609_s10  ;;  %19558 = vmatprep.subr.msk.bf16.mxu0 %vm1062_vm1, %v9664_v18  ;;  %v24834_v30 = vpop.permute.xlu0 %12591  ;;  %v24846_v18 = vld [vmem:[#allocation2 + $0x58] ss:$76 sps:$4 sm:$0xfc]  }
 0x2e0   : > { %27280 = vst [vmem:[#allocation27_spill] sm:$0xff] %v24834_v30  ;;  %v27286_v23 = vld [vmem:[#allocation51_spill] sm:$0xff] }
 0x2e1   : > { %14808 = vrot.lane.b32.xlu0 %v24731_v17, %s21609_s10  ;;  %v24848_v37 = vpop.permute.xlu1 %12593 }
 0x2e2   : > { %27283 = vst [vmem:[#allocation12_spill] sm:$0xff] %v24848_v37  ;;  %19553 = vmatmul.mubr.msk.bf16.vlgmr.msra.gmra.mrb[28].mxu1 %vm1058_vm2, %v21537_v63  ;;  %v10004_v63 = vsel %vm1049_vm0, %v27287_v46, %v27286_v23 }
 0x2e3   : > { %14810 = vrot.lane.b32.xlu1 %v27284_v53, %s21609_s10  ;;  %9733 = vmatpush1.bf16.msra.mxu1 %v9674_v6  ;;  %v24858_v17 = vpop.permute.xlu0 %12595  ;;  %v9665_v6 = vsel %vm1460_vm3, %v27277_v41, %v27282_v34  ;;  %v24876_v53 = vld [vmem:[#allocation2 + $0x60] ss:$76 sps:$4 sm:$0xfc]   ;;  %v27290_v34 = vrot.slane %v24832_v47, 2 }
 0x2e4   : > { %27285 = vst [vmem:[#allocation29_spill] sm:$0xff] %v24858_v17  ;;  %9764 = vmatprep.mubr.bf16.mxu1 %v27120_v24  ;;  %19560 = vmatprep.subr.msk.bf16.mxu1 %vm1062_vm1, %v9666_v52  ;;  %v27292_v52 = vld [vmem:[#allocation49_spill] sm:$0xff]  ;;  %v27293_v17 = vrot.slane %v24846_v18, 2  ;;  %v27294_v41 = vld [vmem:[#allocation32_spill] sm:$0xff] }
 0x2e5   : > { %15316 = vrot.lane.b32.xlu0 %v27288_v50, %s21608_s9  ;;  %19555 = vmatmul.mubr.msk.bf16.vlgmr.msra.gmra.mrb[24].mxu0 %vm1058_vm2, %v21538_v29  ;;  %v24878_v9 = vpop.permute.xlu1 %12597  ;;  %v24886_v50 = vld [vmem:[#allocation2 + $0x64] ss:$76 sps:$4 sm:$0xfc]   ;;  %v10003_v4 = vsel %vm1049_vm0, %v27292_v52, %v27287_v46  ;;  %v27297_v46 = vrot.slane %v24856_v31, 2 }
 0x2e6   : > { %27289 = vst [vmem:[#allocation48_spill] sm:$0xff] %v24878_v9  ;;  %9774 = vmatpush1.bf16.msra.mxu0 %v9680_v22  ;;  %9805 = vmatprep.mubr.bf16.mxu0 %v27120_v24  ;;  %v9686_v22 = vsel %vm1062_vm1, %v9665_v6, 0  ;;  %v24898_v9 = vld [vmem:[#allocation2 + $0x68] ss:$76 sps:$4 sm:$0xfc]  }
 0x2e7   : > { %15318 = vrot.lane.b32.xlu1 %v27290_v34, %s21608_s9  ;;  %19581 = vmatprep.subr.msk.bf16.mxu0 %vm1062_vm1, %v10004_v63  ;;  %v24888_v58 = vpop.permute.xlu0 %12599  ;;  %v27295_v63 = vld [vmem:[#allocation33_spill] sm:$0xff]  ;;  %v24928_v6 = vld [vmem:[#allocation2 + $0x70] ss:$76 sps:$4 sm:$0xfc]  }
 0x2e8   : > { %27291 = vst [vmem:[#allocation51_spill] sm:$0xff] %v24888_v58  ;;  %v10006_v30 = vsel %vm1049_vm0, %v27295_v63, %v27294_v41  ;;  %v24911_v52 = vld [vmem:[#allocation2 + $0x6c] ss:$76 sps:$4 sm:$0xfc]  }
 0x2e9   : > { %15320 = vrot.lane.b32.xlu0 %v27293_v17, %s21608_s9  ;;  %v24903_v37 = vpop.permute.xlu1 %12601  ;;  %v10012_v17 = vsel %vm1062_vm1, %v10003_v4, 0  ;;  %v27299_v58 = vld [vmem:[#allocation4_spill] sm:$0xff]  ;;  %v15313_v4 = vrot.slane %v24898_v9, 2 }
 0x2ea   : > { %27296 = vst [vmem:[#allocation30_spill] sm:$0xff] %v24903_v37  ;;  %19557 = vmatmul.mubr.msk.bf16.vlgmr.msra.gmra.mrb[24].mxu1 %vm1058_vm2, %v21538_v29  ;;  %v27300_v37 = vld [vmem:[#allocation52_spill] sm:$0xff] }
 0x2eb   : > { %15322 = vrot.lane.b32.xlu1 %v27297_v46, %s21608_s9  ;;  %9815 = vmatpush1.bf16.msra.mxu1 %v9686_v22  ;;  %v24913_v34 = vpop.permute.xlu0 %13090  ;;  %v10008_v10 = vsel %vm1049_vm0, %v27300_v37, %v27299_v58  ;;  %v10005_v22 = vsel %vm1049_vm0, %v27286_v23, %v27295_v63  ;;  %v27301_v46 = vrot.slane %v24876_v53, 2  ;;  %v15314_v23 = vrot.slane %v24911_v52, 2 }
 0x2ec   : > { %27298 = vst [vmem:[#allocation49_spill] sm:$0xff] %v24913_v34  ;;  %9846 = vmatprep.mubr.bf16.mxu1 %v27120_v24  ;;  %19583 = vmatprep.subr.msk.bf16.mxu1 %vm1062_vm1, %v10006_v30  ;;  %v27303_v30 = vrot.slane %v24886_v50, 2  ;;  %v10007_v9 = vsel %vm1049_vm0, %v27294_v41, %v27300_v37  ;;  %v10009_v41 = vsel %vm1049_vm0, %v27299_v58, %v27306_v0  ;;  %v27310_v52 = vrot.slane %v24824_v27, 2  ;;  %v21540_v58 = vld [vmem:[#allocation2 + $0x50] ss:$76 sps:$4 sm:$0x3f]  }
 0x2ed   : > { %15324 = vrot.lane.b32.xlu0 %v27301_v46, %s21608_s9  ;;  %19559 = vmatmul.mubr.msk.bf16.vlgmr.msra.gmra.mrb[28].mxu0 %vm1058_vm2, %v21538_v29  ;;  %v24930_v34 = vpop.permute.xlu1 %13092  ;;  %v10018_v46 = vsel %vm1062_vm1, %v10005_v22, 0  ;;  %v10030_v22 = vsel %vm1062_vm1, %v10009_v41, 0  ;;  %v21541_v27 = vld [vmem:[#allocation2 + $0x4c] ss:$76 sps:$4 sm:$0x3f]   ;;  %v27316_v41 = vld [vmem:[#allocation22_spill] sm:$0xff] }
 0x2ee   : > { %27302 = vst [vmem:[#allocation32_spill] sm:$0xff] %v24930_v34  ;;  %10036 = vmatpush1.bf16.msra.mxu0 %v10012_v17  ;;  %10067 = vmatprep.mubr.bf16.mxu0 %v27120_v24  ;;  %v27053_v17 = vrot.slane %v24928_v6, 2  ;;  %v27305_v34 = vld [vmem:[#allocation3_spill] sm:$0xff] }
 0x2ef   : > { %15326 = vrot.lane.b32.xlu1 %v27303_v30, %s21608_s9  ;;  %19585 = vmatprep.subr.msk.bf16.mxu0 %vm1062_vm1, %v10008_v10  ;;  %v24938_v63 = vpop.permute.xlu0 %13094  ;;  %v10010_v30 = vsel %vm1049_vm0, %v27306_v0, %v27305_v34  ;;  %v10024_v10 = vsel %vm1062_vm1, %v10007_v9, 0  ;;  %v27312_v9 = vrot.slane %v24832_v47, 2  ;;  %v27317_v47 = vrot.slane %v24856_v31, 2 }
 0x2f0   : > { %27304 = vst [vmem:[#allocation33_spill] sm:$0xff] %v24938_v63 }
 0x2f1   : > { %15328 = vrot.lane.b32.xlu0 %v15313_v4, %s21608_s9  ;;  %v24949_v38 = vpop.permute.xlu1 %13096 }
 0x2f2   : > { %27307 = vst [vmem:[#allocation4_spill] sm:$0xff] %v24949_v38  ;;  %19561 = vmatmul.mubr.msk.bf16.vlgmr.msra.gmra.mrb[28].mxu1 %vm1058_vm2, %v21538_v29  ;;  %v21539_v29 = vld [vmem:[%s26946_s2 + $0x4] sm:$0xf] }
 0x2f3   : > { %15330 = vrot.lane.b32.xlu1 %v15314_v23, %s21608_s9  ;;  %10077 = vmatpush1.bf16.msra.mxu1 %v10018_v46  ;;  %v24954_v37 = vpop.permute.xlu0 %13098 }
 0x2f4   : > { %27308 = vst [vmem:[#allocation52_spill] sm:$0xff] %v24954_v37  ;;  %10108 = vmatprep.mubr.bf16.mxu1 %v27120_v24  ;;  %19587 = vmatprep.subr.msk.bf16.mxu1 %vm1062_vm1, %v10010_v30  ;;  %v27314_v30 = vrot.slane %v24846_v18, 2  ;;  %v16004_v18 = vld [vmem:[#allocation2 + $0x54] sm:$0xcc] }
 0x2f5   : > { %15332 = vrot.lane.b32.xlu0 %v27053_v17, %s21608_s9  ;;  %19582 = vmatmul.mubr.msk.bf16.vlgmr.msra.gmra.mrb[32].mxu0 %vm1058_vm2, %v21539_v29  ;;  %v24968_v34 = vpop.permute.xlu1 %13100 }
 0x2f6   : > { %27309 = vst [vmem:[#allocation3_spill] sm:$0xff] %v24968_v34  ;;  %10118 = vmatpush1.bf16.msra.mxu0 %v10024_v10  ;;  %10149 = vmatprep.mubr.bf16.mxu0 %v27120_v24  ;;  %v10200_v10 = vsel %vm1062_vm1, %v21541_v27, 0  ;;  %v27322_v27 = vld [vmem:[#allocation21_spill] sm:$0xff] }
 0x2f7   : > { %15538 = vrot.lane.b32.xlu1 %v27310_v52, %s21609_s10  ;;  %19589 = vmatprep.subr.msk.bf16.mxu0 %vm1062_vm1, %v21540_v58  ;;  %v24975_v0 = vpop.permute.xlu0 %13102  ;;  %v10206_v31 = vsel %vm1062_vm1, %v27322_v27, 0 }
 0x2f8   : > { %27311 = vst [vmem:[#allocation53_spill] sm:$0xff] %v24975_v0 }
 0x2f9   : > { %15540 = vrot.lane.b32.xlu0 %v27312_v9, %s21609_s10  ;;  %v24981_v46 = vpop.permute.xlu1 %13104  ;;  %v27320_v9 = vld [vmem:[#allocation24_spill] sm:$0xff] }
 0x2fa   : > { %27313 = vst [vmem:[#allocation77_spill] sm:$0xff] %v24981_v46  ;;  %19584 = vmatmul.mubr.msk.bf16.vlgmr.msra.gmra.mrb[32].mxu1 %vm1058_vm2, %v21539_v29 }
 0x2fb   : > { %15542 = vrot.lane.b32.xlu1 %v27314_v30, %s21609_s10  ;;  %10159 = vmatpush1.bf16.msra.mxu1 %v10030_v22  ;;  %v24988_v52 = vpop.permute.xlu0 %13106  ;;  %v27319_v22 = vrot.slane %v24876_v53, 2  ;;  %v16005_v53 = vld [vmem:[#allocation2 + $0x5c] sm:$0xcc] }
 0x2fc   : > { %27315 = vst [vmem:[#allocation78_spill] sm:$0xff] %v24988_v52  ;;  %10190 = vmatprep.mubr.bf16.mxu1 %v27120_v24  ;;  %19591 = vmatprep.subr.msk.bf16.mxu1 %vm1062_vm1, %v27316_v41  ;;  %v27323_v41 = vrot.slane %v24886_v50, 2  ;;  %v27327_v50 = vld [vmem:[#allocation5_spill] sm:$0xff]  ;;  %v27340_v52 = vld [vmem:[#allocation35_spill] sm:$0xff] }
 0x2fd   : > { %15544 = vrot.lane.b32.xlu0 %v27317_v47, %s21609_s10  ;;  %19586 = vmatmul.mubr.msk.bf16.vlgmr.msra.gmra.mrb[36].mxu0 %vm1058_vm2, %v21539_v29  ;;  %v24997_v58 = vpop.permute.xlu1 %13312 }
 0x2fe   : > { %27318 = vst [vmem:[#allocation22_spill] sm:$0xff] %v24997_v58  ;;  %10224 = vmatpush1.bf16.msra.mxu0 %v10200_v10  ;;  %10255 = vmatprep.mubr.bf16.mxu0 %v27120_v24  ;;  %v19910_v10 = vcombine.low %v16004_v18, %v24638_v26 }
 0x2ff   : > { %15546 = vrot.lane.b32.xlu1 %v27319_v22, %s21609_s10  ;;  %19593 = vmatprep.subr.msk.bf16.mxu0 %vm1062_vm1, %v27320_v9  ;;  %v25005_v30 = vpop.permute.xlu0 %13314  ;;  %v19911_v22 = vcombine.high %v16004_v18, %v24638_v26  ;;  %v27325_v9 = vld [vmem:[#allocation13_spill] sm:$0xff]  ;;  %v21542_v26 = vld [vmem:[%s26946_s2] sm:$0xf] }
 0x300   : > { %27321 = vst [vmem:[#allocation24_spill] sm:$0xff] %v25005_v30  ;;  %v10212_v17 = vsel %vm1062_vm1, %v27325_v9, 0  ;;  %v27329_v30 = vld [vmem:[#allocation26_spill] sm:$0xff]  ;;  %v19913_v9 = vcombine.high %v16005_v53, %v24658_v13 }
 0x301   : > { %15548 = vrot.lane.b32.xlu0 %v27323_v41, %s21609_s10  ;;  %v25013_v47 = vpop.permute.xlu1 %13316  ;;  %v27328_v41 = vld [vmem:[#allocation8_spill] sm:$0xff] }
 0x302   : > { %27324 = vst [vmem:[#allocation21_spill] sm:$0xff] %v25013_v47  ;;  %19588 = vmatmul.mubr.msk.bf16.vlgmr.msra.gmra.mrb[36].mxu1 %vm1058_vm2, %v21539_v29  ;;  %v10406_v58 = vsel %vm1460_vm3, %v27328_v41, %v27327_v50  ;;  %v19912_v29 = vcombine.low %v16005_v53, %v24658_v13 }
 0x303   : > { %15550 = vrot.lane.b32.xlu1 %v15313_v4, %s21609_s10  ;;  %10265 = vmatpush1.bf16.msra.mxu1 %v10206_v31  ;;  %v25020_v27 = vpop.permute.xlu0 %13318  ;;  %v25033_v4 = vrot.slane %v19910_v10, 2  ;;  %v16006_v31 = vld [vmem:[#allocation2 + $0x64] sm:$0xcc] }
 0x304   : > { %27326 = vst [vmem:[#allocation13_spill] sm:$0xff] %v25020_v27  ;;  %10296 = vmatprep.mubr.bf16.mxu1 %v27120_v24  ;;  %19595 = vmatprep.subr.msk.bf16.mxu1 %vm1062_vm1, %v27329_v30  ;;  %v27331_v30 = vrot.slane %v24928_v6, 2  ;;  %v27333_v27 = vld [vmem:[#allocation6_spill] sm:$0xff]  ;;  %v25055_v6 = vrot.slane %v19912_v29, 2  ;;  %v25069_v29 = vrot.slane %v19913_v9, 2 }
 0x305   : > { %15552 = vrot.lane.b32.xlu0 %v15314_v23, %s21609_s10  ;;  %19590 = vmatmul.mubr.msk.bf16.vlgmr.msra.gmra.mrb[32].mxu0 %vm1058_vm2, %v21542_v26  ;;  %v25036_v18 = vpop.permute.xlu1 %13320  ;;  %v25042_v23 = vrot.slane %v19911_v22, 2  ;;  %v19914_v22 = vcombine.low %v16006_v31, %v24678_v14 }
 0x306   : > { %27330 = vst [vmem:[#allocation5_spill] sm:$0xff] %v25036_v18  ;;  %10306 = vmatpush1.bf16.msra.mxu0 %v10212_v17  ;;  %10337 = vmatprep.mubr.bf16.mxu0 %v27120_v24  ;;  %v10405_v18 = vsel %vm1460_vm3, %v27333_v27, %v27328_v41  ;;  %v27334_v17 = vld [vmem:[#allocation15_spill] sm:$0xff]  ;;  %v25064_v27 = vld [vmem:[#allocation2 + $0xb8] sm:$0xff] }
 0x307   : > { %15554 = vrot.lane.b32.xlu1 %v27331_v30, %s21609_s10  ;;  %19597 = vmatprep.subr.msk.bf16.mxu0 %vm1062_vm1, %v10406_v58  ;;  %v25046_v10 = vpop.permute.xlu0 %13322  ;;  %v10218_v47 = vsel %vm1062_vm1, %v27334_v17, 0  ;;  %v27335_v30 = vld [vmem:[#allocation37_spill] sm:$0xff]  ;;  %v27336_v58 = vld [vmem:[#allocation7_spill] sm:$0xff]  ;;  %v10414_v41 = vsel %vm1062_vm1, %v10405_v18, 0  ;;  %v19915_v17 = vcombine.high %v16006_v31, %v24678_v14  ;;  %v25085_v14 = vrot.slane %v19914_v22, 2 }
 0x308   : > { %27332 = vst [vmem:[#allocation8_spill] sm:$0xff] %v25046_v10  ;;  %v10408_v13 = vsel %vm1460_vm3, %v27336_v58, %v27335_v30  ;;  %v16007_v10 = vld [vmem:[#allocation2 + $0x6c] sm:$0xcc]  ;;  %v10407_v18 = vsel %vm1460_vm3, %v27327_v50, %v27336_v58  ;;  %v10409_v22 = vsel %vm1460_vm3, %v27335_v30, %v27340_v52 }
 0x309   : > { %16060 = vrot.lane.b32.xlu0 %v25033_v4, %s21608_s9  ;;  %v25061_v53 = vpop.permute.xlu1 %13324  ;;  %v25093_v9 = vrot.slane %v19915_v17, 2  ;;  %v19917_v50 = vcombine.high %v16007_v10, %v25064_v27  ;;  %v10426_v30 = vsel %vm1062_vm1, %v10409_v22, 0 }
 0x30a   : > { %27337 = vst [vmem:[#allocation26_spill] sm:$0xff] %v25061_v53  ;;  %19592 = vmatmul.mubr.msk.bf16.vlgmr.msra.gmra.mrb[32].mxu1 %vm1058_vm2, %v21542_v26  ;;  %v27339_v53 = vld [vmem:[#allocation10_spill] sm:$0xff] }
 0x30b   : > { %16062 = vrot.lane.b32.xlu1 %v25042_v23, %s21608_s9  ;;  %10347 = vmatpush1.bf16.msra.mxu1 %v10218_v47  ;;  %v25072_v46 = vpop.permute.xlu0 %13326  ;;  %v10410_v34 = vsel %vm1460_vm3, %v27340_v52, %v27339_v53  ;;  %v19916_v47 = vcombine.low %v16007_v10, %v25064_v27  ;;  %v25117_v52 = vrot.slane %v19917_v50, 2 }
 0x30c   : > { %27338 = vst [vmem:[#allocation6_spill] sm:$0xff] %v25072_v46  ;;  %10378 = vmatprep.mubr.bf16.mxu1 %v27120_v24  ;;  %19599 = vmatprep.subr.msk.bf16.mxu1 %vm1062_vm1, %v10408_v13  ;;  %v10420_v13 = vsel %vm1062_vm1, %v10407_v18, 0  ;;  %v27344_v46 = vld [vmem:[#allocation34_spill] sm:$0xff] }
 0x30d   : > { %16064 = vrot.lane.b32.xlu0 %v25055_v6, %s21608_s9  ;;  %19594 = vmatmul.mubr.msk.bf16.vlgmr.msra.gmra.mrb[36].mxu0 %vm1058_vm2, %v21542_v26  ;;  %v25088_v31 = vpop.permute.xlu1 %13328  ;;  %v25108_v17 = vrot.slane %v19916_v47, 2  ;;  %v21388_v18 = vld [vmem:[#allocation2 + $0x54] ss:$76 sps:$4 sm:$0x3f]   ;;  %v10411_v47 = vsel %vm1460_vm3, %v27339_v53, %v27344_v46 }
 0x30e   : > { %27341 = vst [vmem:[#allocation15_spill] sm:$0xff] %v25088_v31  ;;  %10438 = vmatpush1.bf16.msra.mxu0 %v10414_v41  ;;  %10469 = vmatprep.mubr.bf16.mxu0 %v27120_v24  ;;  %v27343_v41 = vld [vmem:[#allocation9_spill] sm:$0xff] }
 0x30f   : > { %16066 = vrot.lane.b32.xlu1 %v25069_v29, %s21608_s9  ;;  %19601 = vmatprep.subr.msk.bf16.mxu0 %vm1062_vm1, %v10410_v34  ;;  %v25097_v58 = vpop.permute.xlu0 %13817  ;;  %v10412_v31 = vsel %vm1460_vm3, %v27344_v46, %v27343_v41  ;;  %v25110_v34 = vld [vmem:[#allocation2 + $0x74] ss:$76 sps:$4 sm:$0xfc]   ;;  %v21390_v46 = vld [vmem:[#allocation2 + $0x50] ss:$76 sps:$4 sm:$0x3f]  }
 0x310   : > { %27342 = vst [vmem:[#allocation37_spill] sm:$0xff] %v25097_v58  ;;  %v27064_v50 = vrot.slane %v25110_v34, 2  ;;  %v27364_v38 = vrot.slane %v25110_v34, 2 }
 0x311   : > { %16068 = vrot.lane.b32.xlu0 %v25085_v14, %s21608_s9  ;;  %v25112_v10 = vpop.permute.xlu1 %13819 }
 0x312   : > { %27345 = vst [vmem:[#allocation7_spill] sm:$0xff] %v25112_v10  ;;  %19596 = vmatmul.mubr.msk.bf16.vlgmr.msra.gmra.mrb[36].mxu1 %vm1058_vm2, %v21542_v26  ;;  %v21543_v26 = vld [vmem:[%s26946_s2 + $0x8] sm:$0xf] }
 0x313   : > { %16070 = vrot.lane.b32.xlu1 %v25093_v9, %s21608_s9  ;;  %10479 = vmatpush1.bf16.msra.mxu1 %v10420_v13  ;;  %v25120_v41 = vpop.permute.xlu0 %13821  ;;  %v21391_v13 = vld [vmem:[#allocation2 + $0x5c] ss:$76 sps:$4 sm:$0x3f]  }
 0x314   : > { %27346 = vst [vmem:[#allocation10_spill] sm:$0xff] %v25120_v41  ;;  %10510 = vmatprep.mubr.bf16.mxu1 %v27120_v24  ;;  %19603 = vmatprep.subr.msk.bf16.mxu1 %vm1062_vm1, %v10412_v31  ;;  %v10432_v31 = vsel %vm1062_vm1, %v10411_v47, 0  ;;  %v21393_v47 = vld [vmem:[#allocation2 + $0x58] ss:$76 sps:$4 sm:$0x3f]  }
 0x315   : > { %16072 = vrot.lane.b32.xlu0 %v25108_v17, %s21608_s9  ;;  %19598 = vmatmul.mubr.msk.bf16.vlgmr.msra.gmra.mrb[32].mxu0 %vm1058_vm2, %v21543_v26  ;;  %v25134_v22 = vpop.permute.xlu1 %13823 }
 0x316   : > { %27347 = vst [vmem:[#allocation35_spill] sm:$0xff] %v25134_v22  ;;  %10520 = vmatpush1.bf16.msra.mxu0 %v10426_v30  ;;  %10551 = vmatprep.mubr.bf16.mxu0 %v27120_v24  ;;  %v10650_v30 = vsel %vm1062_vm1, %v21390_v46, 0 }
 0x317   : > { %16074 = vrot.lane.b32.xlu1 %v25117_v52, %s21608_s9  ;;  %19613 = vmatprep.subr.msk.bf16.mxu0 %vm1062_vm1, %v21388_v18  ;;  %v25140_v53 = vpop.permute.xlu0 %13825  ;;  %v21394_v18 = vld [vmem:[#allocation2 + $0x64] ss:$76 sps:$4 sm:$0x3f]  }
 0x318   : > { %27348 = vst [vmem:[#allocation9_spill] sm:$0xff] %v25140_v53  ;;  %v25211_v53 = vld [vmem:[#allocation2 + $0xc8] sm:$0xff] }
 0x319   : > { %16076 = vrot.lane.b32.xlu0 %v27064_v50, %s21608_s9  ;;  %v25146_v58 = vpop.permute.xlu1 %13827 }
 0x31a   : > { %27349 = vst [vmem:[#allocation34_spill] sm:$0xff] %v25146_v58  ;;  %19600 = vmatmul.mubr.msk.bf16.vlgmr.msra.gmra.mrb[32].mxu1 %vm1058_vm2, %v21543_v26 }
 0x31b   : > { %16282 = vrot.lane.b32.xlu1 %v25033_v4, %s21609_s10  ;;  %10561 = vmatpush1.bf16.msra.mxu1 %v10432_v31  ;;  %v25152_v22 = vpop.permute.xlu0 %13829  ;;  %v21396_v4 = vld [vmem:[#allocation2 + $0x60] ss:$76 sps:$4 sm:$0x3f]   ;;  %v10656_v31 = vsel %vm1062_vm1, %v21393_v47, 0 }
 0x31c   : > { %27350 = vst [vmem:[#allocation79_spill] sm:$0xff] %v25152_v22  ;;  %10592 = vmatprep.mubr.bf16.mxu1 %v27120_v24  ;;  %19615 = vmatprep.subr.msk.bf16.mxu1 %vm1062_vm1, %v21391_v13  ;;  %v21399_v13 = vld [vmem:[#allocation2 + $0x6c] ss:$76 sps:$4 sm:$0x3f]  }
 0x31d   : > { %16284 = vrot.lane.b32.xlu0 %v25042_v23, %s21609_s10  ;;  %19602 = vmatmul.mubr.msk.bf16.vlgmr.msra.gmra.mrb[36].mxu0 %vm1058_vm2, %v21543_v26  ;;  %v25159_v50 = vpop.permute.xlu1 %13831  ;;  %v27355_v47 = vld [vmem:[#allocation44_spill] sm:$0xff] }
 0x31e   : > { %27351 = vst [vmem:[#allocation80_spill] sm:$0xff] %v25159_v50  ;;  %10674 = vmatpush1.bf16.msra.mxu0 %v10650_v30  ;;  %10705 = vmatprep.mubr.bf16.mxu0 %v27120_v24  ;;  %v16577_v30 = vld [vmem:[#allocation2 + $0x6c] sm:$0xcc]  ;;  %v27356_v50 = vld [vmem:[#allocation39_spill] sm:$0xff] }
 0x31f   : > { %16286 = vrot.lane.b32.xlu1 %v25055_v6, %s21609_s10  ;;  %19617 = vmatprep.subr.msk.bf16.mxu0 %vm1062_vm1, %v21394_v18  ;;  %v25165_v46 = vpop.permute.xlu0 %13833  ;;  %v10662_v6 = vsel %vm1062_vm1, %v21396_v4, 0 }
 0x320   : > { %27352 = vst [vmem:[#allocation81_spill] sm:$0xff] %v25165_v46  ;;  %v10911_v46 = vsel %vm1049_vm0, %v27356_v50, %v27355_v47 }
 0x321   : > { %16288 = vrot.lane.b32.xlu0 %v25069_v29, %s21609_s10  ;;  %v25170_v23 = vpop.permute.xlu1 %14039  ;;  %v21401_v29 = vld [vmem:[#allocation2 + $0x68] ss:$76 sps:$4 sm:$0x3f]  }
 0x322   : > { %27353 = vst [vmem:[#allocation82_spill] sm:$0xff] %v25170_v23  ;;  %19604 = vmatmul.mubr.msk.bf16.vlgmr.msra.gmra.mrb[36].mxu1 %vm1058_vm2, %v21543_v26  ;;  %v19943_v26 = vcombine.low %v16577_v30, %v25064_v27  ;;  %v25197_v23 = vld [vmem:[#allocation2 + $0xc0] sm:$0xff] }
 0x323   : > { %16290 = vrot.lane.b32.xlu1 %v25085_v14, %s21609_s10  ;;  %10715 = vmatpush1.bf16.msra.mxu1 %v10656_v31  ;;  %v25176_v18 = vpop.permute.xlu0 %14041  ;;  %v25188_v14 = vld [vmem:[%s26946_s2 + $0xc] sm:$0xf]  ;;  %v19944_v31 = vcombine.high %v16577_v30, %v25064_v27  ;;  %v10668_v27 = vsel %vm1062_vm1, %v21401_v29, 0  ;;  %v16579_v30 = vld [vmem:[#allocation2 + $0x7c] sm:$0xcc] }
 0x324   : > { %27354 = vst [vmem:[#allocation83_spill] sm:$0xff] %v25176_v18  ;;  %10746 = vmatprep.mubr.bf16.mxu1 %v27120_v24  ;;  %19619 = vmatprep.subr.msk.bf16.mxu1 %vm1062_vm1, %v21399_v13  ;;  %v16578_v13 = vld [vmem:[#allocation2 + $0x74] sm:$0xcc]  ;;  %v27359_v18 = vld [vmem:[#allocation40_spill] sm:$0xff] }
 0x325   : > { %16292 = vrot.lane.b32.xlu0 %v25093_v9, %s21609_s10  ;;  %19614 = vmatmul.mubr.msk.bf16.vlgmr.msra.gmra.mrb[32].mxu0 %vm1058_vm2, %v25188_v14  ;;  %v25193_v4 = vpop.permute.xlu1 %14043  ;;  %v10910_v58 = vsel %vm1049_vm0, %v27359_v18, %v27356_v50  ;;  %v19945_v50 = vcombine.low %v16578_v13, %v25197_v23 }
 0x326   : > { %27357 = vst [vmem:[#allocation44_spill] sm:$0xff] %v25193_v4  ;;  %10756 = vmatpush1.bf16.msra.mxu0 %v10662_v6  ;;  %10787 = vmatprep.mubr.bf16.mxu0 %v27120_v24  ;;  %v27360_v4 = vld [vmem:[#allocation54_spill] sm:$0xff]  ;;  %v10919_v37 = vsel %vm1062_vm1, %v10910_v58, 0 }
 0x327   : > { %16294 = vrot.lane.b32.xlu1 %v25108_v17, %s21609_s10  ;;  %19630 = vmatprep.subr.msk.bf16.mxu0 %vm1062_vm1, %v10911_v46  ;;  %v25202_v9 = vpop.permute.xlu0 %14045  ;;  %v10912_v6 = vsel %vm1049_vm0, %v27355_v47, %v27360_v4  ;;  %v10913_v18 = vsel %vm1049_vm0, %v27360_v4, %v24368_v5  ;;  %v25248_v58 = vrot.slane %v19945_v50, 2  ;;  %v27368_v50 = vld [vmem:[#allocation41_spill] sm:$0xff] }
 0x328   : > { %27358 = vst [vmem:[#allocation39_spill] sm:$0xff] %v25202_v9  ;;  %v7484_v22 = vpop.f32.mrb[16].mxu0  ;;  %v25216_v9 = vrot.slane %v19943_v26, 2  ;;  %v19946_v26 = vcombine.high %v16578_v13, %v25197_v23 }
 0x329   : > { %v7622_v17 = vmul.f32 %v7484_v22, %v27252_v55  ;;  %16296 = vrot.lane.b32.xlu0 %v25117_v52, %s21609_s10  ;;  %v7486_v46 = vpop.f32.mrb[17].mxu0  ;;  %v25222_v47 = vpop.permute.xlu1 %14047  ;;  %v25227_v52 = vrot.slane %v19944_v31, 2  ;;  %27366 = vst [vmem:[#allocation86_spill] sm:$0xff] %v25248_v58 }
 0x32a   : > { %27361 = vst [vmem:[#allocation40_spill] sm:$0xff] %v25216_v9  ;;  %27362 = vst [vmem:[#allocation54_spill] sm:$0xff] %v25222_v47  ;;  %v7623_v29 = vmul.f32 %v7486_v46, %v27254_v42  ;;  %v20080_v10 = vpack.c.bf16 %v7486_v46, %v7484_v22  ;;  %19616 = vmatmul.mubr.msk.bf16.vlgmr.msra.gmra.mrb[32].mxu1 %vm1058_vm2, %v25188_v14  ;;  %v7488_v41 = vpop.f32.mrb[18].mxu0  ;;  %v19947_v47 = vcombine.low %v16579_v30, %v25211_v53 }
 0x32b   : > { %27363 = vst [vmem:[#allocation84_spill] sm:$0xff] %v25227_v52  ;;  %v7677_v0 = vmul.f32 %v7622_v17, %v7484_v22  ;;  %16298 = vrot.lane.b32.xlu1 %v27364_v38, %s21609_s10  ;;  %v7489_v4 = vpop.f32.mrb[19].mxu0  ;;  %10797 = vmatpush1.bf16.msra.mxu1 %v10668_v27  ;;  %v19948_v42 = vcombine.high %v16579_v30, %v25211_v53  ;;  %v25236_v55 = vpop.permute.xlu0 %14049 }
 0x32c   : > { %27365 = vst [vmem:[#allocation85_spill] sm:$0xff] %v25236_v55  ;;  %19443 = vst [vmem:[%s23652_s7 + $0x40] sm:$0xff] %v20080_v10  ;;  %v7667_v41 = vadd.f32 %v7623_v29, %v7622_v17  ;;  %v7678_v31 = vmul.f32 %v7623_v29, %v7486_v46  ;;  %10828 = vmatprep.mubr.bf16.mxu1 %v27120_v24  ;;  %19632 = vmatprep.subr.msk.bf16.mxu1 %vm1062_vm1, %v10913_v18  ;;  %v25257_v17 = vld [vmem:[#allocation2 + $0x84] sm:$0xcc]  ;;  %v25259_v46 = vld [vmem:[#allocation2 + $0xd0] sm:$0xff] }
 0x32d   : > { %v10915_v38 = vsel %vm1049_vm0, %v24374_v61, %v24381_v40  ;;  %v7525_v34 = vpop.f32.mrb[16].mxu1  ;;  %16633 = vrot.lane.b32.xlu0 %v25216_v9, %s21608_s9  ;;  %19618 = vmatmul.mubr.msk.bf16.vlgmr.msra.gmra.mrb[36].mxu0 %vm1058_vm2, %v25188_v14  ;;  %v25250_v10 = vpop.permute.xlu1 %14051  ;;  %v10914_v22 = vsel %vm1049_vm0, %v24368_v5, %v24374_v61  ;;  %v25264_v61 = vrot.slane %v19946_v26, 2  ;;  %v10925_v5 = vsel %vm1062_vm1, %v10912_v6, 0 }
 0x32e   : > { %27367 = vst [vmem:[#allocation87_spill] sm:$0xff] %v25250_v10  ;;  %v7685_v13 = vadd.f32 %v7678_v31, %v7677_v0  ;;  %v7624_v27 = vmul.f32 %v7525_v34, %v27257_v56  ;;  %v7527_v30 = vpop.f32.mrb[17].mxu1  ;;  %10943 = vmatpush1.bf16.msra.mxu0 %v10919_v37  ;;  %10974 = vmatprep.mubr.bf16.mxu0 %v27120_v24  ;;  %v25270_v56 = vrot.slane %v19947_v47, 2  ;;  %v25272_v63 = vrot.slane %v19948_v42, 2 }
 0x32f   : > { %16635 = vrot.lane.b32.xlu1 %v25227_v52, %s21608_s9  ;;  %v7625_v18 = vmul.f32 %v7527_v30, %v27368_v50  ;;  %v20081_v29 = vpack.c.bf16 %v7527_v30, %v7525_v34  ;;  %v7529_v4 = vpop.f32.mrb[18].mxu1  ;;  %27369 = vst [vmem:[#allocation88_spill] sm:$0xff] %v25264_v61  ;;  %19634 = vmatprep.subr.msk.bf16.mxu0 %vm1062_vm1, %v10915_v38  ;;  %v25268_v37 = vpop.permute.xlu0 %14053  ;;  %v27373_v38 = vld [vmem:[#allocation56_spill] sm:$0xff] }
 0x330   : > { %27370 = vst [vmem:[#allocation89_spill] sm:$0xff] %v25268_v37  ;;  %v7668_v0 = vadd.f32 %v7667_v41, %v7624_v27  ;;  %v7679_v31 = vmul.f32 %v7624_v27, %v7525_v34  ;;  %v7530_v55 = vpop.f32.mrb[19].mxu1  ;;  %v7566_v10 = vpop.f32.mrb[20].mxu0  ;;  %27371 = vst [vmem:[#allocation90_spill] sm:$0xff] %v25270_v56  ;;  %v19949_v26 = vcombine.low %v25257_v17, %v25259_v46  ;;  %v27374_v41 = vld [vmem:[#allocation55_spill] sm:$0xff] }
 0x331   : > { %27372 = vst [vmem:[#allocation91_spill] sm:$0xff] %v25272_v63  ;;  %19444 = vst [vmem:[%s23652_s7 + $0x48] sm:$0xff] %v20081_v29  ;;  %v7680_v50 = vmul.f32 %v7625_v18, %v7527_v30  ;;  %v7626_v4 = vmul.f32 %v7566_v10, %v23670_v16  ;;  %16637 = vrot.lane.b32.xlu0 %v25248_v58, %s21608_s9  ;;  %v7568_v6 = vpop.f32.mrb[21].mxu0  ;;  %v10917_v55 = vsel %vm1049_vm0, %v27374_v41, %v27373_v38  ;;  %v25283_v34 = vpop.permute.xlu1 %14055 }
 0x332   : > { %27375 = vst [vmem:[#allocation56_spill] sm:$0xff] %v25283_v34  ;;  %v7686_v47 = vadd.f32 %v7685_v13, %v7679_v31  ;;  %v7669_v42 = vadd.f32 %v7668_v0, %v7625_v18  ;;  %v7627_v27 = vmul.f32 %v7568_v6, %v23679_v2  ;;  %v20082_v30 = vpack.c.bf16 %v7568_v6, %v7566_v10  ;;  %v7570_v29 = vpop.f32.mrb[22].mxu0  ;;  %v27376_v31 = vld [vmem:[#allocation59_spill] sm:$0xff]  ;;  %v27377_v18 = vld [vmem:[#allocation58_spill] sm:$0xff] }
 0x333   : > { %19620 = vmatmul.mubr.msk.bf16.vlgmr.msra.gmra.mrb[36].mxu1 %vm1058_vm2, %v25188_v14  ;;  %v7681_v37 = vmul.f32 %v7626_v4, %v7566_v10  ;;  %16639 = vrot.lane.b32.xlu1 %v25264_v61, %s21608_s9  ;;  %v7571_v16 = vpop.f32.mrb[23].mxu0  ;;  %v10931_v38 = vsel %vm1062_vm1, %v10914_v22, 0  ;;  %v19950_v13 = vcombine.high %v25257_v17, %v25259_v46  ;;  %v11133_v0 = vsel %vm1460_vm3, %v27377_v18, %v27376_v31  ;;  %v25296_v34 = vpop.permute.xlu0 %14392  ;;  %v25309_v17 = vld [vmem:[%s26946_s2 + $0x10] sm:$0xf] }
 0x334   : > { %10984 = vmatpush1.bf16.msra.mxu1 %v10925_v5  ;;  %27378 = vst [vmem:[#allocation55_spill] sm:$0xff] %v25296_v34  ;;  %v7687_v2 = vadd.f32 %v7686_v47, %v7680_v50  ;;  %v7670_v14 = vadd.f32 %v7669_v42, %v7626_v4  ;;  %19445 = vst [vmem:[%s23652_s7 + $0x50] sm:$0xff] %v20082_v30  ;;  %v7682_v10 = vmul.f32 %v7627_v27, %v7568_v6  ;;  %v25315_v5 = vld [vmem:[#allocation2 + $0x8c] ss:$76 sps:$4 sm:$0xfc]  }
 0x335   : > { %11015 = vmatprep.mubr.bf16.mxu1 %v27120_v24  ;;  %19636 = vmatprep.subr.msk.bf16.mxu1 %vm1062_vm1, %v10917_v55  ;;  %v10916_v16 = vsel %vm1049_vm0, %v24381_v40, %v27374_v41  ;;  %v7607_v22 = vpop.f32.mrb[20].mxu1  ;;  %v25313_v50 = vrot.slane %v19949_v26, 2  ;;  %v25317_v4 = vpop.permute.xlu1 %14394  ;;  %v27381_v47 = vld [vmem:[#allocation57_spill] sm:$0xff] }
 0x336   : > { %16641 = vrot.lane.b32.xlu0 %v25270_v56, %s21608_s9  ;;  %19631 = vmatmul.mubr.msk.bf16.vlgmr.msra.gmra.mrb[32].mxu0 %vm1058_vm2, %v25309_v17  ;;  %27380 = vst [vmem:[#allocation58_spill] sm:$0xff] %v25317_v4  ;;  %v7688_v6 = vadd.f32 %v7687_v2, %v7681_v37  ;;  %v7671_v40 = vadd.f32 %v7670_v14, %v7627_v27  ;;  %v7609_v55 = vpop.f32.mrb[21].mxu1  ;;  %v25327_v2 = vrot.slane %v19950_v13, 2  ;;  %v10937_v4 = vsel %vm1062_vm1, %v10916_v16, 0  ;;  %v27385_v13 = vld [vmem:[#allocation60_spill] sm:$0xff] }
 0x337   : > { %27379 = vst [vmem:[#allocation59_spill] sm:$0xff] %v25313_v50  ;;  %v7628_v41 = vmul.f32 %v7607_v22, %v23700_v1  ;;  %11025 = vmatpush1.bf16.msra.mxu0 %v10931_v38  ;;  %11056 = vmatprep.mubr.bf16.mxu0 %v27120_v24  ;;  %v11132_v42 = vsel %vm1460_vm3, %v27381_v47, %v27377_v18  ;;  %v7611_v29 = vpop.f32.mrb[22].mxu1  ;;  %v25330_v37 = vpop.permute.xlu0 %14396  ;;  %v16632_v47 = vrot.slane %v25315_v5, 2 }
 0x338   : > { %16643 = vrot.lane.b32.xlu1 %v25272_v63, %s21608_s9  ;;  %v7629_v26 = vmul.f32 %v7609_v55, %v23728_v25  ;;  %v20083_v30 = vpack.c.bf16 %v7609_v55, %v7607_v22  ;;  %27382 = vst [vmem:[#allocation57_spill] sm:$0xff] %v25327_v2  ;;  %19638 = vmatprep.subr.msk.bf16.mxu0 %vm1062_vm1, %v11133_v0  ;;  %27383 = vst [vmem:[#allocation92_spill] sm:$0xff] %v25330_v37  ;;  %v7612_v34 = vpop.f32.mrb[23].mxu1  ;;  %v27384_v29 = vld [vmem:[#allocation61_spill] sm:$0xff] }
 0x339   : > { %v7689_v27 = vadd.f32 %v7688_v6, %v7682_v10  ;;  %v7672_v38 = vadd.f32 %v7671_v40, %v7628_v41  ;;  %v7683_v14 = vmul.f32 %v7628_v41, %v7607_v22  ;;  %v11135_v25 = vsel %vm1460_vm3, %v27385_v13, %v27384_v29  ;;  %v25340_v0 = vpop.permute.xlu1 %14398  ;;  %v27386_v22 = vld [vmem:[#allocation63_spill] sm:$0xff]  ;;  %v27387_v6 = vld [vmem:[#allocation62_spill] sm:$0xff] }
 0x33a   : > { %19446 = vst [vmem:[%s23652_s7 + $0x58] sm:$0xff] %v20083_v30  ;;  %v7684_v18 = vmul.f32 %v7629_v26, %v7609_v55  ;;  %16645 = vrot.lane.b32.xlu0 %v25313_v50, %s21608_s9  ;;  %v11141_v10 = vsel %vm1062_vm1, %v11132_v42, 0  ;;  %v11137_v40 = vsel %vm1460_vm3, %v27387_v6, %v27386_v22  ;;  %v11134_v55 = vsel %vm1460_vm3, %v27376_v31, %v27385_v13  ;;  %v21415_v13 = vld [vmem:[#allocation2 + $0x54] ss:$76 sps:$4 sm:$0x3f]  }
 0x33b   : > { %v7690_v37 = vadd.f32 %v7689_v27, %v7683_v14  ;;  %19633 = vmatmul.mubr.msk.bf16.vlgmr.msra.gmra.mrb[32].mxu1 %vm1058_vm2, %v25309_v17  ;;  %v25344_v34 = vadd.f32 %v7672_v38, %v7629_v26  ;;  %v25349_v16 = vpop.permute.xlu0 %14400  ;;  %v11136_v31 = vsel %vm1460_vm3, %v27384_v29, %v27387_v6  ;;  %v11147_v42 = vsel %vm1062_vm1, %v11134_v55, 0  ;;  %v27388_v26 = vld [vmem:[#allocation64_spill] sm:$0xff]  ;;  %v21412_v38 = vld [vmem:[#allocation2 + $0x58] ss:$76 sps:$4 sm:$0x3f]  }
 0x33c   : > { %16647 = vrot.lane.b32.xlu1 %v25327_v2, %s21608_s9  ;;  %11066 = vmatpush1.bf16.msra.mxu1 %v10937_v4  ;;  %v11139_v30 = vsel %vm1460_vm3, %v27388_v26, %v24500_v44  ;;  %v11153_v27 = vsel %vm1062_vm1, %v11136_v31, 0  ;;  %v11138_v44 = vsel %vm1460_vm3, %v27386_v22, %v27388_v26  ;;  %v21419_v6 = vld [vmem:[#allocation2 + $0x60] ss:$76 sps:$4 sm:$0x3f]  }
 0x33d   : > { %11097 = vmatprep.mubr.bf16.mxu1 %v27120_v24  ;;  %19640 = vmatprep.subr.msk.bf16.mxu1 %vm1062_vm1, %v11135_v25  ;;  %v25356_v41 = vadd.f32 %v7690_v37, %v7684_v18  ;;  %v25366_v4 = vpop.permute.xlu1 %14402  ;;  %v25402_v18 = vld [vmem:[%s26946_s2 + $0x14] sm:$0xf]  ;;  %v11159_v22 = vsel %vm1062_vm1, %v11138_v44, 0  ;;  %v25437_v44 = vld [vmem:[#allocation2 + $0x78] ss:$76 sps:$4 sm:$0xfc]  }
 0x33e   : > { %16649 = vrot.lane.b32.xlu0 %v16632_v47, %s21608_s9  ;;  %19635 = vmatmul.mubr.msk.bf16.vlgmr.msra.gmra.mrb[36].mxu0 %vm1058_vm2, %v25309_v17  ;;  %v25423_v31 = vld [vmem:[#allocation2 + $0x74] ss:$76 sps:$4 sm:$0xfc]   ;;  %v21422_v26 = vld [vmem:[#allocation2 + $0x68] ss:$76 sps:$4 sm:$0x3f]  }
 0x33f   : > { %11165 = vmatpush1.bf16.msra.mxu0 %v11141_v10  ;;  %11196 = vmatprep.mubr.bf16.mxu0 %v27120_v24  ;;  %v25372_v25 = vpop.permute.xlu0 %14404 }
 0x340   : > { %17035 = vrot.lane.b32.xlu1 %v25216_v9, %s21609_s10  ;;  %19642 = vmatprep.subr.msk.bf16.mxu0 %vm1062_vm1, %v11137_v40  ;;  %v25417_v40 = vld [vmem:[#allocation2 + $0x70] ss:$76 sps:$4 sm:$0xfc]   ;;  %v21433_v9 = vld [vmem:[#allocation2 + $0x6c] ss:$76 sps:$4 sm:$0x3f]  }
 0x341   : > { %v25383_v37 = vpop.permute.xlu1 %14406 }
 0x342   : > { %17037 = vrot.lane.b32.xlu0 %v25227_v52, %s21609_s10 }
 0x343   : > { %19637 = vmatmul.mubr.msk.bf16.vlgmr.msra.gmra.mrb[36].mxu1 %vm1058_vm2, %v25309_v17  ;;  %v25390_v14 = vpop.permute.xlu0 %14408 }
 0x344   : > { %17039 = vrot.lane.b32.xlu1 %v25248_v58, %s21609_s10  ;;  %11206 = vmatpush1.bf16.msra.mxu1 %v11147_v42  ;;  %v11377_v42 = vsel %vm1062_vm1, %v21415_v13, 0  ;;  %v27390_v13 = vrot.slane %v25417_v40, 2  ;;  %v25456_v58 = vld [vmem:[#allocation2 + $0x80] ss:$76 sps:$4 sm:$0xfc]  }
 0x345   : > { %11237 = vmatprep.mubr.bf16.mxu1 %v27120_v24  ;;  %19644 = vmatprep.subr.msk.bf16.mxu1 %vm1062_vm1, %v11139_v30  ;;  %v25406_v29 = vpop.permute.xlu1 %14794 }
 0x346   : > { %17041 = vrot.lane.b32.xlu0 %v25264_v61, %s21609_s10  ;;  %19639 = vmatmul.mubr.msk.bf16.vlgmr.msra.gmra.mrb[32].mxu0 %vm1058_vm2, %v25402_v18 }
 0x347   : > { %11247 = vmatpush1.bf16.msra.mxu0 %v11153_v27  ;;  %11278 = vmatprep.mubr.bf16.mxu0 %v27120_v24  ;;  %v25412_v10 = vpop.permute.xlu0 %14796  ;;  %v21421_v27 = vld [vmem:[#allocation2 + $0x5c] ss:$76 sps:$4 sm:$0x3f]  }
 0x348   : > { %17043 = vrot.lane.b32.xlu1 %v25270_v56, %s21609_s10  ;;  %19654 = vmatprep.subr.msk.bf16.mxu0 %vm1062_vm1, %v21412_v38  ;;  %v11383_v38 = vsel %vm1062_vm1, %v21421_v27, 0  ;;  %v21428_v56 = vld [vmem:[#allocation2 + $0x70] ss:$76 sps:$4 sm:$0x3f]  }
 0x349   : > { %v25419_v55 = vpop.permute.xlu1 %14798 }
 0x34a   : > { %17045 = vrot.lane.b32.xlu0 %v25272_v63, %s21609_s10  ;;  %v25467_v63 = vld [vmem:[#allocation2 + $0x84] ss:$76 sps:$4 sm:$0xfc]  }
 0x34b   : > { %19641 = vmatmul.mubr.msk.bf16.vlgmr.msra.gmra.mrb[32].mxu1 %vm1058_vm2, %v25402_v18  ;;  %v25428_v30 = vpop.permute.xlu0 %14800 }
 0x34c   : > { %17047 = vrot.lane.b32.xlu1 %v25313_v50, %s21609_s10  ;;  %11288 = vmatpush1.bf16.msra.mxu1 %v11159_v22  ;;  %v21426_v50 = vld [vmem:[#allocation2 + $0x64] ss:$76 sps:$4 sm:$0x3f]  }
 0x34d   : > { %11319 = vmatprep.mubr.bf16.mxu1 %v27120_v24  ;;  %19656 = vmatprep.subr.msk.bf16.mxu1 %vm1062_vm1, %v21419_v6  ;;  %v25439_v22 = vpop.permute.xlu1 %14802  ;;  %v25446_v6 = vld [vmem:[#allocation2 + $0x7c] ss:$76 sps:$4 sm:$0xfc]   ;;  %v11389_v27 = vsel %vm1062_vm1, %v21426_v50, 0  ;;  %v25482_v50 = vld [vmem:[%s26946_s2 + $0x18] sm:$0xf] }
 0x34e   : > { %17049 = vrot.lane.b32.xlu0 %v25327_v2, %s21609_s10  ;;  %19643 = vmatmul.mubr.msk.bf16.vlgmr.msra.gmra.mrb[36].mxu0 %vm1058_vm2, %v25402_v18 }
 0x34f   : > { %11401 = vmatpush1.bf16.msra.mxu0 %v11377_v42  ;;  %11432 = vmatprep.mubr.bf16.mxu0 %v27120_v24  ;;  %v25449_v2 = vpop.permute.xlu0 %14804  ;;  %v27394_v42 = vld [vmem:[#allocation66_spill] sm:$0xff] }
 0x350   : > { %17051 = vrot.lane.b32.xlu1 %v16632_v47, %s21609_s10  ;;  %19658 = vmatprep.subr.msk.bf16.mxu0 %vm1062_vm1, %v21422_v26  ;;  %27389 = vst [vmem:[#allocation61_spill] sm:$0xff] %v25449_v2  ;;  %v27392_v47 = vrot.slane %v25423_v31, 2  ;;  %v11638_v61 = vsel %vm1049_vm0, %v27394_v42, %v24547_v57 }
 0x351   : > { %v25458_v5 = vpop.permute.xlu1 %14806 }
 0x352   : > { %17557 = vrot.lane.b32.xlu0 %v27390_v13, %s21608_s9  ;;  %27391 = vst [vmem:[#allocation60_spill] sm:$0xff] %v25458_v5  ;;  %v25509_v5 = vld [vmem:[#allocation2 + $0x90] ss:$76 sps:$4 sm:$0xfc]  }
 0x353   : > { %19645 = vmatmul.mubr.msk.bf16.vlgmr.msra.gmra.mrb[36].mxu1 %vm1058_vm2, %v25402_v18  ;;  %v25469_v13 = vpop.permute.xlu0 %14808 }
 0x354   : > { %17559 = vrot.lane.b32.xlu1 %v27392_v47, %s21608_s9  ;;  %11442 = vmatpush1.bf16.msra.mxu1 %v11383_v38  ;;  %27393 = vst [vmem:[#allocation63_spill] sm:$0xff] %v25469_v13  ;;  %v27395_v47 = vrot.slane %v25437_v44, 2  ;;  %v25497_v13 = vld [vmem:[#allocation2 + $0x8c] ss:$76 sps:$4 sm:$0xfc]   ;;  %v11395_v38 = vsel %vm1062_vm1, %v21433_v9, 0 }
 0x355   : > { %11473 = vmatprep.mubr.bf16.mxu1 %v27120_v24  ;;  %19660 = vmatprep.subr.msk.bf16.mxu1 %vm1062_vm1, %v21428_v56  ;;  %v25487_v56 = vld [vmem:[#allocation2 + $0x88] ss:$76 sps:$4 sm:$0xfc]   ;;  %v25489_v26 = vpop.permute.xlu1 %14810  ;;  %v27402_v9 = vrot.slane %v25467_v63, 2 }
 0x356   : > { %17561 = vrot.lane.b32.xlu0 %v27395_v47, %s21608_s9  ;;  %19655 = vmatmul.mubr.msk.bf16.vlgmr.msra.gmra.mrb[32].mxu0 %vm1058_vm2, %v25482_v50  ;;  %27396 = vst [vmem:[#allocation62_spill] sm:$0xff] %v25489_v26  ;;  %v27397_v47 = vrot.slane %v25446_v6, 2  ;;  %v27399_v26 = vrot.slane %v25456_v58, 2 }
 0x357   : > { %11483 = vmatpush1.bf16.msra.mxu0 %v11389_v27  ;;  %11514 = vmatprep.mubr.bf16.mxu0 %v27120_v24  ;;  %v25499_v2 = vpop.permute.xlu0 %15316 }
 0x358   : > { %17563 = vrot.lane.b32.xlu1 %v27397_v47, %s21608_s9  ;;  %19671 = vmatprep.subr.msk.bf16.mxu0 %vm1062_vm1, %v11638_v61  ;;  %27398 = vst [vmem:[#allocation64_spill] sm:$0xff] %v25499_v2  ;;  %v11640_v47 = vsel %vm1049_vm0, %v24559_v32, %v24567_v11  ;;  %v27401_v61 = vld [vmem:[#allocation65_spill] sm:$0xff] }
 0x359   : > { %v25511_v52 = vpop.permute.xlu1 %15318  ;;  %v11637_v2 = vsel %vm1049_vm0, %v27401_v61, %v27394_v42  ;;  %v11642_v42 = vsel %vm1049_vm0, %v24582_v12, %v24589_v15  ;;  %v27403_v61 = vrot.slane %v25487_v56, 2 }
 0x35a   : > { %17565 = vrot.lane.b32.xlu0 %v27399_v26, %s21608_s9  ;;  %27400 = vst [vmem:[#allocation66_spill] sm:$0xff] %v25511_v52  ;;  %v27404_v52 = vrot.slane %v25497_v13, 2 }
 0x35b   : > { %19657 = vmatmul.mubr.msk.bf16.vlgmr.msra.gmra.mrb[32].mxu1 %vm1058_vm2, %v25482_v50  ;;  %v25522_v27 = vpop.permute.xlu0 %15320 }
 0x35c   : > { %17567 = vrot.lane.b32.xlu1 %v27402_v9, %s21608_s9  ;;  %11524 = vmatpush1.bf16.msra.mxu1 %v11395_v38  ;;  %v11646_v9 = vsel %vm1062_vm1, %v11637_v2, 0  ;;  %v17556_v38 = vrot.slane %v25509_v5, 2  ;;  %v11644_v2 = vsel %vm1049_vm0, %v24600_v49, %v24608_v43  ;;  %v25578_v43 = vld [vmem:[%s26946_s2 + $0x1c] sm:$0xf]  ;;  %v11865_v5 = vsel %vm1460_vm3, %v24675_v19, %v24686_v3 }
 0x35d   : > { %11555 = vmatprep.mubr.bf16.mxu1 %v27120_v24  ;;  %19673 = vmatprep.subr.msk.bf16.mxu1 %vm1062_vm1, %v11640_v47  ;;  %v25536_v26 = vpop.permute.xlu1 %15322  ;;  %v11639_v47 = vsel %vm1049_vm0, %v24547_v57, %v24559_v32  ;;  %v11641_v57 = vsel %vm1049_vm0, %v24567_v11, %v24582_v12  ;;  %v11860_v11 = vsel %vm1460_vm3, %v24629_v28, %v24635_v54  ;;  %v27406_v12 = vrot.slane %v25423_v31, 2 }
 0x35e   : > { %17569 = vrot.lane.b32.xlu0 %v27403_v61, %s21608_s9  ;;  %19659 = vmatmul.mubr.msk.bf16.vlgmr.msra.gmra.mrb[36].mxu0 %vm1058_vm2, %v25482_v50  ;;  %v11652_v32 = vsel %vm1062_vm1, %v11639_v47, 0  ;;  %v11643_v31 = vsel %vm1049_vm0, %v24589_v15, %v24600_v49  ;;  %v11862_v15 = vsel %vm1460_vm3, %v24644_v21, %v24655_v48 }
 0x35f   : > { %11670 = vmatpush1.bf16.msra.mxu0 %v11646_v9  ;;  %11701 = vmatprep.mubr.bf16.mxu0 %v27120_v24  ;;  %v25546_v61 = vpop.permute.xlu0 %15324 }
 0x360   : > { %17571 = vrot.lane.b32.xlu1 %v27404_v52, %s21608_s9  ;;  %19675 = vmatprep.subr.msk.bf16.mxu0 %vm1062_vm1, %v11642_v42  ;;  %v27405_v52 = vrot.slane %v25417_v40, 2  ;;  %v11658_v40 = vsel %vm1062_vm1, %v11641_v57, 0  ;;  %v11859_v57 = vsel %vm1460_vm3, %v24622_v45, %v24629_v28  ;;  %v27409_v45 = vrot.slane %v25456_v58, 2 }
 0x361   : > { %v25554_v9 = vpop.permute.xlu1 %15326  ;;  %v27410_v58 = vrot.slane %v25467_v63, 2 }
 0x362   : > { %17573 = vrot.lane.b32.xlu0 %v17556_v38, %s21608_s9 }
 0x363   : > { %19661 = vmatmul.mubr.msk.bf16.vlgmr.msra.gmra.mrb[36].mxu1 %vm1058_vm2, %v25482_v50  ;;  %v25565_v42 = vpop.permute.xlu0 %15328 }
 0x364   : > { %17779 = vrot.lane.b32.xlu1 %v27405_v52, %s21609_s10  ;;  %11711 = vmatpush1.bf16.msra.mxu1 %v11652_v32  ;;  %v27408_v52 = vrot.slane %v25446_v6, 2  ;;  %v11864_v6 = vsel %vm1460_vm3, %v24666_v35, %v24675_v19 }
 0x365   : > { %11742 = vmatprep.mubr.bf16.mxu1 %v27120_v24  ;;  %19677 = vmatprep.subr.msk.bf16.mxu1 %vm1062_vm1, %v11644_v2  ;;  %v25583_v47 = vpop.permute.xlu1 %15330  ;;  %v27407_v2 = vrot.slane %v25437_v44, 2  ;;  %v11664_v44 = vsel %vm1062_vm1, %v11643_v31, 0  ;;  %v11861_v31 = vsel %vm1460_vm3, %v24635_v54, %v24644_v21  ;;  %v27411_v54 = vrot.slane %v25487_v56, 2 }
 0x366   : > { %17781 = vrot.lane.b32.xlu0 %v27406_v12, %s21609_s10  ;;  %19672 = vmatmul.mubr.msk.bf16.vlgmr.msra.gmra.mrb[32].mxu0 %vm1058_vm2, %v25578_v43  ;;  %v11868_v12 = vsel %vm1062_vm1, %v11859_v57, 0  ;;  %v27413_v56 = vrot.slane %v25497_v13, 2 }
 0x367   : > { %11752 = vmatpush1.bf16.msra.mxu0 %v11658_v40  ;;  %11783 = vmatprep.mubr.bf16.mxu0 %v27120_v24  ;;  %v25593_v32 = vpop.permute.xlu0 %15332 }
 0x368   : > { %17783 = vrot.lane.b32.xlu1 %v27407_v2, %s21609_s10  ;;  %19679 = vmatprep.subr.msk.bf16.mxu0 %vm1062_vm1, %v11860_v11  ;;  %v18245_v11 = vld [vmem:[#allocation2 + $0x74] sm:$0xcc] }
 0x369   : > { %v15539_v49 = vpop.permute.xlu1 %15538  ;;  %v20033_v2 = vcombine.low %v18245_v11, %v25197_v23  ;;  %v20034_v21 = vcombine.high %v18245_v11, %v25197_v23 }
 0x36a   : > { %17785 = vrot.lane.b32.xlu0 %v27408_v52, %s21609_s10  ;;  %v18246_v52 = vld [vmem:[#allocation2 + $0x7c] sm:$0xcc] }
 0x36b   : > { %19674 = vmatmul.mubr.msk.bf16.vlgmr.msra.gmra.mrb[32].mxu1 %vm1058_vm2, %v25578_v43  ;;  %v15541_v28 = vpop.permute.xlu0 %15540  ;;  %v20035_v23 = vcombine.low %v18246_v52, %v25211_v53 }
 0x36c   : > { %17787 = vrot.lane.b32.xlu1 %v27409_v45, %s21609_s10  ;;  %11793 = vmatpush1.bf16.msra.mxu1 %v11664_v44  ;;  %v25617_v40 = vsel %vm1460_vm3, %v15539_v49, %v15541_v28  ;;  %v11863_v49 = vsel %vm1460_vm3, %v24655_v48, %v24666_v35  ;;  %v11874_v44 = vsel %vm1062_vm1, %v11861_v31, 0  ;;  %v11866_v45 = vsel %vm1460_vm3, %v24686_v3, %v24702_v8  ;;  %v18247_v48 = vld [vmem:[#allocation2 + $0x84] sm:$0xcc] }
 0x36d   : > { %11824 = vmatprep.mubr.bf16.mxu1 %v27120_v24  ;;  %19681 = vmatprep.subr.msk.bf16.mxu1 %vm1062_vm1, %v11862_v15  ;;  %v15543_v57 = vpop.permute.xlu1 %15542  ;;  %v25661_v8 = vrot.slane %v20034_v21, 2  ;;  %v11880_v13 = vsel %vm1062_vm1, %v11863_v49, 0  ;;  %v11886_v49 = vsel %vm1062_vm1, %v11865_v5, 0  ;;  %v25739_v5 = vld [vmem:[#allocation2 + $0x94] ss:$76 sps:$4 sm:$0xfc]  }
 0x36e   : > { %17789 = vrot.lane.b32.xlu0 %v27410_v58, %s21609_s10  ;;  %19676 = vmatmul.mubr.msk.bf16.vlgmr.msra.gmra.mrb[36].mxu0 %vm1058_vm2, %v25578_v43  ;;  %v25630_v15 = vsel %vm1460_vm3, %v15541_v28, %v15543_v57  ;;  %v25650_v28 = vrot.slane %v20033_v2, 2  ;;  %v12202_v58 = vsel %vm1049_vm0, %v24723_v60, %v24733_v62 }
 0x36f   : > { %11892 = vmatpush1.bf16.msra.mxu0 %v11868_v12  ;;  %11923 = vmatprep.mubr.bf16.mxu0 %v27120_v24  ;;  %v15545_v63 = vpop.permute.xlu0 %15544 }
 0x370   : > { %17791 = vrot.lane.b32.xlu1 %v27411_v54, %s21609_s10  ;;  %19683 = vmatprep.subr.msk.bf16.mxu0 %vm1062_vm1, %v11864_v6  ;;  %v25642_v12 = vsel %vm1460_vm3, %v15543_v57, %v15545_v63  ;;  %v20036_v6 = vcombine.high %v18246_v52, %v25211_v53  ;;  %v25681_v53 = vld [vmem:[%s26946_s2 + $0x20] sm:$0xf]  ;;  %v20037_v57 = vcombine.low %v18247_v48, %v25259_v46 }
 0x371   : > { %27412 = vst [vmem:[#allocation65_spill] sm:$0xff] %v25642_v12  ;;  %v15547_v11 = vpop.permute.xlu1 %15546  ;;  %v20038_v54 = vcombine.high %v18247_v48, %v25259_v46  ;;  %v12204_v46 = vsel %vm1049_vm0, %v24745_v36, %v24754_v20  ;;  %v25724_v48 = vld [vmem:[#allocation2 + $0x90] ss:$76 sps:$4 sm:$0xfc]  }
 0x372   : > { %17793 = vrot.lane.b32.xlu0 %v27413_v56, %s21609_s10  ;;  %v25656_v35 = vsel %vm1460_vm3, %v15545_v63, %v15547_v11  ;;  %v25694_v3 = vrot.slane %v20036_v6, 2  ;;  %v12201_v63 = vsel %vm1049_vm0, %v24711_v51, %v24723_v60  ;;  %v25709_v56 = vld [vmem:[#allocation2 + $0x8c] ss:$76 sps:$4 sm:$0xfc]   ;;  %v12206_v6 = vsel %vm1049_vm0, %v24762_v39, %v24771_v33 }
 0x373   : > { %19678 = vmatmul.mubr.msk.bf16.vlgmr.msra.gmra.mrb[36].mxu1 %vm1058_vm2, %v25578_v43  ;;  %27414 = vst [vmem:[#allocation93_spill] sm:$0xff] %v25656_v35  ;;  %v15549_v31 = vpop.permute.xlu0 %15548  ;;  %v25721_v60 = vrot.slane %v20038_v54, 2  ;;  %v12205_v54 = vsel %vm1049_vm0, %v24754_v20, %v24762_v39 }
 0x374   : > { %17795 = vrot.lane.b32.xlu1 %v17556_v38, %s21609_s10  ;;  %11933 = vmatpush1.bf16.msra.mxu1 %v11874_v44  ;;  %v25671_v2 = vsel %vm1460_vm3, %v15547_v11, %v15549_v31  ;;  %v25685_v38 = vrot.slane %v20035_v23, 2  ;;  %v12210_v11 = vsel %vm1062_vm1, %v12201_v63, 0  ;;  %v12222_v39 = vsel %vm1062_vm1, %v12205_v54, 0 }
 0x375   : > { %11964 = vmatprep.mubr.bf16.mxu1 %v27120_v24  ;;  %19685 = vmatprep.subr.msk.bf16.mxu1 %vm1062_vm1, %v11866_v45  ;;  %27415 = vst [vmem:[#allocation94_spill] sm:$0xff] %v25671_v2  ;;  %v15551_v52 = vpop.permute.xlu1 %15550  ;;  %v25707_v45 = vrot.slane %v20037_v57, 2  ;;  %v27484_v2 = vld [vmem:[#allocation77_spill] sm:$0xff] }
 0x376   : > { %18301 = vrot.lane.b32.xlu0 %v25650_v28, %s21608_s9  ;;  %19680 = vmatmul.mubr.msk.bf16.vlgmr.msra.gmra.mrb[32].mxu0 %vm1058_vm2, %v25681_v53  ;;  %v25690_v19 = vsel %vm1460_vm3, %v15549_v31, %v15551_v52  ;;  %v12203_v31 = vsel %vm1049_vm0, %v24733_v62, %v24745_v36  ;;  %v18299_v62 = vrot.slane %v25724_v48, 2 }
 0x377   : > { %11974 = vmatpush1.bf16.msra.mxu0 %v11880_v13  ;;  %12005 = vmatprep.mubr.bf16.mxu0 %v27120_v24  ;;  %27416 = vst [vmem:[#allocation95_spill] sm:$0xff] %v25690_v19  ;;  %v15553_v21 = vpop.permute.xlu0 %15552  ;;  %v27488_v19 = vld [vmem:[#allocation24_spill] sm:$0xff] }
 0x378   : > { %18303 = vrot.lane.b32.xlu1 %v25661_v8, %s21608_s9  ;;  %19704 = vmatprep.subr.msk.bf16.mxu0 %vm1062_vm1, %v12202_v58  ;;  %v25703_v44 = vsel %vm1460_vm3, %v15551_v52, %v15553_v21  ;;  %v18298_v58 = vrot.slane %v25709_v56, 2  ;;  %v25860_v56 = vld [vmem:[%s26946_s2] sm:$0xf] }
 0x379   : > { %27417 = vst [vmem:[#allocation96_spill] sm:$0xff] %v25703_v44  ;;  %v15555_v23 = vpop.permute.xlu1 %15554 }
 0x37a   : > { %18305 = vrot.lane.b32.xlu0 %v25685_v38, %s21608_s9  ;;  %v25717_v51 = vsel %vm1460_vm3, %v15553_v21, %v15555_v23  ;;  %v12216_v21 = vsel %vm1062_vm1, %v12203_v31, 0 }
 0x37b   : > { %19682 = vmatmul.mubr.msk.bf16.vlgmr.msra.gmra.mrb[32].mxu1 %vm1058_vm2, %v25681_v53  ;;  %27418 = vst [vmem:[#allocation97_spill] sm:$0xff] %v25717_v51  ;;  %v16061_v13 = vpop.permute.xlu0 %16060  ;;  %v27476_v51 = vld [vmem:[#allocation68_spill] sm:$0xff] }
 0x37c   : > { %18307 = vrot.lane.b32.xlu1 %v25694_v3, %s21608_s9  ;;  %12015 = vmatpush1.bf16.msra.mxu1 %v11886_v49  ;;  %v18300_v49 = vrot.slane %v25739_v5, 2 }
 0x37d   : > { %12046 = vmatprep.mubr.bf16.mxu1 %v27120_v24  ;;  %19706 = vmatprep.subr.msk.bf16.mxu1 %vm1062_vm1, %v12204_v46  ;;  %v16063_v57 = vpop.permute.xlu1 %16062  ;;  %v12208_v46 = vsel %vm1049_vm0, %v24785_v7, %v24794_v59 }
 0x37e   : > { %18309 = vrot.lane.b32.xlu0 %v25707_v45, %s21608_s9  ;;  %19684 = vmatmul.mubr.msk.bf16.vlgmr.msra.gmra.mrb[36].mxu0 %vm1058_vm2, %v25681_v53  ;;  %v25743_v52 = vsel %vm1049_vm0, %v16061_v13, %v16063_v57  ;;  %v12207_v13 = vsel %vm1049_vm0, %v24771_v33, %v24785_v7  ;;  %v27424_v33 = vld [vmem:[#allocation20_spill] sm:$0xff] }
 0x37f   : > { %12234 = vmatpush1.bf16.msra.mxu0 %v12210_v11  ;;  %12265 = vmatprep.mubr.bf16.mxu0 %v27120_v24  ;;  %27419 = vst [vmem:[#allocation98_spill] sm:$0xff] %v25743_v52  ;;  %v16065_v36 = vpop.permute.xlu0 %16064  ;;  %v27475_v52 = vld [vmem:[#allocation3_spill] sm:$0xff] }
 0x380   : > { %18311 = vrot.lane.b32.xlu1 %v25721_v60, %s21608_s9  ;;  %19708 = vmatprep.subr.msk.bf16.mxu0 %vm1062_vm1, %v12206_v6  ;;  %v25754_v63 = vsel %vm1049_vm0, %v16063_v57, %v16065_v36  ;;  %v25786_v6 = vld [vmem:[%s26946_s2 + $0x4] sm:$0xf] }
 0x381   : > { %27420 = vst [vmem:[#allocation99_spill] sm:$0xff] %v25754_v63  ;;  %v16067_v23 = vpop.permute.xlu1 %16066 }
 0x382   : > { %18313 = vrot.lane.b32.xlu0 %v18298_v58, %s21608_s9  ;;  %v25766_v20 = vsel %vm1049_vm0, %v16065_v36, %v16067_v23  ;;  %v12228_v36 = vsel %vm1062_vm1, %v12207_v13, 0  ;;  %v27430_v13 = vld [vmem:[#allocation28_spill] sm:$0xff] }
 0x383   : > { %19686 = vmatmul.mubr.msk.bf16.vlgmr.msra.gmra.mrb[36].mxu1 %vm1058_vm2, %v25681_v53  ;;  %27421 = vst [vmem:[#allocation100_spill] sm:$0xff] %v25766_v20  ;;  %v16069_v11 = vpop.permute.xlu0 %16068 }
 0x384   : > { %18315 = vrot.lane.b32.xlu1 %v18299_v62, %s21608_s9  ;;  %12275 = vmatpush1.bf16.msra.mxu1 %v12216_v21  ;;  %v25775_v59 = vsel %vm1049_vm0, %v16067_v23, %v16069_v11 }
 0x385   : > { %12306 = vmatprep.mubr.bf16.mxu1 %v27120_v24  ;;  %19710 = vmatprep.subr.msk.bf16.mxu1 %vm1062_vm1, %v12208_v46  ;;  %27422 = vst [vmem:[#allocation101_spill] sm:$0xff] %v25775_v59  ;;  %v16071_v31 = vpop.permute.xlu1 %16070 }
 0x386   : > { %18317 = vrot.lane.b32.xlu0 %v18300_v49, %s21608_s9  ;;  %19705 = vmatmul.mubr.msk.bf16.vlgmr.msra.gmra.mrb[40].mxu0 %vm1058_vm2, %v25786_v6  ;;  %v25792_v57 = vsel %vm1049_vm0, %v16069_v11, %v16071_v31  ;;  %v27428_v11 = vld [vmem:[#allocation14_spill] sm:$0xff]  ;;  %s26476_s9 = scalar_lea.vmem %s26949_s5, %s19005_s19 }
 0x387   : > { %12316 = vmatpush1.bf16.msra.mxu0 %v12222_v39  ;;  %12347 = vmatprep.mubr.bf16.mxu0 %v27120_v24  ;;  %27423 = vst [vmem:[#allocation102_spill] sm:$0xff] %v25792_v57  ;;  %v16073_v7 = vpop.permute.xlu0 %16072  ;;  %v27471_v57 = vld [vmem:[#allocation4_spill] sm:$0xff] }
 0x388   : > { %18523 = vrot.lane.b32.xlu1 %v25650_v28, %s21609_s10  ;;  %19712 = vmatprep.subr.msk.bf16.mxu0 %vm1062_vm1, %v27424_v33  ;;  %v25800_v54 = vsel %vm1049_vm0, %v16071_v31, %v16073_v7  ;;  %v27427_v28 = vld [vmem:[#allocation18_spill] sm:$0xff]  ;;  %v27431_v33 = vld [vmem:[#allocation23_spill] sm:$0xff] }
 0x389   : > { %27425 = vst [vmem:[#allocation20_spill] sm:$0xff] %v25800_v54  ;;  %v16075_v21 = vpop.permute.xlu1 %16074  ;;  %v12398_v23 = vsel %vm1062_vm1, %v27427_v28, 0  ;;  %v27474_v54 = vld [vmem:[#allocation53_spill] sm:$0xff] }
 0x38a   : > { %18525 = vrot.lane.b32.xlu0 %v25661_v8, %s21609_s10  ;;  %v25807_v46 = vsel %vm1049_vm0, %v16073_v7, %v16075_v21  ;;  %v12404_v7 = vsel %vm1062_vm1, %v27431_v33, 0  ;;  %v13113_v59 = vsel %vm1049_vm0, %v27475_v52, %v27474_v54 }
 0x38b   : > { %19707 = vmatmul.mubr.msk.bf16.vlgmr.msra.gmra.mrb[40].mxu1 %vm1058_vm2, %v25786_v6  ;;  %27426 = vst [vmem:[#allocation103_spill] sm:$0xff] %v25807_v46  ;;  %v16077_v39 = vpop.permute.xlu0 %16076  ;;  %v27469_v46 = vld [vmem:[#allocation38_spill] sm:$0xff] }
 0x38c   : > { %18527 = vrot.lane.b32.xlu1 %v25685_v38, %s21609_s10  ;;  %12357 = vmatpush1.bf16.msra.mxu1 %v12228_v36  ;;  %v25817_v8 = vsel %vm1049_vm0, %v16075_v21, %v16077_v39  ;;  %v27435_v39 = vld [vmem:[#allocation50_spill] sm:$0xff] }
 0x38d   : > { %12388 = vmatprep.mubr.bf16.mxu1 %v27120_v24  ;;  %19714 = vmatprep.subr.msk.bf16.mxu1 %vm1062_vm1, %v27428_v11  ;;  %27429 = vst [vmem:[#allocation18_spill] sm:$0xff] %v25817_v8  ;;  %v16283_v38 = vpop.permute.xlu1 %16282  ;;  %v27437_v11 = vld [vmem:[#allocation11_spill] sm:$0xff] }
 0x38e   : > { %18529 = vrot.lane.b32.xlu0 %v25694_v3, %s21609_s10  ;;  %19709 = vmatmul.mubr.msk.bf16.vlgmr.msra.gmra.mrb[44].mxu0 %vm1058_vm2, %v25786_v6 }
 0x38f   : > { %12422 = vmatpush1.bf16.msra.mxu0 %v12398_v23  ;;  %12453 = vmatprep.mubr.bf16.mxu0 %v27120_v24  ;;  %v16285_v31 = vpop.permute.xlu0 %16284 }
 0x390   : > { %18531 = vrot.lane.b32.xlu1 %v25707_v45, %s21609_s10  ;;  %19716 = vmatprep.subr.msk.bf16.mxu0 %vm1062_vm1, %v27430_v13  ;;  %v25831_v36 = vsel %vm1460_vm3, %v16283_v38, %v16285_v31  ;;  %v27434_v45 = vld [vmem:[#allocation25_spill] sm:$0xff] }
 0x391   : > { %27432 = vst [vmem:[#allocation14_spill] sm:$0xff] %v25831_v36  ;;  %v16287_v3 = vpop.permute.xlu1 %16286  ;;  %v12410_v28 = vsel %vm1062_vm1, %v27434_v45, 0 }
 0x392   : > { %18533 = vrot.lane.b32.xlu0 %v25721_v60, %s21609_s10  ;;  %v25838_v21 = vsel %vm1460_vm3, %v16285_v31, %v16287_v3  ;;  %v27436_v60 = vld [vmem:[#allocation19_spill] sm:$0xff] }
 0x393   : > { %19711 = vmatmul.mubr.msk.bf16.vlgmr.msra.gmra.mrb[44].mxu1 %vm1058_vm2, %v25786_v6  ;;  %27433 = vst [vmem:[#allocation28_spill] sm:$0xff] %v25838_v21  ;;  %v16289_v23 = vpop.permute.xlu0 %16288  ;;  %v12604_v38 = vsel %vm1460_vm3, %v27437_v11, %v27436_v60 }
 0x394   : > { %18535 = vrot.lane.b32.xlu1 %v18298_v58, %s21609_s10  ;;  %12463 = vmatpush1.bf16.msra.mxu1 %v12404_v7  ;;  %v25852_v13 = vsel %vm1460_vm3, %v16287_v3, %v16289_v23  ;;  %v27441_v7 = vld [vmem:[#allocation31_spill] sm:$0xff] }
 0x395   : > { %12494 = vmatprep.mubr.bf16.mxu1 %v27120_v24  ;;  %19718 = vmatprep.subr.msk.bf16.mxu1 %vm1062_vm1, %v27435_v39  ;;  %27438 = vst [vmem:[#allocation23_spill] sm:$0xff] %v25852_v13  ;;  %v16291_v58 = vpop.permute.xlu1 %16290  ;;  %v12416_v3 = vsel %vm1062_vm1, %v27441_v7, 0 }
 0x396   : > { %18537 = vrot.lane.b32.xlu0 %v18299_v62, %s21609_s10  ;;  %19713 = vmatmul.mubr.msk.bf16.vlgmr.msra.gmra.mrb[40].mxu0 %vm1058_vm2, %v25860_v56  ;;  %v25866_v31 = vsel %vm1460_vm3, %v16289_v23, %v16291_v58  ;;  %v27440_v62 = vld [vmem:[#allocation17_spill] sm:$0xff]  ;;  %v27444_v23 = vld [vmem:[#allocation27_spill] sm:$0xff] }
 0x397   : > { %12504 = vmatpush1.bf16.msra.mxu0 %v12410_v28  ;;  %12535 = vmatprep.mubr.bf16.mxu0 %v27120_v24  ;;  %27439 = vst [vmem:[#allocation25_spill] sm:$0xff] %v25866_v31  ;;  %v16293_v48 = vpop.permute.xlu0 %16292  ;;  %v12603_v33 = vsel %vm1460_vm3, %v27440_v62, %v27437_v11  ;;  %v27443_v28 = vld [vmem:[#allocation12_spill] sm:$0xff] }
 0x398   : > { %18539 = vrot.lane.b32.xlu1 %v18300_v49, %s21609_s10  ;;  %19720 = vmatprep.subr.msk.bf16.mxu0 %vm1062_vm1, %v12604_v38  ;;  %v25878_v45 = vsel %vm1460_vm3, %v16291_v58, %v16293_v48  ;;  %v12606_v39 = vsel %vm1460_vm3, %v27444_v23, %v27443_v28  ;;  %v12612_v49 = vsel %vm1062_vm1, %v12603_v33, 0  ;;  %v27446_v38 = vld [vmem:[#allocation48_spill] sm:$0xff]  ;;  %v27447_v58 = vld [vmem:[#allocation29_spill] sm:$0xff] }
 0x399   : > { %27442 = vst [vmem:[#allocation50_spill] sm:$0xff] %v25878_v45  ;;  %v16295_v13 = vpop.permute.xlu1 %16294  ;;  %v12608_v62 = vsel %vm1460_vm3, %v27447_v58, %v27446_v38 }
 0x39a   : > { %v25886_v5 = vsel %vm1460_vm3, %v16293_v48, %v16295_v13  ;;  %v12605_v48 = vsel %vm1460_vm3, %v27436_v60, %v27444_v23  ;;  %v27450_v60 = vld [vmem:[#allocation30_spill] sm:$0xff]  ;;  %v27451_v23 = vld [vmem:[#allocation51_spill] sm:$0xff] }
 0x39b   : > { %19715 = vmatmul.mubr.msk.bf16.vlgmr.msra.gmra.mrb[40].mxu1 %vm1058_vm2, %v25860_v56  ;;  %27445 = vst [vmem:[#allocation19_spill] sm:$0xff] %v25886_v5  ;;  %v16297_v11 = vpop.permute.xlu0 %16296  ;;  %v12610_v45 = vsel %vm1460_vm3, %v27451_v23, %v27450_v60 }
 0x39c   : > { %12545 = vmatpush1.bf16.msra.mxu1 %v12416_v3  ;;  %12576 = vmatprep.mubr.bf16.mxu1 %v27120_v24  ;;  %v25895_v7 = vsel %vm1460_vm3, %v16295_v13, %v16297_v11  ;;  %v12607_v13 = vsel %vm1460_vm3, %v27443_v28, %v27447_v58 }
 0x39d   : > { %19722 = vmatprep.subr.msk.bf16.mxu1 %vm1062_vm1, %v12606_v39  ;;  %27448 = vst [vmem:[#allocation11_spill] sm:$0xff] %v25895_v7  ;;  %v16299_v33 = vpop.permute.xlu1 %16298  ;;  %v12618_v7 = vsel %vm1062_vm1, %v12605_v48, 0  ;;  %v12609_v48 = vsel %vm1460_vm3, %v27446_v38, %v27451_v23 }
 0x39e   : > { %19717 = vmatmul.mubr.msk.bf16.vlgmr.msra.gmra.mrb[44].mxu0 %vm1058_vm2, %v25860_v56  ;;  %v25904_v3 = vsel %vm1460_vm3, %v16297_v11, %v16299_v33  ;;  %v12624_v11 = vsel %vm1062_vm1, %v12607_v13, 0  ;;  %v25931_v33 = vld [vmem:[%s26946_s2 + $0x8] sm:$0xf]  ;;  %v12630_v38 = vsel %vm1062_vm1, %v12609_v48, 0 }
 0x39f   : > { %12636 = vmatpush1.bf16.msra.mxu0 %v12612_v49  ;;  %12667 = vmatprep.mubr.bf16.mxu0 %v27120_v24  ;;  %27449 = vst [vmem:[#allocation17_spill] sm:$0xff] %v25904_v3  ;;  %v16634_v39 = vpop.permute.xlu0 %16633  ;;  %v21442_v13 = vld [vmem:[#allocation2 + $0x7c] ss:$76 sps:$4 sm:$0x3f]  }
 0x3a0   : > { %19724 = vmatprep.subr.msk.bf16.mxu0 %vm1062_vm1, %v12608_v62  ;;  %v21439_v62 = vld [vmem:[#allocation2 + $0x74] ss:$76 sps:$4 sm:$0x3f]   ;;  %v21444_v48 = vld [vmem:[#allocation2 + $0x78] ss:$76 sps:$4 sm:$0x3f]  }
 0x3a1   : > { %v16636_v5 = vpop.permute.xlu1 %16635 }
 0x3a2   : > { %v25917_v49 = vsel %vm1049_vm0, %v16634_v39, %v16636_v5 }
 0x3a3   : > { %19719 = vmatmul.mubr.msk.bf16.vlgmr.msra.gmra.mrb[44].mxu1 %vm1058_vm2, %v25860_v56  ;;  %27452 = vst [vmem:[#allocation31_spill] sm:$0xff] %v25917_v49  ;;  %v16638_v28 = vpop.permute.xlu0 %16637 }
 0x3a4   : > { %12677 = vmatpush1.bf16.msra.mxu1 %v12618_v7  ;;  %12708 = vmatprep.mubr.bf16.mxu1 %v27120_v24  ;;  %v25923_v58 = vsel %vm1049_vm0, %v16636_v5, %v16638_v28  ;;  %v21441_v5 = vld [vmem:[#allocation2 + $0x70] ss:$76 sps:$4 sm:$0x3f]  }
 0x3a5   : > { %19726 = vmatprep.subr.msk.bf16.mxu1 %vm1062_vm1, %v12610_v45  ;;  %27453 = vst [vmem:[#allocation12_spill] sm:$0xff] %v25923_v58  ;;  %v16640_v7 = vpop.permute.xlu1 %16639  ;;  %v27466_v58 = vld [vmem:[#allocation67_spill] sm:$0xff] }
 0x3a6   : > { %19721 = vmatmul.mubr.msk.bf16.vlgmr.msra.gmra.mrb[40].mxu0 %vm1058_vm2, %v25931_v33  ;;  %v25937_v45 = vsel %vm1049_vm0, %v16638_v28, %v16640_v7  ;;  %v21445_v28 = vld [vmem:[#allocation2 + $0x84] ss:$76 sps:$4 sm:$0x3f]  }
 0x3a7   : > { %12718 = vmatpush1.bf16.msra.mxu0 %v12624_v11  ;;  %12749 = vmatprep.mubr.bf16.mxu0 %v27120_v24  ;;  %27454 = vst [vmem:[#allocation27_spill] sm:$0xff] %v25937_v45 }
 0x3a8   : > { %19736 = vmatprep.subr.msk.bf16.mxu0 %vm1062_vm1, %v21439_v62  ;;  %v16642_v39 = vpop.permute.xlu0 %16641  ;;  %v12848_v62 = vsel %vm1062_vm1, %v21441_v5, 0  ;;  %v21447_v5 = vld [vmem:[#allocation2 + $0x80] ss:$76 sps:$4 sm:$0x3f]  }
 0x3a9   : > { %v25942_v60 = vsel %vm1049_vm0, %v16640_v7, %v16642_v39 }
 0x3aa   : > { %27455 = vst [vmem:[#allocation48_spill] sm:$0xff] %v25942_v60  ;;  %v16644_v23 = vpop.permute.xlu1 %16643 }
 0x3ab   : > { %19723 = vmatmul.mubr.msk.bf16.vlgmr.msra.gmra.mrb[40].mxu1 %vm1058_vm2, %v25931_v33  ;;  %v25947_v11 = vsel %vm1049_vm0, %v16642_v39, %v16644_v23 }
 0x3ac   : > { %27456 = vst [vmem:[#allocation29_spill] sm:$0xff] %v25947_v11  ;;  %12759 = vmatpush1.bf16.msra.mxu1 %v12630_v38  ;;  %12790 = vmatprep.mubr.bf16.mxu1 %v27120_v24  ;;  %v16646_v45 = vpop.permute.xlu0 %16645  ;;  %v21448_v11 = vld [vmem:[#allocation2 + $0x8c] ss:$76 sps:$4 sm:$0x3f]  }
 0x3ad   : > { %19738 = vmatprep.subr.msk.bf16.mxu1 %vm1062_vm1, %v21442_v13  ;;  %v25953_v7 = vsel %vm1049_vm0, %v16644_v23, %v16646_v45  ;;  %v12854_v13 = vsel %vm1062_vm1, %v21444_v48, 0  ;;  %v27462_v48 = vld [vmem:[#allocation32_spill] sm:$0xff] }
 0x3ae   : > { %27457 = vst [vmem:[#allocation30_spill] sm:$0xff] %v25953_v7  ;;  %19725 = vmatmul.mubr.msk.bf16.vlgmr.msra.gmra.mrb[44].mxu0 %vm1058_vm2, %v25931_v33  ;;  %v16648_v60 = vpop.permute.xlu1 %16647 }
 0x3af   : > { %12872 = vmatpush1.bf16.msra.mxu0 %v12848_v62  ;;  %12903 = vmatprep.mubr.bf16.mxu0 %v27120_v24  ;;  %v25959_v39 = vsel %vm1049_vm0, %v16646_v45, %v16648_v60  ;;  %v12860_v45 = vsel %vm1062_vm1, %v21447_v5, 0 }
 0x3b0   : > { %27458 = vst [vmem:[#allocation51_spill] sm:$0xff] %v25959_v39  ;;  %19740 = vmatprep.subr.msk.bf16.mxu0 %vm1062_vm1, %v21445_v28  ;;  %v16650_v38 = vpop.permute.xlu0 %16649  ;;  %v27460_v39 = vld [vmem:[#allocation46_spill] sm:$0xff]  ;;  %v27461_v28 = vld [vmem:[#allocation33_spill] sm:$0xff] }
 0x3b1   : > { %v25964_v23 = vsel %vm1049_vm0, %v16648_v60, %v16650_v38  ;;  %v13109_v49 = vsel %vm1049_vm0, %v27462_v48, %v27461_v28  ;;  %v21450_v60 = vld [vmem:[#allocation2 + $0x88] ss:$76 sps:$4 sm:$0x3f]  }
 0x3b2   : > { %27459 = vst [vmem:[#allocation104_spill] sm:$0xff] %v25964_v23  ;;  %v17036_v7 = vpop.permute.xlu1 %17035  ;;  %v12866_v3 = vsel %vm1062_vm1, %v21450_v60, 0 }
 0x3b3   : > { %19727 = vmatmul.mubr.msk.bf16.vlgmr.msra.gmra.mrb[44].mxu1 %vm1058_vm2, %v25931_v33 }
 0x3b4   : > { %12913 = vmatpush1.bf16.msra.mxu1 %v12854_v13  ;;  %12944 = vmatprep.mubr.bf16.mxu1 %v27120_v24  ;;  %v17038_v62 = vpop.permute.xlu0 %17037  ;;  %v25981_v13 = vld [vmem:[%s26946_s2 + $0xc] sm:$0xf] }
 0x3b5   : > { %3232 = vadd.xlane.f32.xlu0 %v27460_v39  ;;  %19742 = vmatprep.subr.msk.bf16.mxu1 %vm1062_vm1, %v21448_v11  ;;  %v25976_v38 = vsel %vm1460_vm3, %v17036_v7, %v17038_v62  ;;  %v27465_v7 = vld [vmem:[#allocation49_spill] sm:$0xff] }
 0x3b6   : > { %27463 = vst [vmem:[#allocation46_spill] sm:$0xff] %v25976_v38  ;;  %19737 = vmatmul.mubr.msk.bf16.vlgmr.msra.gmra.mrb[40].mxu0 %vm1058_vm2, %v25981_v13  ;;  %v17040_v5 = vpop.permute.xlu1 %17039  ;;  %v13108_v38 = vsel %vm1049_vm0, %v27465_v7, %v27462_v48  ;;  %v27470_v7 = vld [vmem:[#allocation52_spill] sm:$0xff] }
 0x3b7   : > { %12954 = vmatpush1.bf16.msra.mxu0 %v12860_v45  ;;  %12985 = vmatprep.mubr.bf16.mxu0 %v27120_v24  ;;  %v25987_v11 = vsel %vm1460_vm3, %v17038_v62, %v17040_v5  ;;  %v27468_v45 = vld [vmem:[#allocation36_spill] sm:$0xff]  ;;  %v13117_v20 = vsel %vm1062_vm1, %v13108_v38, 0 }
 0x3b8   : > { %27464 = vst [vmem:[#allocation33_spill] sm:$0xff] %v25987_v11  ;;  %19753 = vmatprep.subr.msk.bf16.mxu0 %vm1062_vm1, %v13109_v49  ;;  %v17042_v39 = vpop.permute.xlu0 %17041  ;;  %v9725_v23 = vpop.f32.mrb[24].mxu0 }
 0x3b9   : > { %5429 = vadd.xlane.f32.xlu0 %v27466_v58  ;;  %v25996_v31 = vsel %vm1460_vm3, %v17040_v5, %v17042_v39  ;;  %v9863_v36 = vmul.f32 %v9725_v23, %v27468_v45  ;;  %v9727_v62 = vpop.f32.mrb[25].mxu0  ;;  %v13111_v58 = vsel %vm1049_vm0, %v27471_v57, %v27470_v7 }
 0x3ba   : > { %27467 = vst [vmem:[#allocation32_spill] sm:$0xff] %v25996_v31  ;;  %v17044_v11 = vpop.permute.xlu1 %17043  ;;  %v9864_v49 = vmul.f32 %v9727_v62, %v27469_v46  ;;  %v20084_v21 = vpack.c.bf16 %v9727_v62, %v9725_v23  ;;  %v9729_v48 = vpop.f32.mrb[26].mxu0  ;;  %v27473_v31 = vld [vmem:[#allocation47_spill] sm:$0xff] }
 0x3bb   : > { %19739 = vmatmul.mubr.msk.bf16.vlgmr.msra.gmra.mrb[40].mxu1 %vm1058_vm2, %v25981_v13  ;;  %v26006_v60 = vsel %vm1460_vm3, %v17042_v39, %v17044_v11  ;;  %v9917_v5 = vmul.f32 %v9863_v36, %v9725_v23  ;;  %v9730_v8 = vpop.f32.mrb[27].mxu0 }
 0x3bc   : > { %27472 = vst [vmem:[#allocation49_spill] sm:$0xff] %v26006_v60  ;;  %3250 = vadd.xlane.f32.xlu1 %v27473_v31  ;;  %12995 = vmatpush1.bf16.msra.mxu1 %v12866_v3  ;;  %v17046_v63 = vpop.permute.xlu0 %17045  ;;  %19566 = vst [vmem:[%s23652_s7 + $0x60] sm:$0xff] %v20084_v21  ;;  %v9907_v48 = vadd.f32 %v9864_v49, %v9863_v36  ;;  %v9918_v44 = vmul.f32 %v9864_v49, %v9727_v62  ;;  %v27478_v3 = vld [vmem:[#allocation16_spill] sm:$0xff] }
 0x3bd   : > { %5447 = vadd.xlane.f32.xlu0 %v27476_v51  ;;  %13026 = vmatprep.mubr.bf16.mxu1 %v27120_v24  ;;  %v26017_v23 = vsel %vm1460_vm3, %v17044_v11, %v17046_v63  ;;  %v13110_v8 = vsel %vm1049_vm0, %v27461_v28, %v27471_v57  ;;  %v9766_v31 = vpop.f32.mrb[24].mxu1  ;;  %v13112_v57 = vsel %vm1049_vm0, %v27470_v7, %v27475_v52  ;;  %v27480_v28 = vld [vmem:[#allocation41_spill] sm:$0xff]  ;;  %v27482_v52 = vld [vmem:[#allocation42_spill] sm:$0xff] }
 0x3be   : > { %27477 = vst [vmem:[#allocation67_spill] sm:$0xff] %v26017_v23  ;;  %19741 = vmatmul.mubr.msk.bf16.vlgmr.msra.gmra.mrb[44].mxu0 %vm1058_vm2, %v25981_v13  ;;  %19755 = vmatprep.subr.msk.bf16.mxu1 %vm1062_vm1, %v13111_v58  ;;  %v17048_v21 = vpop.permute.xlu1 %17047  ;;  %v9925_v36 = vadd.f32 %v9918_v44, %v9917_v5  ;;  %v9865_v38 = vmul.f32 %v9766_v31, %v27478_v3  ;;  %v9768_v51 = vpop.f32.mrb[25].mxu1 }
 0x3bf   : > { %13141 = vmatpush1.bf16.msra.mxu0 %v13117_v20  ;;  %13172 = vmatprep.mubr.bf16.mxu0 %v27120_v24  ;;  %v26028_v11 = vsel %vm1460_vm3, %v17046_v63, %v17048_v21  ;;  %v9866_v39 = vmul.f32 %v9768_v51, %v27480_v28  ;;  %v20085_v62 = vpack.c.bf16 %v9768_v51, %v9766_v31  ;;  %v9770_v44 = vpop.f32.mrb[26].mxu1  ;;  %v13123_v63 = vsel %vm1062_vm1, %v13110_v8, 0 }
 0x3c0   : > { %27479 = vst [vmem:[#allocation36_spill] sm:$0xff] %v26028_v11  ;;  %7674 = vadd.xlane.f32.xlu1 %v25344_v34  ;;  %19757 = vmatprep.subr.msk.bf16.mxu0 %vm1062_vm1, %v13113_v59  ;;  %v17050_v49 = vpop.permute.xlu0 %17049  ;;  %v9908_v20 = vadd.f32 %v9907_v48, %v9865_v38  ;;  %v9919_v58 = vmul.f32 %v9865_v38, %v9766_v31  ;;  %v9771_v5 = vpop.f32.mrb[27].mxu1  ;;  %v27483_v44 = vld [vmem:[#allocation78_spill] sm:$0xff] }
 0x3c1   : > { %v9807_v23 = vpop.f32.mrb[28].mxu0  ;;  %7692 = vadd.xlane.f32.xlu0 %v25356_v41  ;;  %v26039_v11 = vsel %vm1460_vm3, %v17048_v21, %v17050_v49  ;;  %19567 = vst [vmem:[%s23652_s7 + $0x68] sm:$0xff] %v20085_v62  ;;  %v9920_v34 = vmul.f32 %v9866_v39, %v9768_v51  ;;  %v13115_v59 = vsel %vm1049_vm0, %v27484_v2, %v27483_v44  ;;  %v27485_v5 = vld [vmem:[#allocation43_spill] sm:$0xff]  ;;  %v13129_v44 = vsel %vm1062_vm1, %v13112_v57, 0 }
 0x3c2   : > { %27481 = vst [vmem:[#allocation38_spill] sm:$0xff] %v26039_v11  ;;  %v9867_v7 = vmul.f32 %v9807_v23, %v27482_v52  ;;  %v9809_v60 = vpop.f32.mrb[29].mxu0  ;;  %v17052_v48 = vpop.permute.xlu1 %17051  ;;  %v9926_v31 = vadd.f32 %v9925_v36, %v9919_v58  ;;  %v9909_v38 = vadd.f32 %v9908_v20, %v9866_v39  ;;  %v13114_v21 = vsel %vm1049_vm0, %v27474_v54, %v27484_v2  ;;  %v27489_v54 = vld [vmem:[#allocation22_spill] sm:$0xff] }
 0x3c3   : > { %v9868_v41 = vmul.f32 %v9809_v60, %v27485_v5  ;;  %v20086_v12 = vpack.c.bf16 %v9809_v60, %v9807_v23  ;;  %19743 = vmatmul.mubr.msk.bf16.vlgmr.msra.gmra.mrb[44].mxu1 %vm1058_vm2, %v25981_v13  ;;  %v9811_v8 = vpop.f32.mrb[30].mxu0  ;;  %v26055_v39 = vsel %vm1460_vm3, %v17050_v49, %v17052_v48 }
 0x3c4   : > { %v9921_v51 = vmul.f32 %v9867_v7, %v9807_v23  ;;  %13182 = vmatpush1.bf16.msra.mxu1 %v13123_v63  ;;  %v9812_v62 = vpop.f32.mrb[31].mxu0  ;;  %13213 = vmatprep.mubr.bf16.mxu1 %v27120_v24  ;;  %v17558_v36 = vpop.permute.xlu0 %17557  ;;  %27486 = vst [vmem:[#allocation52_spill] sm:$0xff] %v26055_v39  ;;  %v9927_v20 = vadd.f32 %v9926_v31, %v9920_v34  ;;  %v27487_v8 = vld [vmem:[#allocation21_spill] sm:$0xff] }
 0x3c5   : > { %v9910_v58 = vadd.f32 %v9909_v38, %v9867_v7  ;;  %19568 = vst [vmem:[%s23652_s7 + $0x70] sm:$0xff] %v20086_v12  ;;  %v9922_v11 = vmul.f32 %v9868_v41, %v9809_v60  ;;  %19759 = vmatprep.subr.msk.bf16.mxu1 %vm1062_vm1, %v13115_v59  ;;  %v13331_v2 = vsel %vm1460_vm3, %v27488_v19, %v27487_v8  ;;  %v9848_v57 = vpop.f32.mrb[28].mxu1  ;;  %v27490_v7 = vld [vmem:[#allocation45_spill] sm:$0xff] }
 0x3c6   : > { %v13330_v23 = vsel %vm1460_vm3, %v27489_v54, %v27488_v19  ;;  %19754 = vmatmul.mubr.msk.bf16.vlgmr.msra.gmra.mrb[40].mxu0 %vm1058_vm2, %v25309_v17  ;;  %v17560_v49 = vpop.permute.xlu1 %17559  ;;  %v9928_v63 = vadd.f32 %v9927_v20, %v9921_v51  ;;  %v9869_v12 = vmul.f32 %v9848_v57, %v23700_v1  ;;  %v9850_v60 = vpop.f32.mrb[29].mxu1  ;;  %v13135_v19 = vsel %vm1062_vm1, %v13114_v21, 0  ;;  %v27491_v54 = vld [vmem:[#allocation5_spill] sm:$0xff] }
 0x3c7   : > { %v9911_v34 = vadd.f32 %v9910_v58, %v9868_v41  ;;  %13223 = vmatpush1.bf16.msra.mxu0 %v13129_v44  ;;  %13254 = vmatprep.mubr.bf16.mxu0 %v27120_v24  ;;  %v9870_v59 = vmul.f32 %v9850_v60, %v27490_v7  ;;  %v20087_v48 = vpack.c.bf16 %v9850_v60, %v9848_v57  ;;  %v9852_v31 = vpop.f32.mrb[30].mxu1  ;;  %v27492_v39 = vld [vmem:[#allocation13_spill] sm:$0xff] }
 0x3c8   : > { %19761 = vmatprep.subr.msk.bf16.mxu0 %vm1062_vm1, %v13331_v2  ;;  %v17562_v38 = vpop.permute.xlu0 %17561  ;;  %v26073_v17 = vsel %vm1049_vm0, %v17558_v36, %v17560_v49  ;;  %v9929_v41 = vadd.f32 %v9928_v63, %v9922_v11  ;;  %v9923_v62 = vmul.f32 %v9869_v12, %v9848_v57  ;;  %v9853_v20 = vpop.f32.mrb[31].mxu1  ;;  %v13333_v31 = vsel %vm1460_vm3, %v27492_v39, %v27491_v54  ;;  %v26085_v36 = vld [vmem:[%s26946_s2 + $0x10] sm:$0xf] }
 0x3c9   : > { %v9912_v51 = vadd.f32 %v9911_v34, %v9869_v12  ;;  %v26076_v44 = vsel %vm1049_vm0, %v17560_v49, %v17562_v38  ;;  %19569 = vst [vmem:[%s23652_s7 + $0x78] sm:$0xff] %v20087_v48  ;;  %v9924_v58 = vmul.f32 %v9870_v59, %v9850_v60  ;;  %v13339_v57 = vsel %vm1062_vm1, %v13330_v23, 0  ;;  %v27493_v34 = vld [vmem:[#allocation26_spill] sm:$0xff]  ;;  %v27494_v12 = vld [vmem:[#allocation8_spill] sm:$0xff] }
 0x3ca   : > { %v17564_v21 = vpop.permute.xlu1 %17563  ;;  %v9930_v35 = vadd.f32 %v9929_v41, %v9923_v62  ;;  %v13335_v60 = vsel %vm1460_vm3, %v27494_v12, %v27493_v34  ;;  %v27495_v41 = vld [vmem:[#allocation15_spill] sm:$0xff] }
 0x3cb   : > { %19756 = vmatmul.mubr.msk.bf16.vlgmr.msra.gmra.mrb[40].mxu1 %vm1058_vm2, %v26085_v36  ;;  %v9913_v11 = vadd.f32 %v9912_v51, %v9870_v59  ;;  %v26090_v2 = vsel %vm1049_vm0, %v17562_v38, %v17564_v21  ;;  %v13332_v59 = vsel %vm1460_vm3, %v27487_v8, %v27492_v39  ;;  %v13334_v38 = vsel %vm1460_vm3, %v27491_v54, %v27494_v12  ;;  %v27496_v51 = vld [vmem:[#allocation6_spill] sm:$0xff]  ;;  %v21451_v54 = vld [vmem:[#allocation2 + $0x78] ss:$76 sps:$4 sm:$0x3f]  }
 0x3cc   : > { %13264 = vmatpush1.bf16.msra.mxu1 %v13135_v19  ;;  %13295 = vmatprep.mubr.bf16.mxu1 %v27120_v24  ;;  %v17566_v49 = vpop.permute.xlu0 %17565  ;;  %v9931_v63 = vadd.f32 %v9930_v35, %v9924_v58  ;;  %v13345_v39 = vsel %vm1062_vm1, %v13332_v59, 0  ;;  %v13337_v62 = vsel %vm1460_vm3, %v27496_v51, %v27495_v41  ;;  %v21454_v59 = vld [vmem:[#allocation2 + $0x80] ss:$76 sps:$4 sm:$0x3f]  }
 0x3cd   : > { %9914 = vadd.xlane.f32.xlu1 %v9913_v11  ;;  %19763 = vmatprep.subr.msk.bf16.mxu1 %vm1062_vm1, %v13333_v31  ;;  %v26099_v48 = vsel %vm1049_vm0, %v17564_v21, %v17566_v49  ;;  %v13351_v31 = vsel %vm1062_vm1, %v13334_v38, 0 }
 0x3ce   : > { %19758 = vmatmul.mubr.msk.bf16.vlgmr.msra.gmra.mrb[44].mxu0 %vm1058_vm2, %v26085_v36  ;;  %v17568_v23 = vpop.permute.xlu1 %17567  ;;  %9932 = vadd.xlane.f32.xlu0 %v9931_v63  ;;  %v21453_v63 = vld [vmem:[#allocation2 + $0x74] ss:$76 sps:$4 sm:$0x3f]  }
 0x3cf   : > { %13363 = vmatpush1.bf16.msra.mxu0 %v13339_v57  ;;  %v26107_v35 = vsel %vm1049_vm0, %v17566_v49, %v17568_v23  ;;  %13394 = vmatprep.mubr.bf16.mxu0 %v27120_v24  ;;  %v13336_v57 = vsel %vm1460_vm3, %v27493_v34, %v27496_v51  ;;  %v26146_v34 = vld [vmem:[%s26946_s2 + $0x14] sm:$0xf]  ;;  %v13575_v38 = vsel %vm1062_vm1, %v21453_v63, 0  ;;  %v21456_v51 = vld [vmem:[#allocation2 + $0x7c] ss:$76 sps:$4 sm:$0x3f]  }
 0x3d0   : > { %19765 = vmatprep.subr.msk.bf16.mxu0 %vm1062_vm1, %v13335_v60  ;;  %v17570_v19 = vpop.permute.xlu0 %17569  ;;  %v13357_v60 = vsel %vm1062_vm1, %v13336_v57, 0  ;;  %v13581_v57 = vsel %vm1062_vm1, %v21456_v51, 0  ;;  %v21462_v51 = vld [vmem:[#allocation2 + $0x8c] ss:$76 sps:$4 sm:$0x3f]  }
 0x3d1   : > { %v26116_v8 = vsel %vm1049_vm0, %v17568_v23, %v17570_v19 }
 0x3d2   : > { %v17572_v20 = vpop.permute.xlu1 %17571 }
 0x3d3   : > { %19760 = vmatmul.mubr.msk.bf16.vlgmr.msra.gmra.mrb[44].mxu1 %vm1058_vm2, %v26085_v36  ;;  %v26124_v58 = vsel %vm1049_vm0, %v17570_v19, %v17572_v20 }
 0x3d4   : > { %13404 = vmatpush1.bf16.msra.mxu1 %v13345_v39  ;;  %13435 = vmatprep.mubr.bf16.mxu1 %v27120_v24  ;;  %v17574_v21 = vpop.permute.xlu0 %17573  ;;  %v21457_v39 = vld [vmem:[#allocation2 + $0x88] ss:$76 sps:$4 sm:$0x3f]  }
 0x3d5   : > { %19767 = vmatprep.subr.msk.bf16.mxu1 %vm1062_vm1, %v13337_v62  ;;  %v26130_v11 = vsel %vm1049_vm0, %v17572_v20, %v17574_v21 }
 0x3d6   : > { %19762 = vmatmul.mubr.msk.bf16.vlgmr.msra.gmra.mrb[40].mxu0 %vm1058_vm2, %v25402_v18  ;;  %v17780_v49 = vpop.permute.xlu1 %17779 }
 0x3d7   : > { %13445 = vmatpush1.bf16.msra.mxu0 %v13351_v31  ;;  %13476 = vmatprep.mubr.bf16.mxu0 %v27120_v24 }
 0x3d8   : > { %19777 = vmatprep.subr.msk.bf16.mxu0 %vm1062_vm1, %v21451_v54  ;;  %v17782_v12 = vpop.permute.xlu0 %17781  ;;  %v21459_v54 = vld [vmem:[#allocation2 + $0x84] ss:$76 sps:$4 sm:$0x3f]  }
 0x3d9   : > { %v26141_v23 = vsel %vm1460_vm3, %v17780_v49, %v17782_v12  ;;  %v21460_v49 = vld [vmem:[#allocation2 + $0x90] ss:$76 sps:$4 sm:$0x3f]  }
 0x3da   : > { %v17784_v19 = vpop.permute.xlu1 %17783 }
 0x3db   : > { %19764 = vmatmul.mubr.msk.bf16.vlgmr.msra.gmra.mrb[40].mxu1 %vm1058_vm2, %v26146_v34  ;;  %v26151_v18 = vsel %vm1460_vm3, %v17782_v12, %v17784_v19 }
 0x3dc   : > { %13486 = vmatpush1.bf16.msra.mxu1 %v13357_v60  ;;  %13517 = vmatprep.mubr.bf16.mxu1 %v27120_v24  ;;  %v17786_v41 = vpop.permute.xlu0 %17785 }
 0x3dd   : > { %19779 = vmatprep.subr.msk.bf16.mxu1 %vm1062_vm1, %v21454_v59  ;;  %v26157_v62 = vsel %vm1460_vm3, %v17784_v19, %v17786_v41  ;;  %v13587_v59 = vsel %vm1062_vm1, %v21459_v54, 0 }
 0x3de   : > { %27497 = vst [vmem:[#allocation4_spill] sm:$0xff] %v26157_v62  ;;  %19766 = vmatmul.mubr.msk.bf16.vlgmr.msra.gmra.mrb[44].mxu0 %vm1058_vm2, %v26146_v34  ;;  %v17788_v20 = vpop.permute.xlu1 %17787  ;;  %v27506_v62 = vld [vmem:[#allocation35_spill] sm:$0xff] }
 0x3df   : > { %13599 = vmatpush1.bf16.msra.mxu0 %v13575_v38  ;;  %13630 = vmatprep.mubr.bf16.mxu0 %v27120_v24  ;;  %v26163_v31 = vsel %vm1460_vm3, %v17786_v41, %v17788_v20  ;;  %v27501_v38 = vld [vmem:[#allocation10_spill] sm:$0xff] }
 0x3e0   : > { %27498 = vst [vmem:[#allocation47_spill] sm:$0xff] %v26163_v31  ;;  %19781 = vmatprep.subr.msk.bf16.mxu0 %vm1062_vm1, %v21457_v39  ;;  %v17790_v21 = vpop.permute.xlu0 %17789  ;;  %v27502_v39 = vld [vmem:[#allocation7_spill] sm:$0xff] }
 0x3e1   : > { %v26168_v63 = vsel %vm1460_vm3, %v17788_v20, %v17790_v21  ;;  %v13836_v41 = vsel %vm1049_vm0, %v27502_v39, %v27501_v38 }
 0x3e2   : > { %27499 = vst [vmem:[#allocation53_spill] sm:$0xff] %v26168_v63  ;;  %v17792_v12 = vpop.permute.xlu1 %17791  ;;  %v27505_v63 = vld [vmem:[#allocation9_spill] sm:$0xff] }
 0x3e3   : > { %19768 = vmatmul.mubr.msk.bf16.vlgmr.msra.gmra.mrb[44].mxu1 %vm1058_vm2, %v26146_v34  ;;  %v26173_v60 = vsel %vm1460_vm3, %v17790_v21, %v17792_v12 }
 0x3e4   : > { %27500 = vst [vmem:[#allocation3_spill] sm:$0xff] %v26173_v60  ;;  %13640 = vmatpush1.bf16.msra.mxu1 %v13581_v57  ;;  %13671 = vmatprep.mubr.bf16.mxu1 %v27120_v24  ;;  %v17794_v19 = vpop.permute.xlu0 %17793  ;;  %v27507_v60 = vld [vmem:[#allocation37_spill] sm:$0xff] }
 0x3e5   : > { %19783 = vmatprep.subr.msk.bf16.mxu1 %vm1062_vm1, %v21460_v49  ;;  %v26182_v20 = vsel %vm1460_vm3, %v17792_v12, %v17794_v19  ;;  %v13593_v49 = vsel %vm1062_vm1, %v21462_v51, 0  ;;  %v13838_v12 = vsel %vm1049_vm0, %v27506_v62, %v27505_v63  ;;  %v13835_v31 = vsel %vm1049_vm0, %v27507_v60, %v27502_v39  ;;  %v27510_v51 = vld [vmem:[#allocation34_spill] sm:$0xff] }
 0x3e6   : > { %27503 = vst [vmem:[#allocation68_spill] sm:$0xff] %v26182_v20  ;;  %19778 = vmatmul.mubr.msk.bf16.vlgmr.msra.gmra.mrb[40].mxu0 %vm1058_vm2, %v25482_v50  ;;  %v17796_v21 = vpop.permute.xlu1 %17795  ;;  %v13844_v60 = vsel %vm1062_vm1, %v13835_v31, 0 }
 0x3e7   : > { %13681 = vmatpush1.bf16.msra.mxu0 %v13587_v59  ;;  %13712 = vmatprep.mubr.bf16.mxu0 %v27120_v24  ;;  %v26188_v54 = vsel %vm1460_vm3, %v17794_v19, %v17796_v21 }
 0x3e8   : > { %27504 = vst [vmem:[#allocation16_spill] sm:$0xff] %v26188_v54  ;;  %19794 = vmatprep.subr.msk.bf16.mxu0 %vm1062_vm1, %v13836_v41  ;;  %v18302_v57 = vpop.permute.xlu0 %18301  ;;  %v27509_v41 = vld [vmem:[#allocation79_spill] sm:$0xff] }
 0x3e9   : > { %v13840_v21 = vsel %vm1049_vm0, %v27510_v51, %v27509_v41 }
 0x3ea   : > { %v18304_v20 = vpop.permute.xlu1 %18303 }
 0x3eb   : > { %19780 = vmatmul.mubr.msk.bf16.vlgmr.msra.gmra.mrb[40].mxu1 %vm1058_vm2, %v25482_v50  ;;  %v26201_v59 = vsel %vm1049_vm0, %v18302_v57, %v18304_v20  ;;  %v26214_v50 = vld [vmem:[%s26946_s2 + $0x18] sm:$0xf] }
 0x3ec   : > { %27508 = vst [vmem:[#allocation41_spill] sm:$0xff] %v26201_v59  ;;  %13722 = vmatpush1.bf16.msra.mxu1 %v13593_v49  ;;  %13753 = vmatprep.mubr.bf16.mxu1 %v27120_v24  ;;  %v18306_v19 = vpop.permute.xlu0 %18305  ;;  %v27514_v59 = vld [vmem:[#allocation81_spill] sm:$0xff] }
 0x3ed   : > { %19796 = vmatprep.subr.msk.bf16.mxu1 %vm1062_vm1, %v13838_v12  ;;  %v26209_v54 = vsel %vm1049_vm0, %v18304_v20, %v18306_v19  ;;  %v13837_v20 = vsel %vm1049_vm0, %v27501_v38, %v27506_v62 }
 0x3ee   : > { %27511 = vst [vmem:[#allocation42_spill] sm:$0xff] %v26209_v54  ;;  %19782 = vmatmul.mubr.msk.bf16.vlgmr.msra.gmra.mrb[44].mxu0 %vm1058_vm2, %v26214_v50  ;;  %v18308_v39 = vpop.permute.xlu1 %18307  ;;  %v27515_v54 = vld [vmem:[#allocation80_spill] sm:$0xff]  ;;  %v13850_v62 = vsel %vm1062_vm1, %v13837_v20, 0 }
 0x3ef   : > { %13868 = vmatpush1.bf16.msra.mxu0 %v13844_v60  ;;  %13899 = vmatprep.mubr.bf16.mxu0 %v27120_v24  ;;  %v26221_v57 = vsel %vm1049_vm0, %v18306_v19, %v18308_v39  ;;  %v13842_v31 = vsel %vm1049_vm0, %v27515_v54, %v27514_v59  ;;  %v13839_v19 = vsel %vm1049_vm0, %v27505_v63, %v27510_v51  ;;  %v27517_v59 = vld [vmem:[#allocation44_spill] sm:$0xff] }
 0x3f0   : > { %27512 = vst [vmem:[#allocation78_spill] sm:$0xff] %v26221_v57  ;;  %19798 = vmatprep.subr.msk.bf16.mxu0 %vm1062_vm1, %v13840_v21  ;;  %v18310_v49 = vpop.permute.xlu0 %18309  ;;  %v13856_v51 = vsel %vm1062_vm1, %v13839_v19, 0 }
 0x3f1   : > { %v26228_v12 = vsel %vm1049_vm0, %v18308_v39, %v18310_v49  ;;  %v27518_v39 = vld [vmem:[#allocation83_spill] sm:$0xff] }
 0x3f2   : > { %27513 = vst [vmem:[#allocation77_spill] sm:$0xff] %v26228_v12  ;;  %v18312_v60 = vpop.permute.xlu1 %18311  ;;  %v14058_v57 = vsel %vm1460_vm3, %v27518_v39, %v27517_v59 }
 0x3f3   : > { %19784 = vmatmul.mubr.msk.bf16.vlgmr.msra.gmra.mrb[44].mxu1 %vm1058_vm2, %v26214_v50  ;;  %v26240_v38 = vsel %vm1049_vm0, %v18310_v49, %v18312_v60 }
 0x3f4   : > { %27516 = vst [vmem:[#allocation43_spill] sm:$0xff] %v26240_v38  ;;  %13909 = vmatpush1.bf16.msra.mxu1 %v13850_v62  ;;  %13940 = vmatprep.mubr.bf16.mxu1 %v27120_v24  ;;  %v18314_v21 = vpop.permute.xlu0 %18313  ;;  %v27521_v62 = vld [vmem:[#allocation82_spill] sm:$0xff] }
 0x3f5   : > { %19800 = vmatprep.subr.msk.bf16.mxu1 %vm1062_vm1, %v13842_v31  ;;  %v26248_v63 = vsel %vm1049_vm0, %v18312_v60, %v18314_v21  ;;  %v13841_v31 = vsel %vm1049_vm0, %v27509_v41, %v27515_v54  ;;  %v14057_v38 = vsel %vm1460_vm3, %v27521_v62, %v27518_v39  ;;  %v27524_v39 = vld [vmem:[#allocation87_spill] sm:$0xff] }
 0x3f6   : > { %27519 = vst [vmem:[#allocation21_spill] sm:$0xff] %v26248_v63  ;;  %19795 = vmatmul.mubr.msk.bf16.vlgmr.msra.gmra.mrb[40].mxu0 %vm1058_vm2, %v25578_v43  ;;  %v18316_v20 = vpop.permute.xlu1 %18315  ;;  %v27523_v63 = vld [vmem:[#allocation39_spill] sm:$0xff]  ;;  %v13862_v54 = vsel %vm1062_vm1, %v13841_v31, 0  ;;  %v14066_v41 = vsel %vm1062_vm1, %v14057_v38, 0 }
 0x3f7   : > { %13950 = vmatpush1.bf16.msra.mxu0 %v13856_v51  ;;  %13981 = vmatprep.mubr.bf16.mxu0 %v27120_v24  ;;  %v26255_v49 = vsel %vm1049_vm0, %v18314_v21, %v18316_v20  ;;  %v27522_v51 = vld [vmem:[#allocation54_spill] sm:$0xff] }
 0x3f8   : > { %27520 = vst [vmem:[#allocation24_spill] sm:$0xff] %v26255_v49  ;;  %19802 = vmatprep.subr.msk.bf16.mxu0 %vm1062_vm1, %v14058_v57  ;;  %v18318_v60 = vpop.permute.xlu0 %18317  ;;  %v14060_v12 = vsel %vm1460_vm3, %v27523_v63, %v27522_v51  ;;  %v14059_v49 = vsel %vm1460_vm3, %v27517_v59, %v27523_v63  ;;  %v27529_v63 = vld [vmem:[#allocation89_spill] sm:$0xff] }
 0x3f9   : > { %v26265_v19 = vsel %vm1049_vm0, %v18316_v20, %v18318_v60  ;;  %v27525_v20 = vld [vmem:[#allocation85_spill] sm:$0xff] }
 0x3fa   : > { %v18524_v21 = vpop.permute.xlu1 %18523  ;;  %v14062_v60 = vsel %vm1460_vm3, %v27525_v20, %v27524_v39 }
 0x3fb   : > { %19797 = vmatmul.mubr.msk.bf16.vlgmr.msra.gmra.mrb[40].mxu1 %vm1058_vm2, %v25578_v43 }
 0x3fc   : > { %13991 = vmatpush1.bf16.msra.mxu1 %v13862_v54  ;;  %14022 = vmatprep.mubr.bf16.mxu1 %v27120_v24  ;;  %v18526_v57 = vpop.permute.xlu0 %18525  ;;  %v14072_v54 = vsel %vm1062_vm1, %v14059_v49, 0 }
 0x3fd   : > { %19804 = vmatprep.subr.msk.bf16.mxu1 %vm1062_vm1, %v14060_v12  ;;  %v26280_v62 = vsel %vm1460_vm3, %v18524_v21, %v18526_v57  ;;  %v14061_v21 = vsel %vm1460_vm3, %v27522_v51, %v27525_v20 }
 0x3fe   : > { %27526 = vst [vmem:[#allocation22_spill] sm:$0xff] %v26280_v62  ;;  %19799 = vmatmul.mubr.msk.bf16.vlgmr.msra.gmra.mrb[44].mxu0 %vm1058_vm2, %v25578_v43  ;;  %v18528_v38 = vpop.permute.xlu1 %18527  ;;  %v27528_v43 = vld [vmem:[#allocation56_spill] sm:$0xff]  ;;  %v14078_v49 = vsel %vm1062_vm1, %v14061_v21, 0 }
 0x3ff   : > { %14090 = vmatpush1.bf16.msra.mxu0 %v14066_v41  ;;  %14121 = vmatprep.mubr.bf16.mxu0 %v27120_v24  ;;  %v26289_v12 = vsel %vm1460_vm3, %v18526_v57, %v18528_v38  ;;  %v14064_v41 = vsel %vm1460_vm3, %v27529_v63, %v27528_v43  ;;  %v26305_v57 = vld [vmem:[%s26946_s2 + $0x1c] sm:$0xf] }
 0x400   : > { %19806 = vmatprep.subr.msk.bf16.mxu0 %vm1062_vm1, %v14062_v60  ;;  %v18530_v31 = vpop.permute.xlu0 %18529  ;;  %v27531_v60 = vld [vmem:[#allocation92_spill] sm:$0xff] }
 0x401   : > { %v26297_v59 = vsel %vm1460_vm3, %v18528_v38, %v18530_v31  ;;  %v27532_v38 = vld [vmem:[#allocation58_spill] sm:$0xff] }
 0x402   : > { %27527 = vst [vmem:[#allocation45_spill] sm:$0xff] %v26297_v59  ;;  %v18532_v62 = vpop.permute.xlu1 %18531  ;;  %v14411_v43 = vsel %vm1049_vm0, %v27532_v38, %v27531_v60 }
 0x403   : > { %19801 = vmatmul.mubr.msk.bf16.vlgmr.msra.gmra.mrb[44].mxu1 %vm1058_vm2, %v26305_v57  ;;  %v26310_v51 = vsel %vm1460_vm3, %v18530_v31, %v18532_v62  ;;  %v14063_v31 = vsel %vm1460_vm3, %v27524_v39, %v27529_v63  ;;  %v14413_v63 = vsel %vm1049_vm0, %v25340_v0, %v25349_v16 }
 0x404   : > { %27530 = vst [vmem:[#allocation5_spill] sm:$0xff] %v26310_v51  ;;  %14131 = vmatpush1.bf16.msra.mxu1 %v14072_v54  ;;  %14162 = vmatprep.mubr.bf16.mxu1 %v27120_v24  ;;  %v18534_v20 = vpop.permute.xlu0 %18533  ;;  %v14084_v51 = vsel %vm1062_vm1, %v14063_v31, 0  ;;  %v14412_v31 = vsel %vm1049_vm0, %v27531_v60, %v25340_v0  ;;  %v27538_v60 = vld [vmem:[#allocation74_spill] sm:$0xff] }
 0x405   : > { %19808 = vmatprep.subr.msk.bf16.mxu1 %vm1062_vm1, %v14064_v41  ;;  %v26319_v59 = vsel %vm1460_vm3, %v18532_v62, %v18534_v20  ;;  %v27534_v62 = vld [vmem:[#allocation55_spill] sm:$0xff] }
 0x406   : > { %27533 = vst [vmem:[#allocation13_spill] sm:$0xff] %v26319_v59  ;;  %19803 = vmatmul.mubr.msk.bf16.vlgmr.msra.gmra.mrb[40].mxu0 %vm1058_vm2, %v25681_v53  ;;  %v18536_v21 = vpop.permute.xlu1 %18535  ;;  %v14410_v59 = vsel %vm1049_vm0, %v27534_v62, %v27532_v38  ;;  %v14415_v38 = vsel %vm1049_vm0, %v25366_v4, %v25372_v25 }
 0x407   : > { %14172 = vmatpush1.bf16.msra.mxu0 %v14078_v49  ;;  %14203 = vmatprep.mubr.bf16.mxu0 %v27120_v24  ;;  %v26328_v54 = vsel %vm1460_vm3, %v18534_v20, %v18536_v21 }
 0x408   : > { %19829 = vmatprep.subr.msk.bf16.mxu0 %vm1062_vm1, %v14411_v43  ;;  %v18538_v41 = vpop.permute.xlu0 %18537  ;;  %v14419_v43 = vsel %vm1062_vm1, %v14410_v59, 0  ;;  %v14414_v59 = vsel %vm1049_vm0, %v25349_v16, %v25366_v4  ;;  %v14416_v16 = vsel %vm1049_vm0, %v25372_v25, %v25383_v37  ;;  %v27535_v4 = vld [vmem:[#allocation70_spill] sm:$0xff] }
 0x409   : > { %v26336_v39 = vsel %vm1460_vm3, %v18536_v21, %v18538_v41  ;;  %v14417_v21 = vsel %vm1049_vm0, %v25383_v37, %v25390_v14  ;;  %v14431_v0 = vsel %vm1062_vm1, %v14414_v59, 0  ;;  %v14437_v14 = vsel %vm1062_vm1, %v14416_v16, 0  ;;  %v27537_v37 = vld [vmem:[#allocation72_spill] sm:$0xff]  ;;  %v27544_v16 = vld [vmem:[#allocation61_spill] sm:$0xff] }
 0x40a   : > { %v18540_v49 = vpop.permute.xlu1 %18539 }
 0x40b   : > { %19805 = vmatmul.mubr.msk.bf16.vlgmr.msra.gmra.mrb[40].mxu1 %vm1058_vm2, %v25681_v53  ;;  %v26344_v20 = vsel %vm1460_vm3, %v18538_v41, %v18540_v49  ;;  %v27539_v41 = vld [vmem:[#allocation71_spill] sm:$0xff] }
 0x40c   : > { %14213 = vmatpush1.bf16.msra.mxu1 %v14084_v51  ;;  %14244 = vmatprep.mubr.bf16.mxu1 %v27120_v24  ;;  %v14425_v51 = vsel %vm1062_vm1, %v14412_v31, 0  ;;  %v14613_v62 = vsel %vm1062_vm1, %v27539_v41, 0  ;;  %v27542_v31 = vld [vmem:[#allocation75_spill] sm:$0xff]  ;;  %v21465_v41 = vld [vmem:[#allocation2 + $0x50] ss:$76 sps:$4 sm:$0xfc]  }
 0x40d   : > { %19831 = vmatprep.subr.msk.bf16.mxu1 %vm1062_vm1, %v14413_v63  ;;  %v27540_v63 = vld [vmem:[#allocation73_spill] sm:$0xff]  ;;  %v14625_v59 = vsel %vm1062_vm1, %v27542_v31, 0 }
 0x40e   : > { %19807 = vmatmul.mubr.msk.bf16.vlgmr.msra.gmra.mrb[44].mxu0 %vm1058_vm2, %v25681_v53  ;;  %v14619_v49 = vsel %vm1062_vm1, %v27540_v63, 0  ;;  %v15017_v63 = vld [vmem:[#allocation2 + $0x58] sm:$0xcc] }
 0x40f   : > { %14443 = vmatpush1.bf16.msra.mxu0 %v14419_v43  ;;  %14474 = vmatprep.mubr.bf16.mxu0 %v27120_v24  ;;  %v27541_v43 = vld [vmem:[#allocation76_spill] sm:$0xff] }
 0x410   : > { %19833 = vmatprep.subr.msk.bf16.mxu0 %vm1062_vm1, %v14415_v38  ;;  %v14813_v38 = vsel %vm1460_vm3, %v25412_v10, %v25419_v55 }
 0x413   : > { %19809 = vmatmul.mubr.msk.bf16.vlgmr.msra.gmra.mrb[44].mxu1 %vm1058_vm2, %v25681_v53  ;;  %v27536_v53 = vld [vmem:[#allocation69_spill] sm:$0xff] }
 0x414   : > { %14484 = vmatpush1.bf16.msra.mxu1 %v14425_v51  ;;  %14515 = vmatprep.mubr.bf16.mxu1 %v27120_v24  ;;  %v14607_v25 = vsel %vm1062_vm1, %v27536_v53, 0  ;;  %v14815_v51 = vsel %vm1460_vm3, %v25428_v30, %v25439_v22 }
 0x415   : > { %19835 = vmatprep.subr.msk.bf16.mxu1 %vm1062_vm1, %v14417_v21 }
 0x416   : > { %19830 = vmatmul.mubr.msk.bf16.vlgmr.msra.gmra.mrb[48].mxu0 %vm1058_vm2, %v25786_v6 }
 0x417   : > { %14525 = vmatpush1.bf16.msra.mxu0 %v14431_v0  ;;  %14556 = vmatprep.mubr.bf16.mxu0 %v27120_v24  ;;  %v27543_v0 = vld [vmem:[#allocation60_spill] sm:$0xff] }
 0x418   : > { %19837 = vmatprep.subr.msk.bf16.mxu0 %vm1062_vm1, %v27535_v4  ;;  %v21463_v4 = vld [vmem:[#allocation2 + $0x54] ss:$76 sps:$4 sm:$0xfc]  }
 0x41b   : > { %19832 = vmatmul.mubr.msk.bf16.vlgmr.msra.gmra.mrb[48].mxu1 %vm1058_vm2, %v25786_v6 }
 0x41c   : > { %14566 = vmatpush1.bf16.msra.mxu1 %v14437_v14  ;;  %14597 = vmatprep.mubr.bf16.mxu1 %v27120_v24  ;;  %v14816_v14 = vsel %vm1460_vm3, %v25439_v22, %v27544_v16 }
 0x41d   : > { %19839 = vmatprep.subr.msk.bf16.mxu1 %vm1062_vm1, %v27537_v37  ;;  %v27546_v37 = vld [vmem:[#allocation63_spill] sm:$0xff] }
 0x41e   : > { %19834 = vmatmul.mubr.msk.bf16.vlgmr.msra.gmra.mrb[52].mxu0 %vm1058_vm2, %v25786_v6  ;;  %v14818_v22 = vsel %vm1460_vm3, %v27543_v0, %v27546_v37 }
 0x41f   : > { %14631 = vmatpush1.bf16.msra.mxu0 %v14607_v25  ;;  %14662 = vmatprep.mubr.bf16.mxu0 %v27120_v24  ;;  %v27545_v25 = vld [vmem:[#allocation62_spill] sm:$0xff] }
 0x420   : > { %19841 = vmatprep.subr.msk.bf16.mxu0 %vm1062_vm1, %v27538_v60  ;;  %v14819_v60 = vsel %vm1460_vm3, %v27546_v37, %v27545_v25  ;;  %v21472_v25 = vld [vmem:[#allocation2 + $0x68] ss:$76 sps:$4 sm:$0xfc]  }
 0x423   : > { %19836 = vmatmul.mubr.msk.bf16.vlgmr.msra.gmra.mrb[52].mxu1 %vm1058_vm2, %v25786_v6  ;;  %v14812_v6 = vsel %vm1460_vm3, %v25406_v29, %v25412_v10  ;;  %v14817_v29 = vsel %vm1460_vm3, %v27544_v16, %v27543_v0  ;;  %v14814_v10 = vsel %vm1460_vm3, %v25419_v55, %v25428_v30  ;;  %v14833_v55 = vsel %vm1062_vm1, %v14816_v14, 0 }
 0x424   : > { %14672 = vmatpush1.bf16.msra.mxu1 %v14613_v62  ;;  %14703 = vmatprep.mubr.bf16.mxu1 %v27120_v24  ;;  %v14821_v21 = vsel %vm1062_vm1, %v14812_v6, 0  ;;  %v14827_v53 = vsel %vm1062_vm1, %v14814_v10, 0  ;;  %v15057_v30 = vrot.slane %v21463_v4, 2  ;;  %v21466_v62 = vld [vmem:[#allocation2 + $0x5c] ss:$76 sps:$4 sm:$0xfc]  }
 0x425   : > { %19843 = vmatprep.subr.msk.bf16.mxu1 %vm1062_vm1, %v27541_v43  ;;  %v21468_v43 = vld [vmem:[#allocation2 + $0x64] ss:$76 sps:$4 sm:$0xfc]   ;;  %v15059_v6 = vrot.slane %v21466_v62, 2 }
 0x426   : > { %19838 = vmatmul.mubr.msk.bf16.vlgmr.msra.gmra.mrb[48].mxu0 %vm1058_vm2, %v25860_v56  ;;  %v15061_v0 = vrot.slane %v21468_v43, 2  ;;  %v21470_v10 = vld [vmem:[#allocation2 + $0x6c] ss:$76 sps:$4 sm:$0xfc]  }
 0x427   : > { %14713 = vmatpush1.bf16.msra.mxu0 %v14619_v49  ;;  %14744 = vmatprep.mubr.bf16.mxu0 %v27120_v24  ;;  %v15021_v49 = vld [vmem:[#allocation2 + $0xa4] sm:$0xff] }
 0x428   : > { %19845 = vmatprep.subr.msk.bf16.mxu0 %vm1062_vm1, %v14813_v38  ;;  %v14839_v38 = vsel %vm1062_vm1, %v14818_v22, 0  ;;  %v19855_v31 = vcombine.low %v15017_v63, %v15021_v49  ;;  %v27548_v22 = vld [vmem:[#allocation64_spill] sm:$0xff] }
 0x42b   : > { %19840 = vmatmul.mubr.msk.bf16.vlgmr.msra.gmra.mrb[48].mxu1 %vm1058_vm2, %v25860_v56 }
 0x42c   : > { %14754 = vmatpush1.bf16.msra.mxu1 %v14625_v59  ;;  %14785 = vmatprep.mubr.bf16.mxu1 %v27120_v24  ;;  %v15018_v59 = vld [vmem:[#allocation2 + $0x60] sm:$0xcc] }
 0x42d   : > { %19847 = vmatprep.subr.msk.bf16.mxu1 %vm1062_vm1, %v14815_v51  ;;  %v15022_v51 = vld [vmem:[#allocation2 + $0xac] sm:$0xff] }
 0x42e   : > { %19842 = vmatmul.mubr.msk.bf16.vlgmr.msra.gmra.mrb[52].mxu0 %vm1058_vm2, %v25860_v56  ;;  %v19857_v16 = vcombine.low %v15018_v59, %v15022_v51  ;;  %v15337_v59 = vsel %vm1049_vm0, %v25536_v26, %v25546_v61 }
 0x42f   : > { %14845 = vmatpush1.bf16.msra.mxu0 %v14821_v21  ;;  %14876 = vmatprep.mubr.bf16.mxu0 %v27120_v24 }
 0x430   : > { %19849 = vmatprep.subr.msk.bf16.mxu0 %vm1062_vm1, %v14817_v29  ;;  %v15058_v29 = vrot.slane %v19855_v31, 2  ;;  %v15060_v4 = vrot.slane %v19857_v16, 2 }
 0x432   : > { %v15071_v14 = vsel %vm1062_vm1, %v15058_v29, 0 }
 0x433   : > { %19844 = vmatmul.mubr.msk.bf16.vlgmr.msra.gmra.mrb[52].mxu1 %vm1058_vm2, %v25860_v56  ;;  %v15056_v56 = vrot.slane %v21465_v41, 2  ;;  %v15062_v41 = vrot.slane %v21472_v25, 2  ;;  %v15339_v25 = vsel %vm1049_vm0, %v25554_v9, %v25565_v42 }
 0x434   : > { %14886 = vmatpush1.bf16.msra.mxu1 %v14827_v53  ;;  %14917 = vmatprep.mubr.bf16.mxu1 %v27120_v24  ;;  %v15063_v53 = vrot.slane %v21470_v10, 2 }
 0x435   : > { %19851 = vmatprep.subr.msk.bf16.mxu1 %vm1062_vm1, %v14819_v60  ;;  %v15065_v21 = vsel %vm1062_vm1, %v15056_v56, 0  ;;  %v15077_v60 = vsel %vm1062_vm1, %v15060_v4, 0  ;;  %v15083_v43 = vsel %vm1062_vm1, %v15062_v41, 0 }
 0x436   : > { %19846 = vmatmul.mubr.msk.bf16.vlgmr.msra.gmra.mrb[48].mxu0 %vm1058_vm2, %v25931_v33 }
 0x437   : > { %14927 = vmatpush1.bf16.msra.mxu0 %v14833_v55  ;;  %14958 = vmatprep.mubr.bf16.mxu0 %v27120_v24  ;;  %v27547_v55 = vld [vmem:[#allocation66_spill] sm:$0xff] }
 0x438   : > { %19861 = vmatprep.subr.msk.bf16.mxu0 %vm1062_vm1, %v15057_v30  ;;  %v15335_v30 = vsel %vm1049_vm0, %v27547_v55, %v25522_v27  ;;  %v15334_v63 = vsel %vm1049_vm0, %v27548_v22, %v27547_v55 }
 0x439   : > { %v15343_v4 = vsel %vm1062_vm1, %v15334_v63, 0 }
 0x43b   : > { %19848 = vmatmul.mubr.msk.bf16.vlgmr.msra.gmra.mrb[48].mxu1 %vm1058_vm2, %v25931_v33 }
 0x43c   : > { %14968 = vmatpush1.bf16.msra.mxu1 %v14839_v38  ;;  %14999 = vmatprep.mubr.bf16.mxu1 %v27120_v24 }
 0x43d   : > { %19863 = vmatprep.subr.msk.bf16.mxu1 %vm1062_vm1, %v15059_v6 }
 0x43e   : > { %19850 = vmatmul.mubr.msk.bf16.vlgmr.msra.gmra.mrb[52].mxu0 %vm1058_vm2, %v25931_v33 }
 0x43f   : > { %15089 = vmatpush1.bf16.msra.mxu0 %v15065_v21  ;;  %15120 = vmatprep.mubr.bf16.mxu0 %v27120_v24 }
 0x440   : > { %19865 = vmatprep.subr.msk.bf16.mxu0 %vm1062_vm1, %v15061_v0 }
 0x442   : > { %v3233_v37 = vpop.xlane.xlu0 %3232 }
 0x443   : > { %19852 = vmatmul.mubr.msk.bf16.vlgmr.msra.gmra.mrb[52].mxu1 %vm1058_vm2, %v25931_v33 }
 0x444   : > { %15130 = vmatpush1.bf16.msra.mxu1 %v15071_v14  ;;  %15161 = vmatprep.mubr.bf16.mxu1 %v27120_v24 }
 0x445   : > { %19867 = vmatprep.subr.msk.bf16.mxu1 %vm1062_vm1, %v15063_v53 }
 0x446   : > { %19862 = vmatmul.mubr.msk.bf16.vlgmr.msra.gmra.mrb[48].mxu0 %vm1058_vm2, %v25981_v13  ;;  %v5430_v33 = vpop.xlane.xlu0 %5429 }
 0x447   : > { %v5431_v62 = vadd.f32 %v5430_v33, %v3233_v37  ;;  %15171 = vmatpush1.bf16.msra.mxu0 %v15077_v60  ;;  %15202 = vmatprep.mubr.bf16.mxu0 %v27120_v24  ;;  %v15336_v37 = vsel %vm1049_vm0, %v25522_v27, %v25536_v26  ;;  %v15338_v27 = vsel %vm1049_vm0, %v25546_v61, %v25554_v9 }
 0x448   : > { %19878 = vmatprep.subr.msk.bf16.mxu0 %vm1062_vm1, %v15335_v30 }
 0x449   : > { %5451 = vst.msk [vmem:[%s26476_s9] sm:$0xff] %vm5450_vm4, %v5431_v62  ;;  %v3251_v49 = vpop.xlane.xlu1 %3250  ;;  %v11925_v56 = vpop.f32.mrb[32].mxu0 }
 0x44a   : > { %v12063_v38 = vmul.f32 %v11925_v56, %v27468_v45  ;;  %v11927_v6 = vpop.f32.mrb[33].mxu0  ;;  %v5448_v31 = vpop.xlane.xlu0 %5447 }
 0x44b   : > { %v12064_v51 = vmul.f32 %v11927_v6, %v27469_v46  ;;  %v20088_v21 = vpack.c.bf16 %v11927_v6, %v11925_v56  ;;  %19864 = vmatmul.mubr.msk.bf16.vlgmr.msra.gmra.mrb[48].mxu1 %vm1058_vm2, %v25981_v13  ;;  %v5449_v0 = vadd.f32 %v5448_v31, %v3251_v49  ;;  %v11929_v16 = vpop.f32.mrb[34].mxu0 }
 0x44c   : > { %v12118_v29 = vmul.f32 %v12063_v38, %v11925_v56  ;;  %v11930_v10 = vpop.f32.mrb[35].mxu0  ;;  %15212 = vmatpush1.bf16.msra.mxu1 %v15083_v43  ;;  %15243 = vmatprep.mubr.bf16.mxu1 %v27120_v24  ;;  %v15349_v43 = vsel %vm1062_vm1, %v15336_v37, 0 }
 0x44d   : > { %19691 = vst [vmem:[%s23652_s7 + $0x80] sm:$0xff] %v20088_v21  ;;  %v12108_v14 = vadd.f32 %v12064_v51, %v12063_v38  ;;  %v12119_v53 = vmul.f32 %v12064_v51, %v11927_v6  ;;  %5453 = vst.msk [vmem:[%s26476_s9] sm:$0xff] %vm5452_vm5, %v5449_v0  ;;  %19880 = vmatprep.subr.msk.bf16.mxu1 %vm1062_vm1, %v15337_v59  ;;  %v15341_v38 = vsel %vm1049_vm0, %v25583_v47, %v25593_v32 }
 0x44e   : > { %v11966_v60 = vpop.f32.mrb[32].mxu1  ;;  %19866 = vmatmul.mubr.msk.bf16.vlgmr.msra.gmra.mrb[52].mxu0 %vm1058_vm2, %v25981_v13  ;;  %v15355_v32 = vsel %vm1062_vm1, %v15338_v27, 0 }
 0x44f   : > { %v12126_v55 = vadd.f32 %v12119_v53, %v12118_v29  ;;  %v12065_v30 = vmul.f32 %v11966_v60, %v27478_v3  ;;  %v11968_v41 = vpop.f32.mrb[33].mxu1  ;;  %15367 = vmatpush1.bf16.msra.mxu0 %v15343_v4  ;;  %15398 = vmatprep.mubr.bf16.mxu0 %v27120_v24  ;;  %v15340_v53 = vsel %vm1049_vm0, %v25565_v42, %v25583_v47 }
 0x450   : > { %v12066_v33 = vmul.f32 %v11968_v41, %v27480_v28  ;;  %v20089_v62 = vpack.c.bf16 %v11968_v41, %v11966_v60  ;;  %v11970_v22 = vpop.f32.mrb[34].mxu1  ;;  %19882 = vmatprep.subr.msk.bf16.mxu0 %vm1062_vm1, %v15339_v25  ;;  %v7675_v25 = vpop.xlane.xlu1 %7674  ;;  %v15361_v42 = vsel %vm1062_vm1, %v15340_v53, 0  ;;  %v21479_v53 = vld [vmem:[#allocation2 + $0x68] ss:$76 sps:$4 sm:$0xfc]  }
 0x451   : > { %v12109_v26 = vadd.f32 %v12108_v14, %v12065_v30  ;;  %v12120_v63 = vmul.f32 %v12065_v30, %v11966_v60  ;;  %v11971_v49 = vpop.f32.mrb[35].mxu1  ;;  %v12007_v56 = vpop.f32.mrb[36].mxu0 }
 0x452   : > { %19692 = vst [vmem:[%s23652_s7 + $0x88] sm:$0xff] %v20089_v62  ;;  %v12121_v6 = vmul.f32 %v12066_v33, %v11968_v41  ;;  %v12067_v31 = vmul.f32 %v12007_v56, %v27482_v52  ;;  %v12009_v59 = vpop.f32.mrb[37].mxu0  ;;  %v7693_v41 = vpop.xlane.xlu0 %7692 }
 0x453   : > { %v12127_v51 = vadd.f32 %v12126_v55, %v12120_v63  ;;  %v12110_v21 = vadd.f32 %v12109_v26, %v12066_v33  ;;  %v12068_v61 = vmul.f32 %v12009_v59, %v27485_v5  ;;  %v20090_v9 = vpack.c.bf16 %v12009_v59, %v12007_v56  ;;  %19868 = vmatmul.mubr.msk.bf16.vlgmr.msra.gmra.mrb[52].mxu1 %vm1058_vm2, %v25981_v13  ;;  %v12011_v0 = vpop.f32.mrb[38].mxu0 }
 0x454   : > { %v12122_v16 = vmul.f32 %v12067_v31, %v12007_v56  ;;  %15408 = vmatpush1.bf16.msra.mxu1 %v15349_v43  ;;  %v12012_v29 = vpop.f32.mrb[39].mxu0  ;;  %15439 = vmatprep.mubr.bf16.mxu1 %v27120_v24 }
 0x455   : > { %v12128_v10 = vadd.f32 %v12127_v51, %v12121_v6  ;;  %v12111_v4 = vadd.f32 %v12110_v21, %v12067_v31  ;;  %19693 = vst [vmem:[%s23652_s7 + $0x90] sm:$0xff] %v20090_v9  ;;  %v12123_v14 = vmul.f32 %v12068_v61, %v12009_v59  ;;  %19884 = vmatprep.subr.msk.bf16.mxu1 %vm1062_vm1, %v15341_v38  ;;  %v27549_v21 = vld [vmem:[#allocation93_spill] sm:$0xff] }
 0x456   : > { %v12048_v13 = vpop.f32.mrb[36].mxu1  ;;  %19879 = vmatmul.mubr.msk.bf16.vlgmr.msra.gmra.mrb[48].mxu0 %vm1058_vm2, %v26085_v36  ;;  %v27551_v9 = vld [vmem:[#allocation65_spill] sm:$0xff] }
 0x457   : > { %v12129_v37 = vadd.f32 %v12128_v10, %v12122_v16  ;;  %v12112_v60 = vadd.f32 %v12111_v4, %v12068_v61  ;;  %v12069_v55 = vmul.f32 %v12048_v13, %v23700_v1  ;;  %v12050_v30 = vpop.f32.mrb[37].mxu1  ;;  %15449 = vmatpush1.bf16.msra.mxu0 %v15355_v32  ;;  %15480 = vmatprep.mubr.bf16.mxu0 %v27120_v24  ;;  %v21473_v61 = vld [vmem:[#allocation2 + $0x58] ss:$76 sps:$4 sm:$0xfc]   ;;  %v15571_v0 = vsel %vm1062_vm1, %v27551_v9, 0  ;;  %v27552_v16 = vld [vmem:[#allocation94_spill] sm:$0xff] }
 0x458   : > { %v12070_v33 = vmul.f32 %v12050_v30, %v27490_v7  ;;  %v20091_v62 = vpack.c.bf16 %v12050_v30, %v12048_v13  ;;  %v12052_v22 = vpop.f32.mrb[38].mxu1  ;;  %19886 = vmatprep.subr.msk.bf16.mxu0 %vm1062_vm1, %v25630_v15  ;;  %v15565_v15 = vsel %vm1062_vm1, %v25617_v40, 0  ;;  %v27550_v40 = vld [vmem:[#allocation95_spill] sm:$0xff]  ;;  %v15577_v29 = vsel %vm1062_vm1, %v27552_v16, 0  ;;  %v27553_v4 = vld [vmem:[#allocation97_spill] sm:$0xff]  ;;  %v27564_v9 = vld [vmem:[#allocation14_spill] sm:$0xff] }
 0x459   : > { %v12130_v47 = vadd.f32 %v12129_v37, %v12123_v14  ;;  %v12113_v27 = vadd.f32 %v12112_v60, %v12069_v55  ;;  %v12124_v26 = vmul.f32 %v12069_v55, %v12048_v13  ;;  %v12053_v63 = vpop.f32.mrb[39].mxu1  ;;  %v15801_v32 = vrot.slane %v21473_v61, 2  ;;  %v21475_v10 = vld [vmem:[#allocation2 + $0x54] ss:$76 sps:$4 sm:$0xfc]   ;;  %v27563_v61 = vld [vmem:[#allocation103_spill] sm:$0xff] }
 0x45a   : > { %19694 = vst [vmem:[%s23652_s7 + $0x98] sm:$0xff] %v20091_v62  ;;  %v12125_v49 = vmul.f32 %v12070_v33, %v12050_v30  ;;  %v9915_v56 = vpop.xlane.xlu1 %9914  ;;  %v21476_v14 = vld [vmem:[#allocation2 + $0x60] ss:$76 sps:$4 sm:$0xfc]   ;;  %v15805_v30 = vrot.slane %v21479_v53, 2  ;;  %v27565_v16 = vld [vmem:[#allocation25_spill] sm:$0xff] }
 0x45b   : > { %v12131_v43 = vadd.f32 %v12130_v47, %v12124_v26  ;;  %v9916_v38 = vadd.f32 %v9915_v56, %v7675_v25  ;;  %19881 = vmatmul.mubr.msk.bf16.vlgmr.msra.gmra.mrb[48].mxu1 %vm1058_vm2, %v26085_v36  ;;  %v12114_v6 = vadd.f32 %v12113_v27, %v12070_v33  ;;  %v9933_v31 = vpop.xlane.xlu0 %9932  ;;  %v27554_v25 = vld [vmem:[#allocation96_spill] sm:$0xff]  ;;  %v15803_v37 = vrot.slane %v21476_v14, 2  ;;  %v21478_v60 = vld [vmem:[#allocation2 + $0x5c] ss:$76 sps:$4 sm:$0xfc]  }
 0x45c   : > { %15490 = vmatpush1.bf16.msra.mxu1 %v15361_v42  ;;  %15521 = vmatprep.mubr.bf16.mxu1 %v27120_v24  ;;  %v9934_v59 = vadd.f32 %v9933_v31, %v7693_v41  ;;  %v15583_v13 = vsel %vm1062_vm1, %v27554_v25, 0  ;;  %v21481_v41 = vld [vmem:[#allocation2 + $0x64] ss:$76 sps:$4 sm:$0xfc]   ;;  %v15802_v33 = vrot.slane %v21478_v60, 2 }
 0x45d   : > { %19570 = vst.msk [vmem:[%s26476_s9 + $0x8] sm:$0xff] %vm5450_vm4, %v9916_v38  ;;  %12115 = vadd.xlane.f32.xlu1 %v12114_v6  ;;  %v12132_v51 = vadd.f32 %v12131_v43, %v12125_v49  ;;  %19888 = vmatprep.subr.msk.bf16.mxu1 %vm1062_vm1, %v27549_v21  ;;  %v21482_v62 = vld [vmem:[#allocation2 + $0x70] ss:$76 sps:$4 sm:$0xfc]   ;;  %v15804_v22 = vrot.slane %v21481_v41, 2  ;;  %v27555_v49 = vld [vmem:[#allocation99_spill] sm:$0xff] }
 0x45e   : > { %19883 = vmatmul.mubr.msk.bf16.vlgmr.msra.gmra.mrb[52].mxu0 %vm1058_vm2, %v26085_v36  ;;  %19571 = vst.msk [vmem:[%s26476_s9 + $0x8] sm:$0xff] %vm5452_vm5, %v9934_v59  ;;  %v15815_v42 = vsel %vm1062_vm1, %v15802_v33, 0  ;;  %v15807_v47 = vrot.slane %v21482_v62, 2  ;;  %v21484_v27 = vld [vmem:[#allocation2 + $0x6c] ss:$76 sps:$4 sm:$0xfc]  }
 0x45f   : > { %12133 = vadd.xlane.f32.xlu0 %v12132_v51  ;;  %15589 = vmatpush1.bf16.msra.mxu0 %v15565_v15  ;;  %v15821_v26 = vsel %vm1062_vm1, %v15804_v22, 0  ;;  %v15806_v63 = vrot.slane %v21484_v27, 2  ;;  %v27557_v43 = vld [vmem:[#allocation98_spill] sm:$0xff]  ;;  %v27558_v6 = vld [vmem:[#allocation20_spill] sm:$0xff]  ;;  %v27571_v25 = vld [vmem:[#allocation11_spill] sm:$0xff] }
 0x460   : > { %15620 = vmatprep.mubr.bf16.mxu0 %v27120_v24  ;;  %19890 = vmatprep.subr.msk.bf16.mxu0 %vm1062_vm1, %v27550_v40  ;;  %v16087_v38 = vsel %vm1062_vm1, %v27557_v43, 0  ;;  %v27559_v15 = vld [vmem:[#allocation100_spill] sm:$0xff]  ;;  %v27560_v59 = vld [vmem:[#allocation18_spill] sm:$0xff]  ;;  %v27575_v41 = vld [vmem:[#allocation27_spill] sm:$0xff] }
 0x461   : > { %v15827_v56 = vsel %vm1062_vm1, %v15806_v63, 0  ;;  %v16093_v31 = vsel %vm1062_vm1, %v27559_v15, 0  ;;  %v27561_v51 = vld [vmem:[#allocation102_spill] sm:$0xff]  ;;  %v27562_v40 = vld [vmem:[#allocation28_spill] sm:$0xff]  ;;  %v16666_v33 = vsel %vm1062_vm1, %v27575_v41, 0  ;;  %v27576_v62 = vld [vmem:[#allocation29_spill] sm:$0xff] }
 0x462   : > { %v16099_v21 = vsel %vm1062_vm1, %v27561_v51, 0  ;;  %v26643_v53 = vld [vmem:[%s26946_s2 + $0x20] sm:$0xf]  ;;  %v16672_v22 = vsel %vm1062_vm1, %v27576_v62, 0  ;;  %v27578_v27 = vld [vmem:[#allocation84_spill] sm:$0xff]  ;;  %v27582_v43 = vld [vmem:[#allocation91_spill] sm:$0xff] }
 0x463   : > { %19885 = vmatmul.mubr.msk.bf16.vlgmr.msra.gmra.mrb[52].mxu1 %vm1058_vm2, %v26085_v36  ;;  %v15800_v36 = vrot.slane %v21475_v10, 2  ;;  %v27584_v15 = vld [vmem:[#allocation90_spill] sm:$0xff]  ;;  %v21490_v62 = vld [vmem:[#allocation2 + $0x78] ss:$76 sps:$4 sm:$0xfc]  }
 0x464   : > { %15630 = vmatpush1.bf16.msra.mxu1 %v15571_v0  ;;  %15661 = vmatprep.mubr.bf16.mxu1 %v27120_v24  ;;  %v16309_v0 = vsel %vm1062_vm1, %v27564_v9, 0  ;;  %v21560_v51 = vld [vmem:[%s26946_s2] sm:$0xf] }
 0x465   : > { %19892 = vmatprep.subr.msk.bf16.mxu1 %vm1062_vm1, %v27553_v4  ;;  %v15809_v55 = vsel %vm1062_vm1, %v15800_v36, 0  ;;  %v27568_v4 = vld [vmem:[#allocation50_spill] sm:$0xff]  ;;  %v27569_v36 = vld [vmem:[#allocation17_spill] sm:$0xff] }
 0x466   : > { %19887 = vmatmul.mubr.msk.bf16.vlgmr.msra.gmra.mrb[48].mxu0 %vm1058_vm2, %v26146_v34  ;;  %v16321_v14 = vsel %vm1062_vm1, %v27568_v4, 0  ;;  %v27592_v4 = vld [vmem:[#allocation67_spill] sm:$0xff] }
 0x467   : > { %15671 = vmatpush1.bf16.msra.mxu0 %v15577_v29  ;;  %15702 = vmatprep.mubr.bf16.mxu0 %v27120_v24  ;;  %v27566_v29 = vld [vmem:[#allocation19_spill] sm:$0xff] }
 0x468   : > { %19902 = vmatprep.subr.msk.bf16.mxu0 %vm1062_vm1, %v15801_v32  ;;  %v27567_v32 = vld [vmem:[#allocation23_spill] sm:$0xff] }
 0x469   : > { %v16315_v10 = vsel %vm1062_vm1, %v27567_v32, 0  ;;  %v27591_v32 = vld [vmem:[#allocation32_spill] sm:$0xff] }
 0x46b   : > { %19889 = vmatmul.mubr.msk.bf16.vlgmr.msra.gmra.mrb[48].mxu1 %vm1058_vm2, %v26146_v34 }
 0x46c   : > { %15712 = vmatpush1.bf16.msra.mxu1 %v15583_v13  ;;  %15743 = vmatprep.mubr.bf16.mxu1 %v27120_v24  ;;  %v16327_v13 = vsel %vm1062_vm1, %v27571_v25, 0  ;;  %v27593_v25 = vld [vmem:[#allocation52_spill] sm:$0xff] }
 0x46d   : > { %19904 = vmatprep.subr.msk.bf16.mxu1 %vm1062_vm1, %v15803_v37  ;;  %v27572_v37 = vld [vmem:[#allocation31_spill] sm:$0xff] }
 0x46e   : > { %19891 = vmatmul.mubr.msk.bf16.vlgmr.msra.gmra.mrb[52].mxu0 %vm1058_vm2, %v26146_v34  ;;  %v16660_v60 = vsel %vm1062_vm1, %v27572_v37, 0  ;;  %v21561_v37 = vld [vmem:[%s26946_s2 + $0x8] sm:$0xf] }
 0x46f   : > { %15833 = vmatpush1.bf16.msra.mxu0 %v15809_v55  ;;  %15864 = vmatprep.mubr.bf16.mxu0 %v27120_v24  ;;  %v27573_v55 = vld [vmem:[#allocation48_spill] sm:$0xff] }
 0x470   : > { %19906 = vmatprep.subr.msk.bf16.mxu0 %vm1062_vm1, %v15805_v30  ;;  %v27574_v30 = vld [vmem:[#allocation30_spill] sm:$0xff] }
 0x473   : > { %19893 = vmatmul.mubr.msk.bf16.vlgmr.msra.gmra.mrb[52].mxu1 %vm1058_vm2, %v26146_v34  ;;  %v27556_v34 = vld [vmem:[#allocation101_spill] sm:$0xff] }
 0x474   : > { %15874 = vmatpush1.bf16.msra.mxu1 %v15815_v42  ;;  %15905 = vmatprep.mubr.bf16.mxu1 %v27120_v24  ;;  %v27577_v42 = vld [vmem:[#allocation104_spill] sm:$0xff] }
 0x475   : > { %19908 = vmatprep.subr.msk.bf16.mxu1 %vm1062_vm1, %v15807_v47  ;;  %v21559_v47 = vld [vmem:[%s26946_s2 + $0x4] sm:$0xf] }
 0x476   : > { %19903 = vmatmul.mubr.msk.bf16.vlgmr.msra.gmra.mrb[48].mxu0 %vm1058_vm2, %v26214_v50 }
 0x477   : > { %15915 = vmatpush1.bf16.msra.mxu0 %v15821_v26  ;;  %15946 = vmatprep.mubr.bf16.mxu0 %v27120_v24  ;;  %v27579_v26 = vld [vmem:[#allocation51_spill] sm:$0xff] }
 0x478   : > { %19919 = vmatprep.subr.msk.bf16.mxu0 %vm1062_vm1, %v27555_v49  ;;  %v16678_v63 = vsel %vm1062_vm1, %v27579_v26, 0  ;;  %v27580_v49 = vld [vmem:[#allocation40_spill] sm:$0xff] }
 0x479   : > { %v21494_v26 = vld [vmem:[#allocation2 + $0x8c] ss:$76 sps:$4 sm:$0xfc]  }
 0x47b   : > { %19905 = vmatmul.mubr.msk.bf16.vlgmr.msra.gmra.mrb[48].mxu1 %vm1058_vm2, %v26214_v50 }
 0x47c   : > { %15956 = vmatpush1.bf16.msra.mxu1 %v15827_v56  ;;  %15987 = vmatprep.mubr.bf16.mxu1 %v27120_v24  ;;  %v16848_v56 = vsel %vm1062_vm1, %v27580_v49, 0 }
 0x47d   : > { %19921 = vmatprep.subr.msk.bf16.mxu1 %vm1062_vm1, %v27556_v34  ;;  %v27581_v34 = vld [vmem:[#allocation88_spill] sm:$0xff] }
 0x47e   : > { %19907 = vmatmul.mubr.msk.bf16.vlgmr.msra.gmra.mrb[52].mxu0 %vm1058_vm2, %v26214_v50 }
 0x47f   : > { %16111 = vmatpush1.bf16.msra.mxu0 %v16087_v38  ;;  %16142 = vmatprep.mubr.bf16.mxu0 %v27120_v24  ;;  %v27583_v38 = vld [vmem:[#allocation86_spill] sm:$0xff] }
 0x480   : > { %19923 = vmatprep.subr.msk.bf16.mxu0 %vm1062_vm1, %v27558_v6  ;;  %v16854_v6 = vsel %vm1062_vm1, %v27583_v38, 0 }
 0x483   : > { %19909 = vmatmul.mubr.msk.bf16.vlgmr.msra.gmra.mrb[52].mxu1 %vm1058_vm2, %v26214_v50  ;;  %v16105_v50 = vsel %vm1062_vm1, %v27563_v61, 0 }
 0x484   : > { %16152 = vmatpush1.bf16.msra.mxu1 %v16093_v31  ;;  %16183 = vmatprep.mubr.bf16.mxu1 %v27120_v24  ;;  %v16860_v31 = vsel %vm1062_vm1, %v27584_v15, 0 }
 0x485   : > { %19925 = vmatprep.subr.msk.bf16.mxu1 %vm1062_vm1, %v27560_v59  ;;  %v27585_v59 = vld [vmem:[#allocation57_spill] sm:$0xff] }
 0x486   : > { %19920 = vmatmul.mubr.msk.bf16.vlgmr.msra.gmra.mrb[48].mxu0 %vm1058_vm2, %v26305_v57 }
 0x487   : > { %16193 = vmatpush1.bf16.msra.mxu0 %v16099_v21  ;;  %16224 = vmatprep.mubr.bf16.mxu0 %v27120_v24  ;;  %v27586_v21 = vld [vmem:[#allocation33_spill] sm:$0xff] }
 0x488   : > { %19927 = vmatprep.subr.msk.bf16.mxu0 %vm1062_vm1, %v27562_v40  ;;  %v27587_v40 = vld [vmem:[#allocation59_spill] sm:$0xff] }
 0x489   : > { %v16866_v61 = vsel %vm1062_vm1, %v27587_v40, 0 }
 0x48b   : > { %19922 = vmatmul.mubr.msk.bf16.vlgmr.msra.gmra.mrb[48].mxu1 %vm1058_vm2, %v26305_v57 }
 0x48c   : > { %16234 = vmatpush1.bf16.msra.mxu1 %v16105_v50  ;;  %16265 = vmatprep.mubr.bf16.mxu1 %v27120_v24  ;;  %v27588_v50 = vld [vmem:[#allocation46_spill] sm:$0xff] }
 0x48d   : > { %19929 = vmatprep.subr.msk.bf16.mxu1 %vm1062_vm1, %v27565_v16  ;;  %v17062_v9 = vsel %vm1062_vm1, %v27588_v50, 0  ;;  %v27590_v16 = vld [vmem:[#allocation36_spill] sm:$0xff]  ;;  %v17584_v50 = vsel %vm1062_vm1, %v26073_v17, 0 }
 0x48e   : > { %19924 = vmatmul.mubr.msk.bf16.vlgmr.msra.gmra.mrb[52].mxu0 %vm1058_vm2, %v26305_v57 }
 0x48f   : > { %16333 = vmatpush1.bf16.msra.mxu0 %v16309_v0  ;;  %16364 = vmatprep.mubr.bf16.mxu0 %v27120_v24  ;;  %v27589_v0 = vld [vmem:[#allocation49_spill] sm:$0xff] }
 0x490   : > { %19931 = vmatprep.subr.msk.bf16.mxu0 %vm1062_vm1, %v27566_v29  ;;  %v21485_v29 = vld [vmem:[#allocation2 + $0x74] ss:$76 sps:$4 sm:$0xfc]  }
 0x493   : > { %19926 = vmatmul.mubr.msk.bf16.vlgmr.msra.gmra.mrb[52].mxu1 %vm1058_vm2, %v26305_v57  ;;  %v27570_v57 = vld [vmem:[#allocation12_spill] sm:$0xff] }
 0x494   : > { %16374 = vmatpush1.bf16.msra.mxu1 %v16315_v10  ;;  %16405 = vmatprep.mubr.bf16.mxu1 %v27120_v24  ;;  %v17068_v10 = vsel %vm1062_vm1, %v27591_v32, 0 }
 0x495   : > { %19933 = vmatprep.subr.msk.bf16.mxu1 %vm1062_vm1, %v27569_v36  ;;  %v17298_v36 = vrot.slane %v21485_v29, 2 }
 0x496   : > { %19928 = vmatmul.mubr.msk.bf16.vlgmr.msra.gmra.mrb[48].mxu0 %vm1058_vm2, %v26643_v53 }
 0x497   : > { %16415 = vmatpush1.bf16.msra.mxu0 %v16321_v14  ;;  %16446 = vmatprep.mubr.bf16.mxu0 %v27120_v24  ;;  %v17074_v14 = vsel %vm1062_vm1, %v27592_v4, 0 }
 0x498   : > { %19952 = vmatprep.subr.msk.bf16.mxu0 %vm1062_vm1, %v27570_v57  ;;  %v21487_v57 = vld [vmem:[#allocation2 + $0x70] ss:$76 sps:$4 sm:$0xfc]  }
 0x49b   : > { %19930 = vmatmul.mubr.msk.bf16.vlgmr.msra.gmra.mrb[48].mxu1 %vm1058_vm2, %v26643_v53 }
 0x49c   : > { %16456 = vmatpush1.bf16.msra.mxu1 %v16327_v13  ;;  %16487 = vmatprep.mubr.bf16.mxu1 %v27120_v24  ;;  %v21488_v13 = vld [vmem:[#allocation2 + $0x7c] ss:$76 sps:$4 sm:$0xfc]  }
 0x49d   : > { %19954 = vmatprep.subr.msk.bf16.mxu1 %vm1062_vm1, %v27573_v55  ;;  %v21491_v55 = vld [vmem:[#allocation2 + $0x84] ss:$76 sps:$4 sm:$0xfc]  }
 0x49e   : > { %19932 = vmatmul.mubr.msk.bf16.vlgmr.msra.gmra.mrb[52].mxu0 %vm1058_vm2, %v26643_v53 }
 0x49f   : > { %16684 = vmatpush1.bf16.msra.mxu0 %v16660_v60  ;;  %16715 = vmatprep.mubr.bf16.mxu0 %v27120_v24  ;;  %v17297_v60 = vrot.slane %v21487_v57, 2 }
 0x4a0   : > { %19956 = vmatprep.subr.msk.bf16.mxu0 %vm1062_vm1, %v27574_v30  ;;  %v27594_v30 = vld [vmem:[#allocation38_spill] sm:$0xff] }
 0x4a1   : > { %v17080_v41 = vsel %vm1062_vm1, %v27594_v30, 0 }
 0x4a3   : > { %19934 = vmatmul.mubr.msk.bf16.vlgmr.msra.gmra.mrb[52].mxu1 %vm1058_vm2, %v26643_v53 }
 0x4a4   : > { %16725 = vmatpush1.bf16.msra.mxu1 %v16666_v33  ;;  %16756 = vmatprep.mubr.bf16.mxu1 %v27120_v24  ;;  %v17300_v33 = vrot.slane %v21488_v13, 2 }
 0x4a5   : > { %19958 = vmatprep.subr.msk.bf16.mxu1 %vm1062_vm1, %v27577_v42  ;;  %v17302_v42 = vrot.slane %v21491_v55, 2 }
 0x4a6   : > { %19953 = vmatmul.mubr.msk.bf16.vlgmr.msra.gmra.mrb[56].mxu0 %vm1058_vm2, %v21559_v47 }
 0x4a7   : > { %16766 = vmatpush1.bf16.msra.mxu0 %v16672_v22  ;;  %16797 = vmatprep.mubr.bf16.mxu0 %v27120_v24  ;;  %v17306_v22 = vsel %vm1062_vm1, %v17297_v60, 0 }
 0x4a8   : > { %19960 = vmatprep.subr.msk.bf16.mxu0 %vm1062_vm1, %v27578_v27  ;;  %v17299_v27 = vrot.slane %v21490_v62, 2 }
 0x4aa   : > { %v17312_v49 = vsel %vm1062_vm1, %v17299_v27, 0 }
 0x4ab   : > { %19955 = vmatmul.mubr.msk.bf16.vlgmr.msra.gmra.mrb[56].mxu1 %vm1058_vm2, %v21559_v47 }
 0x4ac   : > { %16807 = vmatpush1.bf16.msra.mxu1 %v16678_v63  ;;  %16838 = vmatprep.mubr.bf16.mxu1 %v27120_v24 }
 0x4ad   : > { %19962 = vmatprep.subr.msk.bf16.mxu1 %vm1062_vm1, %v27581_v34  ;;  %v21496_v34 = vld [vmem:[#allocation2 + $0x88] ss:$76 sps:$4 sm:$0xfc]  }
 0x4ae   : > { %19957 = vmatmul.mubr.msk.bf16.vlgmr.msra.gmra.mrb[60].mxu0 %vm1058_vm2, %v21559_v47  ;;  %v17303_v38 = vrot.slane %v21496_v34, 2 }
 0x4af   : > { %16872 = vmatpush1.bf16.msra.mxu0 %v16848_v56  ;;  %16903 = vmatprep.mubr.bf16.mxu0 %v27120_v24  ;;  %v17304_v56 = vrot.slane %v21494_v26, 2 }
 0x4b0   : > { %19964 = vmatprep.subr.msk.bf16.mxu0 %vm1062_vm1, %v27582_v43 }
 0x4b3   : > { %19959 = vmatmul.mubr.msk.bf16.vlgmr.msra.gmra.mrb[60].mxu1 %vm1058_vm2, %v21559_v47  ;;  %v21493_v47 = vld [vmem:[#allocation2 + $0x80] ss:$76 sps:$4 sm:$0xfc]  }
 0x4b4   : > { %16913 = vmatpush1.bf16.msra.mxu1 %v16854_v6  ;;  %16944 = vmatprep.mubr.bf16.mxu1 %v27120_v24  ;;  %v17301_v63 = vrot.slane %v21493_v47, 2  ;;  %v21562_v6 = vld [vmem:[%s26946_s2 + $0xc] sm:$0xf] }
 0x4b5   : > { %19966 = vmatprep.subr.msk.bf16.mxu1 %vm1062_vm1, %v27585_v59 }
 0x4b6   : > { %19961 = vmatmul.mubr.msk.bf16.vlgmr.msra.gmra.mrb[56].mxu0 %vm1058_vm2, %v21560_v51  ;;  %v17318_v43 = vsel %vm1062_vm1, %v17301_v63, 0 }
 0x4b7   : > { %16954 = vmatpush1.bf16.msra.mxu0 %v16860_v31  ;;  %16985 = vmatprep.mubr.bf16.mxu0 %v27120_v24  ;;  %v17324_v31 = vsel %vm1062_vm1, %v17303_v38, 0 }
 0x4b8   : > { %19968 = vmatprep.subr.msk.bf16.mxu0 %vm1062_vm1, %v27586_v21 }
 0x4bb   : > { %19963 = vmatmul.mubr.msk.bf16.vlgmr.msra.gmra.mrb[56].mxu1 %vm1058_vm2, %v21560_v51 }
 0x4bc   : > { %16995 = vmatpush1.bf16.msra.mxu1 %v16866_v61  ;;  %17026 = vmatprep.mubr.bf16.mxu1 %v27120_v24 }
 0x4bd   : > { %19970 = vmatprep.subr.msk.bf16.mxu1 %vm1062_vm1, %v27589_v0 }
 0x4be   : > { %19965 = vmatmul.mubr.msk.bf16.vlgmr.msra.gmra.mrb[60].mxu0 %vm1058_vm2, %v21560_v51 }
 0x4bf   : > { %17086 = vmatpush1.bf16.msra.mxu0 %v17062_v9  ;;  %17117 = vmatprep.mubr.bf16.mxu0 %v27120_v24 }
 0x4c0   : > { %19972 = vmatprep.subr.msk.bf16.mxu0 %vm1062_vm1, %v27590_v16 }
 0x4c3   : > { %19967 = vmatmul.mubr.msk.bf16.vlgmr.msra.gmra.mrb[60].mxu1 %vm1058_vm2, %v21560_v51 }
 0x4c4   : > { %17127 = vmatpush1.bf16.msra.mxu1 %v17068_v10  ;;  %17158 = vmatprep.mubr.bf16.mxu1 %v27120_v24 }
 0x4c5   : > { %19974 = vmatprep.subr.msk.bf16.mxu1 %vm1062_vm1, %v27593_v25 }
 0x4c6   : > { %19969 = vmatmul.mubr.msk.bf16.vlgmr.msra.gmra.mrb[56].mxu0 %vm1058_vm2, %v21561_v37 }
 0x4c7   : > { %17168 = vmatpush1.bf16.msra.mxu0 %v17074_v14  ;;  %17199 = vmatprep.mubr.bf16.mxu0 %v27120_v24 }
 0x4c8   : > { %19984 = vmatprep.subr.msk.bf16.mxu0 %vm1062_vm1, %v17298_v36 }
 0x4cb   : > { %19971 = vmatmul.mubr.msk.bf16.vlgmr.msra.gmra.mrb[56].mxu1 %vm1058_vm2, %v21561_v37 }
 0x4cc   : > { %17209 = vmatpush1.bf16.msra.mxu1 %v17080_v41  ;;  %17240 = vmatprep.mubr.bf16.mxu1 %v27120_v24 }
 0x4cd   : > { %19986 = vmatprep.subr.msk.bf16.mxu1 %vm1062_vm1, %v17300_v33 }
 0x4ce   : > { %19973 = vmatmul.mubr.msk.bf16.vlgmr.msra.gmra.mrb[60].mxu0 %vm1058_vm2, %v21561_v37 }
 0x4cf   : > { %17330 = vmatpush1.bf16.msra.mxu0 %v17306_v22  ;;  %17361 = vmatprep.mubr.bf16.mxu0 %v27120_v24 }
 0x4d0   : > { %19988 = vmatprep.subr.msk.bf16.mxu0 %vm1062_vm1, %v17302_v42 }
 0x4d3   : > { %19975 = vmatmul.mubr.msk.bf16.vlgmr.msra.gmra.mrb[60].mxu1 %vm1058_vm2, %v21561_v37 }
 0x4d4   : > { %17371 = vmatpush1.bf16.msra.mxu1 %v17312_v49  ;;  %17402 = vmatprep.mubr.bf16.mxu1 %v27120_v24 }
 0x4d5   : > { %19990 = vmatprep.subr.msk.bf16.mxu1 %vm1062_vm1, %v17304_v56  ;;  %v21563_v56 = vld [vmem:[%s26946_s2 + $0x10] sm:$0xf] }
 0x4d6   : > { %19985 = vmatmul.mubr.msk.bf16.vlgmr.msra.gmra.mrb[56].mxu0 %vm1058_vm2, %v21562_v6 }
 0x4d7   : > { %17412 = vmatpush1.bf16.msra.mxu0 %v17318_v43  ;;  %17443 = vmatprep.mubr.bf16.mxu0 %v27120_v24 }
 0x4d8   : > { %20001 = vmatprep.subr.msk.bf16.mxu0 %vm1062_vm1, %v26076_v44 }
 0x4d9   : > { %v14123_v15 = vpop.f32.mrb[40].mxu0 }
 0x4da   : > { %v14261_v59 = vmul.f32 %v14123_v15, %v27468_v45  ;;  %v14125_v51 = vpop.f32.mrb[41].mxu0 }
 0x4db   : > { %v14262_v21 = vmul.f32 %v14125_v51, %v27469_v46  ;;  %v20092_v40 = vpack.c.bf16 %v14125_v51, %v14123_v15  ;;  %19987 = vmatmul.mubr.msk.bf16.vlgmr.msra.gmra.mrb[56].mxu1 %vm1058_vm2, %v21562_v6  ;;  %v14127_v61 = vpop.f32.mrb[42].mxu0 }
 0x4dc   : > { %v14315_v9 = vmul.f32 %v14261_v59, %v14123_v15  ;;  %v14128_v0 = vpop.f32.mrb[43].mxu0  ;;  %17453 = vmatpush1.bf16.msra.mxu1 %v17324_v31  ;;  %17484 = vmatprep.mubr.bf16.mxu1 %v27120_v24  ;;  %v17602_v31 = vsel %vm1062_vm1, %v26124_v58, 0  ;;  %v27596_v58 = vld [vmem:[#allocation3_spill] sm:$0xff] }
 0x4dd   : > { %19814 = vst [vmem:[%s23652_s7 + $0xa0] sm:$0xff] %v20092_v40  ;;  %v14305_v44 = vadd.f32 %v14262_v21, %v14261_v59  ;;  %v14316_v16 = vmul.f32 %v14262_v21, %v14125_v51  ;;  %20003 = vmatprep.subr.msk.bf16.mxu1 %vm1062_vm1, %v26099_v48  ;;  %v17590_v48 = vsel %vm1062_vm1, %v26090_v2, 0  ;;  %v17596_v2 = vsel %vm1062_vm1, %v26107_v35, 0 }
 0x4de   : > { %v14164_v29 = vpop.f32.mrb[40].mxu1  ;;  %19989 = vmatmul.mubr.msk.bf16.vlgmr.msra.gmra.mrb[60].mxu0 %vm1058_vm2, %v21562_v6  ;;  %v17806_v0 = vsel %vm1062_vm1, %v26141_v23, 0 }
 0x4df   : > { %v14323_v32 = vadd.f32 %v14316_v16, %v14315_v9  ;;  %v14263_v10 = vmul.f32 %v14164_v29, %v27478_v3  ;;  %v14166_v4 = vpop.f32.mrb[41].mxu1  ;;  %17608 = vmatpush1.bf16.msra.mxu0 %v17584_v50  ;;  %17639 = vmatprep.mubr.bf16.mxu0 %v27120_v24  ;;  %v21497_v16 = vld [vmem:[#allocation2 + $0x78] ss:$76 sps:$4 sm:$0xfc]  }
 0x4e0   : > { %v14264_v17 = vmul.f32 %v14166_v4, %v27480_v28  ;;  %v20093_v14 = vpack.c.bf16 %v14166_v4, %v14164_v29  ;;  %v14168_v36 = vpop.f32.mrb[42].mxu1  ;;  %20005 = vmatprep.subr.msk.bf16.mxu0 %vm1062_vm1, %v26116_v8 }
 0x4e1   : > { %v14306_v57 = vadd.f32 %v14305_v44, %v14263_v10  ;;  %v14317_v25 = vmul.f32 %v14263_v10, %v14164_v29  ;;  %v14169_v13 = vpop.f32.mrb[43].mxu1  ;;  %v14205_v37 = vpop.f32.mrb[44].mxu0  ;;  %v27595_v44 = vld [vmem:[#allocation47_spill] sm:$0xff]  ;;  %v27597_v29 = vld [vmem:[#allocation4_spill] sm:$0xff] }
 0x4e2   : > { %19815 = vst [vmem:[%s23652_s7 + $0xa8] sm:$0xff] %v20093_v14  ;;  %v14318_v60 = vmul.f32 %v14264_v17, %v14166_v4  ;;  %v14265_v55 = vmul.f32 %v14205_v37, %v27482_v52  ;;  %v14207_v30 = vpop.f32.mrb[45].mxu0  ;;  %v17812_v23 = vsel %vm1062_vm1, %v27597_v29, 0  ;;  %v18042_v4 = vrot.slane %v21497_v16, 2  ;;  %v27599_v14 = vld [vmem:[#allocation16_spill] sm:$0xff] }
 0x4e3   : > { %v14324_v41 = vadd.f32 %v14323_v32, %v14317_v25  ;;  %v14307_v33 = vadd.f32 %v14306_v57, %v14264_v17  ;;  %v14266_v62 = vmul.f32 %v14207_v30, %v27485_v5  ;;  %v20094_v22 = vpack.c.bf16 %v14207_v30, %v14205_v37  ;;  %19991 = vmatmul.mubr.msk.bf16.vlgmr.msra.gmra.mrb[60].mxu1 %vm1058_vm2, %v21562_v6  ;;  %v14209_v8 = vpop.f32.mrb[46].mxu0  ;;  %v27598_v32 = vld [vmem:[#allocation53_spill] sm:$0xff]  ;;  %v21500_v36 = vld [vmem:[#allocation2 + $0x80] ss:$76 sps:$4 sm:$0xfc]  }
 0x4e4   : > { %v14319_v42 = vmul.f32 %v14265_v55, %v14205_v37  ;;  %17649 = vmatpush1.bf16.msra.mxu1 %v17590_v48  ;;  %v14210_v47 = vpop.f32.mrb[47].mxu0  ;;  %17680 = vmatprep.mubr.bf16.mxu1 %v27120_v24  ;;  %v17818_v10 = vsel %vm1062_vm1, %v27598_v32, 0  ;;  %v21499_v17 = vld [vmem:[#allocation2 + $0x74] ss:$76 sps:$4 sm:$0xfc]   ;;  %v27600_v13 = vld [vmem:[#allocation68_spill] sm:$0xff] }
 0x4e5   : > { %v14325_v27 = vadd.f32 %v14324_v41, %v14318_v60  ;;  %v14308_v26 = vadd.f32 %v14307_v33, %v14265_v55  ;;  %19816 = vst [vmem:[%s23652_s7 + $0xb0] sm:$0xff] %v20094_v22  ;;  %v14320_v63 = vmul.f32 %v14266_v62, %v14207_v30  ;;  %20007 = vmatprep.subr.msk.bf16.mxu1 %vm1062_vm1, %v26130_v11  ;;  %v21564_v48 = vld [vmem:[%s26946_s2 + $0x14] sm:$0xf]  ;;  %v18041_v57 = vrot.slane %v21499_v17, 2 }
 0x4e6   : > { %v14246_v49 = vpop.f32.mrb[44].mxu1  ;;  %20002 = vmatmul.mubr.msk.bf16.vlgmr.msra.gmra.mrb[56].mxu0 %vm1058_vm2, %v21563_v56  ;;  %v21503_v25 = vld [vmem:[#allocation2 + $0x88] ss:$76 sps:$4 sm:$0xfc]   ;;  %v17824_v37 = vsel %vm1062_vm1, %v27600_v13, 0  ;;  %v18044_v60 = vrot.slane %v21500_v36, 2 }
 0x4e7   : > { %v14326_v35 = vadd.f32 %v14325_v27, %v14319_v42  ;;  %v14309_v34 = vadd.f32 %v14308_v26, %v14266_v62  ;;  %v14267_v43 = vmul.f32 %v14246_v49, %v23700_v1  ;;  %v14248_v38 = vpop.f32.mrb[45].mxu1  ;;  %17690 = vmatpush1.bf16.msra.mxu0 %v17596_v2  ;;  %17721 = vmatprep.mubr.bf16.mxu0 %v27120_v24  ;;  %v21502_v55 = vld [vmem:[#allocation2 + $0x7c] ss:$76 sps:$4 sm:$0xfc]   ;;  %v18050_v30 = vsel %vm1062_vm1, %v18041_v57, 0 }
 0x4e8   : > { %v14268_v6 = vmul.f32 %v14248_v38, %v27490_v7  ;;  %v20095_v15 = vpack.c.bf16 %v14248_v38, %v14246_v49  ;;  %v14250_v11 = vpop.f32.mrb[46].mxu1  ;;  %20009 = vmatprep.subr.msk.bf16.mxu0 %vm1062_vm1, %v26151_v18  ;;  %v18046_v41 = vrot.slane %v21503_v25, 2  ;;  %v21505_v33 = vld [vmem:[#allocation2 + $0x84] ss:$76 sps:$4 sm:$0xfc]   ;;  %v18043_v62 = vrot.slane %v21502_v55, 2 }
 0x4e9   : > { %v14327_v59 = vadd.f32 %v14326_v35, %v14320_v63  ;;  %v14310_v51 = vadd.f32 %v14309_v34, %v14267_v43  ;;  %v14321_v21 = vmul.f32 %v14267_v43, %v14246_v49  ;;  %v14251_v40 = vpop.f32.mrb[47].mxu1  ;;  %v21506_v22 = vld [vmem:[#allocation2 + $0x90] ss:$76 sps:$4 sm:$0xfc]   ;;  %v18045_v8 = vrot.slane %v21505_v33, 2  ;;  %v27602_v35 = vld [vmem:[#allocation41_spill] sm:$0xff] }
 0x4ea   : > { %19817 = vst [vmem:[%s23652_s7 + $0xb8] sm:$0xff] %v20095_v15  ;;  %v14322_v61 = vmul.f32 %v14268_v6, %v14248_v38  ;;  %v18056_v2 = vsel %vm1062_vm1, %v18043_v62, 0  ;;  %v18048_v42 = vrot.slane %v21506_v22, 2  ;;  %v21508_v47 = vld [vmem:[#allocation2 + $0x8c] ss:$76 sps:$4 sm:$0xfc]  }
 0x4eb   : > { %v14328_v50 = vadd.f32 %v14327_v59, %v14321_v21  ;;  %20004 = vmatmul.mubr.msk.bf16.vlgmr.msra.gmra.mrb[56].mxu1 %vm1058_vm2, %v21563_v56  ;;  %v14311_v9 = vadd.f32 %v14310_v51, %v14268_v6  ;;  %v18062_v27 = vsel %vm1062_vm1, %v18045_v8, 0  ;;  %v18047_v26 = vrot.slane %v21508_v47, 2  ;;  %v21565_v63 = vld [vmem:[%s26946_s2 + $0x18] sm:$0xf]  ;;  %v27601_v49 = vld [vmem:[#allocation42_spill] sm:$0xff]  ;;  %v27606_v11 = vld [vmem:[#allocation43_spill] sm:$0xff] }
 0x4ec   : > { %17731 = vmatpush1.bf16.msra.mxu1 %v17602_v31  ;;  %17762 = vmatprep.mubr.bf16.mxu1 %v27120_v24  ;;  %v18328_v34 = vsel %vm1062_vm1, %v27602_v35, 0  ;;  %v27603_v43 = vld [vmem:[#allocation77_spill] sm:$0xff]  ;;  %v27605_v6 = vld [vmem:[#allocation78_spill] sm:$0xff]  ;;  %v18340_v31 = vsel %vm1062_vm1, %v27606_v11, 0  ;;  %v27607_v51 = vld [vmem:[#allocation24_spill] sm:$0xff] }
 0x4ed   : > { %14312 = vadd.xlane.f32.xlu1 %v14311_v9  ;;  %v14329_v18 = vadd.f32 %v14328_v50, %v14322_v61  ;;  %20011 = vmatprep.subr.msk.bf16.mxu1 %vm1062_vm1, %v27595_v44  ;;  %v27604_v38 = vld [vmem:[#allocation21_spill] sm:$0xff]  ;;  %v18334_v15 = vsel %vm1062_vm1, %v27605_v6, 0  ;;  %v21566_v59 = vld [vmem:[%s26946_s2 + $0x1c] sm:$0xf]  ;;  %v18346_v21 = vsel %vm1062_vm1, %v27607_v51, 0 }
 0x4ee   : > { %20006 = vmatmul.mubr.msk.bf16.vlgmr.msra.gmra.mrb[60].mxu0 %vm1058_vm2, %v21563_v56  ;;  %v27608_v40 = vld [vmem:[#allocation22_spill] sm:$0xff]  ;;  %v27609_v61 = vld [vmem:[#allocation5_spill] sm:$0xff] }
 0x4ef   : > { %14330 = vadd.xlane.f32.xlu0 %v14329_v18  ;;  %17830 = vmatpush1.bf16.msra.mxu0 %v17806_v0  ;;  %v27611_v9 = vld [vmem:[#allocation13_spill] sm:$0xff] }
 0x4f0   : > { %17861 = vmatprep.mubr.bf16.mxu0 %v27120_v24  ;;  %20013 = vmatprep.subr.msk.bf16.mxu0 %vm1062_vm1, %v27596_v58  ;;  %v18562_v0 = vsel %vm1062_vm1, %v27611_v9, 0 }
 0x4f3   : > { %20008 = vmatmul.mubr.msk.bf16.vlgmr.msra.gmra.mrb[60].mxu1 %vm1058_vm2, %v21563_v56  ;;  %v18068_v56 = vsel %vm1062_vm1, %v18047_v26, 0 }
 0x4f4   : > { %17871 = vmatpush1.bf16.msra.mxu1 %v17812_v23  ;;  %17902 = vmatprep.mubr.bf16.mxu1 %v27120_v24 }
 0x4f5   : > { %20015 = vmatprep.subr.msk.bf16.mxu1 %vm1062_vm1, %v27599_v14 }
 0x4f6   : > { %20010 = vmatmul.mubr.msk.bf16.vlgmr.msra.gmra.mrb[56].mxu0 %vm1058_vm2, %v21564_v48 }
 0x4f7   : > { %17912 = vmatpush1.bf16.msra.mxu0 %v17818_v10  ;;  %17943 = vmatprep.mubr.bf16.mxu0 %v27120_v24 }
 0x4f8   : > { %20025 = vmatprep.subr.msk.bf16.mxu0 %vm1062_vm1, %v18042_v4 }
 0x4fb   : > { %20012 = vmatmul.mubr.msk.bf16.vlgmr.msra.gmra.mrb[56].mxu1 %vm1058_vm2, %v21564_v48 }
 0x4fc   : > { %17953 = vmatpush1.bf16.msra.mxu1 %v17824_v37  ;;  %17984 = vmatprep.mubr.bf16.mxu1 %v27120_v24 }
 0x4fd   : > { %20027 = vmatprep.subr.msk.bf16.mxu1 %vm1062_vm1, %v18044_v60 }
 0x4fe   : > { %20014 = vmatmul.mubr.msk.bf16.vlgmr.msra.gmra.mrb[60].mxu0 %vm1058_vm2, %v21564_v48 }
 0x4ff   : > { %18074 = vmatpush1.bf16.msra.mxu0 %v18050_v30  ;;  %18105 = vmatprep.mubr.bf16.mxu0 %v27120_v24 }
 0x500   : > { %20029 = vmatprep.subr.msk.bf16.mxu0 %vm1062_vm1, %v18046_v41 }
 0x503   : > { %20016 = vmatmul.mubr.msk.bf16.vlgmr.msra.gmra.mrb[60].mxu1 %vm1058_vm2, %v21564_v48 }
 0x504   : > { %18115 = vmatpush1.bf16.msra.mxu1 %v18056_v2  ;;  %18146 = vmatprep.mubr.bf16.mxu1 %v27120_v24 }
 0x505   : > { %20031 = vmatprep.subr.msk.bf16.mxu1 %vm1062_vm1, %v18048_v42 }
 0x506   : > { %20026 = vmatmul.mubr.msk.bf16.vlgmr.msra.gmra.mrb[56].mxu0 %vm1058_vm2, %v21565_v63 }
 0x507   : > { %18156 = vmatpush1.bf16.msra.mxu0 %v18062_v27  ;;  %18187 = vmatprep.mubr.bf16.mxu0 %v27120_v24 }
 0x508   : > { %20042 = vmatprep.subr.msk.bf16.mxu0 %vm1062_vm1, %v27601_v49 }
 0x50b   : > { %20028 = vmatmul.mubr.msk.bf16.vlgmr.msra.gmra.mrb[56].mxu1 %vm1058_vm2, %v21565_v63 }
 0x50c   : > { %18197 = vmatpush1.bf16.msra.mxu1 %v18068_v56  ;;  %18228 = vmatprep.mubr.bf16.mxu1 %v27120_v24 }
 0x50d   : > { %20044 = vmatprep.subr.msk.bf16.mxu1 %vm1062_vm1, %v27603_v43 }
 0x50e   : > { %20030 = vmatmul.mubr.msk.bf16.vlgmr.msra.gmra.mrb[60].mxu0 %vm1058_vm2, %v21565_v63 }
 0x50f   : > { %18352 = vmatpush1.bf16.msra.mxu0 %v18328_v34  ;;  %18383 = vmatprep.mubr.bf16.mxu0 %v27120_v24 }
 0x510   : > { %20046 = vmatprep.subr.msk.bf16.mxu0 %vm1062_vm1, %v27604_v38  ;;  %v12134_v38 = vpop.xlane.xlu0 %12133 }
 0x513   : > { %20032 = vmatmul.mubr.msk.bf16.vlgmr.msra.gmra.mrb[60].mxu1 %vm1058_vm2, %v21565_v63  ;;  %v12116_v63 = vpop.xlane.xlu1 %12115 }
 0x514   : > { %18393 = vmatpush1.bf16.msra.mxu1 %v18334_v15  ;;  %18424 = vmatprep.mubr.bf16.mxu1 %v27120_v24 }
 0x515   : > { %20048 = vmatprep.subr.msk.bf16.mxu1 %vm1062_vm1, %v26265_v19  ;;  %v18550_v19 = vsel %vm1062_vm1, %v27608_v40, 0 }
 0x516   : > { %20043 = vmatmul.mubr.msk.bf16.vlgmr.msra.gmra.mrb[56].mxu0 %vm1058_vm2, %v21566_v59 }
 0x517   : > { %18434 = vmatpush1.bf16.msra.mxu0 %v18340_v31  ;;  %18465 = vmatprep.mubr.bf16.mxu0 %v27120_v24 }
 0x518   : > { %20050 = vmatprep.subr.msk.bf16.mxu0 %vm1062_vm1, %v26289_v12  ;;  %v27610_v12 = vld [vmem:[#allocation45_spill] sm:$0xff] }
 0x519   : > { %v18556_v50 = vsel %vm1062_vm1, %v27610_v12, 0 }
 0x51b   : > { %20045 = vmatmul.mubr.msk.bf16.vlgmr.msra.gmra.mrb[56].mxu1 %vm1058_vm2, %v21566_v59 }
 0x51c   : > { %18475 = vmatpush1.bf16.msra.mxu1 %v18346_v21  ;;  %18506 = vmatprep.mubr.bf16.mxu1 %v27120_v24 }
 0x51d   : > { %20052 = vmatprep.subr.msk.bf16.mxu1 %vm1062_vm1, %v27609_v61 }
 0x51e   : > { %20047 = vmatmul.mubr.msk.bf16.vlgmr.msra.gmra.mrb[60].mxu0 %vm1058_vm2, %v21566_v59 }
 0x51f   : > { %18574 = vmatpush1.bf16.msra.mxu0 %v18550_v19  ;;  %18605 = vmatprep.mubr.bf16.mxu0 %v27120_v24 }
 0x520   : > { %20054 = vmatprep.subr.msk.bf16.mxu0 %vm1062_vm1, %v26328_v54  ;;  %v18568_v54 = vsel %vm1062_vm1, %v26336_v39, 0 }
 0x523   : > { %20049 = vmatmul.mubr.msk.bf16.vlgmr.msra.gmra.mrb[60].mxu1 %vm1058_vm2, %v21566_v59 }
 0x524   : > { %18615 = vmatpush1.bf16.msra.mxu1 %v18556_v50  ;;  %18646 = vmatprep.mubr.bf16.mxu1 %v27120_v24 }
 0x525   : > { %20056 = vmatprep.subr.msk.bf16.mxu1 %vm1062_vm1, %v26344_v20 }
 0x526   : > { %20051 = vmatmul.mubr.msk.bf16.vlgmr.msra.gmra.mrb[56].mxu0 %vm1058_vm2, %v26643_v53 }
 0x527   : > { %18656 = vmatpush1.bf16.msra.mxu0 %v18562_v0  ;;  %18687 = vmatprep.mubr.bf16.mxu0 %v27120_v24 }
 0x52b   : > { %20053 = vmatmul.mubr.msk.bf16.vlgmr.msra.gmra.mrb[56].mxu1 %vm1058_vm2, %v26643_v53 }
 0x52c   : > { %18697 = vmatpush1.bf16.msra.mxu1 %v18568_v54  ;;  %18728 = vmatprep.mubr.bf16.mxu1 %v27120_v24 }
 0x52e   : > { %20055 = vmatmul.mubr.msk.bf16.vlgmr.msra.gmra.mrb[60].mxu0 %vm1058_vm2, %v26643_v53 }
 0x533   : > { %20057 = vmatmul.mubr.msk.bf16.vlgmr.msra.gmra.mrb[60].mxu1 %vm1058_vm2, %v26643_v53 }
 0x569   : > { %v16366_v20 = vpop.f32.mrb[48].mxu0 }
 0x56a   : > { %v16504_v18 = vmul.f32 %v16366_v20, %v27468_v45  ;;  %v16368_v44 = vpop.f32.mrb[49].mxu0 }
 0x56b   : > { %v16505_v58 = vmul.f32 %v16368_v44, %v27469_v46  ;;  %v20096_v16 = vpack.c.bf16 %v16368_v44, %v16366_v20  ;;  %v16370_v39 = vpop.f32.mrb[50].mxu0 }
 0x56c   : > { %v16559_v29 = vmul.f32 %v16504_v18, %v16366_v20  ;;  %v16371_v23 = vpop.f32.mrb[51].mxu0 }
 0x56d   : > { %19939 = vst [vmem:[%s23652_s7 + $0xc0] sm:$0xff] %v20096_v16  ;;  %v16549_v32 = vadd.f32 %v16505_v58, %v16504_v18  ;;  %v16560_v24 = vmul.f32 %v16505_v58, %v16368_v44 }
 0x56e   : > { %v16407_v10 = vpop.f32.mrb[48].mxu1 }
 0x56f   : > { %v16567_v4 = vadd.f32 %v16560_v24, %v16559_v29  ;;  %v16506_v17 = vmul.f32 %v16407_v10, %v27478_v3  ;;  %v16409_v14 = vpop.f32.mrb[49].mxu1 }
 0x570   : > { %v16507_v53 = vmul.f32 %v16409_v14, %v27480_v28  ;;  %v20097_v36 = vpack.c.bf16 %v16409_v14, %v16407_v10  ;;  %v16411_v48 = vpop.f32.mrb[50].mxu1 }
 0x571   : > { %v16550_v57 = vadd.f32 %v16549_v32, %v16506_v17  ;;  %v16561_v25 = vmul.f32 %v16506_v17, %v16407_v10  ;;  %v16412_v13 = vpop.f32.mrb[51].mxu1  ;;  %v16448_v37 = vpop.f32.mrb[52].mxu0 }
 0x572   : > { %19940 = vst [vmem:[%s23652_s7 + $0xc8] sm:$0xff] %v20097_v36  ;;  %v16562_v60 = vmul.f32 %v16507_v53, %v16409_v14  ;;  %v16508_v55 = vmul.f32 %v16448_v37, %v27482_v52  ;;  %v16450_v30 = vpop.f32.mrb[53].mxu0 }
 0x573   : > { %v16568_v41 = vadd.f32 %v16567_v4, %v16561_v25  ;;  %v16551_v33 = vadd.f32 %v16550_v57, %v16507_v53  ;;  %v16509_v62 = vmul.f32 %v16450_v30, %v27485_v5  ;;  %v20098_v22 = vpack.c.bf16 %v16450_v30, %v16448_v37  ;;  %v16452_v8 = vpop.f32.mrb[54].mxu0 }
 0x574   : > { %v16563_v2 = vmul.f32 %v16508_v55, %v16448_v37  ;;  %v16453_v42 = vpop.f32.mrb[55].mxu0 }
 0x575   : > { %v16569_v47 = vadd.f32 %v16568_v41, %v16562_v60  ;;  %v16552_v27 = vadd.f32 %v16551_v33, %v16508_v55  ;;  %19941 = vst [vmem:[%s23652_s7 + $0xd0] sm:$0xff] %v20098_v22  ;;  %v16564_v26 = vmul.f32 %v16509_v62, %v16450_v30 }
 0x576   : > { %v16489_v49 = vpop.f32.mrb[52].mxu1 }
 0x577   : > { %v16570_v56 = vadd.f32 %v16569_v47, %v16563_v2  ;;  %v16553_v35 = vadd.f32 %v16552_v27, %v16509_v62  ;;  %v16510_v34 = vmul.f32 %v16489_v49, %v23700_v1  ;;  %v16491_v43 = vpop.f32.mrb[53].mxu1 }
 0x578   : > { %v16511_v6 = vmul.f32 %v16491_v43, %v27490_v7  ;;  %v20099_v15 = vpack.c.bf16 %v16491_v43, %v16489_v49  ;;  %v16493_v11 = vpop.f32.mrb[54].mxu1 }
 0x579   : > { %v16571_v31 = vadd.f32 %v16570_v56, %v16564_v26  ;;  %v16554_v59 = vadd.f32 %v16553_v35, %v16510_v34  ;;  %v16565_v51 = vmul.f32 %v16510_v34, %v16489_v49  ;;  %v16494_v21 = vpop.f32.mrb[55].mxu1 }
 0x57a   : > { %19942 = vst [vmem:[%s23652_s7 + $0xd8] sm:$0xff] %v20099_v15  ;;  %v16566_v40 = vmul.f32 %v16511_v6, %v16491_v43  ;;  %v14313_v19 = vpop.xlane.xlu1 %14312 }
 0x57b   : > { %v16572_v61 = vadd.f32 %v16571_v31, %v16565_v51  ;;  %v14314_v12 = vadd.f32 %v14313_v19, %v12116_v63  ;;  %v16555_v50 = vadd.f32 %v16554_v59, %v16511_v6 }
 0x57c   : > { %v14331_v9 = vpop.xlane.xlu0 %14330 }
 0x57d   : > { %19818 = vst.msk [vmem:[%s26476_s9 + $0x10] sm:$0xff] %vm5450_vm4, %v14314_v12  ;;  %v14332_v0 = vadd.f32 %v14331_v9, %v12134_v38  ;;  %16556 = vadd.xlane.f32.xlu1 %v16555_v50  ;;  %v16573_v54 = vadd.f32 %v16572_v61, %v16566_v40 }
 0x57f   : > { %19819 = vst.msk [vmem:[%s26476_s9 + $0x10] sm:$0xff] %vm5452_vm5, %v14332_v0  ;;  %16574 = vadd.xlane.f32.xlu0 %v16573_v54 }
 0x5f9   : > { %v18607_v20 = vpop.f32.mrb[56].mxu0 }
 0x5fa   : > { %v18745_v18 = vmul.f32 %v18607_v20, %v27468_v45  ;;  %v18609_v44 = vpop.f32.mrb[57].mxu0 }
 0x5fb   : > { %v18746_v58 = vmul.f32 %v18609_v44, %v27469_v46  ;;  %v20100_v16 = vpack.c.bf16 %v18609_v44, %v18607_v20  ;;  %v18611_v39 = vpop.f32.mrb[58].mxu0 }
 0x5fc   : > { %v18799_v29 = vmul.f32 %v18745_v18, %v18607_v20  ;;  %v18612_v23 = vpop.f32.mrb[59].mxu0 }
 0x5fd   : > { %20062 = vst [vmem:[%s23652_s7 + $0xe0] sm:$0xff] %v20100_v16  ;;  %v18789_v32 = vadd.f32 %v18746_v58, %v18745_v18  ;;  %v18800_v24 = vmul.f32 %v18746_v58, %v18609_v44 }
 0x5fe   : > { %v18648_v10 = vpop.f32.mrb[56].mxu1 }
 0x5ff   : > { %v18807_v4 = vadd.f32 %v18800_v24, %v18799_v29  ;;  %v18747_v17 = vmul.f32 %v18648_v10, %v27478_v3  ;;  %v18650_v14 = vpop.f32.mrb[57].mxu1 }
 0x600   : > { %v18748_v53 = vmul.f32 %v18650_v14, %v27480_v28  ;;  %v20101_v36 = vpack.c.bf16 %v18650_v14, %v18648_v10  ;;  %v18652_v45 = vpop.f32.mrb[58].mxu1 }
 0x601   : > { %v18790_v48 = vadd.f32 %v18789_v32, %v18747_v17  ;;  %v18801_v57 = vmul.f32 %v18747_v17, %v18648_v10  ;;  %v18653_v46 = vpop.f32.mrb[59].mxu1  ;;  %v18689_v25 = vpop.f32.mrb[60].mxu0 }
 0x602   : > { %20063 = vst [vmem:[%s23652_s7 + $0xe8] sm:$0xff] %v20101_v36  ;;  %v18802_v13 = vmul.f32 %v18748_v53, %v18650_v14  ;;  %v18749_v37 = vmul.f32 %v18689_v25, %v27482_v52  ;;  %v18691_v60 = vpop.f32.mrb[61].mxu0 }
 0x603   : > { %v18808_v55 = vadd.f32 %v18807_v4, %v18801_v57  ;;  %v18791_v30 = vadd.f32 %v18790_v48, %v18748_v53  ;;  %v18750_v41 = vmul.f32 %v18691_v60, %v27485_v5  ;;  %v20102_v3 = vpack.c.bf16 %v18691_v60, %v18689_v25  ;;  %v18693_v33 = vpop.f32.mrb[62].mxu0 }
 0x604   : > { %v18803_v62 = vmul.f32 %v18749_v37, %v18689_v25  ;;  %v18694_v28 = vpop.f32.mrb[63].mxu0 }
 0x605   : > { %v18809_v22 = vadd.f32 %v18808_v55, %v18802_v13  ;;  %v18792_v8 = vadd.f32 %v18791_v30, %v18749_v37  ;;  %20064 = vst [vmem:[%s23652_s7 + $0xf0] sm:$0xff] %v20102_v3  ;;  %v18804_v2 = vmul.f32 %v18750_v41, %v18691_v60 }
 0x606   : > { %v18730_v42 = vpop.f32.mrb[60].mxu1 }
 0x607   : > { %v18810_v47 = vadd.f32 %v18809_v22, %v18803_v62  ;;  %v18793_v27 = vadd.f32 %v18792_v8, %v18750_v41  ;;  %v18751_v26 = vmul.f32 %v18730_v42, %v23700_v1  ;;  %v18732_v52 = vpop.f32.mrb[61].mxu1 }
 0x608   : > { %v18752_v63 = vmul.f32 %v18732_v52, %v27490_v7  ;;  %v20103_v49 = vpack.c.bf16 %v18732_v52, %v18730_v42  ;;  %v18734_v56 = vpop.f32.mrb[62].mxu1 }
 0x609   : > { %v18811_v5 = vadd.f32 %v18810_v47, %v18804_v2  ;;  %v18794_v35 = vadd.f32 %v18793_v27, %v18751_v26  ;;  %v18805_v34 = vmul.f32 %v18751_v26, %v18730_v42  ;;  %v18735_v43 = vpop.f32.mrb[63].mxu1 }
 0x60a   : > { %20065 = vst [vmem:[%s23652_s7 + $0xf8] sm:$0xff] %v20103_v49  ;;  %v18806_v38 = vmul.f32 %v18752_v63, %v18732_v52  ;;  %v16557_v31 = vpop.xlane.xlu1 %16556 }
 0x60b   : > { %v18812_v6 = vadd.f32 %v18811_v5, %v18805_v34  ;;  %v18795_v15 = vadd.f32 %v18794_v35, %v18752_v63 }
 0x60c   : > { %v16575_v1 = vpop.xlane.xlu0 %16574 }
 0x60d   : > { %18796 = vadd.xlane.f32.xlu1 %v18795_v15  ;;  %v18813_v11 = vadd.f32 %v18812_v6, %v18806_v38 }
 0x60f   : > { %18814 = vadd.xlane.f32.xlu0 %v18813_v11 }
 0x69a   : > { %v18797_v59 = vpop.xlane.xlu1 %18796 }
 0x69b   : > { %v18798_v51 = vadd.f32 %v18797_v59, %v16557_v31 }
 0x69c   : > { %v18815_v7 = vpop.xlane.xlu0 %18814 }
 0x69d   : > { %20066 = vst.msk [vmem:[%s26476_s9 + $0x18] sm:$0xff] %vm5450_vm4, %v18798_v51  ;;  %v18816_v21 = vadd.f32 %v18815_v7, %v16575_v1 }
 0x69f   : > { %20067 = vst.msk [vmem:[%s26476_s9 + $0x18] sm:$0xff] %vm5452_vm5, %v18816_v21 }
 0x6a0 PF: > { %s16_s22 = sadd.s32 1, %s21605_s22   ;;  %s27612_s18 = smov %s21597_s20 }
 0x6a1   : > { %p13_p9 = scmp.ge.s32.totalorder %s16_s22, 10   ;;  %s27613_s19 = smov %s21601_s21 }
 0x6a2   : > { %s27614_s20 = smov %s27617_s23  ;;  %s27615_s21 = smov %s27621_s24 }
 0x6a3   :  { %15 = sbr.rel (!%p13_p9) target bundleno = 3 (0x3), region = 91 }

</bundles_post_ra>
